<compile_context>
chip_gen: v7x
topology: tpu7x:2x2x1
jax: 0.10.0
libtpu: 0.0.40
codegen_flags: <defaults>
</compile_context>

<pallas_src>
import functools

import jax
import jax.numpy as jnp
import numpy as np
from jax import lax
from jax.experimental import pallas as pl
from jax.experimental.pallas import tpu as pltpu


def _saa_kernel(H, W, cin, cout, offs,
                x_ref, a_ref, b_ref, acat_ref, bcat_ref, fc1_ref, fc2_ref,
                mask_ref, out_ref, p_ref, pcat_ref):
    """One batch element per grid step.  Spatial (padded) grid on lanes.

    x_ref   : (1, cin, L)        zero-extended flattened padded input, bf16
    a_ref   : (3*cout, 81*cin)   fused conv weight [square; vertical; horizontal], bf16
    b_ref   : (3*cout, 1)        fused conv bias, f32
    acat_ref: (2, 81*4)          shared convCat weight (block structured), f32
    bcat_ref: (2, 1)             convCat bias, f32
    fc1_ref : (cmid, cout)       SE fc1 weight, f32
    fc2_ref : (cout, cmid)       SE fc2 weight, f32
    mask_ref: (1, N)             1.0 on interior (valid) positions, 0.0 on halo
    out_ref : (1, cout, N)       result on padded-flat grid (halo = don't care)
    p_ref   : (81*cin, N) bf16   scratch: im2col patch matrix for the fused conv
    pcat_ref: (81*4,  N) f32     scratch: patch matrix for the shared convCat
    """
    f32 = jnp.float32
    Hp, Wp = H + 8, W + 8
    N = Hp * Wp
    E = 4 * Wp + 4                      # max |tap offset| == lane extension of x_ref

    mask = mask_ref[...]                # (1, N)
    xv = x_ref[0]                       # (cin, L) bf16

    # ---- im2col: one static lane-shifted copy per 9x9 tap (fully unrolled) ----
    for t, off in enumerate(offs):
        p_ref[t * cin:(t + 1) * cin, :] = xv[:, E + off:E + off + N]

    # ---- all three convolutions in a single MXU matmul (bf16 in, f32 acc) -----
    # rows 0:cout -> 9x9 square, cout:2cout -> 3x1 vertical, 2cout:3cout -> 1x3 horizontal
    conv = jnp.dot(a_ref[...], p_ref[...],
                   preferred_element_type=f32) + b_ref[...]            # (3*cout, N)
    xsq = conv[0:cout, :]
    ver = conv[cout:2 * cout, :]
    hor = conv[2 * cout:3 * cout, :]

    # ---- spatial attention maps: channel mean / max (sublane reductions) ------
    maps = jnp.concatenate(
        [jnp.mean(ver, axis=0, keepdims=True),
         jnp.max(ver, axis=0, keepdims=True),
         jnp.mean(hor, axis=0, keepdims=True),
         jnp.max(hor, axis=0, keepdims=True)], axis=0)                  # (4, N)
    maps = maps * mask                                                  # zero the halo
    zpad = jnp.zeros((4, E), f32)
    maps_ext = jnp.concatenate([zpad, maps, zpad], axis=1)              # (4, L)

    # ---- shared 9x9 convCat on both branches: same im2col trick + 1 matmul ----
    for t, off in enumerate(offs):
        pcat_ref[t * 4:(t + 1) * 4, :] = maps_ext[:, E + off:E + off + N]
    xcat = jnp.dot(acat_ref[...], pcat_ref[...],
                   preferred_element_type=f32) + bcat_ref[...]          # (2, N)
    xatt = jax.nn.sigmoid(xcat)
    x0 = xatt[0:1, :] + xatt[1:2, :]                                    # (1, N)

    # ---- SE layer on the square-conv branch (column-wise, no transposes) ------
    y = jnp.sum(xsq * mask, axis=1, keepdims=True) * (1.0 / (H * W))    # (cout, 1)
    h1 = jnp.maximum(jnp.dot(fc1_ref[...], y, preferred_element_type=f32), 0.0)
    gate = jax.nn.sigmoid(jnp.dot(fc2_ref[...], h1,
                                  preferred_element_type=f32))          # (cout, 1)

    res = xsq * gate * x0
    out_ref[0] = jnp.where(res > 0, res, 0.2 * res)                     # LeakyReLU(0.2)


def _pack_params(params):
    """Repack PyTorch-layout weights once (hoisted out of the per-call path)."""
    cout, cin, _, _ = params["wsq"].shape
    f32 = jnp.float32

    # fused conv weight: rows = [square ; vertical ; horizontal], K = 81 taps * cin
    a_sq = jnp.transpose(params["wsq"], (0, 2, 3, 1)).reshape(cout, 81 * cin)
    a_ver = jnp.zeros((cout, 81, cin), f32)
    for i, t in enumerate((3 * 9 + 4, 4 * 9 + 4, 5 * 9 + 4)):       # (dy,dx)=(3..5,4)
        a_ver = a_ver.at[:, t, :].set(params["wver"][:, :, i, 0])
    a_hor = jnp.zeros((cout, 81, cin), f32)
    for j, t in enumerate((4 * 9 + 3, 4 * 9 + 4, 4 * 9 + 5)):       # (dy,dx)=(4,3..5)
        a_hor = a_hor.at[:, t, :].set(params["whor"][:, :, 0, j])
    a_all = jnp.concatenate(
        [a_sq, a_ver.reshape(cout, 81 * cin), a_hor.reshape(cout, 81 * cin)],
        axis=0).astype(jnp.bfloat16)                                 # (3*cout, 81*cin)
    b_all = jnp.concatenate(
        [params["bsq"], params["bver"], params["bhor"]]).reshape(3 * cout, 1).astype(f32)

    # shared convCat (2->1, 9x9): block structure so one matmul does both branches.
    wc = jnp.transpose(params["wcat"][0], (1, 2, 0)).reshape(81, 2)  # [tap, {avg,max}]
    z = jnp.zeros((81, 2), f32)
    acat = jnp.stack([jnp.concatenate([wc, z], axis=1).reshape(-1),   # vertical branch
                      jnp.concatenate([z, wc], axis=1).reshape(-1)],  # horizontal branch
                     axis=0).astype(f32)                              # (2, 81*4)
    bcat = jnp.full((2, 1), params["bcat"][0], f32)

    return dict(a=a_all, b=b_all, acat=acat, bcat=bcat,
                fc1=params["fc1"].astype(f32), fc2=params["fc2"].astype(f32))


def saa_forward(x_nchw, packed):
    """Pallas implementation of sapatialasymmetricAttentionModule.forward (NCHW in/out)."""
    B, cin, H, W = x_nchw.shape
    cout = packed["a"].shape[0] // 3
    cmid = packed["fc1"].shape[0]
    Hp, Wp = H + 8, W + 8
    N = Hp * Wp
    E = 4 * Wp + 4
    L = N + 2 * E

    # glue: zero-pad spatially by 4 and flatten the padded grid onto the lane axis.
    # TODO(synk): for large H*W*cin, do the halo handling in-kernel instead of jnp.pad.
    x_pad = jnp.pad(x_nchw.astype(jnp.float32), ((0, 0), (0, 0), (4, 4), (4, 4)))
    x_ext = jnp.pad(x_pad.reshape(B, cin, N),
                    ((0, 0), (0, 0), (E, E))).astype(jnp.bfloat16)    # (B, cin, L)

    mask = jnp.pad(jnp.ones((H, W), jnp.float32), ((4, 4), (4, 4))).reshape(1, N)

    offs = tuple((dy - 4) * Wp + (dx - 4) for dy in range(9) for dx in range(9))
    kernel = functools.partial(_saa_kernel, H, W, cin, cout, offs)

    out_pad = pl.pallas_call(
        kernel,
        out_shape=jax.ShapeDtypeStruct((B, cout, N), jnp.float32),
        grid_spec=pltpu.PrefetchScalarGridSpec(
            num_scalar_prefetch=0,
            grid=(B,),
            in_specs=[
                pl.BlockSpec((1, cin, L), lambda b: (b, 0, 0)),
                pl.BlockSpec((3 * cout, 81 * cin), lambda b: (0, 0)),
                pl.BlockSpec((3 * cout, 1), lambda b: (0, 0)),
                pl.BlockSpec((2, 81 * 4), lambda b: (0, 0)),
                pl.BlockSpec((2, 1), lambda b: (0, 0)),
                pl.BlockSpec((cmid, cout), lambda b: (0, 0)),
                pl.BlockSpec((cout, cmid), lambda b: (0, 0)),
                pl.BlockSpec((1, N), lambda b: (0, 0)),
            ],
            out_specs=pl.BlockSpec((1, cout, N), lambda b: (b, 0, 0)),
            scratch_shapes=[
                pltpu.VMEM((81 * cin, N), jnp.bfloat16),
                pltpu.VMEM((81 * 4, N), jnp.float32),
            ],
        ),
        compiler_params=pltpu.CompilerParams(
            dimension_semantics=("parallel",),            # v7x: shard batch over 2 TCs
            vmem_limit_bytes=32 * 1024 * 1024,
        ),
    )(x_ext, packed["a"], packed["b"], packed["acat"], packed["bcat"],
      packed["fc1"], packed["fc2"], mask)

    # drop the halo: interior of (B, cout, Hp, Wp) is exactly NCHW (no transpose).
    return out_pad.reshape(B, cout, Hp, Wp)[:, :, 4:4 + H, 4:4 + W]


# ----------------------------- pure-JAX reference -----------------------------
def _conv(x, w, pad):
    return lax.conv_general_dilated(
        x, w, window_strides=(1, 1), padding=pad,
        dimension_numbers=("NCHW", "OIHW", "NCHW"),
        precision=lax.Precision.HIGHEST)


def reference_forward(x, p):
    xsq = _conv(x, p["wsq"], [(4, 4), (4, 4)]) + p["bsq"][None, :, None, None]
    ver = _conv(x, p["wver"], [(1, 1), (0, 0)]) + p["bver"][None, :, None, None]
    hor = _conv(x, p["whor"], [(0, 0), (1, 1)]) + p["bhor"][None, :, None, None]

    def att(t):
        avg = jnp.mean(t, axis=1, keepdims=True)
        mx = jnp.max(t, axis=1, keepdims=True)
        cat = jnp.concatenate([avg, mx], axis=1)
        return jax.nn.sigmoid(
            _conv(cat, p["wcat"], [(4, 4), (4, 4)]) + p["bcat"][None, :, None, None])

    x0 = att(ver) + att(hor)

    y = jnp.mean(xsq, axis=(2, 3))
    y = jnp.maximum(y @ p["fc1"].T, 0.0)
    y = jax.nn.sigmoid(y @ p["fc2"].T)
    x9 = xsq * y[:, :, None, None]

    r = x9 * x0
    return jnp.where(r > 0, r, 0.2 * r)                  # LeakyReLU(0.2)


if __name__ == "__main__":
    B, cin, cout, H, W = 2, 4, 16, 16, 16
    cmid = cout // 16          # SELayer reduction=16 -> need cout >= 16

    key = jax.random.PRNGKey(0)
    ks = jax.random.split(key, 11)
    params = {
        "wsq":  0.05 * jax.random.normal(ks[0], (cout, cin, 9, 9), jnp.float32),
        "bsq":  0.10 * jax.random.normal(ks[1], (cout,), jnp.float32),
        "wver": 0.20 * jax.random.normal(ks[2], (cout, cin, 3, 1), jnp.float32),
        "bver": 0.10 * jax.random.normal(ks[3], (cout,), jnp.float32),
        "whor": 0.20 * jax.random.normal(ks[4], (cout, cin, 1, 3), jnp.float32),
        "bhor": 0.10 * jax.random.normal(ks[5], (cout,), jnp.float32),
        "wcat": 0.08 * jax.random.normal(ks[6], (1, 2, 9, 9), jnp.float32),
        "bcat": 0.10 * jax.random.normal(ks[7], (1,), jnp.float32),
        "fc1":  0.30 * jax.random.normal(ks[8], (cmid, cout), jnp.float32),
        "fc2":  0.30 * jax.random.normal(ks[9], (cout, cmid), jnp.float32),
    }
    x = jax.random.normal(ks[10], (B, cin, H, W), jnp.float32)

    packed = _pack_params(params)          # weight repack hoisted: done once
    fwd = jax.jit(saa_forward)

    out = jax.block_until_ready(fwd(x, packed))
    ref = jax.block_until_ready(reference_forward(x, params))

    assert out.shape == (B, cout, H, W)
    # bf16 MXU passes with f32 accumulation vs XLA f32 conv: generous tolerance
    np.testing.assert_allclose(np.asarray(out), np.asarray(ref), atol=2e-2, rtol=2e-2)
    print("KERNEL_OK")
</pallas_src>

<mosaic_0001>
module attributes {stable_mosaic.version = 11 : i64} {
  func.func @_saa_kernel(%arg0: i32, %arg1: memref<1x4x776xbf16, #tpu.memory_space<vmem>>, %arg2: memref<48x324xbf16, #tpu.memory_space<vmem>>, %arg3: memref<48x1xf32, #tpu.memory_space<vmem>>, %arg4: memref<2x324xf32, #tpu.memory_space<vmem>>, %arg5: memref<2x1xf32, #tpu.memory_space<vmem>>, %arg6: memref<1x16xf32, #tpu.memory_space<vmem>>, %arg7: memref<16x1xf32, #tpu.memory_space<vmem>>, %arg8: memref<1x576xf32, #tpu.memory_space<vmem>>, %arg9: memref<1x16x576xf32, #tpu.memory_space<vmem>>, %arg10: memref<324x576xbf16, #tpu.memory_space<vmem>>, %arg11: memref<324x576xf32, #tpu.memory_space<vmem>>) attributes {dimension_semantics = [#tpu.dimension_semantics<parallel>], iteration_bounds = array<i64: 2>, scalar_prefetch = 0 : i64, scratch_operands = 2 : i64, tpu.core_type = #tpu.core_type<tc>, window_params = [{transform_indices = @transform_0, window_bounds = array<i64: 1, 4, 776>}, {pipeline_mode = #tpu.pipeline_mode<synchronous>, transform_indices = @transform_1, window_bounds = array<i64: 48, 324>}, {pipeline_mode = #tpu.pipeline_mode<synchronous>, transform_indices = @transform_2, window_bounds = array<i64: 48, 1>}, {pipeline_mode = #tpu.pipeline_mode<synchronous>, transform_indices = @transform_3, window_bounds = array<i64: 2, 324>}, {pipeline_mode = #tpu.pipeline_mode<synchronous>, transform_indices = @transform_4, window_bounds = array<i64: 2, 1>}, {pipeline_mode = #tpu.pipeline_mode<synchronous>, transform_indices = @transform_5, window_bounds = array<i64: 1, 16>}, {pipeline_mode = #tpu.pipeline_mode<synchronous>, transform_indices = @transform_6, window_bounds = array<i64: 16, 1>}, {pipeline_mode = #tpu.pipeline_mode<synchronous>, transform_indices = @transform_7, window_bounds = array<i64: 1, 576>}, {transform_indices = @transform_8, window_bounds = array<i64: 1, 16, 576>}]} {
    %c0 = arith.constant 0 : index
    %c0_0 = arith.constant 0 : index
    %0 = vector.load %arg8[%c0, %c0_0] : memref<1x576xf32, #tpu.memory_space<vmem>>, vector<1x576xf32>
    %c0_1 = arith.constant 0 : index
    %c0_2 = arith.constant 0 : index
    %c0_3 = arith.constant 0 : index
    %1 = vector.load %arg1[%c0_1, %c0_2, %c0_3] : memref<1x4x776xbf16, #tpu.memory_space<vmem>>, vector<1x4x776xbf16>
    %2 = vector.shape_cast %1 : vector<1x4x776xbf16> to vector<4x776xbf16>
    %3 = vector.extract_strided_slice %2 {offsets = [0, 0], sizes = [4, 576], strides = [1, 1]} : vector<4x776xbf16> to vector<4x576xbf16>
    %c0_4 = arith.constant 0 : index
    %c0_5 = arith.constant 0 : index
    %4 = vector.load %arg10[%c0_4, %c0_5] : memref<324x576xbf16, #tpu.memory_space<vmem>>, vector<4x576xbf16>
    tpu.vector_store %arg10[%c0_4, %c0_5], %3 {strides = array<i32>} : memref<324x576xbf16, #tpu.memory_space<vmem>>, vector<4x576xbf16>,
    %5 = vector.extract_strided_slice %2 {offsets = [0, 1], sizes = [4, 576], strides = [1, 1]} : vector<4x776xbf16> to vector<4x576xbf16>
    %c4 = arith.constant 4 : index
    %c0_6 = arith.constant 0 : index
    %6 = vector.load %arg10[%c4, %c0_6] : memref<324x576xbf16, #tpu.memory_space<vmem>>, vector<4x576xbf16>
    tpu.vector_store %arg10[%c4, %c0_6], %5 {strides = array<i32>} : memref<324x576xbf16, #tpu.memory_space<vmem>>, vector<4x576xbf16>,
    %7 = vector.extract_strided_slice %2 {offsets = [0, 2], sizes = [4, 576], strides = [1, 1]} : vector<4x776xbf16> to vector<4x576xbf16>
    %c8 = arith.constant 8 : index
    %c0_7 = arith.constant 0 : index
    %8 = vector.load %arg10[%c8, %c0_7] : memref<324x576xbf16, #tpu.memory_space<vmem>>, vector<4x576xbf16>
    tpu.vector_store %arg10[%c8, %c0_7], %7 {strides = array<i32>} : memref<324x576xbf16, #tpu.memory_space<vmem>>, vector<4x576xbf16>,
    %9 = vector.extract_strided_slice %2 {offsets = [0, 3], sizes = [4, 576], strides = [1, 1]} : vector<4x776xbf16> to vector<4x576xbf16>
    %c12 = arith.constant 12 : index
    %c0_8 = arith.constant 0 : index
    %10 = vector.load %arg10[%c12, %c0_8] : memref<324x576xbf16, #tpu.memory_space<vmem>>, vector<4x576xbf16>
    tpu.vector_store %arg10[%c12, %c0_8], %9 {strides = array<i32>} : memref<324x576xbf16, #tpu.memory_space<vmem>>, vector<4x576xbf16>,
    %11 = vector.extract_strided_slice %2 {offsets = [0, 4], sizes = [4, 576], strides = [1, 1]} : vector<4x776xbf16> to vector<4x576xbf16>
    %c16 = arith.constant 16 : index
    %c0_9 = arith.constant 0 : index
    %12 = vector.load %arg10[%c16, %c0_9] : memref<324x576xbf16, #tpu.memory_space<vmem>>, vector<4x576xbf16>
    tpu.vector_store %arg10[%c16, %c0_9], %11 {strides = array<i32>} : memref<324x576xbf16, #tpu.memory_space<vmem>>, vector<4x576xbf16>,
    %13 = vector.extract_strided_slice %2 {offsets = [0, 5], sizes = [4, 576], strides = [1, 1]} : vector<4x776xbf16> to vector<4x576xbf16>
    %c20 = arith.constant 20 : index
    %c0_10 = arith.constant 0 : index
    %14 = vector.load %arg10[%c20, %c0_10] : memref<324x576xbf16, #tpu.memory_space<vmem>>, vector<4x576xbf16>
    tpu.vector_store %arg10[%c20, %c0_10], %13 {strides = array<i32>} : memref<324x576xbf16, #tpu.memory_space<vmem>>, vector<4x576xbf16>,
    %15 = vector.extract_strided_slice %2 {offsets = [0, 6], sizes = [4, 576], strides = [1, 1]} : vector<4x776xbf16> to vector<4x576xbf16>
    %c24 = arith.constant 24 : index
    %c0_11 = arith.constant 0 : index
    %16 = vector.load %arg10[%c24, %c0_11] : memref<324x576xbf16, #tpu.memory_space<vmem>>, vector<4x576xbf16>
    tpu.vector_store %arg10[%c24, %c0_11], %15 {strides = array<i32>} : memref<324x576xbf16, #tpu.memory_space<vmem>>, vector<4x576xbf16>,
    %17 = vector.extract_strided_slice %2 {offsets = [0, 7], sizes = [4, 576], strides = [1, 1]} : vector<4x776xbf16> to vector<4x576xbf16>
    %c28 = arith.constant 28 : index
    %c0_12 = arith.constant 0 : index
    %18 = vector.load %arg10[%c28, %c0_12] : memref<324x576xbf16, #tpu.memory_space<vmem>>, vector<4x576xbf16>
    tpu.vector_store %arg10[%c28, %c0_12], %17 {strides = array<i32>} : memref<324x576xbf16, #tpu.memory_space<vmem>>, vector<4x576xbf16>,
    %19 = vector.extract_strided_slice %2 {offsets = [0, 8], sizes = [4, 576], strides = [1, 1]} : vector<4x776xbf16> to vector<4x576xbf16>
    %c32 = arith.constant 32 : index
    %c0_13 = arith.constant 0 : index
    %20 = vector.load %arg10[%c32, %c0_13] : memref<324x576xbf16, #tpu.memory_space<vmem>>, vector<4x576xbf16>
    tpu.vector_store %arg10[%c32, %c0_13], %19 {strides = array<i32>} : memref<324x576xbf16, #tpu.memory_space<vmem>>, vector<4x576xbf16>,
    %21 = vector.extract_strided_slice %2 {offsets = [0, 24], sizes = [4, 576], strides = [1, 1]} : vector<4x776xbf16> to vector<4x576xbf16>
    %c36 = arith.constant 36 : index
    %c0_14 = arith.constant 0 : index
    %22 = vector.load %arg10[%c36, %c0_14] : memref<324x576xbf16, #tpu.memory_space<vmem>>, vector<4x576xbf16>
    tpu.vector_store %arg10[%c36, %c0_14], %21 {strides = array<i32>} : memref<324x576xbf16, #tpu.memory_space<vmem>>, vector<4x576xbf16>,
    %23 = vector.extract_strided_slice %2 {offsets = [0, 25], sizes = [4, 576], strides = [1, 1]} : vector<4x776xbf16> to vector<4x576xbf16>
    %c40 = arith.constant 40 : index
    %c0_15 = arith.constant 0 : index
    %24 = vector.load %arg10[%c40, %c0_15] : memref<324x576xbf16, #tpu.memory_space<vmem>>, vector<4x576xbf16>
    tpu.vector_store %arg10[%c40, %c0_15], %23 {strides = array<i32>} : memref<324x576xbf16, #tpu.memory_space<vmem>>, vector<4x576xbf16>,
    %25 = vector.extract_strided_slice %2 {offsets = [0, 26], sizes = [4, 576], strides = [1, 1]} : vector<4x776xbf16> to vector<4x576xbf16>
    %c44 = arith.constant 44 : index
    %c0_16 = arith.constant 0 : index
    %26 = vector.load %arg10[%c44, %c0_16] : memref<324x576xbf16, #tpu.memory_space<vmem>>, vector<4x576xbf16>
    tpu.vector_store %arg10[%c44, %c0_16], %25 {strides = array<i32>} : memref<324x576xbf16, #tpu.memory_space<vmem>>, vector<4x576xbf16>,
    %27 = vector.extract_strided_slice %2 {offsets = [0, 27], sizes = [4, 576], strides = [1, 1]} : vector<4x776xbf16> to vector<4x576xbf16>
    %c48 = arith.constant 48 : index
    %c0_17 = arith.constant 0 : index
    %28 = vector.load %arg10[%c48, %c0_17] : memref<324x576xbf16, #tpu.memory_space<vmem>>, vector<4x576xbf16>
    tpu.vector_store %arg10[%c48, %c0_17], %27 {strides = array<i32>} : memref<324x576xbf16, #tpu.memory_space<vmem>>, vector<4x576xbf16>,
    %29 = vector.extract_strided_slice %2 {offsets = [0, 28], sizes = [4, 576], strides = [1, 1]} : vector<4x776xbf16> to vector<4x576xbf16>
    %c52 = arith.constant 52 : index
    %c0_18 = arith.constant 0 : index
    %30 = vector.load %arg10[%c52, %c0_18] : memref<324x576xbf16, #tpu.memory_space<vmem>>, vector<4x576xbf16>
    tpu.vector_store %arg10[%c52, %c0_18], %29 {strides = array<i32>} : memref<324x576xbf16, #tpu.memory_space<vmem>>, vector<4x576xbf16>,
    %31 = vector.extract_strided_slice %2 {offsets = [0, 29], sizes = [4, 576], strides = [1, 1]} : vector<4x776xbf16> to vector<4x576xbf16>
    %c56 = arith.constant 56 : index
    %c0_19 = arith.constant 0 : index
    %32 = vector.load %arg10[%c56, %c0_19] : memref<324x576xbf16, #tpu.memory_space<vmem>>, vector<4x576xbf16>
    tpu.vector_store %arg10[%c56, %c0_19], %31 {strides = array<i32>} : memref<324x576xbf16, #tpu.memory_space<vmem>>, vector<4x576xbf16>,
    %33 = vector.extract_strided_slice %2 {offsets = [0, 30], sizes = [4, 576], strides = [1, 1]} : vector<4x776xbf16> to vector<4x576xbf16>
    %c60 = arith.constant 60 : index
    %c0_20 = arith.constant 0 : index
    %34 = vector.load %arg10[%c60, %c0_20] : memref<324x576xbf16, #tpu.memory_space<vmem>>, vector<4x576xbf16>
    tpu.vector_store %arg10[%c60, %c0_20], %33 {strides = array<i32>} : memref<324x576xbf16, #tpu.memory_space<vmem>>, vector<4x576xbf16>,
    %35 = vector.extract_strided_slice %2 {offsets = [0, 31], sizes = [4, 576], strides = [1, 1]} : vector<4x776xbf16> to vector<4x576xbf16>
    %c64 = arith.constant 64 : index
    %c0_21 = arith.constant 0 : index
    %36 = vector.load %arg10[%c64, %c0_21] : memref<324x576xbf16, #tpu.memory_space<vmem>>, vector<4x576xbf16>
    tpu.vector_store %arg10[%c64, %c0_21], %35 {strides = array<i32>} : memref<324x576xbf16, #tpu.memory_space<vmem>>, vector<4x576xbf16>,
    %37 = vector.extract_strided_slice %2 {offsets = [0, 32], sizes = [4, 576], strides = [1, 1]} : vector<4x776xbf16> to vector<4x576xbf16>
    %c68 = arith.constant 68 : index
    %c0_22 = arith.constant 0 : index
    %38 = vector.load %arg10[%c68, %c0_22] : memref<324x576xbf16, #tpu.memory_space<vmem>>, vector<4x576xbf16>
    tpu.vector_store %arg10[%c68, %c0_22], %37 {strides = array<i32>} : memref<324x576xbf16, #tpu.memory_space<vmem>>, vector<4x576xbf16>,
    %39 = vector.extract_strided_slice %2 {offsets = [0, 48], sizes = [4, 576], strides = [1, 1]} : vector<4x776xbf16> to vector<4x576xbf16>
    %c72 = arith.constant 72 : index
    %c0_23 = arith.constant 0 : index
    %40 = vector.load %arg10[%c72, %c0_23] : memref<324x576xbf16, #tpu.memory_space<vmem>>, vector<4x576xbf16>
    tpu.vector_store %arg10[%c72, %c0_23], %39 {strides = array<i32>} : memref<324x576xbf16, #tpu.memory_space<vmem>>, vector<4x576xbf16>,
    %41 = vector.extract_strided_slice %2 {offsets = [0, 49], sizes = [4, 576], strides = [1, 1]} : vector<4x776xbf16> to vector<4x576xbf16>
    %c76 = arith.constant 76 : index
    %c0_24 = arith.constant 0 : index
    %42 = vector.load %arg10[%c76, %c0_24] : memref<324x576xbf16, #tpu.memory_space<vmem>>, vector<4x576xbf16>
    tpu.vector_store %arg10[%c76, %c0_24], %41 {strides = array<i32>} : memref<324x576xbf16, #tpu.memory_space<vmem>>, vector<4x576xbf16>,
    %43 = vector.extract_strided_slice %2 {offsets = [0, 50], sizes = [4, 576], strides = [1, 1]} : vector<4x776xbf16> to vector<4x576xbf16>
    %c80 = arith.constant 80 : index
    %c0_25 = arith.constant 0 : index
    %44 = vector.load %arg10[%c80, %c0_25] : memref<324x576xbf16, #tpu.memory_space<vmem>>, vector<4x576xbf16>
    tpu.vector_store %arg10[%c80, %c0_25], %43 {strides = array<i32>} : memref<324x576xbf16, #tpu.memory_space<vmem>>, vector<4x576xbf16>,
    %45 = vector.extract_strided_slice %2 {offsets = [0, 51], sizes = [4, 576], strides = [1, 1]} : vector<4x776xbf16> to vector<4x576xbf16>
    %c84 = arith.constant 84 : index
    %c0_26 = arith.constant 0 : index
    %46 = vector.load %arg10[%c84, %c0_26] : memref<324x576xbf16, #tpu.memory_space<vmem>>, vector<4x576xbf16>
    tpu.vector_store %arg10[%c84, %c0_26], %45 {strides = array<i32>} : memref<324x576xbf16, #tpu.memory_space<vmem>>, vector<4x576xbf16>,
    %47 = vector.extract_strided_slice %2 {offsets = [0, 52], sizes = [4, 576], strides = [1, 1]} : vector<4x776xbf16> to vector<4x576xbf16>
    %c88 = arith.constant 88 : index
    %c0_27 = arith.constant 0 : index
    %48 = vector.load %arg10[%c88, %c0_27] : memref<324x576xbf16, #tpu.memory_space<vmem>>, vector<4x576xbf16>
    tpu.vector_store %arg10[%c88, %c0_27], %47 {strides = array<i32>} : memref<324x576xbf16, #tpu.memory_space<vmem>>, vector<4x576xbf16>,
    %49 = vector.extract_strided_slice %2 {offsets = [0, 53], sizes = [4, 576], strides = [1, 1]} : vector<4x776xbf16> to vector<4x576xbf16>
    %c92 = arith.constant 92 : index
    %c0_28 = arith.constant 0 : index
    %50 = vector.load %arg10[%c92, %c0_28] : memref<324x576xbf16, #tpu.memory_space<vmem>>, vector<4x576xbf16>
    tpu.vector_store %arg10[%c92, %c0_28], %49 {strides = array<i32>} : memref<324x576xbf16, #tpu.memory_space<vmem>>, vector<4x576xbf16>,
    %51 = vector.extract_strided_slice %2 {offsets = [0, 54], sizes = [4, 576], strides = [1, 1]} : vector<4x776xbf16> to vector<4x576xbf16>
    %c96 = arith.constant 96 : index
    %c0_29 = arith.constant 0 : index
    %52 = vector.load %arg10[%c96, %c0_29] : memref<324x576xbf16, #tpu.memory_space<vmem>>, vector<4x576xbf16>
    tpu.vector_store %arg10[%c96, %c0_29], %51 {strides = array<i32>} : memref<324x576xbf16, #tpu.memory_space<vmem>>, vector<4x576xbf16>,
    %53 = vector.extract_strided_slice %2 {offsets = [0, 55], sizes = [4, 576], strides = [1, 1]} : vector<4x776xbf16> to vector<4x576xbf16>
    %c100 = arith.constant 100 : index
    %c0_30 = arith.constant 0 : index
    %54 = vector.load %arg10[%c100, %c0_30] : memref<324x576xbf16, #tpu.memory_space<vmem>>, vector<4x576xbf16>
    tpu.vector_store %arg10[%c100, %c0_30], %53 {strides = array<i32>} : memref<324x576xbf16, #tpu.memory_space<vmem>>, vector<4x576xbf16>,
    %55 = vector.extract_strided_slice %2 {offsets = [0, 56], sizes = [4, 576], strides = [1, 1]} : vector<4x776xbf16> to vector<4x576xbf16>
    %c104 = arith.constant 104 : index
    %c0_31 = arith.constant 0 : index
    %56 = vector.load %arg10[%c104, %c0_31] : memref<324x576xbf16, #tpu.memory_space<vmem>>, vector<4x576xbf16>
    tpu.vector_store %arg10[%c104, %c0_31], %55 {strides = array<i32>} : memref<324x576xbf16, #tpu.memory_space<vmem>>, vector<4x576xbf16>,
    %57 = vector.extract_strided_slice %2 {offsets = [0, 72], sizes = [4, 576], strides = [1, 1]} : vector<4x776xbf16> to vector<4x576xbf16>
    %c108 = arith.constant 108 : index
    %c0_32 = arith.constant 0 : index
    %58 = vector.load %arg10[%c108, %c0_32] : memref<324x576xbf16, #tpu.memory_space<vmem>>, vector<4x576xbf16>
    tpu.vector_store %arg10[%c108, %c0_32], %57 {strides = array<i32>} : memref<324x576xbf16, #tpu.memory_space<vmem>>, vector<4x576xbf16>,
    %59 = vector.extract_strided_slice %2 {offsets = [0, 73], sizes = [4, 576], strides = [1, 1]} : vector<4x776xbf16> to vector<4x576xbf16>
    %c112 = arith.constant 112 : index
    %c0_33 = arith.constant 0 : index
    %60 = vector.load %arg10[%c112, %c0_33] : memref<324x576xbf16, #tpu.memory_space<vmem>>, vector<4x576xbf16>
    tpu.vector_store %arg10[%c112, %c0_33], %59 {strides = array<i32>} : memref<324x576xbf16, #tpu.memory_space<vmem>>, vector<4x576xbf16>,
    %61 = vector.extract_strided_slice %2 {offsets = [0, 74], sizes = [4, 576], strides = [1, 1]} : vector<4x776xbf16> to vector<4x576xbf16>
    %c116 = arith.constant 116 : index
    %c0_34 = arith.constant 0 : index
    %62 = vector.load %arg10[%c116, %c0_34] : memref<324x576xbf16, #tpu.memory_space<vmem>>, vector<4x576xbf16>
    tpu.vector_store %arg10[%c116, %c0_34], %61 {strides = array<i32>} : memref<324x576xbf16, #tpu.memory_space<vmem>>, vector<4x576xbf16>,
    %63 = vector.extract_strided_slice %2 {offsets = [0, 75], sizes = [4, 576], strides = [1, 1]} : vector<4x776xbf16> to vector<4x576xbf16>
    %c120 = arith.constant 120 : index
    %c0_35 = arith.constant 0 : index
    %64 = vector.load %arg10[%c120, %c0_35] : memref<324x576xbf16, #tpu.memory_space<vmem>>, vector<4x576xbf16>
    tpu.vector_store %arg10[%c120, %c0_35], %63 {strides = array<i32>} : memref<324x576xbf16, #tpu.memory_space<vmem>>, vector<4x576xbf16>,
    %65 = vector.extract_strided_slice %2 {offsets = [0, 76], sizes = [4, 576], strides = [1, 1]} : vector<4x776xbf16> to vector<4x576xbf16>
    %c124 = arith.constant 124 : index
    %c0_36 = arith.constant 0 : index
    %66 = vector.load %arg10[%c124, %c0_36] : memref<324x576xbf16, #tpu.memory_space<vmem>>, vector<4x576xbf16>
    tpu.vector_store %arg10[%c124, %c0_36], %65 {strides = array<i32>} : memref<324x576xbf16, #tpu.memory_space<vmem>>, vector<4x576xbf16>,
    %67 = vector.extract_strided_slice %2 {offsets = [0, 77], sizes = [4, 576], strides = [1, 1]} : vector<4x776xbf16> to vector<4x576xbf16>
    %c128 = arith.constant 128 : index
    %c0_37 = arith.constant 0 : index
    %68 = vector.load %arg10[%c128, %c0_37] : memref<324x576xbf16, #tpu.memory_space<vmem>>, vector<4x576xbf16>
    tpu.vector_store %arg10[%c128, %c0_37], %67 {strides = array<i32>} : memref<324x576xbf16, #tpu.memory_space<vmem>>, vector<4x576xbf16>,
    %69 = vector.extract_strided_slice %2 {offsets = [0, 78], sizes = [4, 576], strides = [1, 1]} : vector<4x776xbf16> to vector<4x576xbf16>
    %c132 = arith.constant 132 : index
    %c0_38 = arith.constant 0 : index
    %70 = vector.load %arg10[%c132, %c0_38] : memref<324x576xbf16, #tpu.memory_space<vmem>>, vector<4x576xbf16>
    tpu.vector_store %arg10[%c132, %c0_38], %69 {strides = array<i32>} : memref<324x576xbf16, #tpu.memory_space<vmem>>, vector<4x576xbf16>,
    %71 = vector.extract_strided_slice %2 {offsets = [0, 79], sizes = [4, 576], strides = [1, 1]} : vector<4x776xbf16> to vector<4x576xbf16>
    %c136 = arith.constant 136 : index
    %c0_39 = arith.constant 0 : index
    %72 = vector.load %arg10[%c136, %c0_39] : memref<324x576xbf16, #tpu.memory_space<vmem>>, vector<4x576xbf16>
    tpu.vector_store %arg10[%c136, %c0_39], %71 {strides = array<i32>} : memref<324x576xbf16, #tpu.memory_space<vmem>>, vector<4x576xbf16>,
    %73 = vector.extract_strided_slice %2 {offsets = [0, 80], sizes = [4, 576], strides = [1, 1]} : vector<4x776xbf16> to vector<4x576xbf16>
    %c140 = arith.constant 140 : index
    %c0_40 = arith.constant 0 : index
    %74 = vector.load %arg10[%c140, %c0_40] : memref<324x576xbf16, #tpu.memory_space<vmem>>, vector<4x576xbf16>
    tpu.vector_store %arg10[%c140, %c0_40], %73 {strides = array<i32>} : memref<324x576xbf16, #tpu.memory_space<vmem>>, vector<4x576xbf16>,
    %75 = vector.extract_strided_slice %2 {offsets = [0, 96], sizes = [4, 576], strides = [1, 1]} : vector<4x776xbf16> to vector<4x576xbf16>
    %c144 = arith.constant 144 : index
    %c0_41 = arith.constant 0 : index
    %76 = vector.load %arg10[%c144, %c0_41] : memref<324x576xbf16, #tpu.memory_space<vmem>>, vector<4x576xbf16>
    tpu.vector_store %arg10[%c144, %c0_41], %75 {strides = array<i32>} : memref<324x576xbf16, #tpu.memory_space<vmem>>, vector<4x576xbf16>,
    %77 = vector.extract_strided_slice %2 {offsets = [0, 97], sizes = [4, 576], strides = [1, 1]} : vector<4x776xbf16> to vector<4x576xbf16>
    %c148 = arith.constant 148 : index
    %c0_42 = arith.constant 0 : index
    %78 = vector.load %arg10[%c148, %c0_42] : memref<324x576xbf16, #tpu.memory_space<vmem>>, vector<4x576xbf16>
    tpu.vector_store %arg10[%c148, %c0_42], %77 {strides = array<i32>} : memref<324x576xbf16, #tpu.memory_space<vmem>>, vector<4x576xbf16>,
    %79 = vector.extract_strided_slice %2 {offsets = [0, 98], sizes = [4, 576], strides = [1, 1]} : vector<4x776xbf16> to vector<4x576xbf16>
    %c152 = arith.constant 152 : index
    %c0_43 = arith.constant 0 : index
    %80 = vector.load %arg10[%c152, %c0_43] : memref<324x576xbf16, #tpu.memory_space<vmem>>, vector<4x576xbf16>
    tpu.vector_store %arg10[%c152, %c0_43], %79 {strides = array<i32>} : memref<324x576xbf16, #tpu.memory_space<vmem>>, vector<4x576xbf16>,
    %81 = vector.extract_strided_slice %2 {offsets = [0, 99], sizes = [4, 576], strides = [1, 1]} : vector<4x776xbf16> to vector<4x576xbf16>
    %c156 = arith.constant 156 : index
    %c0_44 = arith.constant 0 : index
    %82 = vector.load %arg10[%c156, %c0_44] : memref<324x576xbf16, #tpu.memory_space<vmem>>, vector<4x576xbf16>
    tpu.vector_store %arg10[%c156, %c0_44], %81 {strides = array<i32>} : memref<324x576xbf16, #tpu.memory_space<vmem>>, vector<4x576xbf16>,
    %83 = vector.extract_strided_slice %2 {offsets = [0, 100], sizes = [4, 576], strides = [1, 1]} : vector<4x776xbf16> to vector<4x576xbf16>
    %c160 = arith.constant 160 : index
    %c0_45 = arith.constant 0 : index
    %84 = vector.load %arg10[%c160, %c0_45] : memref<324x576xbf16, #tpu.memory_space<vmem>>, vector<4x576xbf16>
    tpu.vector_store %arg10[%c160, %c0_45], %83 {strides = array<i32>} : memref<324x576xbf16, #tpu.memory_space<vmem>>, vector<4x576xbf16>,
    %85 = vector.extract_strided_slice %2 {offsets = [0, 101], sizes = [4, 576], strides = [1, 1]} : vector<4x776xbf16> to vector<4x576xbf16>
    %c164 = arith.constant 164 : index
    %c0_46 = arith.constant 0 : index
    %86 = vector.load %arg10[%c164, %c0_46] : memref<324x576xbf16, #tpu.memory_space<vmem>>, vector<4x576xbf16>
    tpu.vector_store %arg10[%c164, %c0_46], %85 {strides = array<i32>} : memref<324x576xbf16, #tpu.memory_space<vmem>>, vector<4x576xbf16>,
    %87 = vector.extract_strided_slice %2 {offsets = [0, 102], sizes = [4, 576], strides = [1, 1]} : vector<4x776xbf16> to vector<4x576xbf16>
    %c168 = arith.constant 168 : index
    %c0_47 = arith.constant 0 : index
    %88 = vector.load %arg10[%c168, %c0_47] : memref<324x576xbf16, #tpu.memory_space<vmem>>, vector<4x576xbf16>
    tpu.vector_store %arg10[%c168, %c0_47], %87 {strides = array<i32>} : memref<324x576xbf16, #tpu.memory_space<vmem>>, vector<4x576xbf16>,
    %89 = vector.extract_strided_slice %2 {offsets = [0, 103], sizes = [4, 576], strides = [1, 1]} : vector<4x776xbf16> to vector<4x576xbf16>
    %c172 = arith.constant 172 : index
    %c0_48 = arith.constant 0 : index
    %90 = vector.load %arg10[%c172, %c0_48] : memref<324x576xbf16, #tpu.memory_space<vmem>>, vector<4x576xbf16>
    tpu.vector_store %arg10[%c172, %c0_48], %89 {strides = array<i32>} : memref<324x576xbf16, #tpu.memory_space<vmem>>, vector<4x576xbf16>,
    %91 = vector.extract_strided_slice %2 {offsets = [0, 104], sizes = [4, 576], strides = [1, 1]} : vector<4x776xbf16> to vector<4x576xbf16>
    %c176 = arith.constant 176 : index
    %c0_49 = arith.constant 0 : index
    %92 = vector.load %arg10[%c176, %c0_49] : memref<324x576xbf16, #tpu.memory_space<vmem>>, vector<4x576xbf16>
    tpu.vector_store %arg10[%c176, %c0_49], %91 {strides = array<i32>} : memref<324x576xbf16, #tpu.memory_space<vmem>>, vector<4x576xbf16>,
    %93 = vector.extract_strided_slice %2 {offsets = [0, 120], sizes = [4, 576], strides = [1, 1]} : vector<4x776xbf16> to vector<4x576xbf16>
    %c180 = arith.constant 180 : index
    %c0_50 = arith.constant 0 : index
    %94 = vector.load %arg10[%c180, %c0_50] : memref<324x576xbf16, #tpu.memory_space<vmem>>, vector<4x576xbf16>
    tpu.vector_store %arg10[%c180, %c0_50], %93 {strides = array<i32>} : memref<324x576xbf16, #tpu.memory_space<vmem>>, vector<4x576xbf16>,
    %95 = vector.extract_strided_slice %2 {offsets = [0, 121], sizes = [4, 576], strides = [1, 1]} : vector<4x776xbf16> to vector<4x576xbf16>
    %c184 = arith.constant 184 : index
    %c0_51 = arith.constant 0 : index
    %96 = vector.load %arg10[%c184, %c0_51] : memref<324x576xbf16, #tpu.memory_space<vmem>>, vector<4x576xbf16>
    tpu.vector_store %arg10[%c184, %c0_51], %95 {strides = array<i32>} : memref<324x576xbf16, #tpu.memory_space<vmem>>, vector<4x576xbf16>,
    %97 = vector.extract_strided_slice %2 {offsets = [0, 122], sizes = [4, 576], strides = [1, 1]} : vector<4x776xbf16> to vector<4x576xbf16>
    %c188 = arith.constant 188 : index
    %c0_52 = arith.constant 0 : index
    %98 = vector.load %arg10[%c188, %c0_52] : memref<324x576xbf16, #tpu.memory_space<vmem>>, vector<4x576xbf16>
    tpu.vector_store %arg10[%c188, %c0_52], %97 {strides = array<i32>} : memref<324x576xbf16, #tpu.memory_space<vmem>>, vector<4x576xbf16>,
    %99 = vector.extract_strided_slice %2 {offsets = [0, 123], sizes = [4, 576], strides = [1, 1]} : vector<4x776xbf16> to vector<4x576xbf16>
    %c192 = arith.constant 192 : index
    %c0_53 = arith.constant 0 : index
    %100 = vector.load %arg10[%c192, %c0_53] : memref<324x576xbf16, #tpu.memory_space<vmem>>, vector<4x576xbf16>
    tpu.vector_store %arg10[%c192, %c0_53], %99 {strides = array<i32>} : memref<324x576xbf16, #tpu.memory_space<vmem>>, vector<4x576xbf16>,
    %101 = vector.extract_strided_slice %2 {offsets = [0, 124], sizes = [4, 576], strides = [1, 1]} : vector<4x776xbf16> to vector<4x576xbf16>
    %c196 = arith.constant 196 : index
    %c0_54 = arith.constant 0 : index
    %102 = vector.load %arg10[%c196, %c0_54] : memref<324x576xbf16, #tpu.memory_space<vmem>>, vector<4x576xbf16>
    tpu.vector_store %arg10[%c196, %c0_54], %101 {strides = array<i32>} : memref<324x576xbf16, #tpu.memory_space<vmem>>, vector<4x576xbf16>,
    %103 = vector.extract_strided_slice %2 {offsets = [0, 125], sizes = [4, 576], strides = [1, 1]} : vector<4x776xbf16> to vector<4x576xbf16>
    %c200 = arith.constant 200 : index
    %c0_55 = arith.constant 0 : index
    %104 = vector.load %arg10[%c200, %c0_55] : memref<324x576xbf16, #tpu.memory_space<vmem>>, vector<4x576xbf16>
    tpu.vector_store %arg10[%c200, %c0_55], %103 {strides = array<i32>} : memref<324x576xbf16, #tpu.memory_space<vmem>>, vector<4x576xbf16>,
    %105 = vector.extract_strided_slice %2 {offsets = [0, 126], sizes = [4, 576], strides = [1, 1]} : vector<4x776xbf16> to vector<4x576xbf16>
    %c204 = arith.constant 204 : index
    %c0_56 = arith.constant 0 : index
    %106 = vector.load %arg10[%c204, %c0_56] : memref<324x576xbf16, #tpu.memory_space<vmem>>, vector<4x576xbf16>
    tpu.vector_store %arg10[%c204, %c0_56], %105 {strides = array<i32>} : memref<324x576xbf16, #tpu.memory_space<vmem>>, vector<4x576xbf16>,
    %107 = vector.extract_strided_slice %2 {offsets = [0, 127], sizes = [4, 576], strides = [1, 1]} : vector<4x776xbf16> to vector<4x576xbf16>
    %c208 = arith.constant 208 : index
    %c0_57 = arith.constant 0 : index
    %108 = vector.load %arg10[%c208, %c0_57] : memref<324x576xbf16, #tpu.memory_space<vmem>>, vector<4x576xbf16>
    tpu.vector_store %arg10[%c208, %c0_57], %107 {strides = array<i32>} : memref<324x576xbf16, #tpu.memory_space<vmem>>, vector<4x576xbf16>,
    %109 = vector.extract_strided_slice %2 {offsets = [0, 128], sizes = [4, 576], strides = [1, 1]} : vector<4x776xbf16> to vector<4x576xbf16>
    %c212 = arith.constant 212 : index
    %c0_58 = arith.constant 0 : index
    %110 = vector.load %arg10[%c212, %c0_58] : memref<324x576xbf16, #tpu.memory_space<vmem>>, vector<4x576xbf16>
    tpu.vector_store %arg10[%c212, %c0_58], %109 {strides = array<i32>} : memref<324x576xbf16, #tpu.memory_space<vmem>>, vector<4x576xbf16>,
    %111 = vector.extract_strided_slice %2 {offsets = [0, 144], sizes = [4, 576], strides = [1, 1]} : vector<4x776xbf16> to vector<4x576xbf16>
    %c216 = arith.constant 216 : index
    %c0_59 = arith.constant 0 : index
    %112 = vector.load %arg10[%c216, %c0_59] : memref<324x576xbf16, #tpu.memory_space<vmem>>, vector<4x576xbf16>
    tpu.vector_store %arg10[%c216, %c0_59], %111 {strides = array<i32>} : memref<324x576xbf16, #tpu.memory_space<vmem>>, vector<4x576xbf16>,
    %113 = vector.extract_strided_slice %2 {offsets = [0, 145], sizes = [4, 576], strides = [1, 1]} : vector<4x776xbf16> to vector<4x576xbf16>
    %c220 = arith.constant 220 : index
    %c0_60 = arith.constant 0 : index
    %114 = vector.load %arg10[%c220, %c0_60] : memref<324x576xbf16, #tpu.memory_space<vmem>>, vector<4x576xbf16>
    tpu.vector_store %arg10[%c220, %c0_60], %113 {strides = array<i32>} : memref<324x576xbf16, #tpu.memory_space<vmem>>, vector<4x576xbf16>,
    %115 = vector.extract_strided_slice %2 {offsets = [0, 146], sizes = [4, 576], strides = [1, 1]} : vector<4x776xbf16> to vector<4x576xbf16>
    %c224 = arith.constant 224 : index
    %c0_61 = arith.constant 0 : index
    %116 = vector.load %arg10[%c224, %c0_61] : memref<324x576xbf16, #tpu.memory_space<vmem>>, vector<4x576xbf16>
    tpu.vector_store %arg10[%c224, %c0_61], %115 {strides = array<i32>} : memref<324x576xbf16, #tpu.memory_space<vmem>>, vector<4x576xbf16>,
    %117 = vector.extract_strided_slice %2 {offsets = [0, 147], sizes = [4, 576], strides = [1, 1]} : vector<4x776xbf16> to vector<4x576xbf16>
    %c228 = arith.constant 228 : index
    %c0_62 = arith.constant 0 : index
    %118 = vector.load %arg10[%c228, %c0_62] : memref<324x576xbf16, #tpu.memory_space<vmem>>, vector<4x576xbf16>
    tpu.vector_store %arg10[%c228, %c0_62], %117 {strides = array<i32>} : memref<324x576xbf16, #tpu.memory_space<vmem>>, vector<4x576xbf16>,
    %119 = vector.extract_strided_slice %2 {offsets = [0, 148], sizes = [4, 576], strides = [1, 1]} : vector<4x776xbf16> to vector<4x576xbf16>
    %c232 = arith.constant 232 : index
    %c0_63 = arith.constant 0 : index
    %120 = vector.load %arg10[%c232, %c0_63] : memref<324x576xbf16, #tpu.memory_space<vmem>>, vector<4x576xbf16>
    tpu.vector_store %arg10[%c232, %c0_63], %119 {strides = array<i32>} : memref<324x576xbf16, #tpu.memory_space<vmem>>, vector<4x576xbf16>,
    %121 = vector.extract_strided_slice %2 {offsets = [0, 149], sizes = [4, 576], strides = [1, 1]} : vector<4x776xbf16> to vector<4x576xbf16>
    %c236 = arith.constant 236 : index
    %c0_64 = arith.constant 0 : index
    %122 = vector.load %arg10[%c236, %c0_64] : memref<324x576xbf16, #tpu.memory_space<vmem>>, vector<4x576xbf16>
    tpu.vector_store %arg10[%c236, %c0_64], %121 {strides = array<i32>} : memref<324x576xbf16, #tpu.memory_space<vmem>>, vector<4x576xbf16>,
    %123 = vector.extract_strided_slice %2 {offsets = [0, 150], sizes = [4, 576], strides = [1, 1]} : vector<4x776xbf16> to vector<4x576xbf16>
    %c240 = arith.constant 240 : index
    %c0_65 = arith.constant 0 : index
    %124 = vector.load %arg10[%c240, %c0_65] : memref<324x576xbf16, #tpu.memory_space<vmem>>, vector<4x576xbf16>
    tpu.vector_store %arg10[%c240, %c0_65], %123 {strides = array<i32>} : memref<324x576xbf16, #tpu.memory_space<vmem>>, vector<4x576xbf16>,
    %125 = vector.extract_strided_slice %2 {offsets = [0, 151], sizes = [4, 576], strides = [1, 1]} : vector<4x776xbf16> to vector<4x576xbf16>
    %c244 = arith.constant 244 : index
    %c0_66 = arith.constant 0 : index
    %126 = vector.load %arg10[%c244, %c0_66] : memref<324x576xbf16, #tpu.memory_space<vmem>>, vector<4x576xbf16>
    tpu.vector_store %arg10[%c244, %c0_66], %125 {strides = array<i32>} : memref<324x576xbf16, #tpu.memory_space<vmem>>, vector<4x576xbf16>,
    %127 = vector.extract_strided_slice %2 {offsets = [0, 152], sizes = [4, 576], strides = [1, 1]} : vector<4x776xbf16> to vector<4x576xbf16>
    %c248 = arith.constant 248 : index
    %c0_67 = arith.constant 0 : index
    %128 = vector.load %arg10[%c248, %c0_67] : memref<324x576xbf16, #tpu.memory_space<vmem>>, vector<4x576xbf16>
    tpu.vector_store %arg10[%c248, %c0_67], %127 {strides = array<i32>} : memref<324x576xbf16, #tpu.memory_space<vmem>>, vector<4x576xbf16>,
    %129 = vector.extract_strided_slice %2 {offsets = [0, 168], sizes = [4, 576], strides = [1, 1]} : vector<4x776xbf16> to vector<4x576xbf16>
    %c252 = arith.constant 252 : index
    %c0_68 = arith.constant 0 : index
    %130 = vector.load %arg10[%c252, %c0_68] : memref<324x576xbf16, #tpu.memory_space<vmem>>, vector<4x576xbf16>
    tpu.vector_store %arg10[%c252, %c0_68], %129 {strides = array<i32>} : memref<324x576xbf16, #tpu.memory_space<vmem>>, vector<4x576xbf16>,
    %131 = vector.extract_strided_slice %2 {offsets = [0, 169], sizes = [4, 576], strides = [1, 1]} : vector<4x776xbf16> to vector<4x576xbf16>
    %c256 = arith.constant 256 : index
    %c0_69 = arith.constant 0 : index
    %132 = vector.load %arg10[%c256, %c0_69] : memref<324x576xbf16, #tpu.memory_space<vmem>>, vector<4x576xbf16>
    tpu.vector_store %arg10[%c256, %c0_69], %131 {strides = array<i32>} : memref<324x576xbf16, #tpu.memory_space<vmem>>, vector<4x576xbf16>,
    %133 = vector.extract_strided_slice %2 {offsets = [0, 170], sizes = [4, 576], strides = [1, 1]} : vector<4x776xbf16> to vector<4x576xbf16>
    %c260 = arith.constant 260 : index
    %c0_70 = arith.constant 0 : index
    %134 = vector.load %arg10[%c260, %c0_70] : memref<324x576xbf16, #tpu.memory_space<vmem>>, vector<4x576xbf16>
    tpu.vector_store %arg10[%c260, %c0_70], %133 {strides = array<i32>} : memref<324x576xbf16, #tpu.memory_space<vmem>>, vector<4x576xbf16>,
    %135 = vector.extract_strided_slice %2 {offsets = [0, 171], sizes = [4, 576], strides = [1, 1]} : vector<4x776xbf16> to vector<4x576xbf16>
    %c264 = arith.constant 264 : index
    %c0_71 = arith.constant 0 : index
    %136 = vector.load %arg10[%c264, %c0_71] : memref<324x576xbf16, #tpu.memory_space<vmem>>, vector<4x576xbf16>
    tpu.vector_store %arg10[%c264, %c0_71], %135 {strides = array<i32>} : memref<324x576xbf16, #tpu.memory_space<vmem>>, vector<4x576xbf16>,
    %137 = vector.extract_strided_slice %2 {offsets = [0, 172], sizes = [4, 576], strides = [1, 1]} : vector<4x776xbf16> to vector<4x576xbf16>
    %c268 = arith.constant 268 : index
    %c0_72 = arith.constant 0 : index
    %138 = vector.load %arg10[%c268, %c0_72] : memref<324x576xbf16, #tpu.memory_space<vmem>>, vector<4x576xbf16>
    tpu.vector_store %arg10[%c268, %c0_72], %137 {strides = array<i32>} : memref<324x576xbf16, #tpu.memory_space<vmem>>, vector<4x576xbf16>,
    %139 = vector.extract_strided_slice %2 {offsets = [0, 173], sizes = [4, 576], strides = [1, 1]} : vector<4x776xbf16> to vector<4x576xbf16>
    %c272 = arith.constant 272 : index
    %c0_73 = arith.constant 0 : index
    %140 = vector.load %arg10[%c272, %c0_73] : memref<324x576xbf16, #tpu.memory_space<vmem>>, vector<4x576xbf16>
    tpu.vector_store %arg10[%c272, %c0_73], %139 {strides = array<i32>} : memref<324x576xbf16, #tpu.memory_space<vmem>>, vector<4x576xbf16>,
    %141 = vector.extract_strided_slice %2 {offsets = [0, 174], sizes = [4, 576], strides = [1, 1]} : vector<4x776xbf16> to vector<4x576xbf16>
    %c276 = arith.constant 276 : index
    %c0_74 = arith.constant 0 : index
    %142 = vector.load %arg10[%c276, %c0_74] : memref<324x576xbf16, #tpu.memory_space<vmem>>, vector<4x576xbf16>
    tpu.vector_store %arg10[%c276, %c0_74], %141 {strides = array<i32>} : memref<324x576xbf16, #tpu.memory_space<vmem>>, vector<4x576xbf16>,
    %143 = vector.extract_strided_slice %2 {offsets = [0, 175], sizes = [4, 576], strides = [1, 1]} : vector<4x776xbf16> to vector<4x576xbf16>
    %c280 = arith.constant 280 : index
    %c0_75 = arith.constant 0 : index
    %144 = vector.load %arg10[%c280, %c0_75] : memref<324x576xbf16, #tpu.memory_space<vmem>>, vector<4x576xbf16>
    tpu.vector_store %arg10[%c280, %c0_75], %143 {strides = array<i32>} : memref<324x576xbf16, #tpu.memory_space<vmem>>, vector<4x576xbf16>,
    %145 = vector.extract_strided_slice %2 {offsets = [0, 176], sizes = [4, 576], strides = [1, 1]} : vector<4x776xbf16> to vector<4x576xbf16>
    %c284 = arith.constant 284 : index
    %c0_76 = arith.constant 0 : index
    %146 = vector.load %arg10[%c284, %c0_76] : memref<324x576xbf16, #tpu.memory_space<vmem>>, vector<4x576xbf16>
    tpu.vector_store %arg10[%c284, %c0_76], %145 {strides = array<i32>} : memref<324x576xbf16, #tpu.memory_space<vmem>>, vector<4x576xbf16>,
    %147 = vector.extract_strided_slice %2 {offsets = [0, 192], sizes = [4, 576], strides = [1, 1]} : vector<4x776xbf16> to vector<4x576xbf16>
    %c288 = arith.constant 288 : index
    %c0_77 = arith.constant 0 : index
    %148 = vector.load %arg10[%c288, %c0_77] : memref<324x576xbf16, #tpu.memory_space<vmem>>, vector<4x576xbf16>
    tpu.vector_store %arg10[%c288, %c0_77], %147 {strides = array<i32>} : memref<324x576xbf16, #tpu.memory_space<vmem>>, vector<4x576xbf16>,
    %149 = vector.extract_strided_slice %2 {offsets = [0, 193], sizes = [4, 576], strides = [1, 1]} : vector<4x776xbf16> to vector<4x576xbf16>
    %c292 = arith.constant 292 : index
    %c0_78 = arith.constant 0 : index
    %150 = vector.load %arg10[%c292, %c0_78] : memref<324x576xbf16, #tpu.memory_space<vmem>>, vector<4x576xbf16>
    tpu.vector_store %arg10[%c292, %c0_78], %149 {strides = array<i32>} : memref<324x576xbf16, #tpu.memory_space<vmem>>, vector<4x576xbf16>,
    %151 = vector.extract_strided_slice %2 {offsets = [0, 194], sizes = [4, 576], strides = [1, 1]} : vector<4x776xbf16> to vector<4x576xbf16>
    %c296 = arith.constant 296 : index
    %c0_79 = arith.constant 0 : index
    %152 = vector.load %arg10[%c296, %c0_79] : memref<324x576xbf16, #tpu.memory_space<vmem>>, vector<4x576xbf16>
    tpu.vector_store %arg10[%c296, %c0_79], %151 {strides = array<i32>} : memref<324x576xbf16, #tpu.memory_space<vmem>>, vector<4x576xbf16>,
    %153 = vector.extract_strided_slice %2 {offsets = [0, 195], sizes = [4, 576], strides = [1, 1]} : vector<4x776xbf16> to vector<4x576xbf16>
    %c300 = arith.constant 300 : index
    %c0_80 = arith.constant 0 : index
    %154 = vector.load %arg10[%c300, %c0_80] : memref<324x576xbf16, #tpu.memory_space<vmem>>, vector<4x576xbf16>
    tpu.vector_store %arg10[%c300, %c0_80], %153 {strides = array<i32>} : memref<324x576xbf16, #tpu.memory_space<vmem>>, vector<4x576xbf16>,
    %155 = vector.extract_strided_slice %2 {offsets = [0, 196], sizes = [4, 576], strides = [1, 1]} : vector<4x776xbf16> to vector<4x576xbf16>
    %c304 = arith.constant 304 : index
    %c0_81 = arith.constant 0 : index
    %156 = vector.load %arg10[%c304, %c0_81] : memref<324x576xbf16, #tpu.memory_space<vmem>>, vector<4x576xbf16>
    tpu.vector_store %arg10[%c304, %c0_81], %155 {strides = array<i32>} : memref<324x576xbf16, #tpu.memory_space<vmem>>, vector<4x576xbf16>,
    %157 = vector.extract_strided_slice %2 {offsets = [0, 197], sizes = [4, 576], strides = [1, 1]} : vector<4x776xbf16> to vector<4x576xbf16>
    %c308 = arith.constant 308 : index
    %c0_82 = arith.constant 0 : index
    %158 = vector.load %arg10[%c308, %c0_82] : memref<324x576xbf16, #tpu.memory_space<vmem>>, vector<4x576xbf16>
    tpu.vector_store %arg10[%c308, %c0_82], %157 {strides = array<i32>} : memref<324x576xbf16, #tpu.memory_space<vmem>>, vector<4x576xbf16>,
    %159 = vector.extract_strided_slice %2 {offsets = [0, 198], sizes = [4, 576], strides = [1, 1]} : vector<4x776xbf16> to vector<4x576xbf16>
    %c312 = arith.constant 312 : index
    %c0_83 = arith.constant 0 : index
    %160 = vector.load %arg10[%c312, %c0_83] : memref<324x576xbf16, #tpu.memory_space<vmem>>, vector<4x576xbf16>
    tpu.vector_store %arg10[%c312, %c0_83], %159 {strides = array<i32>} : memref<324x576xbf16, #tpu.memory_space<vmem>>, vector<4x576xbf16>,
    %161 = vector.extract_strided_slice %2 {offsets = [0, 199], sizes = [4, 576], strides = [1, 1]} : vector<4x776xbf16> to vector<4x576xbf16>
    %c316 = arith.constant 316 : index
    %c0_84 = arith.constant 0 : index
    %162 = vector.load %arg10[%c316, %c0_84] : memref<324x576xbf16, #tpu.memory_space<vmem>>, vector<4x576xbf16>
    tpu.vector_store %arg10[%c316, %c0_84], %161 {strides = array<i32>} : memref<324x576xbf16, #tpu.memory_space<vmem>>, vector<4x576xbf16>,
    %163 = vector.extract_strided_slice %2 {offsets = [0, 200], sizes = [4, 576], strides = [1, 1]} : vector<4x776xbf16> to vector<4x576xbf16>
    %c320 = arith.constant 320 : index
    %c0_85 = arith.constant 0 : index
    %164 = vector.load %arg10[%c320, %c0_85] : memref<324x576xbf16, #tpu.memory_space<vmem>>, vector<4x576xbf16>
    tpu.vector_store %arg10[%c320, %c0_85], %163 {strides = array<i32>} : memref<324x576xbf16, #tpu.memory_space<vmem>>, vector<4x576xbf16>,
    %c0_86 = arith.constant 0 : index
    %c0_87 = arith.constant 0 : index
    %165 = vector.load %arg2[%c0_86, %c0_87] : memref<48x324xbf16, #tpu.memory_space<vmem>>, vector<48x324xbf16>
    %c0_88 = arith.constant 0 : index
    %c0_89 = arith.constant 0 : index
    %166 = vector.load %arg10[%c0_88, %c0_89] : memref<324x576xbf16, #tpu.memory_space<vmem>>, vector<324x576xbf16>
    %cst = arith.constant dense<0.000000e+00> : vector<48x576xf32>
    %167 = tpu.matmul %165, %166, %cst {dimension_numbers = #tpu.dot_dimension_numbers<[1], [0], [0], [1], [0, 0, 1, 1], [], []>} : vector<48x324xbf16>, vector<324x576xbf16>, vector<48x576xf32> -> vector<48x576xf32>
    %c0_90 = arith.constant 0 : index
    %c0_91 = arith.constant 0 : index
    %168 = vector.load %arg3[%c0_90, %c0_91] : memref<48x1xf32, #tpu.memory_space<vmem>>, vector<48x1xf32>
    %169 = vector.broadcast %168 : vector<48x1xf32> to vector<48x576xf32>
    %170 = arith.addf %167, %169 : vector<48x576xf32>
    %171 = vector.extract_strided_slice %170 {offsets = [0, 0], sizes = [16, 576], strides = [1, 1]} : vector<48x576xf32> to vector<16x576xf32>
    %172 = vector.extract_strided_slice %170 {offsets = [16, 0], sizes = [16, 576], strides = [1, 1]} : vector<48x576xf32> to vector<16x576xf32>
    %173 = vector.extract_strided_slice %170 {offsets = [32, 0], sizes = [16, 576], strides = [1, 1]} : vector<48x576xf32> to vector<16x576xf32>
    %cst_92 = arith.constant dense<0.000000e+00> : vector<576xf32>
    %174 = vector.multi_reduction <add>, %172, %cst_92 [0] : vector<16x576xf32> to vector<576xf32>
    %175 = vector.shape_cast %174 : vector<576xf32> to vector<1x576xf32>
    %cst_93 = arith.constant 1.600000e+01 : f32
    %176 = vector.broadcast %cst_93 : f32 to vector<1x576xf32>
    %177 = arith.divf %175, %176 : vector<1x576xf32>
    %cst_94 = arith.constant dense<0xFF800000> : vector<576xf32>
    %178 = vector.multi_reduction <maximumf>, %172, %cst_94 [0] : vector<16x576xf32> to vector<576xf32>
    %179 = vector.shape_cast %178 : vector<576xf32> to vector<1x576xf32>
    %cst_95 = arith.constant dense<0.000000e+00> : vector<576xf32>
    %180 = vector.multi_reduction <add>, %173, %cst_95 [0] : vector<16x576xf32> to vector<576xf32>
    %181 = vector.shape_cast %180 : vector<576xf32> to vector<1x576xf32>
    %cst_96 = arith.constant 1.600000e+01 : f32
    %182 = vector.broadcast %cst_96 : f32 to vector<1x576xf32>
    %183 = arith.divf %181, %182 : vector<1x576xf32>
    %cst_97 = arith.constant dense<0xFF800000> : vector<576xf32>
    %184 = vector.multi_reduction <maximumf>, %173, %cst_97 [0] : vector<16x576xf32> to vector<576xf32>
    %185 = vector.shape_cast %184 : vector<576xf32> to vector<1x576xf32>
    %186 = tpu.concatenate %177, %179, %183, %185 in 0 : vector<1x576xf32>, vector<1x576xf32>, vector<1x576xf32>, vector<1x576xf32> -> vector<4x576xf32>
    %187 = vector.broadcast %0 : vector<1x576xf32> to vector<4x576xf32>
    %188 = arith.mulf %186, %187 : vector<4x576xf32>
    %cst_98 = arith.constant 0.000000e+00 : f32
    %189 = vector.broadcast %cst_98 : f32 to vector<4x100xf32>
    %190 = tpu.concatenate %189, %188, %189 in 1 : vector<4x100xf32>, vector<4x576xf32>, vector<4x100xf32> -> vector<4x776xf32>
    %191 = vector.extract_strided_slice %190 {offsets = [0, 0], sizes = [4, 576], strides = [1, 1]} : vector<4x776xf32> to vector<4x576xf32>
    %c0_99 = arith.constant 0 : index
    %c0_100 = arith.constant 0 : index
    %192 = vector.load %arg11[%c0_99, %c0_100] : memref<324x576xf32, #tpu.memory_space<vmem>>, vector<4x576xf32>
    tpu.vector_store %arg11[%c0_99, %c0_100], %191 {strides = array<i32>} : memref<324x576xf32, #tpu.memory_space<vmem>>, vector<4x576xf32>,
    %193 = vector.extract_strided_slice %190 {offsets = [0, 1], sizes = [4, 576], strides = [1, 1]} : vector<4x776xf32> to vector<4x576xf32>
    %c4_101 = arith.constant 4 : index
    %c0_102 = arith.constant 0 : index
    %194 = vector.load %arg11[%c4_101, %c0_102] : memref<324x576xf32, #tpu.memory_space<vmem>>, vector<4x576xf32>
    tpu.vector_store %arg11[%c4_101, %c0_102], %193 {strides = array<i32>} : memref<324x576xf32, #tpu.memory_space<vmem>>, vector<4x576xf32>,
    %195 = vector.extract_strided_slice %190 {offsets = [0, 2], sizes = [4, 576], strides = [1, 1]} : vector<4x776xf32> to vector<4x576xf32>
    %c8_103 = arith.constant 8 : index
    %c0_104 = arith.constant 0 : index
    %196 = vector.load %arg11[%c8_103, %c0_104] : memref<324x576xf32, #tpu.memory_space<vmem>>, vector<4x576xf32>
    tpu.vector_store %arg11[%c8_103, %c0_104], %195 {strides = array<i32>} : memref<324x576xf32, #tpu.memory_space<vmem>>, vector<4x576xf32>,
    %197 = vector.extract_strided_slice %190 {offsets = [0, 3], sizes = [4, 576], strides = [1, 1]} : vector<4x776xf32> to vector<4x576xf32>
    %c12_105 = arith.constant 12 : index
    %c0_106 = arith.constant 0 : index
    %198 = vector.load %arg11[%c12_105, %c0_106] : memref<324x576xf32, #tpu.memory_space<vmem>>, vector<4x576xf32>
    tpu.vector_store %arg11[%c12_105, %c0_106], %197 {strides = array<i32>} : memref<324x576xf32, #tpu.memory_space<vmem>>, vector<4x576xf32>,
    %199 = vector.extract_strided_slice %190 {offsets = [0, 4], sizes = [4, 576], strides = [1, 1]} : vector<4x776xf32> to vector<4x576xf32>
    %c16_107 = arith.constant 16 : index
    %c0_108 = arith.constant 0 : index
    %200 = vector.load %arg11[%c16_107, %c0_108] : memref<324x576xf32, #tpu.memory_space<vmem>>, vector<4x576xf32>
    tpu.vector_store %arg11[%c16_107, %c0_108], %199 {strides = array<i32>} : memref<324x576xf32, #tpu.memory_space<vmem>>, vector<4x576xf32>,
    %201 = vector.extract_strided_slice %190 {offsets = [0, 5], sizes = [4, 576], strides = [1, 1]} : vector<4x776xf32> to vector<4x576xf32>
    %c20_109 = arith.constant 20 : index
    %c0_110 = arith.constant 0 : index
    %202 = vector.load %arg11[%c20_109, %c0_110] : memref<324x576xf32, #tpu.memory_space<vmem>>, vector<4x576xf32>
    tpu.vector_store %arg11[%c20_109, %c0_110], %201 {strides = array<i32>} : memref<324x576xf32, #tpu.memory_space<vmem>>, vector<4x576xf32>,
    %203 = vector.extract_strided_slice %190 {offsets = [0, 6], sizes = [4, 576], strides = [1, 1]} : vector<4x776xf32> to vector<4x576xf32>
    %c24_111 = arith.constant 24 : index
    %c0_112 = arith.constant 0 : index
    %204 = vector.load %arg11[%c24_111, %c0_112] : memref<324x576xf32, #tpu.memory_space<vmem>>, vector<4x576xf32>
    tpu.vector_store %arg11[%c24_111, %c0_112], %203 {strides = array<i32>} : memref<324x576xf32, #tpu.memory_space<vmem>>, vector<4x576xf32>,
    %205 = vector.extract_strided_slice %190 {offsets = [0, 7], sizes = [4, 576], strides = [1, 1]} : vector<4x776xf32> to vector<4x576xf32>
    %c28_113 = arith.constant 28 : index
    %c0_114 = arith.constant 0 : index
    %206 = vector.load %arg11[%c28_113, %c0_114] : memref<324x576xf32, #tpu.memory_space<vmem>>, vector<4x576xf32>
    tpu.vector_store %arg11[%c28_113, %c0_114], %205 {strides = array<i32>} : memref<324x576xf32, #tpu.memory_space<vmem>>, vector<4x576xf32>,
    %207 = vector.extract_strided_slice %190 {offsets = [0, 8], sizes = [4, 576], strides = [1, 1]} : vector<4x776xf32> to vector<4x576xf32>
    %c32_115 = arith.constant 32 : index
    %c0_116 = arith.constant 0 : index
    %208 = vector.load %arg11[%c32_115, %c0_116] : memref<324x576xf32, #tpu.memory_space<vmem>>, vector<4x576xf32>
    tpu.vector_store %arg11[%c32_115, %c0_116], %207 {strides = array<i32>} : memref<324x576xf32, #tpu.memory_space<vmem>>, vector<4x576xf32>,
    %209 = vector.extract_strided_slice %190 {offsets = [0, 24], sizes = [4, 576], strides = [1, 1]} : vector<4x776xf32> to vector<4x576xf32>
    %c36_117 = arith.constant 36 : index
    %c0_118 = arith.constant 0 : index
    %210 = vector.load %arg11[%c36_117, %c0_118] : memref<324x576xf32, #tpu.memory_space<vmem>>, vector<4x576xf32>
    tpu.vector_store %arg11[%c36_117, %c0_118], %209 {strides = array<i32>} : memref<324x576xf32, #tpu.memory_space<vmem>>, vector<4x576xf32>,
    %211 = vector.extract_strided_slice %190 {offsets = [0, 25], sizes = [4, 576], strides = [1, 1]} : vector<4x776xf32> to vector<4x576xf32>
    %c40_119 = arith.constant 40 : index
    %c0_120 = arith.constant 0 : index
    %212 = vector.load %arg11[%c40_119, %c0_120] : memref<324x576xf32, #tpu.memory_space<vmem>>, vector<4x576xf32>
    tpu.vector_store %arg11[%c40_119, %c0_120], %211 {strides = array<i32>} : memref<324x576xf32, #tpu.memory_space<vmem>>, vector<4x576xf32>,
    %213 = vector.extract_strided_slice %190 {offsets = [0, 26], sizes = [4, 576], strides = [1, 1]} : vector<4x776xf32> to vector<4x576xf32>
    %c44_121 = arith.constant 44 : index
    %c0_122 = arith.constant 0 : index
    %214 = vector.load %arg11[%c44_121, %c0_122] : memref<324x576xf32, #tpu.memory_space<vmem>>, vector<4x576xf32>
    tpu.vector_store %arg11[%c44_121, %c0_122], %213 {strides = array<i32>} : memref<324x576xf32, #tpu.memory_space<vmem>>, vector<4x576xf32>,
    %215 = vector.extract_strided_slice %190 {offsets = [0, 27], sizes = [4, 576], strides = [1, 1]} : vector<4x776xf32> to vector<4x576xf32>
    %c48_123 = arith.constant 48 : index
    %c0_124 = arith.constant 0 : index
    %216 = vector.load %arg11[%c48_123, %c0_124] : memref<324x576xf32, #tpu.memory_space<vmem>>, vector<4x576xf32>
    tpu.vector_store %arg11[%c48_123, %c0_124], %215 {strides = array<i32>} : memref<324x576xf32, #tpu.memory_space<vmem>>, vector<4x576xf32>,
    %217 = vector.extract_strided_slice %190 {offsets = [0, 28], sizes = [4, 576], strides = [1, 1]} : vector<4x776xf32> to vector<4x576xf32>
    %c52_125 = arith.constant 52 : index
    %c0_126 = arith.constant 0 : index
    %218 = vector.load %arg11[%c52_125, %c0_126] : memref<324x576xf32, #tpu.memory_space<vmem>>, vector<4x576xf32>
    tpu.vector_store %arg11[%c52_125, %c0_126], %217 {strides = array<i32>} : memref<324x576xf32, #tpu.memory_space<vmem>>, vector<4x576xf32>,
    %219 = vector.extract_strided_slice %190 {offsets = [0, 29], sizes = [4, 576], strides = [1, 1]} : vector<4x776xf32> to vector<4x576xf32>
    %c56_127 = arith.constant 56 : index
    %c0_128 = arith.constant 0 : index
    %220 = vector.load %arg11[%c56_127, %c0_128] : memref<324x576xf32, #tpu.memory_space<vmem>>, vector<4x576xf32>
    tpu.vector_store %arg11[%c56_127, %c0_128], %219 {strides = array<i32>} : memref<324x576xf32, #tpu.memory_space<vmem>>, vector<4x576xf32>,
    %221 = vector.extract_strided_slice %190 {offsets = [0, 30], sizes = [4, 576], strides = [1, 1]} : vector<4x776xf32> to vector<4x576xf32>
    %c60_129 = arith.constant 60 : index
    %c0_130 = arith.constant 0 : index
    %222 = vector.load %arg11[%c60_129, %c0_130] : memref<324x576xf32, #tpu.memory_space<vmem>>, vector<4x576xf32>
    tpu.vector_store %arg11[%c60_129, %c0_130], %221 {strides = array<i32>} : memref<324x576xf32, #tpu.memory_space<vmem>>, vector<4x576xf32>,
    %223 = vector.extract_strided_slice %190 {offsets = [0, 31], sizes = [4, 576], strides = [1, 1]} : vector<4x776xf32> to vector<4x576xf32>
    %c64_131 = arith.constant 64 : index
    %c0_132 = arith.constant 0 : index
    %224 = vector.load %arg11[%c64_131, %c0_132] : memref<324x576xf32, #tpu.memory_space<vmem>>, vector<4x576xf32>
    tpu.vector_store %arg11[%c64_131, %c0_132], %223 {strides = array<i32>} : memref<324x576xf32, #tpu.memory_space<vmem>>, vector<4x576xf32>,
    %225 = vector.extract_strided_slice %190 {offsets = [0, 32], sizes = [4, 576], strides = [1, 1]} : vector<4x776xf32> to vector<4x576xf32>
    %c68_133 = arith.constant 68 : index
    %c0_134 = arith.constant 0 : index
    %226 = vector.load %arg11[%c68_133, %c0_134] : memref<324x576xf32, #tpu.memory_space<vmem>>, vector<4x576xf32>
    tpu.vector_store %arg11[%c68_133, %c0_134], %225 {strides = array<i32>} : memref<324x576xf32, #tpu.memory_space<vmem>>, vector<4x576xf32>,
    %227 = vector.extract_strided_slice %190 {offsets = [0, 48], sizes = [4, 576], strides = [1, 1]} : vector<4x776xf32> to vector<4x576xf32>
    %c72_135 = arith.constant 72 : index
    %c0_136 = arith.constant 0 : index
    %228 = vector.load %arg11[%c72_135, %c0_136] : memref<324x576xf32, #tpu.memory_space<vmem>>, vector<4x576xf32>
    tpu.vector_store %arg11[%c72_135, %c0_136], %227 {strides = array<i32>} : memref<324x576xf32, #tpu.memory_space<vmem>>, vector<4x576xf32>,
    %229 = vector.extract_strided_slice %190 {offsets = [0, 49], sizes = [4, 576], strides = [1, 1]} : vector<4x776xf32> to vector<4x576xf32>
    %c76_137 = arith.constant 76 : index
    %c0_138 = arith.constant 0 : index
    %230 = vector.load %arg11[%c76_137, %c0_138] : memref<324x576xf32, #tpu.memory_space<vmem>>, vector<4x576xf32>
    tpu.vector_store %arg11[%c76_137, %c0_138], %229 {strides = array<i32>} : memref<324x576xf32, #tpu.memory_space<vmem>>, vector<4x576xf32>,
    %231 = vector.extract_strided_slice %190 {offsets = [0, 50], sizes = [4, 576], strides = [1, 1]} : vector<4x776xf32> to vector<4x576xf32>
    %c80_139 = arith.constant 80 : index
    %c0_140 = arith.constant 0 : index
    %232 = vector.load %arg11[%c80_139, %c0_140] : memref<324x576xf32, #tpu.memory_space<vmem>>, vector<4x576xf32>
    tpu.vector_store %arg11[%c80_139, %c0_140], %231 {strides = array<i32>} : memref<324x576xf32, #tpu.memory_space<vmem>>, vector<4x576xf32>,
    %233 = vector.extract_strided_slice %190 {offsets = [0, 51], sizes = [4, 576], strides = [1, 1]} : vector<4x776xf32> to vector<4x576xf32>
    %c84_141 = arith.constant 84 : index
    %c0_142 = arith.constant 0 : index
    %234 = vector.load %arg11[%c84_141, %c0_142] : memref<324x576xf32, #tpu.memory_space<vmem>>, vector<4x576xf32>
    tpu.vector_store %arg11[%c84_141, %c0_142], %233 {strides = array<i32>} : memref<324x576xf32, #tpu.memory_space<vmem>>, vector<4x576xf32>,
    %235 = vector.extract_strided_slice %190 {offsets = [0, 52], sizes = [4, 576], strides = [1, 1]} : vector<4x776xf32> to vector<4x576xf32>
    %c88_143 = arith.constant 88 : index
    %c0_144 = arith.constant 0 : index
    %236 = vector.load %arg11[%c88_143, %c0_144] : memref<324x576xf32, #tpu.memory_space<vmem>>, vector<4x576xf32>
    tpu.vector_store %arg11[%c88_143, %c0_144], %235 {strides = array<i32>} : memref<324x576xf32, #tpu.memory_space<vmem>>, vector<4x576xf32>,
    %237 = vector.extract_strided_slice %190 {offsets = [0, 53], sizes = [4, 576], strides = [1, 1]} : vector<4x776xf32> to vector<4x576xf32>
    %c92_145 = arith.constant 92 : index
    %c0_146 = arith.constant 0 : index
    %238 = vector.load %arg11[%c92_145, %c0_146] : memref<324x576xf32, #tpu.memory_space<vmem>>, vector<4x576xf32>
    tpu.vector_store %arg11[%c92_145, %c0_146], %237 {strides = array<i32>} : memref<324x576xf32, #tpu.memory_space<vmem>>, vector<4x576xf32>,
    %239 = vector.extract_strided_slice %190 {offsets = [0, 54], sizes = [4, 576], strides = [1, 1]} : vector<4x776xf32> to vector<4x576xf32>
    %c96_147 = arith.constant 96 : index
    %c0_148 = arith.constant 0 : index
    %240 = vector.load %arg11[%c96_147, %c0_148] : memref<324x576xf32, #tpu.memory_space<vmem>>, vector<4x576xf32>
    tpu.vector_store %arg11[%c96_147, %c0_148], %239 {strides = array<i32>} : memref<324x576xf32, #tpu.memory_space<vmem>>, vector<4x576xf32>,
    %241 = vector.extract_strided_slice %190 {offsets = [0, 55], sizes = [4, 576], strides = [1, 1]} : vector<4x776xf32> to vector<4x576xf32>
    %c100_149 = arith.constant 100 : index
    %c0_150 = arith.constant 0 : index
    %242 = vector.load %arg11[%c100_149, %c0_150] : memref<324x576xf32, #tpu.memory_space<vmem>>, vector<4x576xf32>
    tpu.vector_store %arg11[%c100_149, %c0_150], %241 {strides = array<i32>} : memref<324x576xf32, #tpu.memory_space<vmem>>, vector<4x576xf32>,
    %243 = vector.extract_strided_slice %190 {offsets = [0, 56], sizes = [4, 576], strides = [1, 1]} : vector<4x776xf32> to vector<4x576xf32>
    %c104_151 = arith.constant 104 : index
    %c0_152 = arith.constant 0 : index
    %244 = vector.load %arg11[%c104_151, %c0_152] : memref<324x576xf32, #tpu.memory_space<vmem>>, vector<4x576xf32>
    tpu.vector_store %arg11[%c104_151, %c0_152], %243 {strides = array<i32>} : memref<324x576xf32, #tpu.memory_space<vmem>>, vector<4x576xf32>,
    %245 = vector.extract_strided_slice %190 {offsets = [0, 72], sizes = [4, 576], strides = [1, 1]} : vector<4x776xf32> to vector<4x576xf32>
    %c108_153 = arith.constant 108 : index
    %c0_154 = arith.constant 0 : index
    %246 = vector.load %arg11[%c108_153, %c0_154] : memref<324x576xf32, #tpu.memory_space<vmem>>, vector<4x576xf32>
    tpu.vector_store %arg11[%c108_153, %c0_154], %245 {strides = array<i32>} : memref<324x576xf32, #tpu.memory_space<vmem>>, vector<4x576xf32>,
    %247 = vector.extract_strided_slice %190 {offsets = [0, 73], sizes = [4, 576], strides = [1, 1]} : vector<4x776xf32> to vector<4x576xf32>
    %c112_155 = arith.constant 112 : index
    %c0_156 = arith.constant 0 : index
    %248 = vector.load %arg11[%c112_155, %c0_156] : memref<324x576xf32, #tpu.memory_space<vmem>>, vector<4x576xf32>
    tpu.vector_store %arg11[%c112_155, %c0_156], %247 {strides = array<i32>} : memref<324x576xf32, #tpu.memory_space<vmem>>, vector<4x576xf32>,
    %249 = vector.extract_strided_slice %190 {offsets = [0, 74], sizes = [4, 576], strides = [1, 1]} : vector<4x776xf32> to vector<4x576xf32>
    %c116_157 = arith.constant 116 : index
    %c0_158 = arith.constant 0 : index
    %250 = vector.load %arg11[%c116_157, %c0_158] : memref<324x576xf32, #tpu.memory_space<vmem>>, vector<4x576xf32>
    tpu.vector_store %arg11[%c116_157, %c0_158], %249 {strides = array<i32>} : memref<324x576xf32, #tpu.memory_space<vmem>>, vector<4x576xf32>,
    %251 = vector.extract_strided_slice %190 {offsets = [0, 75], sizes = [4, 576], strides = [1, 1]} : vector<4x776xf32> to vector<4x576xf32>
    %c120_159 = arith.constant 120 : index
    %c0_160 = arith.constant 0 : index
    %252 = vector.load %arg11[%c120_159, %c0_160] : memref<324x576xf32, #tpu.memory_space<vmem>>, vector<4x576xf32>
    tpu.vector_store %arg11[%c120_159, %c0_160], %251 {strides = array<i32>} : memref<324x576xf32, #tpu.memory_space<vmem>>, vector<4x576xf32>,
    %253 = vector.extract_strided_slice %190 {offsets = [0, 76], sizes = [4, 576], strides = [1, 1]} : vector<4x776xf32> to vector<4x576xf32>
    %c124_161 = arith.constant 124 : index
    %c0_162 = arith.constant 0 : index
    %254 = vector.load %arg11[%c124_161, %c0_162] : memref<324x576xf32, #tpu.memory_space<vmem>>, vector<4x576xf32>
    tpu.vector_store %arg11[%c124_161, %c0_162], %253 {strides = array<i32>} : memref<324x576xf32, #tpu.memory_space<vmem>>, vector<4x576xf32>,
    %255 = vector.extract_strided_slice %190 {offsets = [0, 77], sizes = [4, 576], strides = [1, 1]} : vector<4x776xf32> to vector<4x576xf32>
    %c128_163 = arith.constant 128 : index
    %c0_164 = arith.constant 0 : index
    %256 = vector.load %arg11[%c128_163, %c0_164] : memref<324x576xf32, #tpu.memory_space<vmem>>, vector<4x576xf32>
    tpu.vector_store %arg11[%c128_163, %c0_164], %255 {strides = array<i32>} : memref<324x576xf32, #tpu.memory_space<vmem>>, vector<4x576xf32>,
    %257 = vector.extract_strided_slice %190 {offsets = [0, 78], sizes = [4, 576], strides = [1, 1]} : vector<4x776xf32> to vector<4x576xf32>
    %c132_165 = arith.constant 132 : index
    %c0_166 = arith.constant 0 : index
    %258 = vector.load %arg11[%c132_165, %c0_166] : memref<324x576xf32, #tpu.memory_space<vmem>>, vector<4x576xf32>
    tpu.vector_store %arg11[%c132_165, %c0_166], %257 {strides = array<i32>} : memref<324x576xf32, #tpu.memory_space<vmem>>, vector<4x576xf32>,
    %259 = vector.extract_strided_slice %190 {offsets = [0, 79], sizes = [4, 576], strides = [1, 1]} : vector<4x776xf32> to vector<4x576xf32>
    %c136_167 = arith.constant 136 : index
    %c0_168 = arith.constant 0 : index
    %260 = vector.load %arg11[%c136_167, %c0_168] : memref<324x576xf32, #tpu.memory_space<vmem>>, vector<4x576xf32>
    tpu.vector_store %arg11[%c136_167, %c0_168], %259 {strides = array<i32>} : memref<324x576xf32, #tpu.memory_space<vmem>>, vector<4x576xf32>,
    %261 = vector.extract_strided_slice %190 {offsets = [0, 80], sizes = [4, 576], strides = [1, 1]} : vector<4x776xf32> to vector<4x576xf32>
    %c140_169 = arith.constant 140 : index
    %c0_170 = arith.constant 0 : index
    %262 = vector.load %arg11[%c140_169, %c0_170] : memref<324x576xf32, #tpu.memory_space<vmem>>, vector<4x576xf32>
    tpu.vector_store %arg11[%c140_169, %c0_170], %261 {strides = array<i32>} : memref<324x576xf32, #tpu.memory_space<vmem>>, vector<4x576xf32>,
    %263 = vector.extract_strided_slice %190 {offsets = [0, 96], sizes = [4, 576], strides = [1, 1]} : vector<4x776xf32> to vector<4x576xf32>
    %c144_171 = arith.constant 144 : index
    %c0_172 = arith.constant 0 : index
    %264 = vector.load %arg11[%c144_171, %c0_172] : memref<324x576xf32, #tpu.memory_space<vmem>>, vector<4x576xf32>
    tpu.vector_store %arg11[%c144_171, %c0_172], %263 {strides = array<i32>} : memref<324x576xf32, #tpu.memory_space<vmem>>, vector<4x576xf32>,
    %265 = vector.extract_strided_slice %190 {offsets = [0, 97], sizes = [4, 576], strides = [1, 1]} : vector<4x776xf32> to vector<4x576xf32>
    %c148_173 = arith.constant 148 : index
    %c0_174 = arith.constant 0 : index
    %266 = vector.load %arg11[%c148_173, %c0_174] : memref<324x576xf32, #tpu.memory_space<vmem>>, vector<4x576xf32>
    tpu.vector_store %arg11[%c148_173, %c0_174], %265 {strides = array<i32>} : memref<324x576xf32, #tpu.memory_space<vmem>>, vector<4x576xf32>,
    %267 = vector.extract_strided_slice %190 {offsets = [0, 98], sizes = [4, 576], strides = [1, 1]} : vector<4x776xf32> to vector<4x576xf32>
    %c152_175 = arith.constant 152 : index
    %c0_176 = arith.constant 0 : index
    %268 = vector.load %arg11[%c152_175, %c0_176] : memref<324x576xf32, #tpu.memory_space<vmem>>, vector<4x576xf32>
    tpu.vector_store %arg11[%c152_175, %c0_176], %267 {strides = array<i32>} : memref<324x576xf32, #tpu.memory_space<vmem>>, vector<4x576xf32>,
    %269 = vector.extract_strided_slice %190 {offsets = [0, 99], sizes = [4, 576], strides = [1, 1]} : vector<4x776xf32> to vector<4x576xf32>
    %c156_177 = arith.constant 156 : index
    %c0_178 = arith.constant 0 : index
    %270 = vector.load %arg11[%c156_177, %c0_178] : memref<324x576xf32, #tpu.memory_space<vmem>>, vector<4x576xf32>
    tpu.vector_store %arg11[%c156_177, %c0_178], %269 {strides = array<i32>} : memref<324x576xf32, #tpu.memory_space<vmem>>, vector<4x576xf32>,
    %271 = vector.extract_strided_slice %190 {offsets = [0, 100], sizes = [4, 576], strides = [1, 1]} : vector<4x776xf32> to vector<4x576xf32>
    %c160_179 = arith.constant 160 : index
    %c0_180 = arith.constant 0 : index
    %272 = vector.load %arg11[%c160_179, %c0_180] : memref<324x576xf32, #tpu.memory_space<vmem>>, vector<4x576xf32>
    tpu.vector_store %arg11[%c160_179, %c0_180], %271 {strides = array<i32>} : memref<324x576xf32, #tpu.memory_space<vmem>>, vector<4x576xf32>,
    %273 = vector.extract_strided_slice %190 {offsets = [0, 101], sizes = [4, 576], strides = [1, 1]} : vector<4x776xf32> to vector<4x576xf32>
    %c164_181 = arith.constant 164 : index
    %c0_182 = arith.constant 0 : index
    %274 = vector.load %arg11[%c164_181, %c0_182] : memref<324x576xf32, #tpu.memory_space<vmem>>, vector<4x576xf32>
    tpu.vector_store %arg11[%c164_181, %c0_182], %273 {strides = array<i32>} : memref<324x576xf32, #tpu.memory_space<vmem>>, vector<4x576xf32>,
    %275 = vector.extract_strided_slice %190 {offsets = [0, 102], sizes = [4, 576], strides = [1, 1]} : vector<4x776xf32> to vector<4x576xf32>
    %c168_183 = arith.constant 168 : index
    %c0_184 = arith.constant 0 : index
    %276 = vector.load %arg11[%c168_183, %c0_184] : memref<324x576xf32, #tpu.memory_space<vmem>>, vector<4x576xf32>
    tpu.vector_store %arg11[%c168_183, %c0_184], %275 {strides = array<i32>} : memref<324x576xf32, #tpu.memory_space<vmem>>, vector<4x576xf32>,
    %277 = vector.extract_strided_slice %190 {offsets = [0, 103], sizes = [4, 576], strides = [1, 1]} : vector<4x776xf32> to vector<4x576xf32>
    %c172_185 = arith.constant 172 : index
    %c0_186 = arith.constant 0 : index
    %278 = vector.load %arg11[%c172_185, %c0_186] : memref<324x576xf32, #tpu.memory_space<vmem>>, vector<4x576xf32>
    tpu.vector_store %arg11[%c172_185, %c0_186], %277 {strides = array<i32>} : memref<324x576xf32, #tpu.memory_space<vmem>>, vector<4x576xf32>,
    %279 = vector.extract_strided_slice %190 {offsets = [0, 104], sizes = [4, 576], strides = [1, 1]} : vector<4x776xf32> to vector<4x576xf32>
    %c176_187 = arith.constant 176 : index
    %c0_188 = arith.constant 0 : index
    %280 = vector.load %arg11[%c176_187, %c0_188] : memref<324x576xf32, #tpu.memory_space<vmem>>, vector<4x576xf32>
    tpu.vector_store %arg11[%c176_187, %c0_188], %279 {strides = array<i32>} : memref<324x576xf32, #tpu.memory_space<vmem>>, vector<4x576xf32>,
    %281 = vector.extract_strided_slice %190 {offsets = [0, 120], sizes = [4, 576], strides = [1, 1]} : vector<4x776xf32> to vector<4x576xf32>
    %c180_189 = arith.constant 180 : index
    %c0_190 = arith.constant 0 : index
    %282 = vector.load %arg11[%c180_189, %c0_190] : memref<324x576xf32, #tpu.memory_space<vmem>>, vector<4x576xf32>
    tpu.vector_store %arg11[%c180_189, %c0_190], %281 {strides = array<i32>} : memref<324x576xf32, #tpu.memory_space<vmem>>, vector<4x576xf32>,
    %283 = vector.extract_strided_slice %190 {offsets = [0, 121], sizes = [4, 576], strides = [1, 1]} : vector<4x776xf32> to vector<4x576xf32>
    %c184_191 = arith.constant 184 : index
    %c0_192 = arith.constant 0 : index
    %284 = vector.load %arg11[%c184_191, %c0_192] : memref<324x576xf32, #tpu.memory_space<vmem>>, vector<4x576xf32>
    tpu.vector_store %arg11[%c184_191, %c0_192], %283 {strides = array<i32>} : memref<324x576xf32, #tpu.memory_space<vmem>>, vector<4x576xf32>,
    %285 = vector.extract_strided_slice %190 {offsets = [0, 122], sizes = [4, 576], strides = [1, 1]} : vector<4x776xf32> to vector<4x576xf32>
    %c188_193 = arith.constant 188 : index
    %c0_194 = arith.constant 0 : index
    %286 = vector.load %arg11[%c188_193, %c0_194] : memref<324x576xf32, #tpu.memory_space<vmem>>, vector<4x576xf32>
    tpu.vector_store %arg11[%c188_193, %c0_194], %285 {strides = array<i32>} : memref<324x576xf32, #tpu.memory_space<vmem>>, vector<4x576xf32>,
    %287 = vector.extract_strided_slice %190 {offsets = [0, 123], sizes = [4, 576], strides = [1, 1]} : vector<4x776xf32> to vector<4x576xf32>
    %c192_195 = arith.constant 192 : index
    %c0_196 = arith.constant 0 : index
    %288 = vector.load %arg11[%c192_195, %c0_196] : memref<324x576xf32, #tpu.memory_space<vmem>>, vector<4x576xf32>
    tpu.vector_store %arg11[%c192_195, %c0_196], %287 {strides = array<i32>} : memref<324x576xf32, #tpu.memory_space<vmem>>, vector<4x576xf32>,
    %289 = vector.extract_strided_slice %190 {offsets = [0, 124], sizes = [4, 576], strides = [1, 1]} : vector<4x776xf32> to vector<4x576xf32>
    %c196_197 = arith.constant 196 : index
    %c0_198 = arith.constant 0 : index
    %290 = vector.load %arg11[%c196_197, %c0_198] : memref<324x576xf32, #tpu.memory_space<vmem>>, vector<4x576xf32>
    tpu.vector_store %arg11[%c196_197, %c0_198], %289 {strides = array<i32>} : memref<324x576xf32, #tpu.memory_space<vmem>>, vector<4x576xf32>,
    %291 = vector.extract_strided_slice %190 {offsets = [0, 125], sizes = [4, 576], strides = [1, 1]} : vector<4x776xf32> to vector<4x576xf32>
    %c200_199 = arith.constant 200 : index
    %c0_200 = arith.constant 0 : index
    %292 = vector.load %arg11[%c200_199, %c0_200] : memref<324x576xf32, #tpu.memory_space<vmem>>, vector<4x576xf32>
    tpu.vector_store %arg11[%c200_199, %c0_200], %291 {strides = array<i32>} : memref<324x576xf32, #tpu.memory_space<vmem>>, vector<4x576xf32>,
    %293 = vector.extract_strided_slice %190 {offsets = [0, 126], sizes = [4, 576], strides = [1, 1]} : vector<4x776xf32> to vector<4x576xf32>
    %c204_201 = arith.constant 204 : index
    %c0_202 = arith.constant 0 : index
    %294 = vector.load %arg11[%c204_201, %c0_202] : memref<324x576xf32, #tpu.memory_space<vmem>>, vector<4x576xf32>
    tpu.vector_store %arg11[%c204_201, %c0_202], %293 {strides = array<i32>} : memref<324x576xf32, #tpu.memory_space<vmem>>, vector<4x576xf32>,
    %295 = vector.extract_strided_slice %190 {offsets = [0, 127], sizes = [4, 576], strides = [1, 1]} : vector<4x776xf32> to vector<4x576xf32>
    %c208_203 = arith.constant 208 : index
    %c0_204 = arith.constant 0 : index
    %296 = vector.load %arg11[%c208_203, %c0_204] : memref<324x576xf32, #tpu.memory_space<vmem>>, vector<4x576xf32>
    tpu.vector_store %arg11[%c208_203, %c0_204], %295 {strides = array<i32>} : memref<324x576xf32, #tpu.memory_space<vmem>>, vector<4x576xf32>,
    %297 = vector.extract_strided_slice %190 {offsets = [0, 128], sizes = [4, 576], strides = [1, 1]} : vector<4x776xf32> to vector<4x576xf32>
    %c212_205 = arith.constant 212 : index
    %c0_206 = arith.constant 0 : index
    %298 = vector.load %arg11[%c212_205, %c0_206] : memref<324x576xf32, #tpu.memory_space<vmem>>, vector<4x576xf32>
    tpu.vector_store %arg11[%c212_205, %c0_206], %297 {strides = array<i32>} : memref<324x576xf32, #tpu.memory_space<vmem>>, vector<4x576xf32>,
    %299 = vector.extract_strided_slice %190 {offsets = [0, 144], sizes = [4, 576], strides = [1, 1]} : vector<4x776xf32> to vector<4x576xf32>
    %c216_207 = arith.constant 216 : index
    %c0_208 = arith.constant 0 : index
    %300 = vector.load %arg11[%c216_207, %c0_208] : memref<324x576xf32, #tpu.memory_space<vmem>>, vector<4x576xf32>
    tpu.vector_store %arg11[%c216_207, %c0_208], %299 {strides = array<i32>} : memref<324x576xf32, #tpu.memory_space<vmem>>, vector<4x576xf32>,
    %301 = vector.extract_strided_slice %190 {offsets = [0, 145], sizes = [4, 576], strides = [1, 1]} : vector<4x776xf32> to vector<4x576xf32>
    %c220_209 = arith.constant 220 : index
    %c0_210 = arith.constant 0 : index
    %302 = vector.load %arg11[%c220_209, %c0_210] : memref<324x576xf32, #tpu.memory_space<vmem>>, vector<4x576xf32>
    tpu.vector_store %arg11[%c220_209, %c0_210], %301 {strides = array<i32>} : memref<324x576xf32, #tpu.memory_space<vmem>>, vector<4x576xf32>,
    %303 = vector.extract_strided_slice %190 {offsets = [0, 146], sizes = [4, 576], strides = [1, 1]} : vector<4x776xf32> to vector<4x576xf32>
    %c224_211 = arith.constant 224 : index
    %c0_212 = arith.constant 0 : index
    %304 = vector.load %arg11[%c224_211, %c0_212] : memref<324x576xf32, #tpu.memory_space<vmem>>, vector<4x576xf32>
    tpu.vector_store %arg11[%c224_211, %c0_212], %303 {strides = array<i32>} : memref<324x576xf32, #tpu.memory_space<vmem>>, vector<4x576xf32>,
    %305 = vector.extract_strided_slice %190 {offsets = [0, 147], sizes = [4, 576], strides = [1, 1]} : vector<4x776xf32> to vector<4x576xf32>
    %c228_213 = arith.constant 228 : index
    %c0_214 = arith.constant 0 : index
    %306 = vector.load %arg11[%c228_213, %c0_214] : memref<324x576xf32, #tpu.memory_space<vmem>>, vector<4x576xf32>
    tpu.vector_store %arg11[%c228_213, %c0_214], %305 {strides = array<i32>} : memref<324x576xf32, #tpu.memory_space<vmem>>, vector<4x576xf32>,
    %307 = vector.extract_strided_slice %190 {offsets = [0, 148], sizes = [4, 576], strides = [1, 1]} : vector<4x776xf32> to vector<4x576xf32>
    %c232_215 = arith.constant 232 : index
    %c0_216 = arith.constant 0 : index
    %308 = vector.load %arg11[%c232_215, %c0_216] : memref<324x576xf32, #tpu.memory_space<vmem>>, vector<4x576xf32>
    tpu.vector_store %arg11[%c232_215, %c0_216], %307 {strides = array<i32>} : memref<324x576xf32, #tpu.memory_space<vmem>>, vector<4x576xf32>,
    %309 = vector.extract_strided_slice %190 {offsets = [0, 149], sizes = [4, 576], strides = [1, 1]} : vector<4x776xf32> to vector<4x576xf32>
    %c236_217 = arith.constant 236 : index
    %c0_218 = arith.constant 0 : index
    %310 = vector.load %arg11[%c236_217, %c0_218] : memref<324x576xf32, #tpu.memory_space<vmem>>, vector<4x576xf32>
    tpu.vector_store %arg11[%c236_217, %c0_218], %309 {strides = array<i32>} : memref<324x576xf32, #tpu.memory_space<vmem>>, vector<4x576xf32>,
    %311 = vector.extract_strided_slice %190 {offsets = [0, 150], sizes = [4, 576], strides = [1, 1]} : vector<4x776xf32> to vector<4x576xf32>
    %c240_219 = arith.constant 240 : index
    %c0_220 = arith.constant 0 : index
    %312 = vector.load %arg11[%c240_219, %c0_220] : memref<324x576xf32, #tpu.memory_space<vmem>>, vector<4x576xf32>
    tpu.vector_store %arg11[%c240_219, %c0_220], %311 {strides = array<i32>} : memref<324x576xf32, #tpu.memory_space<vmem>>, vector<4x576xf32>,
    %313 = vector.extract_strided_slice %190 {offsets = [0, 151], sizes = [4, 576], strides = [1, 1]} : vector<4x776xf32> to vector<4x576xf32>
    %c244_221 = arith.constant 244 : index
    %c0_222 = arith.constant 0 : index
    %314 = vector.load %arg11[%c244_221, %c0_222] : memref<324x576xf32, #tpu.memory_space<vmem>>, vector<4x576xf32>
    tpu.vector_store %arg11[%c244_221, %c0_222], %313 {strides = array<i32>} : memref<324x576xf32, #tpu.memory_space<vmem>>, vector<4x576xf32>,
    %315 = vector.extract_strided_slice %190 {offsets = [0, 152], sizes = [4, 576], strides = [1, 1]} : vector<4x776xf32> to vector<4x576xf32>
    %c248_223 = arith.constant 248 : index
    %c0_224 = arith.constant 0 : index
    %316 = vector.load %arg11[%c248_223, %c0_224] : memref<324x576xf32, #tpu.memory_space<vmem>>, vector<4x576xf32>
    tpu.vector_store %arg11[%c248_223, %c0_224], %315 {strides = array<i32>} : memref<324x576xf32, #tpu.memory_space<vmem>>, vector<4x576xf32>,
    %317 = vector.extract_strided_slice %190 {offsets = [0, 168], sizes = [4, 576], strides = [1, 1]} : vector<4x776xf32> to vector<4x576xf32>
    %c252_225 = arith.constant 252 : index
    %c0_226 = arith.constant 0 : index
    %318 = vector.load %arg11[%c252_225, %c0_226] : memref<324x576xf32, #tpu.memory_space<vmem>>, vector<4x576xf32>
    tpu.vector_store %arg11[%c252_225, %c0_226], %317 {strides = array<i32>} : memref<324x576xf32, #tpu.memory_space<vmem>>, vector<4x576xf32>,
    %319 = vector.extract_strided_slice %190 {offsets = [0, 169], sizes = [4, 576], strides = [1, 1]} : vector<4x776xf32> to vector<4x576xf32>
    %c256_227 = arith.constant 256 : index
    %c0_228 = arith.constant 0 : index
    %320 = vector.load %arg11[%c256_227, %c0_228] : memref<324x576xf32, #tpu.memory_space<vmem>>, vector<4x576xf32>
    tpu.vector_store %arg11[%c256_227, %c0_228], %319 {strides = array<i32>} : memref<324x576xf32, #tpu.memory_space<vmem>>, vector<4x576xf32>,
    %321 = vector.extract_strided_slice %190 {offsets = [0, 170], sizes = [4, 576], strides = [1, 1]} : vector<4x776xf32> to vector<4x576xf32>
    %c260_229 = arith.constant 260 : index
    %c0_230 = arith.constant 0 : index
    %322 = vector.load %arg11[%c260_229, %c0_230] : memref<324x576xf32, #tpu.memory_space<vmem>>, vector<4x576xf32>
    tpu.vector_store %arg11[%c260_229, %c0_230], %321 {strides = array<i32>} : memref<324x576xf32, #tpu.memory_space<vmem>>, vector<4x576xf32>,
    %323 = vector.extract_strided_slice %190 {offsets = [0, 171], sizes = [4, 576], strides = [1, 1]} : vector<4x776xf32> to vector<4x576xf32>
    %c264_231 = arith.constant 264 : index
    %c0_232 = arith.constant 0 : index
    %324 = vector.load %arg11[%c264_231, %c0_232] : memref<324x576xf32, #tpu.memory_space<vmem>>, vector<4x576xf32>
    tpu.vector_store %arg11[%c264_231, %c0_232], %323 {strides = array<i32>} : memref<324x576xf32, #tpu.memory_space<vmem>>, vector<4x576xf32>,
    %325 = vector.extract_strided_slice %190 {offsets = [0, 172], sizes = [4, 576], strides = [1, 1]} : vector<4x776xf32> to vector<4x576xf32>
    %c268_233 = arith.constant 268 : index
    %c0_234 = arith.constant 0 : index
    %326 = vector.load %arg11[%c268_233, %c0_234] : memref<324x576xf32, #tpu.memory_space<vmem>>, vector<4x576xf32>
    tpu.vector_store %arg11[%c268_233, %c0_234], %325 {strides = array<i32>} : memref<324x576xf32, #tpu.memory_space<vmem>>, vector<4x576xf32>,
    %327 = vector.extract_strided_slice %190 {offsets = [0, 173], sizes = [4, 576], strides = [1, 1]} : vector<4x776xf32> to vector<4x576xf32>
    %c272_235 = arith.constant 272 : index
    %c0_236 = arith.constant 0 : index
    %328 = vector.load %arg11[%c272_235, %c0_236] : memref<324x576xf32, #tpu.memory_space<vmem>>, vector<4x576xf32>
    tpu.vector_store %arg11[%c272_235, %c0_236], %327 {strides = array<i32>} : memref<324x576xf32, #tpu.memory_space<vmem>>, vector<4x576xf32>,
    %329 = vector.extract_strided_slice %190 {offsets = [0, 174], sizes = [4, 576], strides = [1, 1]} : vector<4x776xf32> to vector<4x576xf32>
    %c276_237 = arith.constant 276 : index
    %c0_238 = arith.constant 0 : index
    %330 = vector.load %arg11[%c276_237, %c0_238] : memref<324x576xf32, #tpu.memory_space<vmem>>, vector<4x576xf32>
    tpu.vector_store %arg11[%c276_237, %c0_238], %329 {strides = array<i32>} : memref<324x576xf32, #tpu.memory_space<vmem>>, vector<4x576xf32>,
    %331 = vector.extract_strided_slice %190 {offsets = [0, 175], sizes = [4, 576], strides = [1, 1]} : vector<4x776xf32> to vector<4x576xf32>
    %c280_239 = arith.constant 280 : index
    %c0_240 = arith.constant 0 : index
    %332 = vector.load %arg11[%c280_239, %c0_240] : memref<324x576xf32, #tpu.memory_space<vmem>>, vector<4x576xf32>
    tpu.vector_store %arg11[%c280_239, %c0_240], %331 {strides = array<i32>} : memref<324x576xf32, #tpu.memory_space<vmem>>, vector<4x576xf32>,
    %333 = vector.extract_strided_slice %190 {offsets = [0, 176], sizes = [4, 576], strides = [1, 1]} : vector<4x776xf32> to vector<4x576xf32>
    %c284_241 = arith.constant 284 : index
    %c0_242 = arith.constant 0 : index
    %334 = vector.load %arg11[%c284_241, %c0_242] : memref<324x576xf32, #tpu.memory_space<vmem>>, vector<4x576xf32>
    tpu.vector_store %arg11[%c284_241, %c0_242], %333 {strides = array<i32>} : memref<324x576xf32, #tpu.memory_space<vmem>>, vector<4x576xf32>,
    %335 = vector.extract_strided_slice %190 {offsets = [0, 192], sizes = [4, 576], strides = [1, 1]} : vector<4x776xf32> to vector<4x576xf32>
    %c288_243 = arith.constant 288 : index
    %c0_244 = arith.constant 0 : index
    %336 = vector.load %arg11[%c288_243, %c0_244] : memref<324x576xf32, #tpu.memory_space<vmem>>, vector<4x576xf32>
    tpu.vector_store %arg11[%c288_243, %c0_244], %335 {strides = array<i32>} : memref<324x576xf32, #tpu.memory_space<vmem>>, vector<4x576xf32>,
    %337 = vector.extract_strided_slice %190 {offsets = [0, 193], sizes = [4, 576], strides = [1, 1]} : vector<4x776xf32> to vector<4x576xf32>
    %c292_245 = arith.constant 292 : index
    %c0_246 = arith.constant 0 : index
    %338 = vector.load %arg11[%c292_245, %c0_246] : memref<324x576xf32, #tpu.memory_space<vmem>>, vector<4x576xf32>
    tpu.vector_store %arg11[%c292_245, %c0_246], %337 {strides = array<i32>} : memref<324x576xf32, #tpu.memory_space<vmem>>, vector<4x576xf32>,
    %339 = vector.extract_strided_slice %190 {offsets = [0, 194], sizes = [4, 576], strides = [1, 1]} : vector<4x776xf32> to vector<4x576xf32>
    %c296_247 = arith.constant 296 : index
    %c0_248 = arith.constant 0 : index
    %340 = vector.load %arg11[%c296_247, %c0_248] : memref<324x576xf32, #tpu.memory_space<vmem>>, vector<4x576xf32>
    tpu.vector_store %arg11[%c296_247, %c0_248], %339 {strides = array<i32>} : memref<324x576xf32, #tpu.memory_space<vmem>>, vector<4x576xf32>,
    %341 = vector.extract_strided_slice %190 {offsets = [0, 195], sizes = [4, 576], strides = [1, 1]} : vector<4x776xf32> to vector<4x576xf32>
    %c300_249 = arith.constant 300 : index
    %c0_250 = arith.constant 0 : index
    %342 = vector.load %arg11[%c300_249, %c0_250] : memref<324x576xf32, #tpu.memory_space<vmem>>, vector<4x576xf32>
    tpu.vector_store %arg11[%c300_249, %c0_250], %341 {strides = array<i32>} : memref<324x576xf32, #tpu.memory_space<vmem>>, vector<4x576xf32>,
    %343 = vector.extract_strided_slice %190 {offsets = [0, 196], sizes = [4, 576], strides = [1, 1]} : vector<4x776xf32> to vector<4x576xf32>
    %c304_251 = arith.constant 304 : index
    %c0_252 = arith.constant 0 : index
    %344 = vector.load %arg11[%c304_251, %c0_252] : memref<324x576xf32, #tpu.memory_space<vmem>>, vector<4x576xf32>
    tpu.vector_store %arg11[%c304_251, %c0_252], %343 {strides = array<i32>} : memref<324x576xf32, #tpu.memory_space<vmem>>, vector<4x576xf32>,
    %345 = vector.extract_strided_slice %190 {offsets = [0, 197], sizes = [4, 576], strides = [1, 1]} : vector<4x776xf32> to vector<4x576xf32>
    %c308_253 = arith.constant 308 : index
    %c0_254 = arith.constant 0 : index
    %346 = vector.load %arg11[%c308_253, %c0_254] : memref<324x576xf32, #tpu.memory_space<vmem>>, vector<4x576xf32>
    tpu.vector_store %arg11[%c308_253, %c0_254], %345 {strides = array<i32>} : memref<324x576xf32, #tpu.memory_space<vmem>>, vector<4x576xf32>,
    %347 = vector.extract_strided_slice %190 {offsets = [0, 198], sizes = [4, 576], strides = [1, 1]} : vector<4x776xf32> to vector<4x576xf32>
    %c312_255 = arith.constant 312 : index
    %c0_256 = arith.constant 0 : index
    %348 = vector.load %arg11[%c312_255, %c0_256] : memref<324x576xf32, #tpu.memory_space<vmem>>, vector<4x576xf32>
    tpu.vector_store %arg11[%c312_255, %c0_256], %347 {strides = array<i32>} : memref<324x576xf32, #tpu.memory_space<vmem>>, vector<4x576xf32>,
    %349 = vector.extract_strided_slice %190 {offsets = [0, 199], sizes = [4, 576], strides = [1, 1]} : vector<4x776xf32> to vector<4x576xf32>
    %c316_257 = arith.constant 316 : index
    %c0_258 = arith.constant 0 : index
    %350 = vector.load %arg11[%c316_257, %c0_258] : memref<324x576xf32, #tpu.memory_space<vmem>>, vector<4x576xf32>
    tpu.vector_store %arg11[%c316_257, %c0_258], %349 {strides = array<i32>} : memref<324x576xf32, #tpu.memory_space<vmem>>, vector<4x576xf32>,
    %351 = vector.extract_strided_slice %190 {offsets = [0, 200], sizes = [4, 576], strides = [1, 1]} : vector<4x776xf32> to vector<4x576xf32>
    %c320_259 = arith.constant 320 : index
    %c0_260 = arith.constant 0 : index
    %352 = vector.load %arg11[%c320_259, %c0_260] : memref<324x576xf32, #tpu.memory_space<vmem>>, vector<4x576xf32>
    tpu.vector_store %arg11[%c320_259, %c0_260], %351 {strides = array<i32>} : memref<324x576xf32, #tpu.memory_space<vmem>>, vector<4x576xf32>,
    %c0_261 = arith.constant 0 : index
    %c0_262 = arith.constant 0 : index
    %353 = vector.load %arg4[%c0_261, %c0_262] : memref<2x324xf32, #tpu.memory_space<vmem>>, vector<2x324xf32>
    %c0_263 = arith.constant 0 : index
    %c0_264 = arith.constant 0 : index
    %354 = vector.load %arg11[%c0_263, %c0_264] : memref<324x576xf32, #tpu.memory_space<vmem>>, vector<324x576xf32>
    %cst_265 = arith.constant dense<0.000000e+00> : vector<2x576xf32>
    %355 = tpu.matmul %353, %354, %cst_265 {dimension_numbers = #tpu.dot_dimension_numbers<[1], [0], [0], [1], [0, 0, 1, 1], [], []>} : vector<2x324xf32>, vector<324x576xf32>, vector<2x576xf32> -> vector<2x576xf32>
    %c0_266 = arith.constant 0 : index
    %c0_267 = arith.constant 0 : index
    %356 = vector.load %arg5[%c0_266, %c0_267] : memref<2x1xf32, #tpu.memory_space<vmem>>, vector<2x1xf32>
    %357 = vector.broadcast %356 : vector<2x1xf32> to vector<2x576xf32>
    %358 = arith.addf %355, %357 : vector<2x576xf32>
    %359 = arith.negf %358 : vector<2x576xf32>
    %360 = math.exp %359 : vector<2x576xf32>
    %cst_268 = arith.constant 1.000000e+00 : f32
    %361 = vector.broadcast %cst_268 : f32 to vector<2x576xf32>
    %362 = arith.addf %361, %360 : vector<2x576xf32>
    %363 = arith.divf %361, %362 : vector<2x576xf32>
    %364 = vector.extract_strided_slice %363 {offsets = [0, 0], sizes = [1, 576], strides = [1, 1]} : vector<2x576xf32> to vector<1x576xf32>
    %365 = vector.extract_strided_slice %363 {offsets = [1, 0], sizes = [1, 576], strides = [1, 1]} : vector<2x576xf32> to vector<1x576xf32>
    %366 = arith.addf %364, %365 : vector<1x576xf32>
    %367 = vector.broadcast %0 : vector<1x576xf32> to vector<16x576xf32>
    %368 = arith.mulf %171, %367 : vector<16x576xf32>
    %cst_269 = arith.constant dense<0.000000e+00> : vector<16xf32>
    %369 = vector.multi_reduction <add>, %368, %cst_269 [1] : vector<16x576xf32> to vector<16xf32>
    %370 = vector.shape_cast %369 : vector<16xf32> to vector<16x1xf32>
    %cst_270 = arith.constant 3.906250e-03 : f32
    %371 = vector.broadcast %cst_270 : f32 to vector<16x1xf32>
    %372 = arith.mulf %370, %371 : vector<16x1xf32>
    %c0_271 = arith.constant 0 : index
    %c0_272 = arith.constant 0 : index
    %373 = vector.load %arg6[%c0_271, %c0_272] : memref<1x16xf32, #tpu.memory_space<vmem>>, vector<1x16xf32>
    %cst_273 = arith.constant dense<0.000000e+00> : vector<1x1xf32>
    %374 = tpu.matmul %373, %372, %cst_273 {dimension_numbers = #tpu.dot_dimension_numbers<[1], [0], [0], [1], [0, 0, 1, 1], [], []>} : vector<1x16xf32>, vector<16x1xf32>, vector<1x1xf32> -> vector<1x1xf32>
    %cst_274 = arith.constant 0.000000e+00 : f32
    %375 = vector.broadcast %cst_274 : f32 to vector<1x1xf32>
    %376 = arith.maximumf %374, %375 : vector<1x1xf32>
    %c0_275 = arith.constant 0 : index
    %c0_276 = arith.constant 0 : index
    %377 = vector.load %arg7[%c0_275, %c0_276] : memref<16x1xf32, #tpu.memory_space<vmem>>, vector<16x1xf32>
    %cst_277 = arith.constant dense<0.000000e+00> : vector<16x1xf32>
    %378 = tpu.matmul %377, %376, %cst_277 {dimension_numbers = #tpu.dot_dimension_numbers<[1], [0], [0], [1], [0, 0, 1, 1], [], []>} : vector<16x1xf32>, vector<1x1xf32>, vector<16x1xf32> -> vector<16x1xf32>
    %379 = arith.negf %378 : vector<16x1xf32>
    %380 = math.exp %379 : vector<16x1xf32>
    %cst_278 = arith.constant 1.000000e+00 : f32
    %381 = vector.broadcast %cst_278 : f32 to vector<16x1xf32>
    %382 = arith.addf %381, %380 : vector<16x1xf32>
    %383 = arith.divf %381, %382 : vector<16x1xf32>
    %384 = vector.broadcast %383 : vector<16x1xf32> to vector<16x576xf32>
    %385 = arith.mulf %171, %384 : vector<16x576xf32>
    %386 = vector.broadcast %366 : vector<1x576xf32> to vector<16x576xf32>
    %387 = arith.mulf %385, %386 : vector<16x576xf32>
    %cst_279 = arith.constant 0.000000e+00 : f32
    %388 = vector.broadcast %cst_279 : f32 to vector<16x576xf32>
    %389 = arith.cmpf ogt, %387, %388 : vector<16x576xf32>
    %cst_280 = arith.constant 2.000000e-01 : f32
    %390 = vector.broadcast %cst_280 : f32 to vector<16x576xf32>
    %391 = arith.mulf %390, %387 : vector<16x576xf32>
    %392 = arith.select %389, %387, %391 : vector<16x576xi1>, vector<16x576xf32>
    %c0_281 = arith.constant 0 : index
    %c0_282 = arith.constant 0 : index
    %c0_283 = arith.constant 0 : index
    %393 = vector.load %arg9[%c0_281, %c0_282, %c0_283] : memref<1x16x576xf32, #tpu.memory_space<vmem>>, vector<1x16x576xf32>
    %394 = vector.shape_cast %393 : vector<1x16x576xf32> to vector<16x576xf32>
    %395 = vector.shape_cast %392 : vector<16x576xf32> to vector<1x16x576xf32>
    tpu.vector_store %arg9[%c0_281, %c0_282, %c0_283], %395 {strides = array<i32>} : memref<1x16x576xf32, #tpu.memory_space<vmem>>, vector<1x16x576xf32>,
    return
  }
  func.func @transform_0(%arg0: i32) -> (i32, i32, i32) {
    %c0_i32 = arith.constant 0 : i32
    %c0_i32_0 = arith.constant 0 : i32
    %c0_i32_1 = arith.constant 0 : i32
    return %arg0, %c0_i32, %c0_i32_0 : i32, i32, i32
  }
  func.func @transform_1(%arg0: i32) -> (i32, i32) {
    %c0_i32 = arith.constant 0 : i32
    %c0_i32_0 = arith.constant 0 : i32
    %c0_i32_1 = arith.constant 0 : i32
    return %c0_i32, %c0_i32_0 : i32, i32
  }
  func.func @transform_2(%arg0: i32) -> (i32, i32) {
    %c0_i32 = arith.constant 0 : i32
    %c0_i32_0 = arith.constant 0 : i32
    %c0_i32_1 = arith.constant 0 : i32
    return %c0_i32, %c0_i32_0 : i32, i32
  }
  func.func @transform_3(%arg0: i32) -> (i32, i32) {
    %c0_i32 = arith.constant 0 : i32
    %c0_i32_0 = arith.constant 0 : i32
    %c0_i32_1 = arith.constant 0 : i32
    return %c0_i32, %c0_i32_0 : i32, i32
  }
  func.func @transform_4(%arg0: i32) -> (i32, i32) {
    %c0_i32 = arith.constant 0 : i32
    %c0_i32_0 = arith.constant 0 : i32
    %c0_i32_1 = arith.constant 0 : i32
    return %c0_i32, %c0_i32_0 : i32, i32
  }
  func.func @transform_5(%arg0: i32) -> (i32, i32) {
    %c0_i32 = arith.constant 0 : i32
    %c0_i32_0 = arith.constant 0 : i32
    %c0_i32_1 = arith.constant 0 : i32
    return %c0_i32, %c0_i32_0 : i32, i32
  }
  func.func @transform_6(%arg0: i32) -> (i32, i32) {
    %c0_i32 = arith.constant 0 : i32
    %c0_i32_0 = arith.constant 0 : i32
    %c0_i32_1 = arith.constant 0 : i32
    return %c0_i32, %c0_i32_0 : i32, i32
  }
  func.func @transform_7(%arg0: i32) -> (i32, i32) {
    %c0_i32 = arith.constant 0 : i32
    %c0_i32_0 = arith.constant 0 : i32
    %c0_i32_1 = arith.constant 0 : i32
    return %c0_i32, %c0_i32_0 : i32, i32
  }
  func.func @transform_8(%arg0: i32) -> (i32, i32, i32) {
    %c0_i32 = arith.constant 0 : i32
    %c0_i32_0 = arith.constant 0 : i32
    %c0_i32_1 = arith.constant 0 : i32
    return %arg0, %c0_i32, %c0_i32_0 : i32, i32, i32
  }
}

</mosaic_0001>

<bundles_post_ra>
// kernel: saa_forward.1
= control target key start
LH: loop header
LB: loop body
LE: loop exit
PB: predicated region body
PF: predicated region fallthrough
CT: control target
= control target key end

     0   :  { %s7506_s27 = smov 0   ;;  %s11136_s0 = inlined_call_operand.vmem [shape: bf16[2,4,776], index: 0, kind: input, shape index: {}]   ;;  %s11137_s1 = inlined_call_operand.vmem [shape: bf16[48,324], index: 1, kind: input, shape index: {}]   ;;  %s11138_s2 = inlined_call_operand.vmem [shape: f32[48,1], index: 2, kind: input, shape index: {}]   ;;  %s11139_s3 = inlined_call_operand.vmem [shape: f32[2,324], index: 3, kind: input, shape index: {}]   ;;  %s11140_s4 = inlined_call_operand.vmem [shape: f32[2,1], index: 4, kind: input, shape index: {}]   ;;  %s11141_s5 = inlined_call_operand.vmem [shape: f32[1,16], index: 5, kind: input, shape index: {}]   ;;  %s11142_s6 = inlined_call_operand.vmem [shape: f32[16,1], index: 6, kind: input, shape index: {}]   ;;  %s11143_s7 = inlined_call_operand.vmem [shape: f32[1,576], index: 7, kind: input, shape index: {}]   ;;  %s11144_s8 = inlined_call_operand.vmem [shape: f32[2,16,576], index: 8, kind: output, shape index: {}]  }
   0x1   :  { %11462 = sst [smem:[#allocation63_spill]] %s11136_s0 }
   0x2   :  { %11463 = sst [smem:[#allocation64_spill]] %s11137_s1 }
   0x3   :  { %11464 = sst [smem:[#allocation65_spill]] %s11138_s2 }
   0x4   :  { %11465 = sst [smem:[#allocation66_spill]] %s11139_s3 }
   0x5   :  { %11466 = sst [smem:[#allocation67_spill]] %s11140_s4 }
   0x6   :  { %11467 = sst [smem:[#allocation68_spill]] %s11141_s5 }
   0x7   :  { %11468 = sst [smem:[#allocation69_spill]] %s11142_s6 }
   0x8   :  { %11469 = sst [smem:[#allocation70_spill]] %s11143_s7 }
   0x9   :  { %11470 = sst [smem:[#allocation71_spill]] %s11144_s8 }
   0xa LB: > { %11471 = sst [smem:[#allocation4_spill]] %s7378_s27  ;;  %s6541_s28 = sadd.s32 4294967295, %s7378_s27   ;;  %s7378_s27 = sphi %s7506_s27, %s18_s27  }
   0xb   : > { %p6545_p0 = scmp.ge.s32.totalorder %s7378_s27, 1  ;;  %p262_p1 = scmp.lt.s32.totalorder %s7378_s27, 3 }
   0xd   : > { %p263_p2 = pnand %p6545_p0, %p262_p1 }
   0xf   : > { %266 = sbr.rel (%p263_p2) target bundleno = 2364 (0x93c), region = 52 }
  0x16   : > { %p296_p3 = scmp.lt.s32.totalorder %s6541_s28, 1  ;;  %v316_v0 = vlaneseq  ;;  %v7380_v1 = vmov 1983009808   ;;  %s11473_s0 = sld [smem:[#allocation63_spill]]  ;;  %vm339_vm0 = vcmask 517120   ;;  %vm366_vm1 = vcmask 1043456  }
  0x17   : > { %v314_v2 = vunpack.c.l.s4 %v7380_v1  ;;  %s7381_s11 = smov 126   ;;  %s11225_s12 = smov 127   ;;  %vm11273_vm2 = vcmask 1039360   ;;  %vm11285_vm3 = vcmask 1031168   ;;  %vm377_vm4 = vcmask 519170  }
  0x18   : > { %s12010_s28 = smov (!%p296_p3, %s6541_s28), 1  ;;  %v7516_v3 = vshrl.u32 %v316_v0, 7  ;;  %s11223_s13 = smov 125   ;;  %vm11222_vm5 = vcmask 1022976   ;;  %vm11282_vm6 = vcmask 1014784   ;;  %vm11191_vm7 = vcmask 1006592  }
  0x19   : > { %11472 = sst [smem:[#allocation5_spill]] %s12010_s28  ;;  %v315_v4 = vunpack.c.0.s8 %v314_v2  ;;  %s7107_s29 = smul.u32 14, %s12010_s28  ;;  %vm11279_vm8 = vcmask 998400   ;;  %vm11176_vm9 = vcmask 990208   ;;  %vm11278_vm10 = vcmask 982016  }
  0x1a   : > { %s11299_s14 = smov 124   ;;  %s11220_s15 = smov 123   ;;  %vm11324_vm11 = vcmask 850944   ;;  %vm11277_vm12 = vcmask 842752   ;;  %vm11173_vm13 = vcmask 834560   ;;  %vm11276_vm14 = vcmask 826368  }
  0x1b   : > { %v7520_v5 = vsub.s32 %v315_v4, %v7516_v3  ;;  %s11269_s16 = smov 122   ;;  %s11217_s17 = smov 121   ;;  %vm11288_vm15 = vcmask 818176  }
  0x1c   : > { %s7525_s10 = scalar_lea.vmem %s11473_s0, %s7107_s29  ;;  %s11267_s18 = smov 120  }
  0x1d   : > { %v308_v6 = vld [vmem:[%s7525_s10] sm:$0xff]  ;;  %v309_v7 = vld [vmem:[%s7525_s10 + $0x8] sm:$0x3f]  ;;  %s11296_s19 = smov 104   ;;  %s11231_s20 = smov 103  }
  0x1e   : > { %v7530_v8 = vrot.slane %v308_v6, %v7520_v5  ;;  %6548 = vst.sshfl [vmem:[#allocation2] sm:$0xf pattern:$0x76325410] %v308_v6  ;;  %v7533_v9 = vrot.slane %v309_v7, %v7520_v5  ;;  %v341_v10 = vcombine.low %v308_v6, %v308_v6  ;;  %v312_v11 = vcombine.high %v308_v6, %v308_v6  ;;  %s11215_s21 = smov 102   ;;  %s11228_s22 = smov 101  }
  0x1f   : > { %v349_v14 = vcombine.low %v309_v7, %v309_v7  ;;  %s7393_s23 = smov 100   ;;  %s11212_s24 = smov 99  }
  0x20   : > { %379 = vrot.lane.b32.xlu1 %v7530_v8, %s7381_s11  ;;  %359 = vrot.lane.b32.xlu0 %v7530_v8, %s11225_s12  ;;  %v7540_v12 = vrot.slane %v341_v10, %v7520_v5  ;;  %6549 = vst.sshfl [vmem:[#allocation2 + $0x8] sm:$0xf pattern:$0x76325410] %v312_v11  ;;  %340 = vst.msk [vmem:[#allocation2 + $0x10] sm:$0x3] %vm339_vm0, %v7533_v9  ;;  %v7549_v13 = vrot.slane %v312_v11, %v7520_v5 }
  0x21   : > { %v7556_v15 = vrot.slane %v349_v14, %v7520_v5  ;;  %s11207_s25 = smov 98   ;;  %s11145_s26 = smov 97  }
  0x22   : > { %s11147_s29 = smov 96   ;;  %s11354_s30 = smov 80  }
  0x23   : > { %s11163_s9 = smov 79   ;;  %s11474_s1 = sld [smem:[#allocation64_spill]] }
  0x24   : > { %383 = vrot.lane.b32.xlu1 %v7533_v9, %s7381_s11  ;;  %357 = vrot.lane.b32.xlu0 %v7540_v12, %s11225_s12  ;;  %s11475_s2 = sld [smem:[#allocation65_spill]]  ;;  %s11486_s7 = sld [smem:[#allocation70_spill]] }
  0x25   : > { %s11621_s0 = smov 24   ;;  %s11635_s27 = smov 5  }
  0x26   : > { %s11636_s8 = smov 4   ;;  %s11639_s28 = smov 3  }
  0x27   : > { %s11641_s4 = smov 2   ;;  %s11646_s6 = smov 1  }
  0x28   : > { %401 = vrot.lane.b32.xlu1 %v7530_v8, %s11223_s13  ;;  %381 = vrot.lane.b32.xlu0 %v7549_v13, %s7381_s11  ;;  %s11648_s5 = smov 112   ;;  %s11699_s3 = sld [smem:[#allocation66_spill]] }
  0x2c   : > { %361 = vrot.lane.b32.xlu1 %v7556_v15, %s11225_s12  ;;  %399 = vrot.lane.b32.xlu0 %v7540_v12, %s11223_s13  ;;  %s11264_s12 = smov 1  }
  0x30   : > { %419 = vrot.lane.b32.xlu1 %v7530_v8, %s11299_s14  ;;  %403 = vrot.lane.b32.xlu0 %v7556_v15, %s11223_s13  ;;  %s11253_s13 = smov 2  }
  0x34   : > { %423 = vrot.lane.b32.xlu1 %v7533_v9, %s11299_s14  ;;  %421 = vrot.lane.b32.xlu0 %v7549_v13, %s11299_s14  ;;  %s11335_s14 = smov 57  }
  0x38   : > { %441 = vrot.lane.b32.xlu1 %v7530_v8, %s11220_s15  ;;  %439 = vrot.lane.b32.xlu0 %v7540_v12, %s11220_s15 }
  0x3c   : > { %459 = vrot.lane.b32.xlu1 %v7530_v8, %s11269_s16  ;;  %443 = vrot.lane.b32.xlu0 %v7556_v15, %s11220_s15  ;;  %s11247_s15 = smov 3  }
  0x40   : > { %463 = vrot.lane.b32.xlu1 %v7533_v9, %s11269_s16  ;;  %461 = vrot.lane.b32.xlu0 %v7549_v13, %s11269_s16  ;;  %s11356_s16 = smov 83  }
  0x44   : > { %481 = vrot.lane.b32.xlu1 %v7530_v8, %s11217_s17  ;;  %479 = vrot.lane.b32.xlu0 %v7540_v12, %s11217_s17 }
  0x48   : > { %499 = vrot.lane.b32.xlu1 %v7530_v8, %s11267_s18  ;;  %483 = vrot.lane.b32.xlu0 %v7556_v15, %s11217_s17  ;;  %s11249_s17 = smov 4  }
  0x4c   : > { %503 = vrot.lane.b32.xlu1 %v7533_v9, %s11267_s18  ;;  %501 = vrot.lane.b32.xlu0 %v7549_v13, %s11267_s18  ;;  %s11347_s18 = smov 82  }
  0x50   : > { %521 = vrot.lane.b32.xlu1 %v7530_v8, %s11296_s19  ;;  %519 = vrot.lane.b32.xlu0 %v7540_v12, %s11296_s19 }
  0x54   : > { %539 = vrot.lane.b32.xlu1 %v7530_v8, %s11231_s20  ;;  %523 = vrot.lane.b32.xlu0 %v7556_v15, %s11296_s19 }
  0x58   : > { %543 = vrot.lane.b32.xlu1 %v7533_v9, %s11231_s20  ;;  %541 = vrot.lane.b32.xlu0 %v7549_v13, %s11231_s20  ;;  %s11259_s20 = smov 111  }
  0x5c   : > { %561 = vrot.lane.b32.xlu1 %v7530_v8, %s11215_s21  ;;  %559 = vrot.lane.b32.xlu0 %v7540_v12, %s11215_s21 }
  0x60   : > { %579 = vrot.lane.b32.xlu1 %v7530_v8, %s11228_s22  ;;  %563 = vrot.lane.b32.xlu0 %v7556_v15, %s11215_s21  ;;  %s11256_s21 = smov 5  }
  0x64   : > { %583 = vrot.lane.b32.xlu1 %v7533_v9, %s11228_s22  ;;  %581 = vrot.lane.b32.xlu0 %v7549_v13, %s11228_s22  ;;  %s11261_s22 = smov 112  }
  0x68   : > { %601 = vrot.lane.b32.xlu1 %v7530_v8, %s7393_s23  ;;  %599 = vrot.lane.b32.xlu0 %v7540_v12, %s7393_s23 }
  0x6c   : > { %619 = vrot.lane.b32.xlu1 %v7530_v8, %s11212_s24  ;;  %603 = vrot.lane.b32.xlu0 %v7556_v15, %s7393_s23 }
  0x70   : > { %623 = vrot.lane.b32.xlu1 %v7533_v9, %s11212_s24  ;;  %621 = vrot.lane.b32.xlu0 %v7549_v13, %s11212_s24  ;;  %s11240_s24 = smov 6  }
  0x74   : > { %641 = vrot.lane.b32.xlu1 %v7530_v8, %s11207_s25  ;;  %639 = vrot.lane.b32.xlu0 %v7540_v12, %s11207_s25 }
  0x78   : > { %659 = vrot.lane.b32.xlu1 %v7530_v8, %s11145_s26  ;;  %643 = vrot.lane.b32.xlu0 %v7556_v15, %s11207_s25  ;;  %s11237_s25 = smov 8  }
  0x7c   : > { %663 = vrot.lane.b32.xlu1 %v7533_v9, %s11145_s26  ;;  %661 = vrot.lane.b32.xlu0 %v7549_v13, %s11145_s26  ;;  %s11149_s26 = smov 78  }
  0x80   : > { %681 = vrot.lane.b32.xlu1 %v7530_v8, %s11147_s29  ;;  %679 = vrot.lane.b32.xlu0 %v7540_v12, %s11147_s29 }
  0x84   : > { %699 = vrot.lane.b32.xlu1 %v7530_v8, %s11354_s30  ;;  %683 = vrot.lane.b32.xlu0 %v7556_v15, %s11147_s29  ;;  %s11151_s29 = smov 77  }
  0x88   : > { %703 = vrot.lane.b32.xlu1 %v7533_v9, %s11354_s30  ;;  %701 = vrot.lane.b32.xlu0 %v7549_v13, %s11354_s30 }
  0x8c   : > { %721 = vrot.lane.b32.xlu1 %v7530_v8, %s11163_s9  ;;  %719 = vrot.lane.b32.xlu0 %v7540_v12, %s11163_s9 }
  0x90   : > { %739 = vrot.lane.b32.xlu1 %v7530_v8, %s11149_s26  ;;  %723 = vrot.lane.b32.xlu0 %v7556_v15, %s11163_s9  ;;  %s11167_s9 = smov 54  }
  0x92   : > { %v380_v16 = vpop.permute.xlu1 %379  ;;  %v360_v17 = vpop.permute.xlu0 %359 }
  0x93   : > { %v364_v20 = vrot.slane %v360_v17, 4  ;;  %v385_v27 = vrot.slane %v380_v16, 4 }
  0x94   : > { %743 = vrot.lane.b32.xlu1 %v7533_v9, %s11149_s26  ;;  %741 = vrot.lane.b32.xlu0 %v7549_v13, %s11149_s26  ;;  %s11153_s26 = smov 76  }
  0x96   : > { %v384_v18 = vpop.permute.xlu1 %383  ;;  %v358_v19 = vpop.permute.xlu0 %357 }
  0x97   : > { %398 = vst.msk [vmem:[#allocation2 + $0x24] sm:$0x3] %vm339_vm0, %v384_v18  ;;  %v363_v21 = vrot.slane %v358_v19, 4  ;;  %v387_v22 = vrot.slane %v384_v18, 4 }
  0x98   : > { %761 = vrot.lane.b32.xlu1 %v7530_v8, %s11151_s29  ;;  %759 = vrot.lane.b32.xlu0 %v7540_v12, %s11151_s29 }
  0x99   : > { %v367_v23 = vsel %vm366_vm1, %v363_v21, %v364_v20 }
  0x9a   : > { %v369_v24 = vsel %vm11273_vm2, %v358_v19, %v367_v23  ;;  %v402_v25 = vpop.permute.xlu1 %401  ;;  %v382_v26 = vpop.permute.xlu0 %381 }
  0x9b   : > { %375 = vst [vmem:[#allocation2] sm:$0xcc] %v369_v24  ;;  %v386_v28 = vrot.slane %v382_v26, 4  ;;  %v406_v29 = vrot.slane %v402_v25, 4 }
  0x9c   : > { %779 = vrot.lane.b32.xlu1 %v7530_v8, %s11153_s26  ;;  %763 = vrot.lane.b32.xlu0 %v7556_v15, %s11151_s29  ;;  %s11155_s29 = smov 75  }
  0x9d   : > { %v388_v30 = vsel %vm366_vm1, %v385_v27, %v386_v28  ;;  %v391_v31 = vsel %vm366_vm1, %v386_v28, %v387_v22 }
  0x9e   : > { %v390_v32 = vsel %vm11285_vm3, %v380_v16, %v388_v30  ;;  %v392_v33 = vsel %vm11285_vm3, %v382_v26, %v391_v31  ;;  %v362_v34 = vpop.permute.xlu1 %361  ;;  %v400_v35 = vpop.permute.xlu0 %399  ;;  %vm11315_vm3 = vcmask 7168  }
  0x9f   : > { %396 = vst [vmem:[#allocation2 + $0x14] sm:$0x33] %v390_v32  ;;  %397 = vst [vmem:[#allocation2 + $0x1c] sm:$0x33] %v392_v33  ;;  %v365_v36 = vrot.slane %v362_v34, 4  ;;  %v405_v37 = vrot.slane %v400_v35, 4 }
  0xa0   : > { %378 = vst.msk [vmem:[#allocation2 + $0x10] sm:$0xc] %vm377_vm4, %v362_v34  ;;  %783 = vrot.lane.b32.xlu1 %v7533_v9, %s11153_s26  ;;  %781 = vrot.lane.b32.xlu0 %v7549_v13, %s11153_s26  ;;  %s11157_s26 = smov 74  }
  0xa1   : > { %v370_v38 = vsel %vm366_vm1, %v364_v20, %v365_v36  ;;  %v408_v39 = vsel %vm366_vm1, %v405_v37, %v406_v29 }
  0xa2   : > { %v371_v40 = vsel %vm11273_vm2, %v360_v17, %v370_v38  ;;  %v410_v41 = vsel %vm11222_vm5, %v400_v35, %v408_v39  ;;  %v420_v42 = vpop.permute.xlu1 %419  ;;  %v404_v43 = vpop.permute.xlu0 %403  ;;  %vm11302_vm2 = vcmask 56320  }
  0xa3   : > { %376 = vst [vmem:[#allocation2 + $0x8] sm:$0xcc] %v371_v40  ;;  %416 = vst [vmem:[#allocation2 + $0x14] sm:$0xcc] %v410_v41  ;;  %v407_v44 = vrot.slane %v404_v43, 4  ;;  %v425_v45 = vrot.slane %v420_v42, 4 }
  0xa4   : > { %418 = vst.msk [vmem:[#allocation2 + $0x24] sm:$0xc] %vm377_vm4, %v404_v43  ;;  %801 = vrot.lane.b32.xlu1 %v7530_v8, %s11155_s29  ;;  %799 = vrot.lane.b32.xlu0 %v7540_v12, %s11155_s29 }
  0xa5   : > { %v411_v46 = vsel %vm366_vm1, %v406_v29, %v407_v44 }
  0xa6   : > { %v412_v47 = vsel %vm11222_vm5, %v402_v25, %v411_v46  ;;  %v424_v48 = vpop.permute.xlu1 %423  ;;  %v422_v49 = vpop.permute.xlu0 %421  ;;  %vm11230_vm5 = vcmask 441344  }
  0xa7   : > { %417 = vst [vmem:[#allocation2 + $0x1c] sm:$0xcc] %v412_v47  ;;  %v427_v50 = vrot.slane %v424_v48, 4  ;;  %438 = vst.msk [vmem:[#allocation2 + $0x38] sm:$0x3] %vm339_vm0, %v424_v48  ;;  %v426_v51 = vrot.slane %v422_v49, 4 }
  0xa8   : > { %819 = vrot.lane.b32.xlu1 %v7530_v8, %s11157_s26  ;;  %803 = vrot.lane.b32.xlu0 %v7556_v15, %s11155_s29  ;;  %s11159_s29 = smov 73  }
  0xa9   : > { %v428_v52 = vsel %vm366_vm1, %v425_v45, %v426_v51  ;;  %v431_v53 = vsel %vm366_vm1, %v426_v51, %v427_v50 }
  0xaa   : > { %v430_v54 = vsel %vm11282_vm6, %v420_v42, %v428_v52  ;;  %v432_v55 = vsel %vm11282_vm6, %v422_v49, %v431_v53  ;;  %v442_v56 = vpop.permute.xlu1 %441  ;;  %v440_v57 = vpop.permute.xlu0 %439  ;;  %v7200_v58 = vld [vmem:[#allocation2 + $0x4] ss:$20 sps:$4 sm:$0xff]   ;;  %v7202_v59 = vld [vmem:[#allocation2] ss:$20 sps:$4 sm:$0xff]   ;;  %v2009_v2 = vld [vmem:[#allocation2 + $0x8] sm:$0xff]  ;;  %vm11305_vm6 = vcmask 15360  }
  0xab   : > { %436 = vst [vmem:[#allocation2 + $0x28] sm:$0x33] %v430_v54  ;;  %437 = vst [vmem:[#allocation2 + $0x30] sm:$0x33] %v432_v55  ;;  %v446_v60 = vrot.slane %v442_v56, 4  ;;  %v445_v61 = vrot.slane %v440_v57, 4  ;;  %2771 = vmatprep.subr.bf16.mxu0 %v7200_v58 }
  0xac   : > { %823 = vrot.lane.b32.xlu1 %v7533_v9, %s11157_s26  ;;  %821 = vrot.lane.b32.xlu0 %v7549_v13, %s11157_s26  ;;  %s11161_s26 = smov 72  }
  0xad   : > { %v448_v62 = vsel %vm366_vm1, %v445_v61, %v446_v60  ;;  %2772 = vmatpush1.bf16.msra.mxu0 %v7202_v59 }
  0xae   : > { %v450_v63 = vsel %vm11191_vm7, %v440_v57, %v448_v62  ;;  %v460_v0 = vpop.permute.xlu1 %459  ;;  %v444_v1 = vpop.permute.xlu0 %443  ;;  %v2012_v4 = vld [vmem:[#allocation2 + $0x1c] sm:$0xff] }
  0xaf   : > { %v7203_v6 = vld [vmem:[#allocation2 + $0xc] ss:$20 sps:$4 sm:$0xff]   ;;  %456 = vst [vmem:[#allocation2 + $0x28] sm:$0xcc] %v450_v63  ;;  %v447_v7 = vrot.slane %v444_v1, 4  ;;  %v6561_v10 = vcombine.low %v2009_v2, %v2012_v4  ;;  %v465_v11 = vrot.slane %v460_v0, 4 }
  0xb0   : > { %458 = vst.msk [vmem:[#allocation2 + $0x38] sm:$0xc] %vm377_vm4, %v444_v1  ;;  %841 = vrot.lane.b32.xlu1 %v7530_v8, %s11159_s29  ;;  %839 = vrot.lane.b32.xlu0 %v7540_v12, %s11159_s29 }
  0xb1   : > { %v451_v14 = vsel %vm366_vm1, %v446_v60, %v447_v7  ;;  %2897 = vmatprep.subr.bf16.mxu1 %v7203_v6 }
  0xb2   : > { %v452_v16 = vsel %vm11191_vm7, %v442_v56, %v451_v14  ;;  %v464_v17 = vpop.permute.xlu1 %463  ;;  %2898 = vmatpush1.bf16.msra.mxu1 %v6561_v10  ;;  %v462_v18 = vpop.permute.xlu0 %461  ;;  %vm11197_vm7 = vcmask 637952  }
  0xb3   : > { %457 = vst [vmem:[#allocation2 + $0x30] sm:$0xcc] %v452_v16  ;;  %v467_v19 = vrot.slane %v464_v17, 4  ;;  %478 = vst.msk [vmem:[#allocation2 + $0x4c] sm:$0x3] %vm339_vm0, %v464_v17  ;;  %v466_v20 = vrot.slane %v462_v18, 4 }
  0xb4   : > { %859 = vrot.lane.b32.xlu1 %v7530_v8, %s11161_s26  ;;  %843 = vrot.lane.b32.xlu0 %v7556_v15, %s11159_s29  ;;  %s11352_s29 = smov 56  }
  0xb5   : > { %v468_v21 = vsel %vm366_vm1, %v465_v11, %v466_v20  ;;  %v471_v22 = vsel %vm366_vm1, %v466_v20, %v467_v19 }
  0xb6   : > { %v470_v23 = vsel %vm11279_vm8, %v460_v0, %v468_v21  ;;  %v472_v24 = vsel %vm11279_vm8, %v462_v18, %v471_v22  ;;  %v482_v25 = vpop.permute.xlu1 %481  ;;  %v480_v26 = vpop.permute.xlu0 %479  ;;  %vm11306_vm8 = vcmask 23552  }
  0xb7   : > { %476 = vst [vmem:[#allocation2 + $0x3c] sm:$0x33] %v470_v23  ;;  %477 = vst [vmem:[#allocation2 + $0x44] sm:$0x33] %v472_v24  ;;  %v486_v27 = vrot.slane %v482_v25, 4  ;;  %v485_v28 = vrot.slane %v480_v26, 4 }
  0xb8   : > { %863 = vrot.lane.b32.xlu1 %v7533_v9, %s11161_s26  ;;  %861 = vrot.lane.b32.xlu0 %v7549_v13, %s11161_s26  ;;  %s11165_s26 = smov 55  }
  0xb9   : > { %v488_v29 = vsel %vm366_vm1, %v485_v28, %v486_v27 }
  0xba   : > { %v490_v30 = vsel %vm11176_vm9, %v480_v26, %v488_v29  ;;  %v500_v31 = vpop.permute.xlu1 %499  ;;  %v484_v32 = vpop.permute.xlu0 %483  ;;  %v2015_v55 = vld [vmem:[#allocation2 + $0x30] sm:$0xff] }
  0xbb   : > { %496 = vst [vmem:[#allocation2 + $0x3c] sm:$0xcc] %v490_v30  ;;  %v487_v33 = vrot.slane %v484_v32, 4  ;;  %498 = vst.msk [vmem:[#allocation2 + $0x4c] sm:$0xc] %vm377_vm4, %v484_v32  ;;  %v505_v34 = vrot.slane %v500_v31, 4 }
  0xbc   : > { %881 = vrot.lane.b32.xlu1 %v7530_v8, %s11352_s29  ;;  %879 = vrot.lane.b32.xlu0 %v7540_v12, %s11352_s29 }
  0xbd   : > { %v491_v35 = vsel %vm366_vm1, %v486_v27, %v487_v33 }
  0xbe   : > { %v492_v36 = vsel %vm11176_vm9, %v482_v25, %v491_v35  ;;  %v504_v37 = vpop.permute.xlu1 %503  ;;  %v502_v38 = vpop.permute.xlu0 %501  ;;  %vm11182_vm9 = vcmask 801792  }
  0xbf   : > { %497 = vst [vmem:[#allocation2 + $0x44] sm:$0xcc] %v492_v36  ;;  %v507_v39 = vrot.slane %v504_v37, 4  ;;  %518 = vst.msk [vmem:[#allocation2 + $0x60] sm:$0x3] %vm339_vm0, %v504_v37  ;;  %v506_v40 = vrot.slane %v502_v38, 4 }
  0xc0   : > { %900 = vrot.lane.b32.xlu1 %v7530_v8, %s11165_s26  ;;  %883 = vrot.lane.b32.xlu0 %v7556_v15, %s11352_s29 }
  0xc1   : > { %v508_v41 = vsel %vm366_vm1, %v505_v34, %v506_v40  ;;  %v511_v42 = vsel %vm366_vm1, %v506_v40, %v507_v39 }
  0xc2   : > { %v510_v43 = vsel %vm11278_vm10, %v500_v31, %v508_v41  ;;  %v512_v44 = vsel %vm11278_vm10, %v502_v38, %v511_v42  ;;  %v522_v45 = vpop.permute.xlu1 %521  ;;  %v520_v46 = vpop.permute.xlu0 %519  ;;  %v7205_v47 = vld [vmem:[#allocation2 + $0x2c] ss:$20 sps:$4 sm:$0xff]   ;;  %v7207_v48 = vld [vmem:[#allocation2 + $0x28] ss:$20 sps:$4 sm:$0xff]   ;;  %vm11304_vm10 = vcmask 31744  }
  0xc3   : > { %516 = vst [vmem:[#allocation2 + $0x50] sm:$0x33] %v510_v43  ;;  %517 = vst [vmem:[#allocation2 + $0x58] sm:$0x33] %v512_v44  ;;  %v7750_v49 = vrot.slane %v522_v45, 4  ;;  %v525_v50 = vrot.slane %v520_v46, 4  ;;  %2773 = vmatprep.subr.bf16.mxu0 %v7205_v47 }
  0xc4   : > { %904 = vrot.lane.b32.xlu1 %v7533_v9, %s11165_s26  ;;  %902 = vrot.lane.b32.xlu0 %v7549_v13, %s11165_s26  ;;  %s11169_s26 = smov 53  }
  0xc5   : > { %v528_v51 = vsel %vm366_vm1, %v525_v50, %v7750_v49  ;;  %2774 = vmatpush1.bf16.msra.mxu0 %v7207_v48 }
  0xc6   : > { %v530_v52 = vsel %vm11324_vm11, %v520_v46, %v528_v51  ;;  %v540_v53 = vpop.permute.xlu1 %539  ;;  %v524_v54 = vpop.permute.xlu0 %523  ;;  %v2018_v56 = vld [vmem:[#allocation2 + $0x44] sm:$0xff] }
  0xc7   : > { %v7208_v57 = vld [vmem:[#allocation2 + $0x34] ss:$20 sps:$4 sm:$0xff]   ;;  %536 = vst [vmem:[#allocation2 + $0x50] sm:$0xcc] %v530_v52  ;;  %v527_v58 = vrot.slane %v524_v54, 4  ;;  %v6566_v59 = vcombine.low %v2015_v55, %v2018_v56  ;;  %v545_v60 = vrot.slane %v540_v53, 4 }
  0xc8   : > { %538 = vst.msk [vmem:[#allocation2 + $0x60] sm:$0xc] %vm377_vm4, %v524_v54  ;;  %923 = vrot.lane.b32.xlu1 %v7530_v8, %s11167_s9  ;;  %921 = vrot.lane.b32.xlu0 %v7540_v12, %s11167_s9 }
  0xc9   : > { %v531_v61 = vsel %vm366_vm1, %v7750_v49, %v527_v58  ;;  %2899 = vmatprep.subr.bf16.mxu1 %v7208_v57 }
  0xca   : > { %v532_v62 = vsel %vm11324_vm11, %v522_v45, %v531_v61  ;;  %v544_v63 = vpop.permute.xlu1 %543  ;;  %2900 = vmatpush1.bf16.msra.mxu1 %v6566_v59  ;;  %v542_v0 = vpop.permute.xlu0 %541 }
  0xcb   : > { %537 = vst [vmem:[#allocation2 + $0x58] sm:$0xcc] %v532_v62  ;;  %v547_v1 = vrot.slane %v544_v63, 4  ;;  %558 = vst.msk [vmem:[#allocation2 + $0x74] sm:$0x3] %vm339_vm0, %v544_v63  ;;  %v546_v2 = vrot.slane %v542_v0, 4 }
  0xcc   : > { %942 = vrot.lane.b32.xlu1 %v7530_v8, %s11169_s26  ;;  %925 = vrot.lane.b32.xlu0 %v7556_v15, %s11167_s9  ;;  %s11171_s9 = smov 52  }
  0xcd   : > { %v548_v4 = vsel %vm366_vm1, %v545_v60, %v546_v2  ;;  %v551_v6 = vsel %vm366_vm1, %v546_v2, %v547_v1 }
  0xce   : > { %v550_v7 = vsel %vm11277_vm12, %v540_v53, %v548_v4  ;;  %v552_v10 = vsel %vm11277_vm12, %v542_v0, %v551_v6  ;;  %v562_v11 = vpop.permute.xlu1 %561  ;;  %v560_v14 = vpop.permute.xlu0 %559  ;;  %vm11316_vm12 = vcmask 39936  }
  0xcf   : > { %556 = vst [vmem:[#allocation2 + $0x64] sm:$0x33] %v550_v7  ;;  %557 = vst [vmem:[#allocation2 + $0x6c] sm:$0x33] %v552_v10  ;;  %v566_v16 = vrot.slane %v562_v11, 4  ;;  %v565_v17 = vrot.slane %v560_v14, 4 }
  0xd0   : > { %946 = vrot.lane.b32.xlu1 %v7533_v9, %s11169_s26  ;;  %944 = vrot.lane.b32.xlu0 %v7549_v13, %s11169_s26  ;;  %s11174_s26 = smov 51  }
  0xd1   : > { %v568_v18 = vsel %vm366_vm1, %v565_v17, %v566_v16 }
  0xd2   : > { %v570_v19 = vsel %vm11173_vm13, %v560_v14, %v568_v18  ;;  %v580_v20 = vpop.permute.xlu1 %579  ;;  %v564_v21 = vpop.permute.xlu0 %563  ;;  %v2021_v44 = vld [vmem:[#allocation2 + $0x58] sm:$0xff] }
  0xd3   : > { %576 = vst [vmem:[#allocation2 + $0x64] sm:$0xcc] %v570_v19  ;;  %v567_v22 = vrot.slane %v564_v21, 4  ;;  %578 = vst.msk [vmem:[#allocation2 + $0x74] sm:$0xc] %vm377_vm4, %v564_v21  ;;  %v585_v23 = vrot.slane %v580_v20, 4 }
  0xd4   : > { %965 = vrot.lane.b32.xlu1 %v7530_v8, %s11171_s9  ;;  %963 = vrot.lane.b32.xlu0 %v7540_v12, %s11171_s9 }
  0xd5   : > { %v571_v24 = vsel %vm366_vm1, %v566_v16, %v567_v22 }
  0xd6   : > { %v572_v25 = vsel %vm11173_vm13, %v562_v11, %v571_v24  ;;  %v584_v26 = vpop.permute.xlu1 %583  ;;  %v582_v27 = vpop.permute.xlu0 %581  ;;  %vm11179_vm13 = vcmask 809984  }
  0xd7   : > { %577 = vst [vmem:[#allocation2 + $0x6c] sm:$0xcc] %v572_v25  ;;  %v587_v28 = vrot.slane %v584_v26, 4  ;;  %598 = vst.msk [vmem:[#allocation2 + $0x88] sm:$0x3] %vm339_vm0, %v584_v26  ;;  %v586_v29 = vrot.slane %v582_v27, 4 }
  0xd8   : > { %984 = vrot.lane.b32.xlu1 %v7530_v8, %s11174_s26  ;;  %967 = vrot.lane.b32.xlu0 %v7556_v15, %s11171_s9  ;;  %s11177_s9 = smov 50  }
  0xd9   : > { %v588_v30 = vsel %vm366_vm1, %v585_v23, %v586_v29  ;;  %v591_v31 = vsel %vm366_vm1, %v586_v29, %v587_v28 }
  0xda   : > { %v590_v32 = vsel %vm11276_vm14, %v580_v20, %v588_v30  ;;  %v592_v33 = vsel %vm11276_vm14, %v582_v27, %v591_v31  ;;  %v602_v34 = vpop.permute.xlu1 %601  ;;  %v600_v35 = vpop.permute.xlu0 %599  ;;  %v7210_v36 = vld [vmem:[#allocation2 + $0x54] ss:$20 sps:$4 sm:$0xff]   ;;  %v7212_v37 = vld [vmem:[#allocation2 + $0x50] ss:$20 sps:$4 sm:$0xff]   ;;  %vm11301_vm14 = vcmask 48128  }
  0xdb   : > { %596 = vst [vmem:[#allocation2 + $0x78] sm:$0x33] %v590_v32  ;;  %597 = vst [vmem:[#allocation2 + $0x80] sm:$0x33] %v592_v33  ;;  %v606_v38 = vrot.slane %v602_v34, 4  ;;  %v605_v39 = vrot.slane %v600_v35, 4  ;;  %2775 = vmatprep.subr.bf16.mxu0 %v7210_v36 }
  0xdc   : > { %988 = vrot.lane.b32.xlu1 %v7533_v9, %s11174_s26  ;;  %986 = vrot.lane.b32.xlu0 %v7549_v13, %s11174_s26  ;;  %s11180_s26 = smov 49  }
  0xdd   : > { %v608_v40 = vsel %vm366_vm1, %v605_v39, %v606_v38  ;;  %2776 = vmatpush1.bf16.msra.mxu0 %v7212_v37 }
  0xde   : > { %v610_v41 = vsel %vm11288_vm15, %v600_v35, %v608_v40  ;;  %v620_v42 = vpop.permute.xlu1 %619  ;;  %v604_v43 = vpop.permute.xlu0 %603  ;;  %v2024_v45 = vld [vmem:[#allocation2 + $0x6c] sm:$0xff] }
  0xdf   : > { %v7213_v46 = vld [vmem:[#allocation2 + $0x5c] ss:$20 sps:$4 sm:$0xff]   ;;  %616 = vst [vmem:[#allocation2 + $0x78] sm:$0xcc] %v610_v41  ;;  %v607_v47 = vrot.slane %v604_v43, 4  ;;  %v6571_v48 = vcombine.low %v2021_v44, %v2024_v45  ;;  %v625_v50 = vrot.slane %v620_v42, 4 }
  0xe0   : > { %618 = vst.msk [vmem:[#allocation2 + $0x88] sm:$0xc] %vm377_vm4, %v604_v43  ;;  %1007 = vrot.lane.b32.xlu1 %v7530_v8, %s11177_s9  ;;  %1005 = vrot.lane.b32.xlu0 %v7540_v12, %s11177_s9 }
  0xe1   : > { %v611_v51 = vsel %vm366_vm1, %v606_v38, %v607_v47  ;;  %2901 = vmatprep.subr.bf16.mxu1 %v7213_v46 }
  0xe2   : > { %v612_v52 = vsel %vm11288_vm15, %v602_v34, %v611_v51  ;;  %v624_v53 = vpop.permute.xlu1 %623  ;;  %2902 = vmatpush1.bf16.msra.mxu1 %v6571_v48  ;;  %v622_v54 = vpop.permute.xlu0 %621  ;;  %vm11307_vm15 = vcmask 916480  }
  0xe3   : > { %617 = vst [vmem:[#allocation2 + $0x80] sm:$0xcc] %v612_v52  ;;  %v627_v55 = vrot.slane %v624_v53, 4  ;;  %638 = vst.msk [vmem:[#allocation2 + $0x9c] sm:$0x3] %vm339_vm0, %v624_v53  ;;  %v626_v56 = vrot.slane %v622_v54, 4 }
  0xe4   : > { %1026 = vrot.lane.b32.xlu1 %v7530_v8, %s11180_s26  ;;  %1009 = vrot.lane.b32.xlu0 %v7556_v15, %s11177_s9  ;;  %s11183_s9 = smov 48  }
  0xe5   : > { %v628_v57 = vsel %vm366_vm1, %v625_v50, %v626_v56  ;;  %v631_v58 = vsel %vm366_vm1, %v626_v56, %v627_v55 }
  0xe6   : > { %v630_v59 = vsel %vm11179_vm13, %v620_v42, %v628_v57  ;;  %v632_v60 = vsel %vm11179_vm13, %v622_v54, %v631_v58  ;;  %v642_v61 = vpop.permute.xlu1 %641  ;;  %v640_v62 = vpop.permute.xlu0 %639  ;;  %vm11185_vm13 = vcmask 793600  }
  0xe7   : > { %636 = vst [vmem:[#allocation2 + $0x8c] sm:$0x33] %v630_v59  ;;  %637 = vst [vmem:[#allocation2 + $0x94] sm:$0x33] %v632_v60  ;;  %v646_v63 = vrot.slane %v642_v61, 4  ;;  %v645_v0 = vrot.slane %v640_v62, 4 }
  0xe8   : > { %1030 = vrot.lane.b32.xlu1 %v7533_v9, %s11180_s26  ;;  %1028 = vrot.lane.b32.xlu0 %v7549_v13, %s11180_s26  ;;  %s11186_s26 = smov 32  }
  0xe9   : > { %v648_v1 = vsel %vm366_vm1, %v645_v0, %v646_v63 }
  0xea   : > { %v650_v2 = vsel %vm11182_vm9, %v640_v62, %v648_v1  ;;  %v660_v4 = vpop.permute.xlu1 %659  ;;  %v644_v6 = vpop.permute.xlu0 %643  ;;  %v2027_v34 = vld [vmem:[#allocation2 + $0x80] sm:$0xff] }
  0xeb   : > { %656 = vst [vmem:[#allocation2 + $0x8c] sm:$0xcc] %v650_v2  ;;  %v647_v7 = vrot.slane %v644_v6, 4  ;;  %658 = vst.msk [vmem:[#allocation2 + $0x9c] sm:$0xc] %vm377_vm4, %v644_v6  ;;  %v665_v10 = vrot.slane %v660_v4, 4 }
  0xec   : > { %1049 = vrot.lane.b32.xlu1 %v7530_v8, %s11183_s9  ;;  %1047 = vrot.lane.b32.xlu0 %v7540_v12, %s11183_s9 }
  0xed   : > { %v651_v11 = vsel %vm366_vm1, %v646_v63, %v647_v7 }
  0xee   : > { %v652_v14 = vsel %vm11182_vm9, %v642_v61, %v651_v11  ;;  %v664_v16 = vpop.permute.xlu1 %663  ;;  %v662_v17 = vpop.permute.xlu0 %661  ;;  %vm11188_vm9 = vcmask 785408  }
  0xef   : > { %657 = vst [vmem:[#allocation2 + $0x94] sm:$0xcc] %v652_v14  ;;  %v667_v18 = vrot.slane %v664_v16, 4  ;;  %678 = vst.msk [vmem:[#allocation2 + $0xb0] sm:$0x3] %vm339_vm0, %v664_v16  ;;  %v666_v19 = vrot.slane %v662_v17, 4 }
  0xf0   : > { %1068 = vrot.lane.b32.xlu1 %v7530_v8, %s11186_s26  ;;  %1051 = vrot.lane.b32.xlu0 %v7556_v15, %s11183_s9  ;;  %s11189_s9 = smov 31  }
  0xf1   : > { %v668_v20 = vsel %vm366_vm1, %v665_v10, %v666_v19  ;;  %v671_v21 = vsel %vm366_vm1, %v666_v19, %v667_v18 }
  0xf2   : > { %v670_v22 = vsel %vm11185_vm13, %v660_v4, %v668_v20  ;;  %v672_v23 = vsel %vm11185_vm13, %v662_v17, %v671_v21  ;;  %v682_v24 = vpop.permute.xlu1 %681  ;;  %v680_v25 = vpop.permute.xlu0 %679  ;;  %v7215_v26 = vld [vmem:[#allocation2 + $0x7c] ss:$20 sps:$4 sm:$0xff]   ;;  %v7217_v27 = vld [vmem:[#allocation2 + $0x78] ss:$20 sps:$4 sm:$0xff]   ;;  %vm709_vm13 = vcmask 654336  }
  0xf3   : > { %676 = vst [vmem:[#allocation2 + $0xa0] sm:$0x33] %v670_v22  ;;  %677 = vst [vmem:[#allocation2 + $0xa8] sm:$0x33] %v672_v23  ;;  %v686_v28 = vrot.slane %v682_v24, 4  ;;  %v685_v29 = vrot.slane %v680_v25, 4  ;;  %2777 = vmatprep.subr.bf16.mxu0 %v7215_v26 }
  0xf4   : > { %1072 = vrot.lane.b32.xlu1 %v7533_v9, %s11186_s26  ;;  %1070 = vrot.lane.b32.xlu0 %v7549_v13, %s11186_s26  ;;  %s11192_s26 = smov 30  }
  0xf5   : > { %v688_v30 = vsel %vm366_vm1, %v685_v29, %v686_v28  ;;  %2778 = vmatpush1.bf16.msra.mxu0 %v7217_v27 }
  0xf6   : > { %v690_v31 = vsel %vm11188_vm9, %v680_v25, %v688_v30  ;;  %v7848_v32 = vpop.permute.xlu1 %699  ;;  %v684_v33 = vpop.permute.xlu0 %683  ;;  %v2030_v35 = vld [vmem:[#allocation2 + $0x94] sm:$0xff] }
  0xf7   : > { %v7218_v36 = vld [vmem:[#allocation2 + $0x84] ss:$20 sps:$4 sm:$0xff]   ;;  %696 = vst [vmem:[#allocation2 + $0xa0] sm:$0xcc] %v690_v31  ;;  %v687_v37 = vrot.slane %v684_v33, 4  ;;  %v6576_v38 = vcombine.low %v2027_v34, %v2030_v35  ;;  %v7856_v39 = vrot.slane %v7848_v32, 4 }
  0xf8   : > { %698 = vst.msk [vmem:[#allocation2 + $0xb0] sm:$0xc] %vm377_vm4, %v684_v33  ;;  %1091 = vrot.lane.b32.xlu1 %v7530_v8, %s11189_s9  ;;  %1089 = vrot.lane.b32.xlu0 %v7540_v12, %s11189_s9 }
  0xf9   : > { %v691_v40 = vsel %vm366_vm1, %v686_v28, %v687_v37  ;;  %2903 = vmatprep.subr.bf16.mxu1 %v7218_v36 }
  0xfa   : > { %v692_v41 = vsel %vm11188_vm9, %v682_v24, %v691_v40  ;;  %v704_v42 = vpop.permute.xlu1 %703  ;;  %2904 = vmatpush1.bf16.msra.mxu1 %v6576_v38  ;;  %v702_v43 = vpop.permute.xlu0 %701  ;;  %vm11194_vm9 = vcmask 646144  }
  0xfb   : > { %697 = vst [vmem:[#allocation2 + $0xa8] sm:$0xcc] %v692_v41  ;;  %v707_v44 = vrot.slane %v704_v42, 4  ;;  %718 = vst.msk [vmem:[#allocation2 + $0xc4] sm:$0x3] %vm339_vm0, %v704_v42  ;;  %v706_v45 = vrot.slane %v702_v43, 4 }
  0xfc   : > { %1110 = vrot.lane.b32.xlu1 %v7530_v8, %s11192_s26  ;;  %1093 = vrot.lane.b32.xlu0 %v7556_v15, %s11189_s9  ;;  %s11195_s9 = smov 29  }
  0xfd   : > { %v708_v46 = vsel %vm366_vm1, %v7856_v39, %v706_v45  ;;  %v711_v47 = vsel %vm366_vm1, %v706_v45, %v707_v44 }
  0xfe   : > { %v710_v48 = vsel %vm709_vm13, %v7848_v32, %v708_v46  ;;  %v712_v50 = vsel %vm709_vm13, %v702_v43, %v711_v47  ;;  %v722_v51 = vpop.permute.xlu1 %721  ;;  %v720_v52 = vpop.permute.xlu0 %719 }
  0xff   : > { %716 = vst [vmem:[#allocation2 + $0xb4] sm:$0x33] %v710_v48  ;;  %717 = vst [vmem:[#allocation2 + $0xbc] sm:$0x33] %v712_v50  ;;  %v726_v53 = vrot.slane %v722_v51, 4  ;;  %v725_v54 = vrot.slane %v720_v52, 4 }
 0x100   : > { %1114 = vrot.lane.b32.xlu1 %v7533_v9, %s11192_s26  ;;  %1112 = vrot.lane.b32.xlu0 %v7549_v13, %s11192_s26  ;;  %s11198_s26 = smov 28  }
 0x101   : > { %v728_v55 = vsel %vm366_vm1, %v725_v54, %v726_v53 }
 0x102   : > { %v730_v56 = vsel %vm11194_vm9, %v720_v52, %v728_v55  ;;  %v740_v57 = vpop.permute.xlu1 %739  ;;  %v724_v58 = vpop.permute.xlu0 %723  ;;  %v2033_v24 = vld [vmem:[#allocation2 + $0xa8] sm:$0xff] }
 0x103   : > { %736 = vst [vmem:[#allocation2 + $0xb4] sm:$0xcc] %v730_v56  ;;  %v727_v59 = vrot.slane %v724_v58, 4  ;;  %738 = vst.msk [vmem:[#allocation2 + $0xc4] sm:$0xc] %vm377_vm4, %v724_v58  ;;  %v745_v60 = vrot.slane %v740_v57, 4 }
 0x104   : > { %1133 = vrot.lane.b32.xlu1 %v7530_v8, %s11195_s9  ;;  %1131 = vrot.lane.b32.xlu0 %v7540_v12, %s11195_s9 }
 0x105   : > { %v731_v61 = vsel %vm366_vm1, %v726_v53, %v727_v59 }
 0x106   : > { %v732_v62 = vsel %vm11194_vm9, %v722_v51, %v731_v61  ;;  %v744_v63 = vpop.permute.xlu1 %743  ;;  %v742_v0 = vpop.permute.xlu0 %741  ;;  %vm11200_vm9 = vcmask 629760  }
 0x107   : > { %737 = vst [vmem:[#allocation2 + $0xbc] sm:$0xcc] %v732_v62  ;;  %v747_v1 = vrot.slane %v744_v63, 4  ;;  %758 = vst.msk [vmem:[#allocation2 + $0xd8] sm:$0x3] %vm339_vm0, %v744_v63  ;;  %v746_v2 = vrot.slane %v742_v0, 4 }
 0x108   : > { %1152 = vrot.lane.b32.xlu1 %v7530_v8, %s11198_s26  ;;  %1135 = vrot.lane.b32.xlu0 %v7556_v15, %s11195_s9  ;;  %s11201_s9 = smov 27  }
 0x109   : > { %v748_v4 = vsel %vm366_vm1, %v745_v60, %v746_v2  ;;  %v751_v6 = vsel %vm366_vm1, %v746_v2, %v747_v1 }
 0x10a   : > { %v750_v7 = vsel %vm11197_vm7, %v740_v57, %v748_v4  ;;  %v752_v10 = vsel %vm11197_vm7, %v742_v0, %v751_v6  ;;  %v762_v11 = vpop.permute.xlu1 %761  ;;  %v760_v14 = vpop.permute.xlu0 %759  ;;  %v7220_v16 = vld [vmem:[#allocation2 + $0xa4] ss:$20 sps:$4 sm:$0xff]   ;;  %v7222_v17 = vld [vmem:[#allocation2 + $0xa0] ss:$20 sps:$4 sm:$0xff]   ;;  %vm11203_vm7 = vcmask 621568  }
 0x10b   : > { %756 = vst [vmem:[#allocation2 + $0xc8] sm:$0x33] %v750_v7  ;;  %757 = vst [vmem:[#allocation2 + $0xd0] sm:$0x33] %v752_v10  ;;  %v766_v18 = vrot.slane %v762_v11, 4  ;;  %v765_v19 = vrot.slane %v760_v14, 4  ;;  %2779 = vmatprep.subr.bf16.mxu0 %v7220_v16 }
 0x10c   : > { %1156 = vrot.lane.b32.xlu1 %v7533_v9, %s11198_s26  ;;  %1154 = vrot.lane.b32.xlu0 %v7549_v13, %s11198_s26  ;;  %s11204_s26 = smov 26  }
 0x10d   : > { %v768_v20 = vsel %vm366_vm1, %v765_v19, %v766_v18  ;;  %2780 = vmatpush1.bf16.msra.mxu0 %v7222_v17 }
 0x10e   : > { %v770_v21 = vsel %vm11200_vm9, %v760_v14, %v768_v20  ;;  %v780_v22 = vpop.permute.xlu1 %779  ;;  %v764_v23 = vpop.permute.xlu0 %763  ;;  %v2036_v25 = vld [vmem:[#allocation2 + $0xbc] sm:$0xff] }
 0x10f   : > { %v7223_v26 = vld [vmem:[#allocation2 + $0xac] ss:$20 sps:$4 sm:$0xff]   ;;  %776 = vst [vmem:[#allocation2 + $0xc8] sm:$0xcc] %v770_v21  ;;  %v767_v27 = vrot.slane %v764_v23, 4  ;;  %v6581_v28 = vcombine.low %v2033_v24, %v2036_v25  ;;  %v785_v29 = vrot.slane %v780_v22, 4 }
 0x110   : > { %778 = vst.msk [vmem:[#allocation2 + $0xd8] sm:$0xc] %vm377_vm4, %v764_v23  ;;  %1175 = vrot.lane.b32.xlu1 %v7530_v8, %s11201_s9  ;;  %1173 = vrot.lane.b32.xlu0 %v7540_v12, %s11201_s9 }
 0x111   : > { %v771_v30 = vsel %vm366_vm1, %v766_v18, %v767_v27  ;;  %2905 = vmatprep.subr.bf16.mxu1 %v7223_v26 }
 0x112   : > { %v772_v31 = vsel %vm11200_vm9, %v762_v11, %v771_v30  ;;  %v784_v33 = vpop.permute.xlu1 %783  ;;  %2906 = vmatpush1.bf16.msra.mxu1 %v6581_v28  ;;  %v782_v34 = vpop.permute.xlu0 %781  ;;  %vm11206_vm9 = vcmask 613376  }
 0x113   : > { %777 = vst [vmem:[#allocation2 + $0xd0] sm:$0xcc] %v772_v31  ;;  %v787_v35 = vrot.slane %v784_v33, 4  ;;  %798 = vst.msk [vmem:[#allocation2 + $0xec] sm:$0x3] %vm339_vm0, %v784_v33  ;;  %v786_v36 = vrot.slane %v782_v34, 4 }
 0x114   : > { %1194 = vrot.lane.b32.xlu1 %v7530_v8, %s11204_s26  ;;  %1177 = vrot.lane.b32.xlu0 %v7556_v15, %s11201_s9  ;;  %s11209_s9 = smov 25  }
 0x115   : > { %v788_v37 = vsel %vm366_vm1, %v785_v29, %v786_v36  ;;  %v791_v38 = vsel %vm366_vm1, %v786_v36, %v787_v35 }
 0x116   : > { %v790_v40 = vsel %vm11203_vm7, %v780_v22, %v788_v37  ;;  %v792_v41 = vsel %vm11203_vm7, %v782_v34, %v791_v38  ;;  %v802_v42 = vpop.permute.xlu1 %801  ;;  %v800_v43 = vpop.permute.xlu0 %799  ;;  %vm11211_vm7 = vcmask 605184  }
 0x117   : > { %796 = vst [vmem:[#allocation2 + $0xdc] sm:$0x33] %v790_v40  ;;  %797 = vst [vmem:[#allocation2 + $0xe4] sm:$0x33] %v792_v41  ;;  %v806_v44 = vrot.slane %v802_v42, 4  ;;  %v805_v45 = vrot.slane %v800_v43, 4 }
 0x118   : > { %1198 = vrot.lane.b32.xlu1 %v7533_v9, %s11204_s26  ;;  %1196 = vrot.lane.b32.xlu0 %v7549_v13, %s11204_s26  ;;  %s11243_s26 = smov 24  }
 0x119   : > { %v808_v46 = vsel %vm366_vm1, %v805_v45, %v806_v44 }
 0x11a   : > { %v810_v47 = vsel %vm11206_vm9, %v800_v43, %v808_v46  ;;  %v820_v48 = vpop.permute.xlu1 %819  ;;  %v804_v50 = vpop.permute.xlu0 %803  ;;  %v2039_v16 = vld [vmem:[#allocation2 + $0xd0] sm:$0xff] }
 0x11b   : > { %816 = vst [vmem:[#allocation2 + $0xdc] sm:$0xcc] %v810_v47  ;;  %v807_v51 = vrot.slane %v804_v50, 4  ;;  %818 = vst.msk [vmem:[#allocation2 + $0xec] sm:$0xc] %vm377_vm4, %v804_v50  ;;  %v825_v52 = vrot.slane %v820_v48, 4 }
 0x11c   : > { %1217 = vrot.lane.b32.xlu1 %v7530_v8, %s11209_s9  ;;  %1215 = vrot.lane.b32.xlu0 %v7540_v12, %s11209_s9 }
 0x11d   : > { %v811_v53 = vsel %vm366_vm1, %v806_v44, %v807_v51 }
 0x11e   : > { %v812_v54 = vsel %vm11206_vm9, %v802_v42, %v811_v53  ;;  %v824_v55 = vpop.permute.xlu1 %823  ;;  %v822_v56 = vpop.permute.xlu0 %821  ;;  %vm11214_vm9 = vcmask 596992  }
 0x11f   : > { %817 = vst [vmem:[#allocation2 + $0xe4] sm:$0xcc] %v812_v54  ;;  %v827_v57 = vrot.slane %v824_v55, 4  ;;  %838 = vst.msk [vmem:[#allocation2 + $0x100] sm:$0x3] %vm339_vm0, %v824_v55  ;;  %v826_v58 = vrot.slane %v822_v56, 4 }
 0x120   : > { %1236 = vrot.lane.b32.xlu1 %v7530_v8, %s11243_s26  ;;  %1219 = vrot.lane.b32.xlu0 %v7556_v15, %s11209_s9  ;;  %s11235_s9 = smov 7   ;;  %v1425_v55 = vrot.slane %v7540_v12, 4 }
 0x121   : > { %v828_v59 = vsel %vm366_vm1, %v825_v52, %v826_v58  ;;  %v831_v60 = vsel %vm366_vm1, %v826_v58, %v827_v57 }
 0x122   : > { %v830_v61 = vsel %vm11211_vm7, %v820_v48, %v828_v59  ;;  %v832_v62 = vsel %vm11211_vm7, %v822_v56, %v831_v60  ;;  %v842_v63 = vpop.permute.xlu1 %841  ;;  %v840_v0 = vpop.permute.xlu0 %839  ;;  %v7225_v1 = vld [vmem:[#allocation2 + $0xcc] ss:$20 sps:$4 sm:$0xff]   ;;  %v7227_v2 = vld [vmem:[#allocation2 + $0xc8] ss:$20 sps:$4 sm:$0xff]   ;;  %vm11219_vm7 = vcmask 588800  }
 0x123   : > { %836 = vst [vmem:[#allocation2 + $0xf0] sm:$0x33] %v830_v61  ;;  %837 = vst [vmem:[#allocation2 + $0xf8] sm:$0x33] %v832_v62  ;;  %v846_v4 = vrot.slane %v842_v63, 4  ;;  %v845_v6 = vrot.slane %v840_v0, 4  ;;  %2781 = vmatprep.subr.bf16.mxu0 %v7225_v1 }
 0x124   : > { %1257 = vrot.lane.b32.xlu1 %v7540_v12, %s11237_s25  ;;  %1238 = vrot.lane.b32.xlu0 %v7549_v13, %s11243_s26  ;;  %v1426_v62 = vrot.slane %v7530_v8, 4 }
 0x125   : > { %v848_v7 = vsel %vm366_vm1, %v845_v6, %v846_v4  ;;  %2782 = vmatpush1.bf16.msra.mxu0 %v7227_v2 }
 0x126   : > { %v850_v10 = vsel %vm11214_vm9, %v840_v0, %v848_v7  ;;  %v860_v11 = vpop.permute.xlu1 %859  ;;  %v844_v14 = vpop.permute.xlu0 %843  ;;  %v2042_v17 = vld [vmem:[#allocation2 + $0xe4] sm:$0xff]  ;;  %v1428_v1 = vsel %vm366_vm1, %v1425_v55, %v1426_v62 }
 0x127   : > { %v7228_v18 = vld [vmem:[#allocation2 + $0xd4] ss:$20 sps:$4 sm:$0xff]   ;;  %856 = vst [vmem:[#allocation2 + $0xf0] sm:$0xcc] %v850_v10  ;;  %v847_v19 = vrot.slane %v844_v14, 4  ;;  %v6586_v20 = vcombine.low %v2039_v16, %v2042_v17  ;;  %v865_v21 = vrot.slane %v860_v11, 4 }
 0x128   : > { %858 = vst.msk [vmem:[#allocation2 + $0x100] sm:$0xc] %vm377_vm4, %v844_v14  ;;  %1278 = vrot.lane.b32.xlu1 %v7530_v8, %s11235_s9  ;;  %1259 = vrot.lane.b32.xlu0 %v7530_v8, %s11237_s25  ;;  %1433 = vst [vmem:[#allocation2 + $0x208] sm:$0xcc] %v1428_v1 }
 0x129   : > { %v851_v22 = vsel %vm366_vm1, %v846_v4, %v847_v19  ;;  %2907 = vmatprep.subr.bf16.mxu1 %v7228_v18 }
 0x12a   : > { %v852_v23 = vsel %vm11214_vm9, %v842_v63, %v851_v22  ;;  %v864_v24 = vpop.permute.xlu1 %863  ;;  %2908 = vmatpush1.bf16.msra.mxu1 %v6586_v20  ;;  %v862_v25 = vpop.permute.xlu0 %861  ;;  %vm11291_vm9 = vcmask 457728  }
 0x12b   : > { %857 = vst [vmem:[#allocation2 + $0xf8] sm:$0xcc] %v852_v23  ;;  %v867_v26 = vrot.slane %v864_v24, 4  ;;  %878 = vst.msk [vmem:[#allocation2 + $0x114] sm:$0x3] %vm339_vm0, %v864_v24  ;;  %v866_v27 = vrot.slane %v862_v25, 4 }
 0x12c   : > { %1299 = vrot.lane.b32.xlu1 %v7540_v12, %s11240_s24  ;;  %1280 = vrot.lane.b32.xlu0 %v7549_v13, %s11235_s9 }
 0x12d   : > { %v868_v28 = vsel %vm366_vm1, %v865_v21, %v866_v27  ;;  %v871_v29 = vsel %vm366_vm1, %v866_v27, %v867_v26 }
 0x12e   : > { %v870_v30 = vsel %vm11219_vm7, %v860_v11, %v868_v28  ;;  %v872_v31 = vsel %vm11219_vm7, %v862_v25, %v871_v29  ;;  %v882_v33 = vpop.permute.xlu1 %881  ;;  %v880_v34 = vpop.permute.xlu0 %879  ;;  %vm11227_vm7 = vcmask 449536  }
 0x12f   : > { %876 = vst [vmem:[#allocation2 + $0x104] sm:$0x33] %v870_v30  ;;  %877 = vst [vmem:[#allocation2 + $0x10c] sm:$0x33] %v872_v31  ;;  %v7959_v35 = vrot.slane %v882_v33, 4  ;;  %v885_v36 = vrot.slane %v880_v34, 4 }
 0x130   : > { %1320 = vrot.lane.b32.xlu1 %v7530_v8, %s11256_s21  ;;  %1301 = vrot.lane.b32.xlu0 %v7530_v8, %s11240_s24 }
 0x131   : > { %v888_v37 = vsel %vm366_vm1, %v885_v36, %v7959_v35 }
 0x132   : > { %v890_v38 = vsel %vm11291_vm9, %v880_v34, %v888_v37  ;;  %v901_v40 = vpop.permute.xlu1 %900  ;;  %v884_v41 = vpop.permute.xlu0 %883  ;;  %v2045_v10 = vld [vmem:[#allocation2 + $0xf8] sm:$0xff] }
 0x133   : > { %897 = vst [vmem:[#allocation2 + $0x104] sm:$0xcc] %v890_v38  ;;  %v887_v42 = vrot.slane %v884_v41, 4  ;;  %v906_v43 = vrot.slane %v901_v40, 4 }
 0x134   : > { %1341 = vrot.lane.b32.xlu1 %v7540_v12, %s11249_s17  ;;  %1322 = vrot.lane.b32.xlu0 %v7549_v13, %s11256_s21 }
 0x135   : > { %v891_v44 = vsel %vm366_vm1, %v7959_v35, %v887_v42  ;;  %v893_v45 = vsel %vm11291_vm9, %v884_v41, %v887_v42 }
 0x136   : > { %v892_v46 = vsel %vm11291_vm9, %v882_v33, %v891_v44  ;;  %899 = vst.msk [vmem:[#allocation2 + $0x114] sm:$0xc] %vm377_vm4, %v893_v45  ;;  %v905_v47 = vpop.permute.xlu1 %904  ;;  %v903_v48 = vpop.permute.xlu0 %902  ;;  %vm11314_vm9 = vcmask 908288  }
 0x137   : > { %898 = vst [vmem:[#allocation2 + $0x10c] sm:$0xcc] %v892_v46  ;;  %v908_v50 = vrot.slane %v905_v47, 4  ;;  %v907_v51 = vrot.slane %v903_v48, 4 }
 0x138   : > { %1362 = vrot.lane.b32.xlu1 %v7530_v8, %s11247_s15  ;;  %1343 = vrot.lane.b32.xlu0 %v7530_v8, %s11249_s17 }
 0x139   : > { %v914_v52 = vsel %vm11227_vm7, %v905_v47, %v908_v50  ;;  %v909_v53 = vsel %vm366_vm1, %v906_v43, %v907_v51  ;;  %v912_v54 = vsel %vm366_vm1, %v907_v51, %v908_v50 }
 0x13a   : > { %920 = vst.msk [vmem:[#allocation2 + $0x128] sm:$0x3] %vm339_vm0, %v914_v52  ;;  %v911_v56 = vsel %vm11227_vm7, %v901_v40, %v909_v53  ;;  %v913_v57 = vsel %vm11227_vm7, %v903_v48, %v912_v54  ;;  %v924_v58 = vpop.permute.xlu1 %923  ;;  %v922_v59 = vpop.permute.xlu0 %921  ;;  %v7230_v60 = vld [vmem:[#allocation2 + $0xf4] ss:$20 sps:$4 sm:$0xff]   ;;  %v7232_v61 = vld [vmem:[#allocation2 + $0xf0] ss:$20 sps:$4 sm:$0xff]  }
 0x13b   : > { %918 = vst [vmem:[#allocation2 + $0x118] sm:$0x33] %v911_v56  ;;  %919 = vst [vmem:[#allocation2 + $0x120] sm:$0x33] %v913_v57  ;;  %v928_v63 = vrot.slane %v924_v58, 4  ;;  %v927_v0 = vrot.slane %v922_v59, 4  ;;  %2783 = vmatprep.subr.bf16.mxu0 %v7230_v60 }
 0x13c   : > { %1383 = vrot.lane.b32.xlu1 %v7540_v12, %s11253_s13  ;;  %1364 = vrot.lane.b32.xlu0 %v7549_v13, %s11247_s15  ;;  %vm11233_vm7 = vcmask 433152  }
 0x13d   : > { %v930_v2 = vsel %vm366_vm1, %v927_v0, %v928_v63  ;;  %2784 = vmatpush1.bf16.msra.mxu0 %v7232_v61 }
 0x13e   : > { %v932_v4 = vsel %vm11230_vm5, %v922_v59, %v930_v2  ;;  %v943_v6 = vpop.permute.xlu1 %942  ;;  %v926_v7 = vpop.permute.xlu0 %925  ;;  %v2048_v11 = vld [vmem:[#allocation2 + $0x10c] sm:$0xff] }
 0x13f   : > { %v7233_v14 = vld [vmem:[#allocation2 + $0xfc] ss:$20 sps:$4 sm:$0xff]   ;;  %939 = vst [vmem:[#allocation2 + $0x118] sm:$0xcc] %v932_v4  ;;  %v929_v16 = vrot.slane %v926_v7, 4  ;;  %v6591_v17 = vcombine.low %v2045_v10, %v2048_v11  ;;  %v948_v18 = vrot.slane %v943_v6, 4 }
 0x140   : > { %1404 = vrot.lane.b32.xlu1 %v7530_v8, %s11264_s12  ;;  %1385 = vrot.lane.b32.xlu0 %v7530_v8, %s11253_s13 }
 0x141   : > { %v933_v19 = vsel %vm366_vm1, %v928_v63, %v929_v16  ;;  %v935_v20 = vsel %vm11230_vm5, %v926_v7, %v929_v16  ;;  %2909 = vmatprep.subr.bf16.mxu1 %v7233_v14 }
 0x142   : > { %v934_v21 = vsel %vm11230_vm5, %v924_v58, %v933_v19  ;;  %941 = vst.msk [vmem:[#allocation2 + $0x128] sm:$0xc] %vm377_vm4, %v935_v20  ;;  %v947_v22 = vpop.permute.xlu1 %946  ;;  %2910 = vmatpush1.bf16.msra.mxu1 %v6591_v17  ;;  %v945_v23 = vpop.permute.xlu0 %944  ;;  %vm11234_vm5 = vcmask 424960  }
 0x143   : > { %940 = vst [vmem:[#allocation2 + $0x120] sm:$0xcc] %v934_v21  ;;  %v950_v24 = vrot.slane %v947_v22, 4  ;;  %v949_v25 = vrot.slane %v945_v23, 4 }
 0x144   : > { %1436 = vrot.lane.b32.xlu1 %v7530_v8, %s11261_s22  ;;  %1406 = vrot.lane.b32.xlu0 %v7549_v13, %s11264_s12 }
 0x145   : > { %v956_v26 = vsel %vm11233_vm7, %v947_v22, %v950_v24  ;;  %v951_v27 = vsel %vm366_vm1, %v948_v18, %v949_v25  ;;  %v954_v28 = vsel %vm366_vm1, %v949_v25, %v950_v24 }
 0x146   : > { %962 = vst.msk [vmem:[#allocation2 + $0x13c] sm:$0x3] %vm339_vm0, %v956_v26  ;;  %v953_v29 = vsel %vm11233_vm7, %v943_v6, %v951_v27  ;;  %v955_v30 = vsel %vm11233_vm7, %v945_v23, %v954_v28  ;;  %v966_v31 = vpop.permute.xlu1 %965  ;;  %v964_v33 = vpop.permute.xlu0 %963  ;;  %vm11239_vm7 = vcmask 416768  }
 0x147   : > { %960 = vst [vmem:[#allocation2 + $0x12c] sm:$0x33] %v953_v29  ;;  %961 = vst [vmem:[#allocation2 + $0x134] sm:$0x33] %v955_v30  ;;  %v970_v34 = vrot.slane %v966_v31, 4  ;;  %v969_v36 = vrot.slane %v964_v33, 4 }
 0x148   : > { %1456 = vrot.lane.b32.xlu1 %v7540_v12, %s11259_s20  ;;  %1438 = vrot.lane.b32.xlu0 %v7549_v13, %s11261_s22 }
 0x149   : > { %v972_v37 = vsel %vm366_vm1, %v969_v36, %v970_v34 }
 0x14a   : > { %v974_v38 = vsel %vm11234_vm5, %v964_v33, %v972_v37  ;;  %v985_v40 = vpop.permute.xlu1 %984  ;;  %v968_v41 = vpop.permute.xlu0 %967  ;;  %v2051_v6 = vld [vmem:[#allocation2 + $0x120] sm:$0xff] }
 0x14b   : > { %981 = vst [vmem:[#allocation2 + $0x12c] sm:$0xcc] %v974_v38  ;;  %v971_v42 = vrot.slane %v968_v41, 4  ;;  %v990_v43 = vrot.slane %v985_v40, 4 }
 0x14c   : > { %1240 = vrot.lane.b32.xlu1 %v7533_v9, %s11243_s26  ;;  %1458 = vrot.lane.b32.xlu0 %v7530_v8, %s11259_s20  ;;  %s11274_s26 = smov 107  }
 0x14d   : > { %v975_v44 = vsel %vm366_vm1, %v970_v34, %v971_v42  ;;  %v977_v45 = vsel %vm11234_vm5, %v968_v41, %v971_v42 }
 0x14e   : > { %v976_v46 = vsel %vm11234_vm5, %v966_v31, %v975_v44  ;;  %983 = vst.msk [vmem:[#allocation2 + $0x13c] sm:$0xc] %vm377_vm4, %v977_v45  ;;  %v989_v47 = vpop.permute.xlu1 %988  ;;  %v987_v48 = vpop.permute.xlu0 %986  ;;  %vm11242_vm5 = vcmask 408576  }
 0x14f   : > { %982 = vst [vmem:[#allocation2 + $0x134] sm:$0xcc] %v976_v46  ;;  %v992_v50 = vrot.slane %v989_v47, 4  ;;  %v991_v51 = vrot.slane %v987_v48, 4 }
 0x150   : > { %1282 = vrot.lane.b32.xlu1 %v7533_v9, %s11235_s9  ;;  %1261 = vrot.lane.b32.xlu0 %v7556_v15, %s11237_s25  ;;  %s11294_s9 = smov 110   ;;  %s11292_s25 = smov 109  }
 0x151   : > { %v998_v52 = vsel %vm11239_vm7, %v989_v47, %v992_v50  ;;  %v993_v53 = vsel %vm366_vm1, %v990_v43, %v991_v51  ;;  %v996_v54 = vsel %vm366_vm1, %v991_v51, %v992_v50 }
 0x152   : > { %1004 = vst.msk [vmem:[#allocation2 + $0x150] sm:$0x3] %vm339_vm0, %v998_v52  ;;  %v995_v55 = vsel %vm11239_vm7, %v985_v40, %v993_v53  ;;  %v997_v56 = vsel %vm11239_vm7, %v987_v48, %v996_v54  ;;  %v1008_v57 = vpop.permute.xlu1 %1007  ;;  %v1006_v58 = vpop.permute.xlu0 %1005  ;;  %v7235_v59 = vld [vmem:[#allocation2 + $0x11c] ss:$20 sps:$4 sm:$0xff]   ;;  %v7237_v60 = vld [vmem:[#allocation2 + $0x118] ss:$20 sps:$4 sm:$0xff]  }
 0x153   : > { %1002 = vst [vmem:[#allocation2 + $0x140] sm:$0x33] %v995_v55  ;;  %1003 = vst [vmem:[#allocation2 + $0x148] sm:$0x33] %v997_v56  ;;  %v1012_v61 = vrot.slane %v1008_v57, 4  ;;  %v1011_v63 = vrot.slane %v1006_v58, 4  ;;  %2785 = vmatprep.subr.bf16.mxu0 %v7235_v59 }
 0x154   : > { %1476 = vrot.lane.b32.xlu1 %v7530_v8, %s11294_s9  ;;  %1303 = vrot.lane.b32.xlu0 %v7556_v15, %s11240_s24  ;;  %vm11245_vm7 = vcmask 400384   ;;  %s11289_s24 = smov 108  }
 0x155   : > { %v1014_v0 = vsel %vm366_vm1, %v1011_v63, %v1012_v61  ;;  %2786 = vmatpush1.bf16.msra.mxu0 %v7237_v60 }
 0x156   : > { %v1016_v1 = vsel %vm11242_vm5, %v1006_v58, %v1014_v0  ;;  %v1027_v2 = vpop.permute.xlu1 %1026  ;;  %v1010_v4 = vpop.permute.xlu0 %1009  ;;  %v2054_v7 = vld [vmem:[#allocation2 + $0x134] sm:$0xff] }
 0x157   : > { %v7238_v10 = vld [vmem:[#allocation2 + $0x124] ss:$20 sps:$4 sm:$0xff]   ;;  %1023 = vst [vmem:[#allocation2 + $0x140] sm:$0xcc] %v1016_v1  ;;  %v1013_v11 = vrot.slane %v1010_v4, 4  ;;  %v6596_v14 = vcombine.low %v2051_v6, %v2054_v7  ;;  %v1032_v16 = vrot.slane %v1027_v2, 4 }
 0x158   : > { %1496 = vrot.lane.b32.xlu1 %v7540_v12, %s11292_s25  ;;  %1478 = vrot.lane.b32.xlu0 %v7549_v13, %s11294_s9 }
 0x159   : > { %v1017_v17 = vsel %vm366_vm1, %v1012_v61, %v1013_v11  ;;  %v1019_v18 = vsel %vm11242_vm5, %v1010_v4, %v1013_v11  ;;  %2911 = vmatprep.subr.bf16.mxu1 %v7238_v10 }
 0x15a   : > { %v1018_v19 = vsel %vm11242_vm5, %v1008_v57, %v1017_v17  ;;  %1025 = vst.msk [vmem:[#allocation2 + $0x150] sm:$0xc] %vm377_vm4, %v1019_v18  ;;  %v1031_v20 = vpop.permute.xlu1 %1030  ;;  %2912 = vmatpush1.bf16.msra.mxu1 %v6596_v14  ;;  %v1029_v21 = vpop.permute.xlu0 %1028  ;;  %vm11246_vm5 = vcmask 392192   ;;  %v1427_v17 = vrot.slane %v7556_v15, 4 }
 0x15b   : > { %1024 = vst [vmem:[#allocation2 + $0x148] sm:$0xcc] %v1018_v19  ;;  %v1034_v22 = vrot.slane %v1031_v20, 4  ;;  %v1033_v23 = vrot.slane %v1029_v21, 4 }
 0x15c   : > { %1516 = vrot.lane.b32.xlu1 %v7530_v8, %s11289_s24  ;;  %1498 = vrot.lane.b32.xlu0 %v7530_v8, %s11292_s25  ;;  %1435 = vst.msk [vmem:[#allocation2 + $0x218] sm:$0xc] %vm377_vm4, %v1427_v17 }
 0x15d   : > { %v1040_v24 = vsel %vm11245_vm7, %v1031_v20, %v1034_v22  ;;  %v1035_v25 = vsel %vm366_vm1, %v1032_v16, %v1033_v23  ;;  %v1038_v26 = vsel %vm366_vm1, %v1033_v23, %v1034_v22  ;;  %v1429_v23 = vsel %vm366_vm1, %v1426_v62, %v1427_v17 }
 0x15e   : > { %1046 = vst.msk [vmem:[#allocation2 + $0x164] sm:$0x3] %vm339_vm0, %v1040_v24  ;;  %v1037_v27 = vsel %vm11245_vm7, %v1027_v2, %v1035_v25  ;;  %v1039_v28 = vsel %vm11245_vm7, %v1029_v21, %v1038_v26  ;;  %v1050_v29 = vpop.permute.xlu1 %1049  ;;  %v1048_v30 = vpop.permute.xlu0 %1047  ;;  %vm11251_vm7 = vcmask 261120   ;;  %1434 = vst [vmem:[#allocation2 + $0x210] sm:$0xcc] %v1429_v23 }
 0x15f   : > { %1044 = vst [vmem:[#allocation2 + $0x154] sm:$0x33] %v1037_v27  ;;  %1045 = vst [vmem:[#allocation2 + $0x15c] sm:$0x33] %v1039_v28  ;;  %v1054_v31 = vrot.slane %v1050_v29, 4  ;;  %v1053_v33 = vrot.slane %v1048_v30, 4 }
 0x160   : > { %1536 = vrot.lane.b32.xlu1 %v7540_v12, %s11274_s26  ;;  %1518 = vrot.lane.b32.xlu0 %v7549_v13, %s11289_s24 }
 0x161   : > { %v1056_v34 = vsel %vm366_vm1, %v1053_v33, %v1054_v31 }
 0x162   : > { %v1058_v36 = vsel %vm11246_vm5, %v1048_v30, %v1056_v34  ;;  %v1069_v37 = vpop.permute.xlu1 %1068  ;;  %v1052_v38 = vpop.permute.xlu0 %1051  ;;  %v2057_v2 = vld [vmem:[#allocation2 + $0x148] sm:$0xff] }
 0x163   : > { %1065 = vst [vmem:[#allocation2 + $0x154] sm:$0xcc] %v1058_v36  ;;  %v1055_v40 = vrot.slane %v1052_v38, 4  ;;  %v1074_v41 = vrot.slane %v1069_v37, 4 }
 0x164   : > { %1324 = vrot.lane.b32.xlu1 %v7533_v9, %s11256_s21  ;;  %1538 = vrot.lane.b32.xlu0 %v7530_v8, %s11274_s26  ;;  %s11364_s21 = smov 87  }
 0x165   : > { %v1059_v42 = vsel %vm366_vm1, %v1054_v31, %v1055_v40  ;;  %v1061_v43 = vsel %vm11246_vm5, %v1052_v38, %v1055_v40 }
 0x166   : > { %v1060_v44 = vsel %vm11246_vm5, %v1050_v29, %v1059_v42  ;;  %1067 = vst.msk [vmem:[#allocation2 + $0x164] sm:$0xc] %vm377_vm4, %v1061_v43  ;;  %v1073_v45 = vpop.permute.xlu1 %1072  ;;  %v1071_v46 = vpop.permute.xlu0 %1070  ;;  %vm11252_vm5 = vcmask 252928  }
 0x167   : > { %1066 = vst [vmem:[#allocation2 + $0x15c] sm:$0xcc] %v1060_v44  ;;  %v1076_v47 = vrot.slane %v1073_v45, 4  ;;  %v1075_v48 = vrot.slane %v1071_v46, 4 }
 0x168   : > { %1366 = vrot.lane.b32.xlu1 %v7533_v9, %s11247_s15  ;;  %1345 = vrot.lane.b32.xlu0 %v7556_v15, %s11249_s17  ;;  %s11286_s15 = smov 106   ;;  %s11283_s17 = smov 105  }
 0x169   : > { %v1082_v50 = vsel %vm11251_vm7, %v1073_v45, %v1076_v47  ;;  %v1077_v51 = vsel %vm366_vm1, %v1074_v41, %v1075_v48  ;;  %v1080_v52 = vsel %vm366_vm1, %v1075_v48, %v1076_v47 }
 0x16a   : > { %1088 = vst.msk [vmem:[#allocation2 + $0x178] sm:$0x3] %vm339_vm0, %v1082_v50  ;;  %v1079_v53 = vsel %vm11251_vm7, %v1069_v37, %v1077_v51  ;;  %v1081_v54 = vsel %vm11251_vm7, %v1071_v46, %v1080_v52  ;;  %v1092_v55 = vpop.permute.xlu1 %1091  ;;  %v1090_v56 = vpop.permute.xlu0 %1089  ;;  %v7240_v57 = vld [vmem:[#allocation2 + $0x144] ss:$20 sps:$4 sm:$0xff]   ;;  %v7242_v58 = vld [vmem:[#allocation2 + $0x140] ss:$20 sps:$4 sm:$0xff]  }
 0x16b   : > { %1086 = vst [vmem:[#allocation2 + $0x168] sm:$0x33] %v1079_v53  ;;  %1087 = vst [vmem:[#allocation2 + $0x170] sm:$0x33] %v1081_v54  ;;  %v1096_v59 = vrot.slane %v1092_v55, 4  ;;  %v1095_v60 = vrot.slane %v1090_v56, 4  ;;  %2787 = vmatprep.subr.bf16.mxu0 %v7240_v57 }
 0x16c   : > { %1556 = vrot.lane.b32.xlu1 %v7530_v8, %s11286_s15  ;;  %1387 = vrot.lane.b32.xlu0 %v7556_v15, %s11253_s13  ;;  %vm11255_vm7 = vcmask 244736   ;;  %s11280_s13 = smov 88  }
 0x16d   : > { %v1098_v61 = vsel %vm366_vm1, %v1095_v60, %v1096_v59  ;;  %2788 = vmatpush1.bf16.msra.mxu0 %v7242_v58 }
 0x16e   : > { %v1100_v63 = vsel %vm11252_vm5, %v1090_v56, %v1098_v61  ;;  %v1111_v0 = vpop.permute.xlu1 %1110  ;;  %v1094_v1 = vpop.permute.xlu0 %1093  ;;  %v2060_v4 = vld [vmem:[#allocation2 + $0x15c] sm:$0xff] }
 0x16f   : > { %v7243_v6 = vld [vmem:[#allocation2 + $0x14c] ss:$20 sps:$4 sm:$0xff]   ;;  %1107 = vst [vmem:[#allocation2 + $0x168] sm:$0xcc] %v1100_v63  ;;  %v1097_v7 = vrot.slane %v1094_v1, 4  ;;  %v6601_v10 = vcombine.low %v2057_v2, %v2060_v4  ;;  %v1116_v11 = vrot.slane %v1111_v0, 4 }
 0x170   : > { %1576 = vrot.lane.b32.xlu1 %v7540_v12, %s11283_s17  ;;  %1558 = vrot.lane.b32.xlu0 %v7549_v13, %s11286_s15 }
 0x171   : > { %v1101_v14 = vsel %vm366_vm1, %v1096_v59, %v1097_v7  ;;  %v1103_v16 = vsel %vm11252_vm5, %v1094_v1, %v1097_v7  ;;  %2913 = vmatprep.subr.bf16.mxu1 %v7243_v6 }
 0x172   : > { %v1102_v18 = vsel %vm11252_vm5, %v1092_v55, %v1101_v14  ;;  %1109 = vst.msk [vmem:[#allocation2 + $0x178] sm:$0xc] %vm377_vm4, %v1103_v16  ;;  %v1115_v19 = vpop.permute.xlu1 %1114  ;;  %2914 = vmatpush1.bf16.msra.mxu1 %v6601_v10  ;;  %v1113_v20 = vpop.permute.xlu0 %1112  ;;  %vm11258_vm5 = vcmask 236544  }
 0x173   : > { %1108 = vst [vmem:[#allocation2 + $0x170] sm:$0xcc] %v1102_v18  ;;  %v1118_v21 = vrot.slane %v1115_v19, 4  ;;  %v1117_v22 = vrot.slane %v1113_v20, 4 }
 0x174   : > { %1596 = vrot.lane.b32.xlu1 %v7549_v13, %s11296_s19  ;;  %1578 = vrot.lane.b32.xlu0 %v7530_v8, %s11283_s17 }
 0x175   : > { %v1124_v24 = vsel %vm11255_vm7, %v1115_v19, %v1118_v21  ;;  %v1119_v25 = vsel %vm366_vm1, %v1116_v11, %v1117_v22  ;;  %v1122_v26 = vsel %vm366_vm1, %v1117_v22, %v1118_v21 }
 0x176   : > { %1130 = vst.msk [vmem:[#allocation2 + $0x18c] sm:$0x3] %vm339_vm0, %v1124_v24  ;;  %v1121_v27 = vsel %vm11255_vm7, %v1111_v0, %v1119_v25  ;;  %v1123_v62 = vsel %vm11255_vm7, %v1113_v20, %v1122_v26  ;;  %v1134_v28 = vpop.permute.xlu1 %1133  ;;  %v1132_v29 = vpop.permute.xlu0 %1131  ;;  %vm11263_vm7 = vcmask 228352  }
 0x177   : > { %1128 = vst [vmem:[#allocation2 + $0x17c] sm:$0x33] %v1121_v27  ;;  %1129 = vst [vmem:[#allocation2 + $0x184] sm:$0x33] %v1123_v62  ;;  %v1138_v30 = vrot.slane %v1134_v28, 4  ;;  %v1137_v31 = vrot.slane %v1132_v29, 4 }
 0x178   : > { %1614 = vrot.lane.b32.xlu1 %v7530_v8, %s11280_s13  ;;  %1612 = vrot.lane.b32.xlu0 %v7540_v12, %s11280_s13 }
 0x179   : > { %v1140_v33 = vsel %vm366_vm1, %v1137_v31, %v1138_v30 }
 0x17a   : > { %v1142_v34 = vsel %vm11258_vm5, %v1132_v29, %v1140_v33  ;;  %v1153_v36 = vpop.permute.xlu1 %1152  ;;  %v1136_v37 = vpop.permute.xlu0 %1135  ;;  %v2063_v1 = vld [vmem:[#allocation2 + $0x170] sm:$0xff] }
 0x17b   : > { %1149 = vst [vmem:[#allocation2 + $0x17c] sm:$0xcc] %v1142_v34  ;;  %v1139_v38 = vrot.slane %v1136_v37, 4  ;;  %v1158_v40 = vrot.slane %v1153_v36, 4  ;;  %v7276_v29 = vld [vmem:[%s11474_s1 + $0x4] ss:$12 sps:$4 sm:$0xff]  }
 0x17c   : > { %1440 = vrot.lane.b32.xlu1 %v7533_v9, %s11261_s22  ;;  %1408 = vrot.lane.b32.xlu0 %v7533_v9, %s11264_s12  ;;  %s11360_s22 = smov 85   ;;  %s11358_s12 = smov 84  }
 0x17d   : > { %v1143_v41 = vsel %vm366_vm1, %v1138_v30, %v1139_v38  ;;  %v1145_v42 = vsel %vm11258_vm5, %v1136_v37, %v1139_v38  ;;  %2803 = vmatprep.mubr.bf16.mxu0 %v7276_v29  ;;  %2929 = vmatprep.mubr.bf16.mxu1 %v7276_v29 }
 0x17e   : > { %v1144_v43 = vsel %vm11258_vm5, %v1134_v28, %v1143_v41  ;;  %1151 = vst.msk [vmem:[#allocation2 + $0x18c] sm:$0xc] %vm377_vm4, %v1145_v42  ;;  %v1157_v44 = vpop.permute.xlu1 %1156  ;;  %v1155_v45 = vpop.permute.xlu0 %1154  ;;  %vm11266_vm5 = vcmask 220160  }
 0x17f   : > { %1150 = vst [vmem:[#allocation2 + $0x184] sm:$0xcc] %v1144_v43  ;;  %v1160_v46 = vrot.slane %v1157_v44, 4  ;;  %v1159_v47 = vrot.slane %v1155_v45, 4 }
 0x180   : > { %1632 = vrot.lane.b32.xlu1 %v7530_v8, %s11364_s21  ;;  %1460 = vrot.lane.b32.xlu0 %v7556_v15, %s11259_s20  ;;  %s11362_s20 = smov 86  }
 0x181   : > { %v1166_v48 = vsel %vm11263_vm7, %v1157_v44, %v1160_v46  ;;  %v1161_v50 = vsel %vm366_vm1, %v1158_v40, %v1159_v47  ;;  %v1164_v51 = vsel %vm366_vm1, %v1159_v47, %v1160_v46 }
 0x182   : > { %1172 = vst.msk [vmem:[#allocation2 + $0x1a0] sm:$0x3] %vm339_vm0, %v1166_v48  ;;  %v1163_v52 = vsel %vm11263_vm7, %v1153_v36, %v1161_v50  ;;  %v1165_v53 = vsel %vm11263_vm7, %v1155_v45, %v1164_v51  ;;  %v1176_v54 = vpop.permute.xlu1 %1175  ;;  %v1174_v55 = vpop.permute.xlu0 %1173  ;;  %v7245_v56 = vld [vmem:[#allocation2 + $0x16c] ss:$20 sps:$4 sm:$0xff]   ;;  %v7247_v57 = vld [vmem:[#allocation2 + $0x168] ss:$20 sps:$4 sm:$0xff]  }
 0x183   : > { %1170 = vst [vmem:[#allocation2 + $0x190] sm:$0x33] %v1163_v52  ;;  %1171 = vst [vmem:[#allocation2 + $0x198] sm:$0x33] %v1165_v53  ;;  %v1180_v58 = vrot.slane %v1176_v54, 4  ;;  %v1179_v59 = vrot.slane %v1174_v55, 4  ;;  %2789 = vmatprep.subr.bf16.mxu0 %v7245_v56 }
 0x184   : > { %1652 = vrot.lane.b32.xlu1 %v7540_v12, %s11362_s20  ;;  %1634 = vrot.lane.b32.xlu0 %v7549_v13, %s11364_s21  ;;  %vm11271_vm7 = vcmask 211968  }
 0x185   : > { %v1182_v60 = vsel %vm366_vm1, %v1179_v59, %v1180_v58  ;;  %2790 = vmatpush1.bf16.msra.mxu0 %v7247_v57 }
 0x186   : > { %v1184_v61 = vsel %vm11266_vm5, %v1174_v55, %v1182_v60  ;;  %v1195_v63 = vpop.permute.xlu1 %1194  ;;  %v1178_v0 = vpop.permute.xlu0 %1177  ;;  %v2066_v2 = vld [vmem:[#allocation2 + $0x184] sm:$0xff] }
 0x187   : > { %v7248_v4 = vld [vmem:[#allocation2 + $0x174] ss:$20 sps:$4 sm:$0xff]   ;;  %1191 = vst [vmem:[#allocation2 + $0x190] sm:$0xcc] %v1184_v61  ;;  %v1181_v6 = vrot.slane %v1178_v0, 4  ;;  %v6606_v7 = vcombine.low %v2063_v1, %v2066_v2  ;;  %v1200_v10 = vrot.slane %v1195_v63, 4 }
 0x188   : > { %1672 = vrot.lane.b32.xlu1 %v7530_v8, %s11360_s22  ;;  %1654 = vrot.lane.b32.xlu0 %v7530_v8, %s11362_s20 }
 0x189   : > { %v1185_v11 = vsel %vm366_vm1, %v1180_v58, %v1181_v6  ;;  %v1187_v14 = vsel %vm11266_vm5, %v1178_v0, %v1181_v6  ;;  %2915 = vmatprep.subr.bf16.mxu1 %v7248_v4 }
 0x18a   : > { %v1186_v16 = vsel %vm11266_vm5, %v1176_v54, %v1185_v11  ;;  %1193 = vst.msk [vmem:[#allocation2 + $0x1a0] sm:$0xc] %vm377_vm4, %v1187_v14  ;;  %v1199_v17 = vpop.permute.xlu1 %1198  ;;  %2916 = vmatpush1.bf16.msra.mxu1 %v6606_v7  ;;  %v1197_v18 = vpop.permute.xlu0 %1196  ;;  %vm11272_vm5 = vcmask 203776  }
 0x18b   : > { %1192 = vst [vmem:[#allocation2 + $0x198] sm:$0xcc] %v1186_v16  ;;  %v1202_v19 = vrot.slane %v1199_v17, 4  ;;  %v1201_v20 = vrot.slane %v1197_v18, 4 }
 0x18c   : > { %1692 = vrot.lane.b32.xlu1 %v7540_v12, %s11358_s12  ;;  %1674 = vrot.lane.b32.xlu0 %v7549_v13, %s11360_s22 }
 0x18d   : > { %v1208_v21 = vsel %vm11271_vm7, %v1199_v17, %v1202_v19  ;;  %v1203_v22 = vsel %vm366_vm1, %v1200_v10, %v1201_v20  ;;  %v1206_v23 = vsel %vm366_vm1, %v1201_v20, %v1202_v19 }
 0x18e   : > { %1214 = vst.msk [vmem:[#allocation2 + $0x1b4] sm:$0x3] %vm339_vm0, %v1208_v21  ;;  %v1205_v24 = vsel %vm11271_vm7, %v1195_v63, %v1203_v22  ;;  %v1207_v25 = vsel %vm11271_vm7, %v1197_v18, %v1206_v23  ;;  %v1218_v26 = vpop.permute.xlu1 %1217  ;;  %v1216_v27 = vpop.permute.xlu0 %1215  ;;  %vm11303_vm7 = vcmask 195584  }
 0x18f   : > { %1212 = vst [vmem:[#allocation2 + $0x1a4] sm:$0x33] %v1205_v24  ;;  %1213 = vst [vmem:[#allocation2 + $0x1ac] sm:$0x33] %v1207_v25  ;;  %v1222_v62 = vrot.slane %v1218_v26, 4  ;;  %v1221_v28 = vrot.slane %v1216_v27, 4 }
 0x190   : > { %1480 = vrot.lane.b32.xlu1 %v7533_v9, %s11294_s9  ;;  %1694 = vrot.lane.b32.xlu0 %v7530_v8, %s11358_s12  ;;  %s11339_s9 = smov 59  }
 0x191   : > { %v1224_v30 = vsel %vm366_vm1, %v1221_v28, %v1222_v62 }
 0x192   : > { %v1226_v31 = vsel %vm11272_vm5, %v1216_v27, %v1224_v30  ;;  %v1237_v33 = vpop.permute.xlu1 %1236  ;;  %v1220_v34 = vpop.permute.xlu0 %1219 }
 0x193   : > { %1233 = vst [vmem:[#allocation2 + $0x1a4] sm:$0xcc] %v1226_v31  ;;  %v1223_v36 = vrot.slane %v1220_v34, 4  ;;  %v1242_v37 = vrot.slane %v1237_v33, 4 }
 0x194   : > { %1520 = vrot.lane.b32.xlu1 %v7533_v9, %s11289_s24  ;;  %1500 = vrot.lane.b32.xlu0 %v7556_v15, %s11292_s25  ;;  %s11312_s24 = smov 61   ;;  %s11310_s25 = smov 60  }
 0x195   : > { %v1227_v38 = vsel %vm366_vm1, %v1222_v62, %v1223_v36  ;;  %v1229_v40 = vsel %vm11272_vm5, %v1220_v34, %v1223_v36 }
 0x196   : > { %v1228_v41 = vsel %vm11272_vm5, %v1218_v26, %v1227_v38  ;;  %1235 = vst.msk [vmem:[#allocation2 + $0x1b4] sm:$0xc] %vm377_vm4, %v1229_v40  ;;  %v1258_v42 = vpop.permute.xlu1 %1257  ;;  %v8182_v43 = vpop.permute.xlu0 %1238  ;;  %vm11298_vm5 = vcmask 64512  }
 0x197   : > { %1234 = vst [vmem:[#allocation2 + $0x1ac] sm:$0xcc] %v1228_v41  ;;  %v1243_v44 = vrot.slane %v8182_v43, 4  ;;  %v1263_v45 = vrot.slane %v1258_v42, 4 }
 0x198   : > { %1712 = vrot.lane.b32.xlu1 %v7530_v8, %s11356_s16  ;;  %1540 = vrot.lane.b32.xlu0 %v7556_v15, %s11274_s26  ;;  %s11345_s26 = smov 81  }
 0x199   : > { %v1245_v46 = vsel %vm366_vm1, %v1242_v37, %v1243_v44 }
 0x19a   : > { %v1247_v47 = vsel %vm11303_vm7, %v1237_v33, %v1245_v46  ;;  %v1279_v48 = vpop.permute.xlu1 %1278  ;;  %v8193_v50 = vpop.permute.xlu0 %1259  ;;  %v7250_v51 = vld [vmem:[#allocation2 + $0x194] ss:$20 sps:$4 sm:$0xff]   ;;  %v7252_v52 = vld [vmem:[#allocation2 + $0x190] ss:$20 sps:$4 sm:$0xff]  }
 0x19b   : > { %1254 = vst [vmem:[#allocation2 + $0x1b8] sm:$0x33] %v1247_v47  ;;  %v1264_v53 = vrot.slane %v8193_v50, 4  ;;  %v1284_v54 = vrot.slane %v1279_v48, 4  ;;  %2791 = vmatprep.subr.bf16.mxu0 %v7250_v51 }
 0x19c   : > { %1732 = vrot.lane.b32.xlu1 %v7540_v12, %s11347_s18  ;;  %1714 = vrot.lane.b32.xlu0 %v7549_v13, %s11356_s16 }
 0x19d   : > { %v1266_v55 = vsel %vm366_vm1, %v1263_v45, %v1264_v53  ;;  %2792 = vmatpush1.bf16.msra.mxu0 %v7252_v52 }
 0x19e   : > { %v1268_v56 = vsel %vm11298_vm5, %v1258_v42, %v1266_v55  ;;  %v1300_v57 = vpop.permute.xlu1 %1299  ;;  %v8204_v58 = vpop.permute.xlu0 %1280  ;;  %v7253_v59 = vld [vmem:[#allocation2 + $0x19c] ss:$20 sps:$4 sm:$0xff]   ;;  %v7255_v60 = vld [vmem:[#allocation2 + $0x198] ss:$20 sps:$4 sm:$0xff]  }
 0x19f   : > { %1275 = vst [vmem:[#allocation2 + $0x1b8] sm:$0xcc] %v1268_v56  ;;  %v1285_v61 = vrot.slane %v8204_v58, 4  ;;  %v1305_v63 = vrot.slane %v1300_v57, 4  ;;  %2917 = vmatprep.subr.bf16.mxu1 %v7253_v59 }
 0x1a0   : > { %1752 = vrot.lane.b32.xlu1 %v7530_v8, %s11345_s26  ;;  %1734 = vrot.lane.b32.xlu0 %v7530_v8, %s11347_s18 }
 0x1a1   : > { %v1287_v0 = vsel %vm366_vm1, %v1284_v54, %v1285_v61  ;;  %2918 = vmatpush1.bf16.msra.mxu1 %v7255_v60 }
 0x1a2   : > { %v1289_v1 = vsel %vm11302_vm2, %v1279_v48, %v1287_v0  ;;  %v1321_v2 = vpop.permute.xlu1 %1320  ;;  %v8215_v4 = vpop.permute.xlu0 %1301 }
 0x1a3   : > { %1296 = vst [vmem:[#allocation2 + $0x1cc] sm:$0x33] %v1289_v1  ;;  %v1306_v6 = vrot.slane %v8215_v4, 4  ;;  %v1326_v7 = vrot.slane %v1321_v2, 4 }
 0x1a4   : > { %1772 = vrot.lane.b32.xlu1 %v7540_v12, %s11354_s30  ;;  %1754 = vrot.lane.b32.xlu0 %v7549_v13, %s11345_s26 }
 0x1a5   : > { %v1308_v10 = vsel %vm366_vm1, %v1305_v63, %v1306_v6 }
 0x1a6   : > { %v1310_v11 = vsel %vm11301_vm14, %v1300_v57, %v1308_v10  ;;  %v1342_v14 = vpop.permute.xlu1 %1341  ;;  %v8226_v16 = vpop.permute.xlu0 %1322 }
 0x1a7   : > { %1317 = vst [vmem:[#allocation2 + $0x1cc] sm:$0xcc] %v1310_v11  ;;  %v1327_v17 = vrot.slane %v8226_v16, 4  ;;  %v1347_v18 = vrot.slane %v1342_v14, 4 }
 0x1a8   : > { %1580 = vrot.lane.b32.xlu1 %v7556_v15, %s11283_s17  ;;  %1560 = vrot.lane.b32.xlu0 %v7533_v9, %s11286_s15  ;;  %s11341_s17 = smov 63   ;;  %s11308_s15 = smov 62  }
 0x1a9   : > { %v1329_v19 = vsel %vm366_vm1, %v1326_v7, %v1327_v17 }
 0x1aa   : > { %v1331_v20 = vsel %vm11316_vm12, %v1321_v2, %v1329_v19  ;;  %v1363_v21 = vpop.permute.xlu1 %1362  ;;  %v8237_v22 = vpop.permute.xlu0 %1343 }
 0x1ab   : > { %1338 = vst [vmem:[#allocation2 + $0x1e0] sm:$0x33] %v1331_v20  ;;  %v1348_v23 = vrot.slane %v8237_v22, 4  ;;  %v1368_v24 = vrot.slane %v1363_v21, 4 }
 0x1ac   : > { %1616 = vrot.lane.b32.xlu1 %v7556_v15, %s11280_s13  ;;  %1598 = vrot.lane.b32.xlu0 %v7533_v9, %s11296_s19  ;;  %s11343_s13 = smov 64   ;;  %s11337_s19 = smov 58  }
 0x1ad   : > { %v1350_v25 = vsel %vm366_vm1, %v1347_v18, %v1348_v23 }
 0x1ae   : > { %v1352_v26 = vsel %vm11304_vm10, %v1342_v14, %v1350_v25  ;;  %v1384_v27 = vpop.permute.xlu1 %1383  ;;  %v8248_v62 = vpop.permute.xlu0 %1364  ;;  %v7256_v28 = vld [vmem:[#allocation2 + $0x1bc] ss:$20 sps:$4 sm:$0xff]   ;;  %v7258_v29 = vld [vmem:[#allocation2 + $0x1b8] ss:$20 sps:$4 sm:$0xff]  }
 0x1af   : > { %1359 = vst [vmem:[#allocation2 + $0x1e0] sm:$0xcc] %v1352_v26  ;;  %v1369_v30 = vrot.slane %v8248_v62, 4  ;;  %v1389_v31 = vrot.slane %v1384_v27, 4  ;;  %2793 = vmatprep.subr.bf16.mxu0 %v7256_v28 }
 0x1b0   : > { %1790 = vrot.lane.b32.xlu1 %v7549_v13, %s11343_s13  ;;  %1788 = vrot.lane.b32.xlu0 %v7530_v8, %s11343_s13 }
 0x1b1   : > { %v1371_v33 = vsel %vm366_vm1, %v1368_v24, %v1369_v30  ;;  %2794 = vmatpush1.bf16.msra.mxu0 %v7258_v29 }
 0x1b2   : > { %v1373_v34 = vsel %vm11306_vm8, %v1363_v21, %v1371_v33  ;;  %v1405_v36 = vpop.permute.xlu1 %1404  ;;  %v8259_v37 = vpop.permute.xlu0 %1385 }
 0x1b3   : > { %1380 = vst [vmem:[#allocation2 + $0x1f4] sm:$0x33] %v1373_v34  ;;  %v1390_v38 = vrot.slane %v8259_v37, 4  ;;  %v1410_v40 = vrot.slane %v1405_v36, 4 }
 0x1b4   : > { %1810 = vrot.lane.b32.xlu1 %v7530_v8, %s11341_s17  ;;  %1808 = vrot.lane.b32.xlu0 %v7540_v12, %s11341_s17 }
 0x1b5   : > { %v1392_v41 = vsel %vm366_vm1, %v1389_v31, %v1390_v38 }
 0x1b6   : > { %v1394_v42 = vsel %vm11305_vm6, %v1384_v27, %v1392_v41  ;;  %v1437_v45 = vpop.permute.xlu1 %1436  ;;  %v8270_v46 = vpop.permute.xlu0 %1406  ;;  %v2080_v1 = vld [vmem:[#allocation2 + $0x1e0] sm:$0xff] }
 0x1b7   : > { %1401 = vst [vmem:[#allocation2 + $0x1f4] sm:$0xcc] %v1394_v42  ;;  %v1411_v47 = vrot.slane %v8270_v46, 4  ;;  %v1442_v48 = vrot.slane %v1437_v45, 4 }
 0x1b8   : > { %1841 = vrot.lane.b32.xlu1 %v7549_v13, %s11308_s15  ;;  %1839 = vrot.lane.b32.xlu0 %v7530_v8, %s11308_s15 }
 0x1b9   : > { %v1413_v51 = vsel %vm366_vm1, %v1410_v40, %v1411_v47 }
 0x1ba   : > { %v1415_v52 = vsel %vm11315_vm3, %v1405_v36, %v1413_v51  ;;  %v1457_v54 = vpop.permute.xlu1 %1456  ;;  %v8281_v55 = vpop.permute.xlu0 %1438 }
 0x1bb   : > { %1422 = vst [vmem:[#allocation2 + $0x208] sm:$0x33] %v1415_v52  ;;  %v1443_v56 = vrot.slane %v8281_v55, 4  ;;  %v1462_v57 = vrot.slane %v1457_v54, 4 }
 0x1bc   : > { %1864 = vrot.lane.b32.xlu1 %v7530_v8, %s11312_s24  ;;  %1862 = vrot.lane.b32.xlu0 %v7540_v12, %s11312_s24 }
 0x1bd   : > { %v1445_v59 = vsel %vm366_vm1, %v1442_v48, %v1443_v56 }
 0x1be   : > { %v1447_v60 = vsel %vm11307_vm15, %v1445_v59, %v8281_v55  ;;  %v1241_v63 = vpop.permute.xlu1 %1240  ;;  %v8293_v0 = vpop.permute.xlu0 %1458  ;;  %v2083_v2 = vld [vmem:[#allocation2 + $0x1f4] sm:$0xff] }
 0x1bf   : > { %v7259_v7 = vld [vmem:[#allocation2 + $0x1e4] ss:$20 sps:$4 sm:$0xff]   ;;  %1453 = vst [vmem:[#allocation2 + $0x21c] sm:$0x33] %v1447_v60  ;;  %v1244_v10 = vrot.slane %v1241_v63, 4  ;;  %v1463_v11 = vrot.slane %v8293_v0, 4  ;;  %v6619_v14 = vcombine.low %v2080_v1, %v2083_v2 }
 0x1c0   : > { %1887 = vrot.lane.b32.xlu1 %v7549_v13, %s11310_s25  ;;  %1885 = vrot.lane.b32.xlu0 %v7530_v8, %s11310_s25 }
 0x1c1   : > { %v1248_v18 = vsel %vm366_vm1, %v1243_v44, %v1244_v10  ;;  %v1250_v19 = vsel %vm11303_vm7, %v1241_v63, %v1244_v10  ;;  %v1465_v20 = vsel %vm366_vm1, %v1462_v57, %v1463_v11  ;;  %2795 = vmatprep.subr.bf16.mxu0 %v7259_v7 }
 0x1c2   : > { %v1249_v21 = vsel %vm11303_vm7, %v8182_v43, %v1248_v18  ;;  %1256 = vst.msk [vmem:[#allocation2 + $0x1c8] sm:$0x3] %vm339_vm0, %v1250_v19  ;;  %v1467_v24 = vsel %vm11314_vm9, %v1465_v20, %v8293_v0  ;;  %v1283_v25 = vpop.permute.xlu1 %1282  ;;  %2796 = vmatpush1.bf16.msra.mxu0 %v6619_v14  ;;  %v1262_v26 = vpop.permute.xlu0 %1261  ;;  %vm11318_vm7 = vcmask 875520  }
 0x1c3   : > { %1255 = vst [vmem:[#allocation2 + $0x1c0] sm:$0x33] %v1249_v21  ;;  %1473 = vst [vmem:[#allocation2 + $0x21c] sm:$0xcc] %v1467_v24  ;;  %v1286_v44 = vrot.slane %v1283_v25, 4  ;;  %v1265_v27 = vrot.slane %v1262_v26, 4 }
 0x1c4   : > { %1910 = vrot.lane.b32.xlu1 %v7530_v8, %s11339_s9  ;;  %1908 = vrot.lane.b32.xlu0 %v7540_v12, %s11339_s9 }
 0x1c5   : > { %v1290_v43 = vsel %vm366_vm1, %v1285_v61, %v1286_v44  ;;  %v1292_v28 = vsel %vm11302_vm2, %v1283_v25, %v1286_v44  ;;  %v1269_v29 = vsel %vm366_vm1, %v1264_v53, %v1265_v27  ;;  %v1271_v31 = vsel %vm11298_vm5, %v1262_v26, %v1265_v27 }
 0x1c6   : > { %v1291_v33 = vsel %vm11302_vm2, %v8204_v58, %v1290_v43  ;;  %1298 = vst.msk [vmem:[#allocation2 + $0x1dc] sm:$0x3] %vm339_vm0, %v1292_v28  ;;  %v1270_v34 = vsel %vm11298_vm5, %v8193_v50, %v1269_v29  ;;  %v1477_v36 = vpop.permute.xlu1 %1476  ;;  %v1304_v61 = vpop.permute.xlu0 %1303  ;;  %vm11323_vm5 = vcmask 900096   ;;  %vm11317_vm2 = vcmask 883712  }
 0x1c7   : > { %1277 = vst.msk [vmem:[#allocation2 + $0x1c8] sm:$0xc] %vm377_vm4, %v1271_v31  ;;  %1297 = vst [vmem:[#allocation2 + $0x1d4] sm:$0x33] %v1291_v33  ;;  %v1307_v40 = vrot.slane %v1304_v61, 4  ;;  %v1482_v53 = vrot.slane %v1477_v36, 4 }
 0x1c8   : > { %1276 = vst [vmem:[#allocation2 + $0x1c0] sm:$0xcc] %v1270_v34  ;;  %1933 = vrot.lane.b32.xlu1 %v7549_v13, %s11337_s19  ;;  %1931 = vrot.lane.b32.xlu0 %v7530_v8, %s11337_s19 }
 0x1c9   : > { %v1311_v58 = vsel %vm366_vm1, %v1306_v6, %v1307_v40  ;;  %v1313_v50 = vsel %vm11301_vm14, %v1304_v61, %v1307_v40 }
 0x1ca   : > { %v1312_v41 = vsel %vm11301_vm14, %v8215_v4, %v1311_v58  ;;  %1319 = vst.msk [vmem:[#allocation2 + $0x1dc] sm:$0xc] %vm377_vm4, %v1313_v50  ;;  %v1497_v42 = vpop.permute.xlu1 %1496  ;;  %v8341_v45 = vpop.permute.xlu0 %1478  ;;  %v7261_v48 = vld [vmem:[#allocation2 + $0x20c] ss:$20 sps:$4 sm:$0xff]   ;;  %v7263_v51 = vld [vmem:[#allocation2 + $0x208] ss:$20 sps:$4 sm:$0xff]  }
 0x1cb   : > { %1318 = vst [vmem:[#allocation2 + $0x1d4] sm:$0xcc] %v1312_v41  ;;  %v1483_v52 = vrot.slane %v8341_v45, 4  ;;  %v1502_v6 = vrot.slane %v1497_v42, 4  ;;  %2797 = vmatprep.subr.bf16.mxu0 %v7261_v48  ;;  %vm11319_vm14 = vcmask 891904   ;;  %v7457_v58 = vmov 0  }
 0x1cc   : > { %1956 = vrot.lane.b32.xlu1 %v7530_v8, %s11335_s14  ;;  %1954 = vrot.lane.b32.xlu0 %v7540_v12, %s11335_s14 }
 0x1cd   : > { %v1485_v4 = vsel %vm366_vm1, %v1482_v53, %v1483_v52  ;;  %2798 = vmatpush1.bf16.msra.mxu0 %v7263_v51  ;;  %7198 = vset.pattern.permute.xlu0 %v7457_v58 }
 0x1ce   : > { %v1487_v54 = vsel %vm11323_vm5, %v1485_v4, %v8341_v45  ;;  %v1517_v57 = vpop.permute.xlu1 %1516  ;;  %v8353_v59 = vpop.permute.xlu0 %1498  ;;  %7199 = vset.pattern.permute.xlu1 %v7457_v58 }
 0x1cf   : > { %1493 = vst [vmem:[#allocation2 + $0x230] sm:$0x33] %v1487_v54  ;;  %v1503_v8 = vrot.slane %v8353_v59, 4  ;;  %v1522_v12 = vrot.slane %v1517_v57, 4  ;;  %v2075_v7 = vld [vmem:[#allocation2 + $0x1c0] sm:$0xff] }
 0x1d0   : > { %1656 = vrot.lane.b32.xlu1 %v7556_v15, %s11362_s20  ;;  %1636 = vrot.lane.b32.xlu0 %v7533_v9, %s11364_s21  ;;  %s11613_s20 = smov 26   ;;  %s11615_s21 = smov 25  }
 0x1d1   : > { %v1505_v60 = vsel %vm366_vm1, %v1502_v6, %v1503_v8 }
 0x1d2   : > { %v1507_v63 = vsel %vm11319_vm14, %v1505_v60, %v8353_v59  ;;  %v1537_v1 = vpop.permute.xlu1 %1536  ;;  %v8365_v2 = vpop.permute.xlu0 %1518  ;;  %v2078_v10 = vld [vmem:[#allocation2 + $0x1d4] sm:$0xff] }
 0x1d3   : > { %v7264_v14 = vld [vmem:[#allocation2 + $0x1c4] ss:$20 sps:$4 sm:$0xff]   ;;  %1513 = vst [vmem:[#allocation2 + $0x230] sm:$0xcc] %v1507_v63  ;;  %v1523_v18 = vrot.slane %v8365_v2, 4  ;;  %v6616_v19 = vcombine.low %v2075_v7, %v2078_v10  ;;  %v1542_v20 = vrot.slane %v1537_v1, 4 }
 0x1d4   : > { %1696 = vrot.lane.b32.xlu1 %v7556_v15, %s11358_s12  ;;  %1676 = vrot.lane.b32.xlu0 %v7533_v9, %s11360_s22  ;;  %s11607_s12 = smov 28   ;;  %s11610_s22 = smov 27  }
 0x1d5   : > { %v1525_v21 = vsel %vm366_vm1, %v1522_v12, %v1523_v18  ;;  %2919 = vmatprep.subr.bf16.mxu1 %v7264_v14 }
 0x1d6   : > { %v1527_v24 = vsel %vm11317_vm2, %v1525_v21, %v8365_v2  ;;  %v1325_v25 = vpop.permute.xlu1 %1324  ;;  %2920 = vmatpush1.bf16.msra.mxu1 %v6616_v19  ;;  %v8377_v26 = vpop.permute.xlu0 %1538 }
 0x1d7   : > { %1533 = vst [vmem:[#allocation2 + $0x244] sm:$0x33] %v1527_v24  ;;  %v1328_v44 = vrot.slane %v1325_v25, 4  ;;  %v1543_v27 = vrot.slane %v8377_v26, 4 }
 0x1d8   : > { %1716 = vrot.lane.b32.xlu1 %v7533_v9, %s11356_s16  ;;  %1977 = vrot.lane.b32.xlu0 %v7549_v13, %s11352_s29  ;;  %s11602_s16 = smov 29  }
 0x1d9   : > { %v1332_v43 = vsel %vm366_vm1, %v1327_v17, %v1328_v44  ;;  %v1334_v28 = vsel %vm11316_vm12, %v1325_v25, %v1328_v44  ;;  %v1545_v29 = vsel %vm366_vm1, %v1542_v20, %v1543_v27 }
 0x1da   : > { %v1333_v31 = vsel %vm11316_vm12, %v8226_v16, %v1332_v43  ;;  %1340 = vst.msk [vmem:[#allocation2 + $0x1f0] sm:$0x3] %vm339_vm0, %v1334_v28  ;;  %v1547_v33 = vsel %vm11318_vm7, %v1545_v29, %v8377_v26  ;;  %v1367_v34 = vpop.permute.xlu1 %1366  ;;  %v1346_v13 = vpop.permute.xlu0 %1345  ;;  %vm11328_vm12 = vcmask 687104  }
 0x1db   : > { %1339 = vst [vmem:[#allocation2 + $0x1e8] sm:$0x33] %v1333_v31  ;;  %1553 = vst [vmem:[#allocation2 + $0x244] sm:$0xcc] %v1547_v33  ;;  %v1370_v36 = vrot.slane %v1367_v34, 4  ;;  %v1349_v17 = vrot.slane %v1346_v13, 4 }
 0x1dc   : > { %1756 = vrot.lane.b32.xlu1 %v7533_v9, %s11345_s26  ;;  %1736 = vrot.lane.b32.xlu0 %v7556_v15, %s11347_s18  ;;  %v7370_v33 = vld [vmem:[%s7525_s10 + $0x8] sm:$0x3f]  ;;  %s11502_s10 = smov 103   ;;  %s11510_s26 = smov 104  }
 0x1dd   : > { %v1374_v16 = vsel %vm366_vm1, %v1369_v30, %v1370_v36  ;;  %v1376_v61 = vsel %vm11306_vm8, %v1367_v34, %v1370_v36  ;;  %v1353_v40 = vsel %vm366_vm1, %v1348_v23, %v1349_v17  ;;  %v1355_v53 = vsel %vm11304_vm10, %v1346_v13, %v1349_v17  ;;  %s11511_s18 = smov 102  }
 0x1de   : > { %v1375_v50 = vsel %vm11306_vm8, %v8248_v62, %v1374_v16  ;;  %1382 = vst.msk [vmem:[#allocation2 + $0x204] sm:$0x3] %vm339_vm0, %v1376_v61  ;;  %v1354_v41 = vsel %vm11304_vm10, %v8237_v22, %v1353_v40  ;;  %v1557_v30 = vpop.permute.xlu1 %1556  ;;  %v1388_v42 = vpop.permute.xlu0 %1387  ;;  %vm11322_vm10 = vcmask 867328   ;;  %vm11321_vm8 = vcmask 719872  }
 0x1df   : > { %1361 = vst.msk [vmem:[#allocation2 + $0x1f0] sm:$0xc] %vm377_vm4, %v1355_v53  ;;  %1381 = vst [vmem:[#allocation2 + $0x1fc] sm:$0x33] %v1375_v50  ;;  %v1391_v23 = vrot.slane %v1388_v42, 4  ;;  %v1562_v62 = vrot.slane %v1557_v30, 4  ;;  %v1831_v34 = vcombine.high %v7370_v33, %v7370_v33 }
 0x1e0   : > { %1360 = vst [vmem:[#allocation2 + $0x1e8] sm:$0xcc] %v1354_v41  ;;  %1792 = vrot.lane.b32.xlu1 %v7533_v9, %s11343_s13  ;;  %1774 = vrot.lane.b32.xlu0 %v7556_v15, %s11354_s30  ;;  %s11509_s13 = smov 121  }
 0x1e1   : > { %v1395_v22 = vsel %vm366_vm1, %v1390_v38, %v1391_v23  ;;  %v1397_v48 = vsel %vm11305_vm6, %v1388_v42, %v1391_v23  ;;  %v1838_v53 = vrot.slane %v1831_v34, %v7520_v5 }
 0x1e2   : > { %v1396_v51 = vsel %vm11305_vm6, %v8259_v37, %v1395_v22  ;;  %1403 = vst.msk [vmem:[#allocation2 + $0x204] sm:$0xc] %vm377_vm4, %v1397_v48  ;;  %v1577_v6 = vpop.permute.xlu1 %1576  ;;  %v8427_v4 = vpop.permute.xlu0 %1558  ;;  %v7266_v54 = vld [vmem:[#allocation2 + $0x234] ss:$20 sps:$4 sm:$0xff]   ;;  %v7268_v57 = vld [vmem:[#allocation2 + $0x230] ss:$20 sps:$4 sm:$0xff]  }
 0x1e3   : > { %1402 = vst [vmem:[#allocation2 + $0x1fc] sm:$0xcc] %v1396_v51  ;;  %v1563_v12 = vrot.slane %v8427_v4, 4  ;;  %v1582_v38 = vrot.slane %v1577_v6, 4  ;;  %2799 = vmatprep.subr.bf16.mxu0 %v7266_v54  ;;  %vm11320_vm6 = vcmask 859136  }
 0x1e4   : > { %1843 = vrot.lane.b32.xlu1 %v7533_v9, %s11308_s15  ;;  %1812 = vrot.lane.b32.xlu0 %v7556_v15, %s11341_s17 }
 0x1e5   : > { %v1565_v37 = vsel %vm366_vm1, %v1562_v62, %v1563_v12  ;;  %2800 = vmatpush1.bf16.msra.mxu0 %v7268_v57  ;;  %v8510_v57 = vld [vmem:[%s11474_s1] ss:$12 sps:$4 sm:$0xff]  }
 0x1e6   : > { %v1567_v60 = vsel %vm11322_vm10, %v1565_v37, %v8427_v4  ;;  %v8439_v63 = vpop.permute.xlu1 %1596  ;;  %v8441_v1 = vpop.permute.xlu0 %1578  ;;  %v2132_v4 = vld [vmem:[%s11475_s2 + $0x8] sm:$0xff] }
 0x1e7   : > { %1573 = vst [vmem:[#allocation2 + $0x258] sm:$0x33] %v1567_v60  ;;  %v1600_v7 = vrot.slane %v8439_v63, 4  ;;  %v1583_v10 = vrot.slane %v8441_v1, 4  ;;  %v2081_v44 = vld [vmem:[#allocation2 + $0x1e8] sm:$0xff] }
 0x1e8   : > { %1889 = vrot.lane.b32.xlu1 %v7533_v9, %s11310_s25  ;;  %1866 = vrot.lane.b32.xlu0 %v7556_v15, %s11312_s24 }
 0x1e9   : > { %v1602_v14 = vsel %vm366_vm1, %v7750_v49, %v1600_v7  ;;  %v1585_v19 = vsel %vm366_vm1, %v1582_v38, %v1583_v10 }
 0x1ea   : > { %v1603_v20 = vsel %vm11324_vm11, %v1602_v14, %v8439_v63  ;;  %v1587_v21 = vsel %vm11320_vm6, %v1585_v19, %v8441_v1  ;;  %v8460_v24 = vpop.permute.xlu1 %1614  ;;  %v1613_v25 = vpop.permute.xlu0 %1612  ;;  %v2084_v43 = vld [vmem:[#allocation2 + $0x1fc] sm:$0xff] }
 0x1eb   : > { %v7269_v28 = vld [vmem:[#allocation2 + $0x1ec] ss:$20 sps:$4 sm:$0xff]   ;;  %1609 = vst [vmem:[#allocation2 + $0x26c] sm:$0x33] %v1603_v20  ;;  %1593 = vst [vmem:[#allocation2 + $0x258] sm:$0xcc] %v1587_v21  ;;  %v6621_v31 = vcombine.low %v2081_v44, %v2084_v43 }
 0x1ec   : > { %v1619_v49 = vrot.slane %v8460_v24, 4  ;;  %v1618_v29 = vrot.slane %v1613_v25, 4  ;;  %1935 = vrot.lane.b32.xlu1 %v7533_v9, %s11337_s19  ;;  %1912 = vrot.lane.b32.xlu0 %v7556_v15, %s11339_s9  ;;  %v8519_v14 = vld [vmem:[%s11474_s1 + $0x1c] ss:$12 sps:$4 sm:$0xff]  }
 0x1ed   : > { %2921 = vmatprep.subr.bf16.mxu1 %v7269_v28 }
 0x1ee   : > { %v1621_v13 = vsel %vm366_vm1, %v1618_v29, %v1619_v49  ;;  %v1441_v17 = vpop.permute.xlu1 %1440  ;;  %2922 = vmatpush1.bf16.msra.mxu1 %v6621_v31  ;;  %v1409_v16 = vpop.permute.xlu0 %1408 }
 0x1ef   : > { %v1623_v36 = vsel %vm11321_vm8, %v1621_v13, %v8460_v24  ;;  %v1444_v61 = vrot.slane %v1441_v17, 4  ;;  %v1412_v40 = vrot.slane %v1409_v16, 4 }
 0x1f0   : > { %1629 = vst [vmem:[#allocation2 + $0x26c] sm:$0xcc] %v1623_v36  ;;  %1979 = vrot.lane.b32.xlu1 %v7533_v9, %s11352_s29  ;;  %1958 = vrot.lane.b32.xlu0 %v7556_v15, %s11335_s14 }
 0x1f1   : > { %v1448_v50 = vsel %vm366_vm1, %v1443_v56, %v1444_v61  ;;  %1455 = vst.msk [vmem:[#allocation2 + $0x22c] sm:$0x3] %vm339_vm0, %v1444_v61  ;;  %v1416_v41 = vsel %vm366_vm1, %v1411_v47, %v1412_v40  ;;  %v1418_v30 = vsel %vm11315_vm3, %v1409_v16, %v1412_v40 }
 0x1f2   : > { %v1449_v42 = vsel %vm11307_vm15, %v1448_v50, %v1441_v17  ;;  %v1417_v23 = vsel %vm11315_vm3, %v8270_v46, %v1416_v41  ;;  %1424 = vst.msk [vmem:[#allocation2 + $0x218] sm:$0x3] %vm339_vm0, %v1418_v30  ;;  %v1633_v15 = vpop.permute.xlu1 %1632  ;;  %v1461_v62 = vpop.permute.xlu0 %1460  ;;  %vm1642_vm15 = vcmask 711680   ;;  %vm1682_vm3 = vcmask 695296   ;;  %v8544_v17 = vld [vmem:[%s11474_s1 + $0x18] ss:$12 sps:$4 sm:$0xff]  }
 0x1f3   : > { %1454 = vst [vmem:[#allocation2 + $0x224] sm:$0x33] %v1449_v42  ;;  %1423 = vst [vmem:[#allocation2 + $0x210] sm:$0x33] %v1417_v23  ;;  %v1464_v55 = vrot.slane %v1461_v62, 4  ;;  %v1638_v47 = vrot.slane %v1633_v15, 4 }
 0x1f4   : > { %1845 = vrot.lane.b32.xlu1 %v1838_v53, %s11308_s15  ;;  %1814 = vrot.lane.b32.xlu0 %v7533_v9, %s11341_s17  ;;  %s11499_s15 = smov 124   ;;  %s11508_s17 = smov 123  }
 0x1f5   : > { %v1468_v56 = vsel %vm366_vm1, %v1463_v11, %v1464_v55  ;;  %1475 = vst.msk [vmem:[#allocation2 + $0x22c] sm:$0xc] %vm377_vm4, %v1464_v55 }
 0x1f6   : > { %v1469_v46 = vsel %vm11314_vm9, %v1468_v56, %v1461_v62  ;;  %v1653_v22 = vpop.permute.xlu1 %1652  ;;  %v8498_v48 = vpop.permute.xlu0 %1634  ;;  %vm1662_vm9 = vcmask 703488   ;;  %v8579_v56 = vld [vmem:[%s11474_s1 + $0x30] ss:$12 sps:$4 sm:$0xff]  }
 0x1f7   : > { %v7271_v51 = vld [vmem:[#allocation2 + $0x25c] ss:$20 sps:$4 sm:$0xff]   ;;  %v7273_v6 = vld [vmem:[#allocation2 + $0x258] ss:$20 sps:$4 sm:$0xff]   ;;  %1474 = vst [vmem:[#allocation2 + $0x224] sm:$0xcc] %v1469_v46 }
 0x1f8   : > { %v1639_v54 = vrot.slane %v8498_v48, 4  ;;  %1891 = vrot.lane.b32.xlu1 %v1838_v53, %s11310_s25  ;;  %1868 = vrot.lane.b32.xlu0 %v7533_v9, %s11312_s24  ;;  %v1658_v0 = vrot.slane %v1653_v22, 4  ;;  %s11500_s24 = smov 122   ;;  %s11501_s25 = smov 120  }
 0x1f9   : > { %2801 = vmatprep.subr.bf16.mxu0 %v7271_v51 }
 0x1fa   : > { %v1641_v11 = vsel %vm366_vm1, %v1638_v47, %v1639_v54  ;;  %v1673_v37 = vpop.permute.xlu1 %1672  ;;  %2802 = vmatpush1.bf16.msra.mxu0 %v7273_v6  ;;  %v8514_v60 = vpop.permute.xlu0 %1654  ;;  %v2087_v28 = vld [vmem:[#allocation2 + $0x210] sm:$0xff] }
 0x1fb   : > { %v1643_v38 = vsel %vm1642_vm15, %v1641_v11, %v8498_v48  ;;  %v1659_v19 = vrot.slane %v8514_v60, 4  ;;  %v1678_v20 = vrot.slane %v1673_v37, 4 }
 0x1fc   : > { %1649 = vst [vmem:[#allocation2 + $0x280] sm:$0x33] %v1643_v38  ;;  %1937 = vrot.lane.b32.xlu1 %v1838_v53, %s11337_s19  ;;  %1914 = vrot.lane.b32.xlu0 %v7533_v9, %s11339_s9  ;;  %s11506_s19 = smov 127   ;;  %s11507_s9 = smov 125  }
 0x1fd   : > { %v1661_v21 = vsel %vm366_vm1, %v1658_v0, %v1659_v19  ;;  %2804 = vmatmul.mubr.bf16.vlgmr.msra.gmra.mrb[0].mxu0 %v8510_v57 }
 0x1fe   : > { %v1663_v25 = vsel %vm1662_vm9, %v1661_v21, %v8514_v60  ;;  %v1693_v44 = vpop.permute.xlu1 %1692  ;;  %v8531_v43 = vpop.permute.xlu0 %1674  ;;  %v2090_v29 = vld [vmem:[#allocation2 + $0x224] sm:$0xff]  ;;  %2813 = vmatprep.mubr.bf16.mxu0 %v8519_v14 }
 0x1ff   : > { %v7274_v31 = vld [vmem:[#allocation2 + $0x214] ss:$20 sps:$4 sm:$0xff]   ;;  %1669 = vst [vmem:[#allocation2 + $0x280] sm:$0xcc] %v1663_v25  ;;  %v1679_v33 = vrot.slane %v8531_v43, 4  ;;  %v6626_v34 = vcombine.low %v2087_v28, %v2090_v29  ;;  %v1698_v13 = vrot.slane %v1693_v44, 4 }
 0x200   : > { %1981 = vrot.lane.b32.xlu1 %v1838_v53, %s11352_s29  ;;  %1960 = vrot.lane.b32.xlu0 %v7533_v9, %s11335_s14  ;;  %v8553_v9 = vld [vmem:[%s11474_s1 + $0x34] ss:$12 sps:$4 sm:$0xff]   ;;  %s11503_s14 = smov 101  }
 0x201   : > { %v1681_v36 = vsel %vm366_vm1, %v1678_v20, %v1679_v33  ;;  %2923 = vmatprep.subr.bf16.mxu1 %v7274_v31 }
 0x202   : > { %v1683_v16 = vsel %vm1682_vm3, %v1681_v36, %v8531_v43  ;;  %v1481_v61 = vpop.permute.xlu1 %1480  ;;  %2924 = vmatpush1.bf16.msra.mxu1 %v6626_v34  ;;  %v8548_v40 = vpop.permute.xlu0 %1694 }
 0x203   : > { %1689 = vst [vmem:[#allocation2 + $0x294] sm:$0x33] %v1683_v16  ;;  %v1484_v53 = vrot.slane %v1481_v61, 4  ;;  %v1699_v50 = vrot.slane %v8548_v40, 4 }
 0x204   : > { %2144 = vperm.xlu1 %7199, %v2132_v4  }
 0x205   : > { %v1488_v41 = vsel %vm366_vm1, %v1483_v52, %v1484_v53  ;;  %1495 = vst.msk [vmem:[#allocation2 + $0x240] sm:$0x3] %vm339_vm0, %v1484_v53  ;;  %v1701_v30 = vsel %vm366_vm1, %v1698_v13, %v1699_v50  ;;  %2814 = vmatmul.mubr.bf16.gmra.mrb[4].mxu0 %v8544_v17 }
 0x206   : > { %v1489_v42 = vsel %vm11323_vm5, %v1488_v41, %v1481_v61  ;;  %v1703_v23 = vsel %vm11328_vm12, %v1701_v30, %v8548_v40  ;;  %v1521_v15 = vpop.permute.xlu1 %1520  ;;  %v1501_v62 = vpop.permute.xlu0 %1500  ;;  %2823 = vmatprep.mubr.bf16.mxu0 %v8553_v9  ;;  %vm11325_vm5 = vcmask 498688  }
 0x207   : > { %1494 = vst [vmem:[#allocation2 + $0x238] sm:$0x33] %v1489_v42  ;;  %1709 = vst [vmem:[#allocation2 + $0x294] sm:$0xcc] %v1703_v23  ;;  %v1524_v45 = vrot.slane %v1521_v15, 4  ;;  %v1504_v52 = vrot.slane %v1501_v62, 4 }
 0x209   : > { %v1528_v55 = vsel %vm366_vm1, %v1523_v18, %v1524_v45  ;;  %1535 = vst.msk [vmem:[#allocation2 + $0x254] sm:$0x3] %vm339_vm0, %v1524_v45  ;;  %v1508_v47 = vsel %vm366_vm1, %v1503_v8, %v1504_v52 }
 0x20a   : > { %1515 = vst.msk [vmem:[#allocation2 + $0x240] sm:$0xc] %vm377_vm4, %v1504_v52  ;;  %v1529_v46 = vsel %vm11317_vm2, %v1528_v55, %v1521_v15  ;;  %v1509_v22 = vsel %vm11319_vm14, %v1508_v47, %v1501_v62  ;;  %v1713_v2 = vpop.permute.xlu1 %1712  ;;  %v1541_v51 = vpop.permute.xlu0 %1540  ;;  %vm11331_vm2 = vcmask 678912   ;;  %vm11329_vm14 = vcmask 662528  }
 0x20b   : > { %1534 = vst [vmem:[#allocation2 + $0x24c] sm:$0x33] %v1529_v46  ;;  %1514 = vst [vmem:[#allocation2 + $0x238] sm:$0xcc] %v1509_v22  ;;  %v1544_v18 = vrot.slane %v1541_v51, 4  ;;  %v1718_v6 = vrot.slane %v1713_v2, 4 }
 0x20d   : > { %v1548_v59 = vsel %vm366_vm1, %v1543_v27, %v1544_v18  ;;  %1555 = vst.msk [vmem:[#allocation2 + $0x254] sm:$0xc] %vm377_vm4, %v1544_v18  ;;  %2824 = vmatmul.mubr.bf16.gmra.mrb[8].mxu0 %v8579_v56 }
 0x20e   : > { %v1549_v8 = vsel %vm11318_vm7, %v1548_v59, %v1541_v51  ;;  %v1733_v0 = vpop.permute.xlu1 %1732  ;;  %v8589_v11 = vpop.permute.xlu0 %1714  ;;  %v7278_v38 = vld [vmem:[#allocation2 + $0x280] ss:$20 sps:$4 sm:$0xff]   ;;  %v7280_v37 = vld [vmem:[#allocation2 + $0x284] ss:$20 sps:$4 sm:$0xff]   ;;  %2866 = vmatprep.mubr.bf16.mxu0 %v7457_v58  ;;  %vm11330_vm7 = vcmask 670720  }
 0x20f   : > { %1554 = vst [vmem:[#allocation2 + $0x24c] sm:$0xcc] %v1549_v8  ;;  %v1719_v20 = vrot.slane %v8589_v11, 4  ;;  %2834 = vmatprep.subr.bf16.mxu0 %v7280_v37  ;;  %v1738_v26 = vrot.slane %v1733_v0, 4  ;;  %v2133_v0 = vld [vmem:[%s11475_s2 + $0x10] sm:$0xff] }
 0x210   : > { %2835 = vmatpush1.bf16.msra.mxu0 %v7278_v38  ;;  %2149 = vperm.xlu1 %7199, %v2133_v0  }
 0x211   : > { %v1721_v27 = vsel %vm366_vm1, %v1718_v6, %v1719_v20 }
 0x212   : > { %v1723_v21 = vsel %vm11331_vm2, %v1721_v27, %v8589_v11  ;;  %v1753_v25 = vpop.permute.xlu1 %1752  ;;  %v8598_v44 = vpop.permute.xlu0 %1734  ;;  %v2093_v16 = vld [vmem:[#allocation2 + $0x238] sm:$0xff] }
 0x213   : > { %1729 = vst [vmem:[#allocation2 + $0x2a8] sm:$0x33] %v1723_v21  ;;  %v1739_v28 = vrot.slane %v8598_v44, 4  ;;  %v1758_v29 = vrot.slane %v1753_v25, 4  ;;  %v2134_v21 = vld [vmem:[%s11475_s2 + $0x18] sm:$0xff] }
 0x215   : > { %v1741_v31 = vsel %vm366_vm1, %v1738_v26, %v1739_v28 }
 0x216   : > { %v1743_v34 = vsel %vm11330_vm7, %v1741_v31, %v8598_v44  ;;  %v1773_v13 = vpop.permute.xlu1 %1772  ;;  %v8606_v36 = vpop.permute.xlu0 %1754  ;;  %v2096_v61 = vld [vmem:[#allocation2 + $0x24c] sm:$0xff] }
 0x217   : > { %v7282_v53 = vld [vmem:[#allocation2 + $0x23c] ss:$20 sps:$4 sm:$0xff]   ;;  %1749 = vst [vmem:[#allocation2 + $0x2a8] sm:$0xcc] %v1743_v34  ;;  %v1776_v41 = vrot.slane %v1773_v13, 4  ;;  %v1759_v30 = vrot.slane %v8606_v36, 4  ;;  %v6631_v42 = vcombine.low %v2093_v16, %v2096_v61 }
 0x218   : > { %2925 = vmatprep.subr.bf16.mxu1 %v7282_v53  ;;  %v2135_v13 = vld [vmem:[%s11475_s2 + $0x20] sm:$0xff]  ;;  %v2136_v53 = vld [vmem:[%s11475_s2 + $0x28] sm:$0xff] }
 0x219   : > { %v1778_v23 = vsel %vm366_vm1, %v1776_v41, %v7856_v39  ;;  %v1761_v15 = vsel %vm366_vm1, %v1758_v29, %v1759_v30  ;;  %2926 = vmatpush1.bf16.msra.mxu1 %v6631_v42  ;;  %2159 = vperm.xlu1 %7199, %v2135_v13  }
 0x21a   : > { %v1779_v62 = vsel %vm709_vm13, %v1778_v23, %v7848_v32  ;;  %v1763_v45 = vsel %vm11329_vm14, %v1761_v15, %v8606_v36  ;;  %v1581_v52 = vpop.permute.xlu1 %1580  ;;  %v1561_v55 = vpop.permute.xlu0 %1560 }
 0x21b   : > { %1785 = vst [vmem:[#allocation2 + $0x2bc] sm:$0xcc] %v1779_v62  ;;  %1769 = vst [vmem:[#allocation2 + $0x2bc] sm:$0x33] %v1763_v45  ;;  %v1584_v47 = vrot.slane %v1581_v52, 4  ;;  %v1564_v46 = vrot.slane %v1561_v55, 4 }
 0x21d   : > { %v1588_v22 = vsel %vm366_vm1, %v1583_v10, %v1584_v47  ;;  %1595 = vst.msk [vmem:[#allocation2 + $0x268] sm:$0xc] %vm377_vm4, %v1584_v47  ;;  %v1568_v2 = vsel %vm366_vm1, %v1563_v12, %v1564_v46  ;;  %v2131_v10 = vld [vmem:[%s11475_s2] sm:$0xff]  ;;  %s11626_s2 = smov 7  }
 0x21e   : > { %1575 = vst.msk [vmem:[#allocation2 + $0x268] sm:$0x3] %vm339_vm0, %v1564_v46  ;;  %v1589_v32 = vsel %vm11320_vm6, %v1588_v22, %v1581_v52  ;;  %v1569_v51 = vsel %vm11322_vm10, %v1568_v2, %v1561_v55  ;;  %v1617_v18 = vpop.permute.xlu1 %1616  ;;  %v1599_v6 = vpop.permute.xlu0 %1598  ;;  %2139 = vperm.xlu0 %7198, %v2131_v10   ;;  %vm1798_vm6 = vcmask 523264   ;;  %vm1851_vm10 = vcmask 506880  }
 0x21f   : > { %1594 = vst [vmem:[#allocation2 + $0x260] sm:$0xcc] %v1589_v32  ;;  %1574 = vst [vmem:[#allocation2 + $0x260] sm:$0x33] %v1569_v51  ;;  %v1620_v59 = vrot.slane %v1617_v18, 4  ;;  %v1601_v1 = vrot.slane %v1599_v6, 4 }
 0x221   : > { %v1624_v12 = vsel %vm366_vm1, %v1619_v49, %v1620_v59  ;;  %1631 = vst.msk [vmem:[#allocation2 + $0x27c] sm:$0xc] %vm377_vm4, %v1620_v59  ;;  %v1604_v8 = vsel %vm366_vm1, %v1600_v7, %v1601_v1 }
 0x222   : > { %1611 = vst.msk [vmem:[#allocation2 + $0x27c] sm:$0x3] %vm339_vm0, %v1601_v1  ;;  %v1625_v38 = vsel %vm11321_vm8, %v1624_v12, %v1617_v18  ;;  %v1605_v24 = vsel %vm11324_vm11, %v1604_v8, %v1599_v6  ;;  %v8647_v37 = vpop.permute.xlu1 %1790  ;;  %v1789_v49 = vpop.permute.xlu0 %1788  ;;  %v7284_v26 = vld [vmem:[#allocation2 + $0x2a8] ss:$20 sps:$4 sm:$0xff]   ;;  %v7286_v27 = vld [vmem:[#allocation2 + $0x2ac] ss:$20 sps:$4 sm:$0xff]   ;;  %2154 = vperm.xlu0 %7198, %v2134_v21  }
 0x223   : > { %1630 = vst [vmem:[#allocation2 + $0x274] sm:$0xcc] %v1625_v38  ;;  %1610 = vst [vmem:[#allocation2 + $0x274] sm:$0x33] %v1605_v24  ;;  %v1795_v63 = vrot.slane %v8647_v37, 4  ;;  %v1794_v7 = vrot.slane %v1789_v49, 4  ;;  %2836 = vmatprep.subr.bf16.mxu0 %v7286_v27 }
 0x224   : > { %2837 = vmatpush1.bf16.msra.mxu0 %v7284_v26  ;;  %vm1820_vm8 = vcmask 515072   ;;  %vm11326_vm11 = vcmask 490496  }
 0x225   : > { %v1797_v25 = vsel %vm366_vm1, %v1794_v7, %v1795_v63 }
 0x226   : > { %v1799_v29 = vsel %vm1798_vm6, %v1797_v25, %v8647_v37  ;;  %v8658_v31 = vpop.permute.xlu1 %1810  ;;  %v1809_v34 = vpop.permute.xlu0 %1808  ;;  %2164 = vperm.xlu0 %7198, %v2136_v53  }
 0x227   : > { %1805 = vst [vmem:[#allocation2 + $0x2d0] sm:$0x33] %v1799_v29  ;;  %v1817_v16 = vrot.slane %v8658_v31, 4  ;;  %v1816_v61 = vrot.slane %v1809_v34, 4 }
 0x229   : > { %v1819_v41 = vsel %vm366_vm1, %v1816_v61, %v1817_v16 }
 0x22a   : > { %v1821_v42 = vsel %vm1820_vm8, %v1819_v41, %v8658_v31  ;;  %v8672_v23 = vpop.permute.xlu1 %1841  ;;  %v1840_v15 = vpop.permute.xlu0 %1839  ;;  %v7287_v62 = vld [vmem:[#allocation2 + $0x264] ss:$20 sps:$4 sm:$0xff]   ;;  %v7289_v45 = vld [vmem:[#allocation2 + $0x260] ss:$20 sps:$4 sm:$0xff]  }
 0x22b   : > { %1828 = vst [vmem:[#allocation2 + $0x2d0] sm:$0xcc] %v1821_v42  ;;  %v1848_v52 = vrot.slane %v8672_v23, 4  ;;  %v1847_v55 = vrot.slane %v1840_v15, 4  ;;  %2927 = vmatprep.subr.bf16.mxu1 %v7287_v62 }
 0x22c   : > { %2928 = vmatpush1.bf16.msra.mxu1 %v7289_v45 }
 0x22d   : > { %v1850_v47 = vsel %vm366_vm1, %v1847_v55, %v1848_v52 }
 0x22e   : > { %v1852_v46 = vsel %vm1851_vm10, %v1850_v47, %v8672_v23  ;;  %v8680_v22 = vpop.permute.xlu1 %1864  ;;  %v1863_v2 = vpop.permute.xlu0 %1862 }
 0x22f   : > { %1859 = vst [vmem:[#allocation2 + $0x2e4] sm:$0x33] %v1852_v46  ;;  %v1871_v32 = vrot.slane %v8680_v22, 4  ;;  %v1870_v51 = vrot.slane %v1863_v2, 4  ;;  %2930 = vmatmul.mubr.bf16.vlgmr.msra.gmra.mrb[0].mxu1 %v8510_v57 }
 0x230   : > { %2939 = vmatprep.mubr.bf16.mxu1 %v8519_v14 }
 0x231   : > { %v1873_v18 = vsel %vm366_vm1, %v1870_v51, %v1871_v32 }
 0x232   : > { %v1875_v6 = vsel %vm11325_vm5, %v1873_v18, %v8680_v22  ;;  %v8690_v59 = vpop.permute.xlu1 %1887  ;;  %v1886_v1 = vpop.permute.xlu0 %1885  ;;  %vm11327_vm5 = vcmask 482304  }
 0x233   : > { %1882 = vst [vmem:[#allocation2 + $0x2e4] sm:$0xcc] %v1875_v6  ;;  %v1894_v10 = vrot.slane %v8690_v59, 4  ;;  %v1893_v4 = vrot.slane %v1886_v1, 4 }
 0x235   : > { %v1896_v12 = vsel %vm366_vm1, %v1893_v4, %v1894_v10 }
 0x236   : > { %v1898_v8 = vsel %vm11326_vm11, %v1896_v12, %v8690_v59  ;;  %v8698_v0 = vpop.permute.xlu1 %1910  ;;  %v1909_v38 = vpop.permute.xlu0 %1908  ;;  %vm1943_vm11 = vcmask 474112  }
 0x237   : > { %1905 = vst [vmem:[#allocation2 + $0x2f8] sm:$0x33] %v1898_v8  ;;  %v1917_v24 = vrot.slane %v8698_v0, 4  ;;  %v1916_v49 = vrot.slane %v1909_v38, 4  ;;  %2940 = vmatmul.mubr.bf16.gmra.mrb[4].mxu1 %v8544_v17 }
 0x238   : > { %2949 = vmatprep.mubr.bf16.mxu1 %v8553_v9 }
 0x239   : > { %v1919_v26 = vsel %vm366_vm1, %v1916_v49, %v1917_v24 }
 0x23a   : > { %v1921_v27 = vsel %vm11327_vm5, %v1919_v26, %v8698_v0  ;;  %v8708_v7 = vpop.permute.xlu1 %1933  ;;  %v1932_v21 = vpop.permute.xlu0 %1931  ;;  %v7290_v25 = vld [vmem:[#allocation2 + $0x2d0] ss:$20 sps:$4 sm:$0xff]   ;;  %v7292_v29 = vld [vmem:[#allocation2 + $0x2d4] ss:$20 sps:$4 sm:$0xff]   ;;  %vm1966_vm5 = vcmask 465920  }
 0x23b   : > { %1928 = vst [vmem:[#allocation2 + $0x2f8] sm:$0xcc] %v1921_v27  ;;  %v1940_v34 = vrot.slane %v8708_v7, 4  ;;  %v1939_v13 = vrot.slane %v1932_v21, 4  ;;  %2838 = vmatprep.subr.bf16.mxu0 %v7292_v29 }
 0x23c   : > { %2839 = vmatpush1.bf16.msra.mxu0 %v7290_v25 }
 0x23d   : > { %v1942_v61 = vsel %vm366_vm1, %v1939_v13, %v1940_v34 }
 0x23e   : > { %v1944_v53 = vsel %vm1943_vm11, %v1942_v61, %v8708_v7  ;;  %v8716_v41 = vpop.permute.xlu1 %1956  ;;  %v1955_v42 = vpop.permute.xlu0 %1954 }
 0x23f   : > { %1951 = vst [vmem:[#allocation2 + $0x30c] sm:$0x33] %v1944_v53  ;;  %v1963_v15 = vrot.slane %v8716_v41, 4  ;;  %v1962_v62 = vrot.slane %v1955_v42, 4  ;;  %2950 = vmatmul.mubr.bf16.gmra.mrb[8].mxu1 %v8579_v56 }
 0x240   : > { %2992 = vmatprep.mubr.bf16.mxu1 %v7457_v58 }
 0x241   : > { %v1965_v45 = vsel %vm366_vm1, %v1962_v62, %v1963_v15 }
 0x242   : > { %v1967_v55 = vsel %vm1966_vm5, %v1965_v45, %v8716_v41  ;;  %v1657_v47 = vpop.permute.xlu1 %1656  ;;  %v1637_v46 = vpop.permute.xlu0 %1636 }
 0x243   : > { %1974 = vst [vmem:[#allocation2 + $0x30c] sm:$0xcc] %v1967_v55  ;;  %v1660_v2 = vrot.slane %v1657_v47, 4  ;;  %v1640_v51 = vrot.slane %v1637_v46, 4 }
 0x245   : > { %v1664_v18 = vsel %vm366_vm1, %v1659_v19, %v1660_v2  ;;  %1671 = vst.msk [vmem:[#allocation2 + $0x290] sm:$0xc] %vm377_vm4, %v1660_v2  ;;  %v1644_v6 = vsel %vm366_vm1, %v1639_v54, %v1640_v51 }
 0x246   : > { %1651 = vst.msk [vmem:[#allocation2 + $0x290] sm:$0x3] %vm339_vm0, %v1640_v51  ;;  %v1665_v1 = vsel %vm1662_vm9, %v1664_v18, %v1657_v47  ;;  %v1645_v4 = vsel %vm1642_vm15, %v1644_v6, %v1637_v46  ;;  %v1697_v12 = vpop.permute.xlu1 %1696  ;;  %v1677_v8 = vpop.permute.xlu0 %1676 }
 0x247   : > { %1670 = vst [vmem:[#allocation2 + $0x288] sm:$0xcc] %v1665_v1  ;;  %1650 = vst [vmem:[#allocation2 + $0x288] sm:$0x33] %v1645_v4  ;;  %v1700_v38 = vrot.slane %v1697_v12, 4  ;;  %v1680_v60 = vrot.slane %v1677_v8, 4 }
 0x249   : > { %v1704_v19 = vsel %vm366_vm1, %v1699_v50, %v1700_v38  ;;  %1711 = vst.msk [vmem:[#allocation2 + $0x2a4] sm:$0xc] %vm377_vm4, %v1700_v38  ;;  %v1684_v48 = vsel %vm366_vm1, %v1679_v33, %v1680_v60 }
 0x24a   : > { %1691 = vst.msk [vmem:[#allocation2 + $0x2a4] sm:$0x3] %vm339_vm0, %v1680_v60  ;;  %v1705_v54 = vsel %vm11328_vm12, %v1704_v19, %v1697_v12  ;;  %v1685_v49 = vsel %vm1682_vm3, %v1684_v48, %v1677_v8  ;;  %v1717_v26 = vpop.permute.xlu1 %1716  ;;  %v8746_v27 = vpop.permute.xlu0 %1977  ;;  %v7296_v21 = vld [vmem:[#allocation2 + $0x2f8] ss:$20 sps:$4 sm:$0xff]   ;;  %v7298_v25 = vld [vmem:[#allocation2 + $0x2fc] ss:$20 sps:$4 sm:$0xff]  }
 0x24b   : > { %1710 = vst [vmem:[#allocation2 + $0x29c] sm:$0xcc] %v1705_v54  ;;  %1690 = vst [vmem:[#allocation2 + $0x29c] sm:$0x33] %v1685_v49  ;;  %v1720_v40 = vrot.slane %v1717_v26, 4  ;;  %v1983_v50 = vrot.slane %v8746_v27, 4  ;;  %2840 = vmatprep.subr.bf16.mxu0 %v7298_v25 }
 0x24c   : > { %2841 = vmatpush1.bf16.msra.mxu0 %v7296_v21  ;;  %vm11476_vm12 = vcmask 457728   ;;  %v7307_v19 = vld [vmem:[#allocation2 + $0x150] ss:$20 sps:$4 sm:$0xff]   ;;  %v8800_v48 = vld [vmem:[%s11474_s1 + $0x8] ss:$12 sps:$4 sm:$0xff]  }
 0x24d   : > { %v1724_v43 = vsel %vm366_vm1, %v1719_v20, %v1720_v40  ;;  %1731 = vst.msk [vmem:[#allocation2 + $0x2b8] sm:$0x3] %vm339_vm0, %v1720_v40  ;;  %v1985_v33 = vsel %vm366_vm1, %v7959_v35, %v1983_v50  ;;  %v7310_v40 = vld [vmem:[#allocation2 + $0x178] ss:$20 sps:$4 sm:$0xff]  }
 0x24e   : > { %v1725_v29 = vsel %vm11331_vm2, %v1724_v43, %v1717_v26  ;;  %v1986_v13 = vsel %vm11476_vm12, %v1985_v33, %v8746_v27  ;;  %v1757_v61 = vpop.permute.xlu1 %1756  ;;  %v1737_v53 = vpop.permute.xlu0 %1736  ;;  %vm2755_vm12 = vcmask 1041408   ;;  %v7309_v26 = vld [vmem:[#allocation2 + $0x10] ss:$20 sps:$4 sm:$0xff]   ;;  %vm11478_vm2 = vcmask 498688  }
 0x24f   : > { %1730 = vst [vmem:[#allocation2 + $0x2b0] sm:$0x33] %v1725_v29  ;;  %1993 = vst [vmem:[#allocation2 + $0x320] sm:$0x33] %v1986_v13  ;;  %v1760_v11 = vrot.slane %v1757_v61, 4  ;;  %v1740_v42 = vrot.slane %v1737_v53, 4 }
 0x251   : > { %v1764_v20 = vsel %vm366_vm1, %v1759_v30, %v1760_v11  ;;  %1771 = vst.msk [vmem:[#allocation2 + $0x2cc] sm:$0x3] %vm339_vm0, %v1760_v11  ;;  %v1744_v35 = vsel %vm366_vm1, %v1739_v28, %v1740_v42 }
 0x252   : > { %1751 = vst.msk [vmem:[#allocation2 + $0x2b8] sm:$0xc] %vm377_vm4, %v1740_v42  ;;  %v1765_v62 = vsel %vm11329_vm14, %v1764_v20, %v1757_v61  ;;  %v1745_v45 = vsel %vm11330_vm7, %v1744_v35, %v1737_v53  ;;  %v1793_v55 = vpop.permute.xlu1 %1792  ;;  %v1775_v47 = vpop.permute.xlu0 %1774  ;;  %v7302_v46 = vld [vmem:[#allocation2 + $0x288] ss:$20 sps:$4 sm:$0xff]   ;;  %v7304_v2 = vld [vmem:[#allocation2 + $0x28c] ss:$20 sps:$4 sm:$0xff]  }
 0x253   : > { %1770 = vst [vmem:[#allocation2 + $0x2c4] sm:$0x33] %v1765_v62  ;;  %1750 = vst [vmem:[#allocation2 + $0x2b0] sm:$0xcc] %v1745_v45  ;;  %v1796_v36 = vrot.slane %v1793_v55, 4  ;;  %v1777_v30 = vrot.slane %v1775_v47, 4  ;;  %2960 = vmatprep.subr.bf16.mxu1 %v7304_v2 }
 0x254   : > { %2961 = vmatpush1.bf16.msra.mxu1 %v7302_v46  ;;  %vm11351_vm14 = vcmask 556032   ;;  %vm11477_vm7 = vcmask 490496   ;;  %v7314_v61 = vld [vmem:[#allocation2 + $0x38] ss:$20 sps:$4 sm:$0xff]   ;;  %v7315_v42 = vld [vmem:[#allocation2 + $0x1a0] ss:$20 sps:$4 sm:$0xff]  }
 0x255   : > { %v1800_v44 = vsel %vm366_vm1, %v1795_v63, %v1796_v36  ;;  %1807 = vst.msk [vmem:[#allocation2 + $0x2e0] sm:$0x3] %vm339_vm0, %v1796_v36  ;;  %v1780_v28 = vsel %vm366_vm1, %v7856_v39, %v1777_v30  ;;  %v8848_v20 = vld [vmem:[%s11474_s1 + $0x20] ss:$12 sps:$4 sm:$0xff]   ;;  %v7318_v46 = vld [vmem:[#allocation2 + $0x1c8] ss:$20 sps:$4 sm:$0xff]  }
 0x256   : > { %1787 = vst.msk [vmem:[#allocation2 + $0x2cc] sm:$0xc] %vm377_vm4, %v1777_v30  ;;  %v1801_v51 = vsel %vm1798_vm6, %v1800_v44, %v1793_v55  ;;  %v1781_v18 = vsel %vm709_vm13, %v1780_v28, %v1775_v47  ;;  %v8779_v6 = vpop.permute.xlu1 %1843  ;;  %v8781_v1 = vpop.permute.xlu0 %1812  ;;  %v2128_v4 = vld [vmem:[#allocation2 + $0x320] sm:$0x33]  ;;  %v7322_v28 = vld [vmem:[#allocation2 + $0x88] ss:$20 sps:$4 sm:$0xff]  }
 0x257   : > { %1806 = vst [vmem:[#allocation2 + $0x2d8] sm:$0x33] %v1801_v51  ;;  %1786 = vst [vmem:[#allocation2 + $0x2c4] sm:$0xcc] %v1781_v18  ;;  %v1849_v37 = vrot.slane %v8779_v6, 4  ;;  %v1818_v63 = vrot.slane %v8781_v1, 4  ;;  %v6660_v39 = vcombine.high %v2128_v4, %v2128_v4  ;;  %v6659_v12 = vcombine.low %v2128_v4, %v2128_v4 }
 0x258   : > { %v7317_v45 = vld [vmem:[#allocation2 + $0x60] ss:$20 sps:$4 sm:$0xff]   ;;  %v7323_v51 = vld [vmem:[#allocation2 + $0x1f0] ss:$20 sps:$4 sm:$0xff]  }
 0x259   : > { %v1853_v8 = vsel %vm366_vm1, %v1848_v52, %v1849_v37  ;;  %v1822_v38 = vsel %vm366_vm1, %v1817_v16, %v1818_v63  ;;  %6664 = vmatprep.subr.msk.bf16.mxu0 %vm2755_vm12, %v6660_v39  ;;  %v2757_v60 = vsel %vm2755_vm12, %v6659_v12, 0  ;;  %v8888_v18 = vld [vmem:[%s11474_s1 + $0x38] ss:$12 sps:$4 sm:$0xff]  }
 0x25a   : > { %v1854_v23 = vsel %vm1851_vm10, %v1853_v8, %v8779_v6  ;;  %v1823_v52 = vsel %vm1820_vm8, %v1822_v38, %v8781_v1  ;;  %v8806_v54 = vpop.permute.xlu1 %1889  ;;  %2843 = vmatpush1.bf16.msra.mxu0 %v2757_v60  ;;  %v8808_v31 = vpop.permute.xlu0 %1866  ;;  %v7326_v39 = vld [vmem:[#allocation2 + $0x218] ss:$20 sps:$4 sm:$0xff]  }
 0x25b   : > { %1860 = vst [vmem:[#allocation2 + $0x2ec] sm:$0x33] %v1854_v23  ;;  %1829 = vst [vmem:[#allocation2 + $0x2d8] sm:$0xcc] %v1823_v52  ;;  %v1895_v16 = vrot.slane %v8806_v54, 4  ;;  %v1872_v49 = vrot.slane %v8808_v31, 4  ;;  %6696 = vmatprep.subr.bf16.mxu0 %v7307_v19 }
 0x25c   : > { %v7371_v19 = vld [vmem:[%s11474_s1 + $0x4] ss:$12 sps:$4 sm:$0xff]   ;;  %s11624_s1 = smov 8  }
 0x25d   : > { %v1899_v21 = vsel %vm366_vm1, %v1894_v10, %v1895_v16  ;;  %v1876_v25 = vsel %vm366_vm1, %v1871_v32, %v1872_v49  ;;  %6665 = vmatmul.mubr.msk.bf16.vlgmr.msra.gmra.mrb[0].mxu0 %vm11351_vm14, %v8800_v48 }
 0x25e   : > { %v1900_v43 = vsel %vm11477_vm7, %v1899_v21, %v8806_v54  ;;  %v1877_v33 = vsel %vm11478_vm2, %v1876_v25, %v8808_v31  ;;  %v8828_v29 = vpop.permute.xlu1 %1935  ;;  %6697 = vmatpush3.bf16.msra.mxu0 %v7309_v26  ;;  %v8830_v59 = vpop.permute.xlu0 %1912  ;;  %v7311_v10 = vld [vmem:[#allocation2 + $0x2b0] ss:$20 sps:$4 sm:$0xff]   ;;  %v7313_v13 = vld [vmem:[#allocation2 + $0x2b4] ss:$20 sps:$4 sm:$0xff]   ;;  %2876 = vmatprep.mubr.bf16.mxu0 %v7457_v58  ;;  %vm11479_vm2 = vcmask 482304   ;;  %vm11480_vm7 = vcmask 457728  }
 0x25f   : > { %1906 = vst [vmem:[#allocation2 + $0x300] sm:$0x33] %v1900_v43  ;;  %1883 = vst [vmem:[#allocation2 + $0x2ec] sm:$0xcc] %v1877_v33  ;;  %v1941_v22 = vrot.slane %v8828_v29, 4  ;;  %v1918_v32 = vrot.slane %v8830_v59, 4  ;;  %6698 = vmatprep.subr.bf16.mxu0 %v7310_v40  ;;  %2962 = vmatprep.subr.bf16.mxu1 %v7313_v13 }
 0x260   : > { %2963 = vmatpush1.bf16.msra.mxu1 %v7311_v10  ;;  %v7330_v31 = vld [vmem:[#allocation2 + $0xd8] ss:$20 sps:$4 sm:$0xff]   ;;  %v7332_v26 = vld [vmem:[#allocation2 + $0x240] ss:$20 sps:$4 sm:$0xff]   ;;  %v11332_v10 = vmov 0.0  }
 0x261   : > { %v1945_v53 = vsel %vm366_vm1, %v1940_v34, %v1941_v22  ;;  %v1922_v11 = vsel %vm366_vm1, %v1917_v24, %v1918_v32  ;;  %v7337_v13 = vld [vmem:[#allocation2 + $0x290] ss:$20 sps:$4 sm:$0xff]  }
 0x262   : > { %v1946_v35 = vsel %vm1943_vm11, %v1945_v53, %v8828_v29  ;;  %v1923_v7 = vsel %vm11479_vm2, %v1922_v11, %v8830_v59  ;;  %v8854_v34 = vpop.permute.xlu1 %1979  ;;  %6699 = vmatpush3.bf16.msra.mxu0 %v7314_v61  ;;  %v8856_v62 = vpop.permute.xlu0 %1958  ;;  %vm11481_vm2 = vcmask 490496   ;;  %v7334_v29 = vld [vmem:[#allocation2 + $0x100] ss:$20 sps:$4 sm:$0xff]   ;;  %v7335_v59 = vld [vmem:[#allocation2 + $0x268] ss:$20 sps:$4 sm:$0xff]  }
 0x263   : > { %1952 = vst [vmem:[#allocation2 + $0x314] sm:$0x33] %v1946_v35  ;;  %1929 = vst [vmem:[#allocation2 + $0x300] sm:$0xcc] %v1923_v7  ;;  %v1984_v0 = vrot.slane %v8854_v34, 4  ;;  %v1964_v24 = vrot.slane %v8856_v62, 4  ;;  %6700 = vmatprep.subr.bf16.mxu0 %v7315_v42 }
 0x265   : > { %v1987_v55 = vsel %vm366_vm1, %v1983_v50, %v1984_v0  ;;  %v1968_v47 = vsel %vm366_vm1, %v1963_v15, %v1964_v24  ;;  %6666 = vmatmul.mubr.msk.bf16.gmra.mrb[4].mxu0 %vm11351_vm14, %v8848_v20 }
 0x266   : > { %v1988_v2 = vsel %vm11480_vm7, %v1987_v55, %v8854_v34  ;;  %v1969_v36 = vsel %vm1966_vm5, %v1968_v47, %v8856_v62  ;;  %v1846_v30 = vpop.permute.xlu1 %1845  ;;  %6701 = vmatpush3.bf16.msra.mxu0 %v7317_v45  ;;  %v1815_v27 = vpop.permute.xlu0 %1814  ;;  %v7319_v50 = vld [vmem:[#allocation2 + $0x2d8] ss:$20 sps:$4 sm:$0xff]   ;;  %v7321_v44 = vld [vmem:[#allocation2 + $0x2dc] ss:$20 sps:$4 sm:$0xff]   ;;  %2886 = vmatprep.mubr.bf16.mxu0 %v7457_v58  ;;  %vm11482_vm7 = vcmask 498688  }
 0x267   : > { %1994 = vst [vmem:[#allocation2 + $0x328] sm:$0x33] %v1988_v2  ;;  %1975 = vst [vmem:[#allocation2 + $0x314] sm:$0xcc] %v1969_v36  ;;  %v1855_v41 = vsel %vm1851_vm10, %v1849_v37, %v1846_v30  ;;  %v1824_v15 = vsel %vm1820_vm8, %v1818_v63, %v1815_v27  ;;  %6702 = vmatprep.subr.bf16.mxu0 %v7318_v46  ;;  %2964 = vmatprep.subr.bf16.mxu1 %v7321_v44  ;;  %v7325_v63 = vld [vmem:[#allocation2 + $0xb0] ss:$20 sps:$4 sm:$0xff]  }
 0x268   : > { %1861 = vst.msk [vmem:[#allocation2 + $0x2f4] sm:$0x3] %vm339_vm0, %v1855_v41  ;;  %2965 = vmatpush1.bf16.msra.mxu1 %v7319_v50 }
 0x269   : > { %1830 = vst.msk [vmem:[#allocation2 + $0x2e0] sm:$0xc] %vm377_vm4, %v1824_v15 }
 0x26a   : > { %v1892_v6 = vpop.permute.xlu1 %1891  ;;  %6703 = vmatpush3.bf16.msra.mxu0 %v7322_v28  ;;  %v1869_v4 = vpop.permute.xlu0 %1868 }
 0x26b   : > { %v1901_v1 = vsel %vm11481_vm2, %v1895_v16, %v1892_v6  ;;  %v1878_v37 = vsel %vm11482_vm7, %v1872_v49, %v1869_v4  ;;  %6704 = vmatprep.subr.bf16.mxu0 %v7323_v51  ;;  %vm11483_vm2 = vcmask 482304   ;;  %vm11484_vm7 = vcmask 457728  }
 0x26c   : > { %1907 = vst.msk [vmem:[#allocation2 + $0x308] sm:$0x3] %vm339_vm0, %v1901_v1 }
 0x26d   : > { %1884 = vst.msk [vmem:[#allocation2 + $0x2f4] sm:$0xc] %vm377_vm4, %v1878_v37  ;;  %6667 = vmatmul.mubr.msk.bf16.gmra.mrb[8].mxu0 %vm11351_vm14, %v8888_v18 }
 0x26e   : > { %v1938_v12 = vpop.permute.xlu1 %1937  ;;  %6705 = vmatpush3.bf16.msra.mxu0 %v7325_v63  ;;  %v1915_v8 = vpop.permute.xlu0 %1914  ;;  %v7327_v38 = vld [vmem:[#allocation2 + $0x300] ss:$20 sps:$4 sm:$0xff]   ;;  %v7329_v60 = vld [vmem:[#allocation2 + $0x304] ss:$20 sps:$4 sm:$0xff]   ;;  %3055 = vmatprep.mubr.bf16.mxu0 %v7371_v19  ;;  %v2129_v54 = vld [vmem:[#allocation2 + $0x328] sm:$0x33] }
 0x26f   : > { %v1947_v23 = vsel %vm1943_vm11, %v1941_v22, %v1938_v12  ;;  %v1924_v52 = vsel %vm11483_vm2, %v1918_v32, %v1915_v8  ;;  %6706 = vmatprep.subr.bf16.mxu0 %v7326_v39  ;;  %2966 = vmatprep.subr.bf16.mxu1 %v7329_v60  ;;  %v6662_v16 = vcombine.high %v2129_v54, %v2129_v54  ;;  %v7336_v22 = vld [vmem:[#allocation2 + $0x128] ss:$20 sps:$4 sm:$0xff]   ;;  %v7338_v32 = vld [vmem:[#allocation2 + $0x2b8] ss:$20 sps:$4 sm:$0xff]   ;;  %v3325_v12 = vsub.s32 2, %v7516_v3 }
 0x270   : > { %1953 = vst.msk [vmem:[#allocation2 + $0x31c] sm:$0x3] %vm339_vm0, %v1947_v23  ;;  %v6661_v49 = vcombine.low %v2129_v54, %v2129_v54  ;;  %2967 = vmatpush1.bf16.msra.mxu1 %v7327_v38  ;;  %vm3308_vm2 = vcmask 1042432  }
 0x271   : > { %1930 = vst.msk [vmem:[#allocation2 + $0x308] sm:$0xc] %vm377_vm4, %v1924_v52  ;;  %6668 = vmatprep.subr.msk.bf16.mxu1 %vm2755_vm12, %v6662_v16 }
 0x272   : > { %v1982_v21 = vpop.permute.xlu1 %1981  ;;  %6707 = vmatpush3.bf16.msra.mxu0 %v7330_v31  ;;  %v1961_v25 = vpop.permute.xlu0 %1960  ;;  %v2763_v33 = vsel %vm2755_vm12, %v6661_v49, 0 }
 0x273   : > { %v1989_v40 = vsel %vm11484_vm7, %v1984_v0, %v1982_v21  ;;  %v1970_v43 = vsel %vm1966_vm5, %v1964_v24, %v1961_v25  ;;  %6708 = vmatprep.subr.bf16.mxu0 %v7332_v26  ;;  %vm11497_vm7 = vcmask 818176  }
 0x274   : > { %1995 = vst.msk [vmem:[#allocation2 + $0x330] sm:$0x3] %vm339_vm0, %v1989_v40  ;;  %2969 = vmatpush1.bf16.msra.mxu1 %v2763_v33  ;;  %v7339_v61 = vld [vmem:[#allocation2 + $0x2e0] ss:$20 sps:$4 sm:$0xff]   ;;  %vm11349_vm0 = vmmov 0  }
 0x275   : > { %1976 = vst.msk [vmem:[#allocation2 + $0x31c] sm:$0xc] %vm377_vm4, %v1970_v43  ;;  %6789 = vmatprep.subr.bf16.mxu1 %v11332_v10  ;;  %v3329_v43 = vsub.s32 3, %v7516_v3  ;;  %vm11334_vm4 = vcmask 1040384  }
 0x276   : > { %6709 = vmatpush3.bf16.msra.mxu0 %v7334_v29 }
 0x277   : > { %6710 = vmatprep.subr.bf16.mxu0 %v7335_v59  ;;  %6669 = vmatmul.mubr.msk.bf16.vlgmr.msra.gmra.mrb[0].mxu1 %vm11351_vm14, %v8800_v48 }
 0x278   : > { %6790 = vmatpush3.bf16.msra.mxu1 %v7337_v13  ;;  %3002 = vmatprep.mubr.bf16.mxu1 %v7457_v58 }
 0x279   : > { %6791 = vmatprep.subr.bf16.mxu1 %v11332_v10 }
 0x27a   : > { %6711 = vmatpush3.bf16.msra.mxu0 %v7336_v22 }
 0x27b   : > { %v7341_v11 = vld [vmem:[#allocation2 + $0x330] ss:$0 sps:$4 sm:$0x33]  }
 0x27c   : > { %6792 = vmatpush3.bf16.msra.mxu1 %v7338_v32  ;;  %v7340_v53 = vld [vmem:[#allocation2 + $0x308] ss:$20 sps:$4 sm:$0xff]  }
 0x27d   : > { %3056 = vmatmul.mubr.bf16.vlgmr.msra.gmra.mrb[12].mxu0 %v8510_v57  ;;  %6793 = vmatprep.subr.bf16.mxu1 %v11332_v10  ;;  %v2769_v57 = vsel %vm2755_vm12, %v7341_v11, 0 }
 0x27e   : > { %3063 = vmatprep.mubr.bf16.mxu0 %v8519_v14  ;;  %v8958_v14 = vld [vmem:[%s11486_s7] sm:$0x1f]  ;;  %s11630_s7 = smov 6  }
 0x27f   : > { %6670 = vmatmul.mubr.msk.bf16.gmra.mrb[4].mxu1 %vm11351_vm14, %v8848_v20  ;;  %v9010_v40 = vrot.slane %v8958_v14, %v3325_v12 }
 0x280   : > { %6794 = vmatpush3.bf16.msra.mxu1 %v7339_v61  ;;  %3012 = vmatprep.mubr.bf16.mxu1 %v7457_v58  ;;  %v8953_v58 = vsub.s32 0, %v7516_v3 }
 0x281   : > { %6795 = vmatprep.subr.bf16.mxu1 %v11332_v10 }
 0x282   : > { %11485 = vst [vmem:[#allocation6_spill] sm:$0xff] %v8953_v58 }
 0x284   : > { %6796 = vmatpush3.bf16.msra.mxu1 %v7340_v53 }
 0x285   : > { %3064 = vmatmul.mubr.bf16.gmra.mrb[16].mxu0 %v8544_v17  ;;  %6797 = vmatprep.subr.bf16.mxu1 %v11332_v10  ;;  %v3321_v17 = vsub.s32 1, %v7516_v3 }
 0x286   : > { %3071 = vmatprep.mubr.bf16.mxu0 %v8553_v9 }
 0x287   : > { %6671 = vmatmul.mubr.msk.bf16.gmra.mrb[8].mxu1 %vm11351_vm14, %v8888_v18  ;;  %v8968_v42 = vrot.slane %v8958_v14, %v3321_v17 }
 0x288   : > { %6798 = vmatpush3.bf16.msra.mxu1 %v2769_v57  ;;  %6799 = vmatprep.mubr.msk.bf16.mxu1 %vm11349_vm0, %v11332_v10 }
 0x28d   : > { %3072 = vmatmul.mubr.bf16.gmra.mrb[20].mxu0 %v8579_v56  ;;  %v8965_v56 = vrot.slane %v8958_v14, %v8953_v58 }
 0x28f   : > { %6800 = vmatmul.mubr.msk.bf16.vlgmr.msra.gmra.mrb[12].mxu1 %vm11351_vm14, %v8800_v48 }
 0x290   : > { %6803 = vmatprep.mubr.msk.bf16.mxu1 %vm11349_vm0, %v11332_v10 }
 0x297   : > { %6804 = vmatmul.mubr.msk.bf16.gmra.mrb[16].mxu1 %vm11351_vm14, %v8848_v20  ;;  %v8970_v20 = vpop.permute.xlu1 %2144 }
 0x298   : > { %6807 = vmatprep.mubr.msk.bf16.mxu1 %vm11349_vm0, %v11332_v10  ;;  %vm11516_vm0 = vcmask 1014784  }
 0x29b   : > { %v8994_v30 = vpop.permute.xlu1 %2149 }
 0x29d   : > { %v8961_v9 = vpop.permute.xlu0 %2139 }
 0x29f   : > { %6808 = vmatmul.mubr.msk.bf16.gmra.mrb[20].mxu1 %vm11351_vm14, %v8888_v18  ;;  %v9005_v60 = vpop.permute.xlu1 %2159  ;;  %vm11517_vm14 = vmmov %vm11516_vm0 }
 0x2a1   : > { %v8998_v44 = vpop.permute.xlu0 %2154 }
 0x2a5   : > { %v9007_v54 = vpop.permute.xlu0 %2164 }
 0x330   : > { %v2868_v48 = vpop.f32.mrb[0].mxu0 }
 0x331   : > { %v8973_v35 = vadd.f32 %v2868_v48, %v8961_v9  ;;  %v2870_v7 = vpop.f32.mrb[1].mxu0 }
 0x332   : > { %v8976_v34 = vadd.f32 %v2870_v7, %v8961_v9  ;;  %v2872_v62 = vpop.f32.mrb[2].mxu0 }
 0x333   : > { %11487 = vst [vmem:[#allocation7_spill] sm:$0xff] %v8973_v35  ;;  %v6196_v0 = vmul.f32 %v8973_v35, %v8965_v56  ;;  %v8981_v24 = vadd.f32 %v2872_v62, %v8970_v20  ;;  %v2874_v45 = vpop.f32.mrb[3].mxu0 }
 0x334   : > { %11488 = vst [vmem:[#allocation8_spill] sm:$0xff] %v8976_v34  ;;  %v6197_v55 = vmul.f32 %v8976_v34, %v8968_v42  ;;  %v8986_v47 = vadd.f32 %v2874_v45, %v8970_v20 }
 0x335   : > { %11489 = vst [vmem:[#allocation9_spill] sm:$0xff] %v8981_v24  ;;  %v6201_v46 = vmul.f32 %v8981_v24, %v8965_v56 }
 0x336   : > { %11490 = vst [vmem:[#allocation10_spill] sm:$0xff] %v8986_v47  ;;  %v8990_v2 = vadd.f32 %v6197_v55, %v6196_v0  ;;  %v6202_v36 = vmul.f32 %v8986_v47, %v8968_v42 }
 0x338   : > { %v8996_v27 = vadd.f32 %v6202_v36, %v6201_v46  ;;  %v2878_v50 = vpop.f32.mrb[4].mxu0 }
 0x339   : > { %v2880_v41 = vpop.f32.mrb[5].mxu0  ;;  %v7055_v28 = vadd.f32 %v2878_v50, %v8994_v30 }
 0x33a   : > { %v2882_v15 = vpop.f32.mrb[6].mxu0  ;;  %v7056_v6 = vadd.f32 %v2880_v41, %v8994_v30 }
 0x33b   : > { %v7057_v51 = vadd.f32 %v2882_v15, %v8998_v44  ;;  %v2884_v18 = vpop.f32.mrb[7].mxu0 }
 0x33c   : > { %v7058_v4 = vadd.f32 %v2884_v18, %v8998_v44 }
 0x33d   : > { %v3137_v1 = vadd.f32 %v7057_v51, %v7055_v28  ;;  %v3181_v37 = vmax.f32 %v7055_v28, %v7057_v51 }
 0x33e   : > { %v3144_v63 = vadd.f32 %v7058_v4, %v7056_v6  ;;  %v3188_v39 = vmax.f32 %v7056_v6, %v7058_v4  ;;  %v9018_v4 = vrot.slane %v8958_v14, %v3329_v43 }
 0x33f   : > { %v3138_v8 = vrot.slane %v3137_v1, 4  ;;  %v3182_v38 = vrot.slane %v3181_v37, 4 }
 0x340   : > { %v3145_v19 = vrot.slane %v3144_v63, 4  ;;  %v3189_v23 = vrot.slane %v3188_v39, 4  ;;  %v2888_v52 = vpop.f32.mrb[8].mxu0 }
 0x341   : > { %v3139_v31 = vadd.f32 %v3138_v8, %v3137_v1  ;;  %v3183_v16 = vmax.f32 %v3181_v37, %v3182_v38  ;;  %v2890_v49 = vpop.f32.mrb[9].mxu0  ;;  %v7059_v59 = vadd.f32 %v2888_v52, %v9005_v60 }
 0x342   : > { %v3146_v26 = vadd.f32 %v3145_v19, %v3144_v63  ;;  %v3190_v21 = vmax.f32 %v3188_v39, %v3189_v23  ;;  %v2892_v25 = vpop.f32.mrb[10].mxu0  ;;  %v7060_v53 = vadd.f32 %v2890_v49, %v9005_v60 }
 0x343   : > { %v3140_v33 = vrot.slane %v3139_v31, 2  ;;  %v3184_v29 = vrot.slane %v3183_v16, 2  ;;  %v7061_v13 = vadd.f32 %v2892_v25, %v9007_v54  ;;  %v2894_v22 = vpop.f32.mrb[11].mxu0 }
 0x344   : > { %v3147_v32 = vrot.slane %v3146_v26, 2  ;;  %v3191_v61 = vrot.slane %v3190_v21, 2  ;;  %v7062_v11 = vadd.f32 %v2894_v22, %v9007_v54 }
 0x345   : > { %v3141_v57 = vadd.f32 %v3140_v33, %v3139_v31  ;;  %v3185_v17 = vmax.f32 %v3183_v16, %v3184_v29  ;;  %v3218_v48 = vadd.f32 %v7061_v13, %v7059_v59  ;;  %v3260_v7 = vmax.f32 %v7059_v59, %v7061_v13 }
 0x346   : > { %v3148_v62 = vadd.f32 %v3147_v32, %v3146_v26  ;;  %v3192_v0 = vmax.f32 %v3190_v21, %v3191_v61  ;;  %v3225_v45 = vadd.f32 %v7062_v11, %v7060_v53  ;;  %v3267_v55 = vmax.f32 %v7060_v53, %v7062_v11 }
 0x347   : > { %v3142_v46 = vrot.slane %v3141_v57, 1  ;;  %v3219_v36 = vrot.slane %v3218_v48, 4  ;;  %v3261_v50 = vrot.slane %v3260_v7, 4  ;;  %v3186_v41 = vrot.slane %v3185_v17, 1 }
 0x348   : > { %v3149_v15 = vrot.slane %v3148_v62, 1  ;;  %v3226_v28 = vrot.slane %v3225_v45, 4  ;;  %v3268_v51 = vrot.slane %v3267_v55, 4  ;;  %v3193_v63 = vrot.slane %v3192_v0, 1 }
 0x349   : > { %v3220_v18 = vadd.f32 %v3219_v36, %v3218_v48  ;;  %v3262_v6 = vmax.f32 %v3260_v7, %v3261_v50  ;;  %v3143_v1 = vadd.f32 %v3142_v46, %v3141_v57  ;;  %v3187_v23 = vmax.f32 %v3185_v17, %v3186_v41 }
 0x34a   : > { %v3150_v37 = vadd.f32 %v3149_v15, %v3148_v62  ;;  %v3227_v39 = vadd.f32 %v3226_v28, %v3225_v45  ;;  %v3269_v12 = vmax.f32 %v3267_v55, %v3268_v51  ;;  %v2994_v38 = vpop.f32.mrb[0].mxu1  ;;  %v3194_v11 = vmax.f32 %v3192_v0, %v3193_v63 }
 0x34b   : > { %v3221_v8 = vrot.slane %v3220_v18, 2  ;;  %v3176_v19 = vmul.f32 0.0625, %v3143_v1  ;;  %v3263_v52 = vrot.slane %v3262_v6, 2  ;;  %v9021_v26 = vadd.f32 %v2994_v38, %v8961_v9  ;;  %v2996_v21 = vpop.f32.mrb[1].mxu1 }
 0x34c   : > { %v3177_v31 = vmul.f32 0.0625, %v3150_v37  ;;  %v3228_v16 = vrot.slane %v3227_v39, 2  ;;  %v3270_v49 = vrot.slane %v3269_v12, 2  ;;  %v9024_v25 = vadd.f32 %v2996_v21, %v8961_v9  ;;  %v2998_v43 = vpop.f32.mrb[2].mxu1 }
 0x34d   : > { %11491 = vst [vmem:[#allocation11_spill] sm:$0xff] %v9021_v26  ;;  %v3222_v33 = vadd.f32 %v3221_v8, %v3220_v18  ;;  %v3264_v29 = vmax.f32 %v3262_v6, %v3263_v52  ;;  %v3298_v59 = vsel %vm11334_vm4, %v3176_v19, %v3187_v23  ;;  %v6198_v32 = vmul.f32 %v9021_v26, %v9010_v40  ;;  %v3000_v53 = vpop.f32.mrb[3].mxu1 }
 0x34e   : > { %11492 = vst [vmem:[#allocation12_spill] sm:$0xff] %v9024_v25  ;;  %v3229_v13 = vadd.f32 %v3228_v16, %v3227_v39  ;;  %v3271_v22 = vmax.f32 %v3269_v12, %v3270_v49  ;;  %v9030_v61 = vadd.f32 %v2998_v43, %v8970_v20  ;;  %v6199_v57 = vmul.f32 %v9024_v25, %v9018_v4 }
 0x34f   : > { %v9035_v17 = vadd.f32 %v3000_v53, %v8970_v20  ;;  %v3223_v48 = vrot.slane %v3222_v33, 1  ;;  %v6207_v62 = vadd.f32 %v8990_v2, %v6198_v32  ;;  %v3265_v46 = vrot.slane %v3264_v29, 1 }
 0x350   : > { %11493 = vst [vmem:[#allocation13_spill] sm:$0xff] %v9030_v61  ;;  %v3230_v7 = vrot.slane %v3229_v13, 1  ;;  %v6203_v45 = vmul.f32 %v9030_v61, %v9010_v40  ;;  %v6712_v55 = vpop.f32.mrb[12].mxu0  ;;  %v3272_v36 = vrot.slane %v3271_v22, 1  ;;  %v3299_v15 = vsel %vm11334_vm4, %v3177_v31, %v3194_v11 }
 0x351   : > { %11494 = vst [vmem:[#allocation14_spill] sm:$0xff] %v9035_v17  ;;  %v6204_v50 = vmul.f32 %v9035_v17, %v9018_v4  ;;  %v6713_v0 = vpop.f32.mrb[13].mxu0  ;;  %v3224_v41 = vadd.f32 %v3223_v48, %v3222_v33  ;;  %v9043_v51 = vadd.f32 %v6207_v62, %v6199_v57  ;;  %v3266_v19 = vmax.f32 %v3264_v29, %v3265_v46 }
 0x352   : > { %v3231_v28 = vadd.f32 %v3230_v7, %v3229_v13  ;;  %v6214_v18 = vadd.f32 %v8996_v27, %v6203_v45  ;;  %v6715_v6 = vpop.f32.mrb[14].mxu0  ;;  %v6714_v2 = vadd.f32 %v6713_v0, %v6712_v55  ;;  %v3004_v37 = vpop.f32.mrb[4].mxu1  ;;  %v3273_v23 = vmax.f32 %v3271_v22, %v3272_v36 }
 0x353   : > { %v6716_v1 = vpop.f32.mrb[15].mxu0  ;;  %v3255_v63 = vmul.f32 0.0625, %v3224_v41  ;;  %v3006_v38 = vpop.f32.mrb[5].mxu1  ;;  %v7067_v16 = vadd.f32 %v3004_v37, %v8994_v30  ;;  %v3333_v62 = vsub.s32 4, %v7516_v3 }
 0x354   : > { %v3256_v39 = vmul.f32 0.0625, %v3231_v28  ;;  %v9046_v12 = vadd.f32 %v6214_v18, %v6204_v50  ;;  %v9048_v8 = vadd.f32 %v6716_v1, %v6715_v6  ;;  %v3008_v52 = vpop.f32.mrb[6].mxu1  ;;  %v7068_v33 = vadd.f32 %v3006_v38, %v8994_v30 }
 0x355   : > { %v3303_v31 = vsel %vm2755_vm12, %v3298_v59, %v3255_v63  ;;  %v7069_v27 = vadd.f32 %v3008_v52, %v8998_v44  ;;  %v3010_v49 = vpop.f32.mrb[7].mxu1  ;;  %v3058_v3 = vadd.f32 %v6714_v2, %v8961_v9  ;;  %v9069_v63 = vrot.slane %v8958_v14, %v3333_v62 }
 0x356   : > { %v3309_v21 = vsel %vm3308_vm2, %v3303_v31, %v3266_v19  ;;  %v3304_v43 = vsel %vm2755_vm12, %v3299_v15, %v3256_v39  ;;  %v7070_v13 = vadd.f32 %v3010_v49, %v8998_v44 }
 0x357   : > { %v3340_v32 = vmul.f32 %v8965_v56, %v3309_v21  ;;  %v3310_v29 = vsel %vm3308_vm2, %v3304_v43, %v3273_v23  ;;  %v3151_v22 = vadd.f32 %v7069_v27, %v7067_v16  ;;  %v3195_v53 = vmax.f32 %v7067_v16, %v7069_v27 }
 0x358   : > { %v6718_v59 = vpop.f32.mrb[16].mxu0  ;;  %v3341_v11 = vmul.f32 %v8968_v42, %v3310_v29  ;;  %v3158_v57 = vadd.f32 %v7070_v13, %v7068_v33  ;;  %v3202_v48 = vmax.f32 %v7068_v33, %v7070_v13 }
 0x359   : > { %v6719_v7 = vpop.f32.mrb[17].mxu0  ;;  %3350 = vrot.lane.b32.xlu1 %v3340_v32, %s7393_s23  ;;  %v3152_v45 = vrot.slane %v3151_v22, 4  ;;  %v3196_v55 = vrot.slane %v3195_v53, 4 }
 0x35a   : > { %v9062_v46 = vadd.f32 %v6719_v7, %v6718_v59  ;;  %v6721_v36 = vpop.f32.mrb[18].mxu0  ;;  %3352 = vrot.lane.b32.xlu0 %v3341_v11, %s7393_s23  ;;  %v3159_v56 = vrot.slane %v3158_v57, 4  ;;  %v3203_v50 = vrot.slane %v3202_v48, 4  ;;  %v3014_v41 = vpop.f32.mrb[8].mxu1 }
 0x35b   : > { %v6722_v0 = vpop.f32.mrb[19].mxu0  ;;  %v3153_v15 = vadd.f32 %v3152_v45, %v3151_v22  ;;  %v3197_v42 = vmax.f32 %v3195_v53, %v3196_v55  ;;  %v3016_v18 = vpop.f32.mrb[9].mxu1  ;;  %v7071_v19 = vadd.f32 %v3014_v41, %v9005_v60 }
 0x35c   : > { %v9065_v28 = vadd.f32 %v6722_v0, %v6721_v36  ;;  %v3160_v6 = vadd.f32 %v3159_v56, %v3158_v57  ;;  %v3204_v1 = vmax.f32 %v3202_v48, %v3203_v50  ;;  %v3018_v37 = vpop.f32.mrb[10].mxu1  ;;  %v7072_v27 = vadd.f32 %v3016_v18, %v9005_v60 }
 0x35d   : > { %v3154_v39 = vrot.slane %v3153_v15, 2  ;;  %v3198_v38 = vrot.slane %v3197_v42, 2  ;;  %v7073_v23 = vadd.f32 %v3018_v37, %v9007_v54  ;;  %v3020_v52 = vpop.f32.mrb[11].mxu1  ;;  %v3061_v56 = vadd.f32 %v9048_v8, %v8970_v20 }
 0x35e   : > { %v3161_v31 = vrot.slane %v3160_v6, 2  ;;  %v3205_v16 = vrot.slane %v3204_v1, 2  ;;  %v7074_v49 = vadd.f32 %v3020_v52, %v9007_v54 }
 0x35f   : > { %v3155_v21 = vadd.f32 %v3154_v39, %v3153_v15  ;;  %v3199_v43 = vmax.f32 %v3197_v42, %v3198_v38  ;;  %v3232_v33 = vadd.f32 %v7073_v23, %v7071_v19  ;;  %v3274_v9 = vmax.f32 %v7071_v19, %v7073_v23 }
 0x360   : > { %v6724_v2 = vpop.f32.mrb[20].mxu0  ;;  %v3162_v14 = vadd.f32 %v3161_v31, %v3160_v6  ;;  %v3206_v13 = vmax.f32 %v3204_v1, %v3205_v16  ;;  %v3239_v32 = vadd.f32 %v7074_v49, %v7072_v27  ;;  %v3281_v29 = vmax.f32 %v7072_v27, %v7074_v49 }
 0x361   : > { %v6725_v22 = vpop.f32.mrb[21].mxu0  ;;  %v3156_v53 = vrot.slane %v3155_v21, 1  ;;  %v3200_v59 = vrot.slane %v3199_v43, 1  ;;  %v3233_v11 = vrot.slane %v3232_v33, 4  ;;  %v3275_v57 = vrot.slane %v3274_v9, 4 }
 0x362   : > { %v6727_v48 = vpop.f32.mrb[22].mxu0  ;;  %v3163_v7 = vrot.slane %v3162_v14, 1  ;;  %v3240_v62 = vrot.slane %v3239_v32, 4  ;;  %v3282_v45 = vrot.slane %v3281_v29, 4  ;;  %v3114_v36 = vpop.f32.mrb[12].mxu1  ;;  %v3207_v0 = vrot.slane %v3206_v13, 1 }
 0x363   : > { %v6728_v55 = vpop.f32.mrb[23].mxu0  ;;  %v3157_v50 = vadd.f32 %v3156_v53, %v3155_v21  ;;  %v3234_v41 = vadd.f32 %v3233_v11, %v3232_v33  ;;  %v3276_v15 = vmax.f32 %v3274_v9, %v3275_v57  ;;  %v6801_v42 = vpop.f32.mrb[13].mxu1  ;;  %v3201_v18 = vmax.f32 %v3199_v43, %v3200_v59 }
 0x364   : > { %v3164_v6 = vadd.f32 %v3163_v7, %v3162_v14  ;;  %v3241_v1 = vadd.f32 %v3240_v62, %v3239_v32  ;;  %v3283_v37 = vmax.f32 %v3281_v29, %v3282_v45  ;;  %v3117_v39 = vpop.f32.mrb[14].mxu1  ;;  %v6726_v52 = vadd.f32 %v6725_v22, %v6724_v2 }
 0x365   : > { %v3178_v38 = vmul.f32 0.0625, %v3157_v50  ;;  %v3235_v19 = vrot.slane %v3234_v41, 2  ;;  %v3277_v23 = vrot.slane %v3276_v15, 2  ;;  %v6802_v31 = vpop.f32.mrb[15].mxu1  ;;  %v6729_v10 = vadd.f32 %v6728_v55, %v6727_v48 }
 0x366   : > { %v3179_v16 = vmul.f32 0.0625, %v3164_v6  ;;  %v3242_v27 = vrot.slane %v3241_v1, 2  ;;  %v3284_v49 = vrot.slane %v3283_v37, 2  ;;  %v9077_v21 = vadd.f32 %v3114_v36, %v3058_v3 }
 0x367   : > { %v3236_v20 = vadd.f32 %v3235_v19, %v3234_v41  ;;  %v3278_v8 = vmax.f32 %v3276_v15, %v3277_v23  ;;  %v9079_v33 = vadd.f32 %v3117_v39, %v3061_v56  ;;  %v3208_v43 = vmax.f32 %v3206_v13, %v3207_v0 }
 0x368   : > { %11495 = vst [vmem:[#allocation15_spill] sm:$0xff] %v9077_v21  ;;  %v3243_v9 = vadd.f32 %v3242_v27, %v3241_v1  ;;  %v3285_v14 = vmax.f32 %v3283_v37, %v3284_v49  ;;  %v3300_v32 = vsel %vm11334_vm4, %v3178_v38, %v3201_v18  ;;  %v6200_v2 = vmul.f32 %v9069_v63, %v9077_v21 }
 0x369   : > { %11496 = vst [vmem:[#allocation16_spill] sm:$0xff] %v9079_v33  ;;  %v3237_v29 = vrot.slane %v3236_v20, 1  ;;  %v6205_v22 = vmul.f32 %v9069_v63, %v9079_v33  ;;  %v3066_v53 = vadd.f32 %v9062_v46, %v8994_v30  ;;  %v3279_v59 = vrot.slane %v3278_v8, 1 }
 0x36a   : > { %v3244_v3 = vrot.slane %v3243_v9, 1  ;;  %v3286_v11 = vrot.slane %v3285_v14, 1  ;;  %v3122_v57 = vpop.f32.mrb[16].mxu1  ;;  %v3301_v13 = vsel %vm11334_vm4, %v3179_v16, %v3208_v43  ;;  %v6209_v7 = vsel %vm1798_vm6, %v6200_v2, 0.0 }
 0x36b   : > { %v3238_v48 = vadd.f32 %v3237_v29, %v3236_v20  ;;  %v6216_v62 = vsel %vm1798_vm6, %v6205_v22, 0.0  ;;  %v6805_v45 = vpop.f32.mrb[17].mxu1  ;;  %v3069_v55 = vadd.f32 %v9065_v28, %v8998_v44  ;;  %v3123_v56 = vadd.f32 %v3122_v57, %v3066_v53 }
 0x36c   : > { %v3245_v36 = vadd.f32 %v3244_v3, %v3243_v9  ;;  %v3125_v50 = vpop.f32.mrb[18].mxu1  ;;  %v9094_v30 = vadd.f32 %v6216_v62, %v9046_v12  ;;  %v9097_v15 = vadd.f32 %v6209_v7, %v9043_v51  ;;  %v3280_v42 = vmax.f32 %v3278_v8, %v3279_v59 }
 0x36d   : > { %v3257_v46 = vmul.f32 0.0625, %v3238_v48  ;;  %v3126_v0 = vadd.f32 %v3125_v50, %v3069_v55  ;;  %v6806_v41 = vpop.f32.mrb[19].mxu1  ;;  %v3287_v6 = vmax.f32 %v3285_v14, %v3286_v11  ;;  %v3166_v1 = vsel %vm1798_vm6, %v3123_v56, 0.0 }
 0x36e   : > { %v3258_v18 = vmul.f32 0.0625, %v3245_v36  ;;  %v3209_v37 = vsel %vm1798_vm6, %v3123_v56, -inf  ;;  %v3074_v23 = vadd.f32 %v6726_v52, %v9005_v60  ;;  %v3077_v14 = vadd.f32 %v6729_v10, %v9007_v54 }
 0x36f   : > { %v3167_v44 = vsel %vm1798_vm6, %v3126_v0, 0.0  ;;  %v3210_v28 = vsel %vm1798_vm6, %v3126_v0, -inf  ;;  %v3305_v12 = vsel %vm2755_vm12, %v3300_v32, %v3257_v46 }
 0x370   : > { %v3168_v39 = vadd.f32 %v3167_v44, %v3166_v1  ;;  %v3211_v38 = vmax.f32 %v3209_v37, %v3210_v28  ;;  %v3311_v19 = vsel %vm3308_vm2, %v3305_v12, %v3280_v42  ;;  %v3306_v51 = vsel %vm2755_vm12, %v3301_v13, %v3258_v18 }
 0x371   : > { %v3342_v31 = vmul.f32 %v9010_v40, %v3311_v19  ;;  %v3312_v16 = vsel %vm3308_vm2, %v3306_v51, %v3287_v6 }
 0x372   : > { %v3169_v27 = vrot.slane %v3168_v39, 4  ;;  %v3212_v49 = vrot.slane %v3211_v38, 4  ;;  %v3130_v20 = vpop.f32.mrb[20].mxu1  ;;  %v3343_v8 = vmul.f32 %v9018_v4, %v3312_v16 }
 0x373   : > { %v3131_v43 = vadd.f32 %v3130_v20, %v3074_v23  ;;  %v6809_v9 = vpop.f32.mrb[21].mxu1  ;;  %3354 = vrot.lane.b32.xlu1 %v3342_v31, %s7393_s23 }
 0x374   : > { %v3170_v32 = vadd.f32 %v3169_v27, %v3168_v39  ;;  %v3213_v29 = vmax.f32 %v3211_v38, %v3212_v49  ;;  %v3133_v2 = vpop.f32.mrb[22].mxu1  ;;  %3356 = vrot.lane.b32.xlu0 %v3343_v8, %s7393_s23 }
 0x375   : > { %v3134_v60 = vadd.f32 %v3133_v2, %v3077_v14  ;;  %v6810_v40 = vpop.f32.mrb[23].mxu1  ;;  %v3246_v53 = vsel %vm1798_vm6, %v3131_v43, 0.0  ;;  %v3288_v59 = vsel %vm1798_vm6, %v3131_v43, -inf }
 0x376   : > { %v3171_v52 = vrot.slane %v3170_v32, 2  ;;  %v3214_v22 = vrot.slane %v3213_v29, 2 }
 0x377   : > { %v3247_v4 = vsel %vm1798_vm6, %v3134_v60, 0.0  ;;  %v3289_v3 = vsel %vm1798_vm6, %v3134_v60, -inf }
 0x378   : > { %v3172_v11 = vadd.f32 %v3171_v52, %v3170_v32  ;;  %v3215_v57 = vmax.f32 %v3213_v29, %v3214_v22  ;;  %v3248_v10 = vadd.f32 %v3247_v4, %v3246_v53  ;;  %v3290_v54 = vmax.f32 %v3288_v59, %v3289_v3 }
 0x37a   : > { %v3173_v13 = vrot.slane %v3172_v11, 1  ;;  %v3216_v48 = vrot.slane %v3215_v57, 1  ;;  %v3249_v7 = vrot.slane %v3248_v10, 4  ;;  %v3291_v62 = vrot.slane %v3290_v54, 4 }
 0x37c   : > { %v3174_v45 = vadd.f32 %v3173_v13, %v3172_v11  ;;  %v3250_v55 = vadd.f32 %v3249_v7, %v3248_v10  ;;  %v3292_v36 = vmax.f32 %v3290_v54, %v3291_v62  ;;  %v3217_v50 = vmax.f32 %v3215_v57, %v3216_v48 }
 0x37e   : > { %v3180_v56 = vmul.f32 0.0625, %v3174_v45  ;;  %v3251_v46 = vrot.slane %v3250_v55, 2  ;;  %v3293_v0 = vrot.slane %v3292_v36, 2 }
 0x380   : > { %v3252_v41 = vadd.f32 %v3251_v46, %v3250_v55  ;;  %v3294_v42 = vmax.f32 %v3292_v36, %v3293_v0  ;;  %v3302_v18 = vsel %vm11334_vm4, %v3180_v56, %v3217_v50  ;;  %vm11498_vm4 = vmmov %vm11497_vm7 }
 0x382   : > { %v3253_v6 = vrot.slane %v3252_v41, 1  ;;  %v3295_v1 = vrot.slane %v3294_v42, 1 }
 0x384   : > { %v3254_v37 = vadd.f32 %v3253_v6, %v3252_v41  ;;  %v3296_v28 = vmax.f32 %v3294_v42, %v3295_v1 }
 0x386   : > { %v3259_v44 = vmul.f32 0.0625, %v3254_v37 }
 0x388   : > { %v3307_v12 = vsel %vm2755_vm12, %v3302_v18, %v3259_v44  ;;  %vm11504_vm12 = vmmov %vm11498_vm4 }
 0x389   : > { %v3313_v39 = vsel %vm3308_vm2, %v3307_v12, %v3296_v28  ;;  %vm3372_vm2 = vcmask 293888  }
 0x38a   : > { %v3344_v38 = vmul.f32 %v9069_v63, %v3313_v39 }
 0x38c   : > { %3358 = vrot.lane.b32.xlu1 %v3344_v38, %s7393_s23 }
 0x3cb   : > { %v3351_v19 = vpop.permute.xlu1 %3350 }
 0x3cc   : > { %v9123_v51 = vsel %vm11497_vm7, 0.0, %v3351_v19  ;;  %v3353_v23 = vpop.permute.xlu0 %3352  ;;  %vm3378_vm7 = vcmask 519168  }
 0x3cd   : > { %3374 = vst [vmem:[#allocation3] sm:$0xf] %v9123_v51  ;;  %v9127_v31 = vsel %vm11498_vm4, %v3351_v19, %v3353_v23  ;;  %3412 = vrot.lane.b32.xlu1 %v9123_v51, %s7381_s11  ;;  %v9225_v60 = vrot.slane %v9123_v51, 4 }
 0x3ce   : > { %3375 = vst [vmem:[#allocation3 + $0x8] sm:$0xf] %v9127_v31  ;;  %3414 = vrot.lane.b32.xlu0 %v9127_v31, %s7381_s11  ;;  %v9135_v63 = vrot.slane %v9127_v31, 4 }
 0x3d0   : > { %4771 = vst [vmem:[#allocation3 + $0x410] sm:$0xf0] %v9135_v63 }
 0x3d1   : > { %3462 = vrot.lane.b32.xlu1 %v9123_v51, %s11499_s15 }
 0x3d5   : > { %3512 = vrot.lane.b32.xlu1 %v9123_v51, %s11500_s24 }
 0x3d9   : > { %3562 = vrot.lane.b32.xlu1 %v9123_v51, %s11501_s25 }
 0x3dd   : > { %3612 = vrot.lane.b32.xlu1 %v9123_v51, %s11502_s10 }
 0x3e1   : > { %3662 = vrot.lane.b32.xlu1 %v9123_v51, %s11503_s14 }
 0x3e5   : > { %v3355_v16 = vpop.permute.xlu1 %3354 }
 0x3e6   : > { %v9149_v27 = vsel %vm11504_vm12, %v3353_v23, %v3355_v16  ;;  %v3357_v49 = vpop.permute.xlu0 %3356  ;;  %vm11505_vm12 = vmmov %vm11498_vm4 }
 0x3e7   : > { %3376 = vst [vmem:[#allocation3 + $0x10] sm:$0xf] %v9149_v27  ;;  %v9153_v20 = vsel %vm11498_vm4, %v3355_v16, %v3357_v49  ;;  %3416 = vrot.lane.b32.xlu1 %v9149_v27, %s7381_s11  ;;  %v9158_v8 = vrot.slane %v9149_v27, 4  ;;  %vm11460_vm4 = vcmask 523268  }
 0x3e8   : > { %3377 = vst [vmem:[#allocation3 + $0x18] sm:$0xf] %v9153_v20  ;;  %3418 = vrot.lane.b32.xlu0 %v9153_v20, %s7381_s11  ;;  %v9164_v43 = vrot.slane %v9153_v20, 4 }
 0x3e9   : > { %4772 = vst [vmem:[#allocation3 + $0x418] sm:$0xf0] %v9158_v8 }
 0x3ea   : > { %4773 = vst [vmem:[#allocation3 + $0x420] sm:$0xf0] %v9164_v43 }
 0x3eb   : > { %3466 = vrot.lane.b32.xlu1 %v9149_v27, %s11499_s15 }
 0x3ec   : > { %3464 = vrot.lane.b32.xlu0 %v9127_v31, %s11499_s15 }
 0x3ef   : > { %3516 = vrot.lane.b32.xlu1 %v9149_v27, %s11500_s24 }
 0x3f0   : > { %3468 = vrot.lane.b32.xlu0 %v9153_v20, %s11499_s15 }
 0x3f3   : > { %3566 = vrot.lane.b32.xlu1 %v9149_v27, %s11501_s25 }
 0x3f4   : > { %3514 = vrot.lane.b32.xlu0 %v9127_v31, %s11500_s24 }
 0x3f7   : > { %3616 = vrot.lane.b32.xlu1 %v9149_v27, %s11502_s10 }
 0x3f8   : > { %3518 = vrot.lane.b32.xlu0 %v9153_v20, %s11500_s24 }
 0x3fb   : > { %3666 = vrot.lane.b32.xlu1 %v9149_v27, %s11503_s14 }
 0x3fc   : > { %3564 = vrot.lane.b32.xlu0 %v9127_v31, %s11501_s25 }
 0x3fe   : > { %v3359_v9 = vpop.permute.xlu1 %3358 }
 0x3ff   : > { %v9189_v14 = vsel %vm11505_vm12, %v3357_v49, %v3359_v9  ;;  %v9191_v32 = vsel %vm3372_vm2, %v3359_v9, 0.0  ;;  %3388 = vrot.lane.b32.xlu1 %v9135_v63, %s11506_s19  ;;  %vm11512_vm2 = vcmask 1031168  }
 0x400   : > { %v9196_v29 = vrot.slane %v9191_v32, 4  ;;  %3568 = vrot.lane.b32.xlu0 %v9153_v20, %s11501_s25  ;;  %v9201_v2 = vrot.slane %v9189_v14, 4  ;;  %3379 = vst.msk [vmem:[#allocation3 + $0x20] sm:$0xf] %vm3378_vm7, %v9189_v14  ;;  %vm11514_vm12 = vmmov %vm11512_vm2 }
 0x402   : > { %4774 = vst [vmem:[#allocation3 + $0x428] sm:$0xf0] %v9201_v2  ;;  %4775 = vst.msk [vmem:[#allocation3 + $0x430] sm:$0xf0] %vm11460_vm4, %v9196_v29 }
 0x403   : > { %3392 = vrot.lane.b32.xlu1 %v9164_v43, %s11506_s19 }
 0x404   : > { %3614 = vrot.lane.b32.xlu0 %v9127_v31, %s11502_s10 }
 0x407   : > { %3439 = vrot.lane.b32.xlu1 %v9135_v63, %s11507_s9 }
 0x408   : > { %3618 = vrot.lane.b32.xlu0 %v9153_v20, %s11502_s10 }
 0x40b   : > { %3443 = vrot.lane.b32.xlu1 %v9164_v43, %s11507_s9 }
 0x40c   : > { %3664 = vrot.lane.b32.xlu0 %v9127_v31, %s11503_s14 }
 0x40f   : > { %3489 = vrot.lane.b32.xlu1 %v9135_v63, %s11508_s17 }
 0x410   : > { %3668 = vrot.lane.b32.xlu0 %v9153_v20, %s11503_s14 }
 0x413   : > { %3493 = vrot.lane.b32.xlu1 %v9164_v43, %s11508_s17 }
 0x414   : > { %3386 = vrot.lane.b32.xlu0 %v9225_v60, %s11506_s19 }
 0x417   : > { %3539 = vrot.lane.b32.xlu1 %v9135_v63, %s11509_s13 }
 0x418   : > { %3437 = vrot.lane.b32.xlu0 %v9225_v60, %s11507_s9 }
 0x41b   : > { %3543 = vrot.lane.b32.xlu1 %v9164_v43, %s11509_s13 }
 0x41c   : > { %3487 = vrot.lane.b32.xlu0 %v9225_v60, %s11508_s17 }
 0x41f   : > { %3589 = vrot.lane.b32.xlu1 %v9135_v63, %s11510_s26 }
 0x420   : > { %3537 = vrot.lane.b32.xlu0 %v9225_v60, %s11509_s13 }
 0x423   : > { %3593 = vrot.lane.b32.xlu1 %v9164_v43, %s11510_s26 }
 0x424   : > { %3587 = vrot.lane.b32.xlu0 %v9225_v60, %s11510_s26 }
 0x427   : > { %3639 = vrot.lane.b32.xlu1 %v9135_v63, %s11511_s18 }
 0x428   : > { %3637 = vrot.lane.b32.xlu0 %v9225_v60, %s11511_s18 }
 0x42b   : > { %3643 = vrot.lane.b32.xlu1 %v9164_v43, %s11511_s18 }
 0x42c   : > { %3390 = vrot.lane.b32.xlu0 %v9158_v8, %s11506_s19 }
 0x42f   : > { %3689 = vrot.lane.b32.xlu1 %v9135_v63, %s7393_s23 }
 0x430   : > { %3441 = vrot.lane.b32.xlu0 %v9158_v8, %s11507_s9 }
 0x433   : > { %3693 = vrot.lane.b32.xlu1 %v9164_v43, %s7393_s23 }
 0x434   : > { %3491 = vrot.lane.b32.xlu0 %v9158_v8, %s11508_s17 }
 0x437   : > { %3420 = vrot.lane.b32.xlu1 %v9189_v14, %s7381_s11  ;;  %s11513_s11 = smov 99  }
 0x438   : > { %3541 = vrot.lane.b32.xlu0 %v9158_v8, %s11509_s13 }
 0x43b   : > { %3470 = vrot.lane.b32.xlu1 %v9189_v14, %s11499_s15  ;;  %s11552_s15 = smov 75  }
 0x43c   : > { %3591 = vrot.lane.b32.xlu0 %v9158_v8, %s11510_s26 }
 0x43f   : > { %v3413_v40 = vpop.permute.xlu1 %3412  ;;  %3520 = vrot.lane.b32.xlu1 %v9189_v14, %s11500_s24  ;;  %s11559_s24 = smov 74  }
 0x440   : > { %v3415_v52 = vpop.permute.xlu0 %3414  ;;  %3641 = vrot.lane.b32.xlu0 %v9158_v8, %s11511_s18 }
 0x441   : > { %v3423_v22 = vsel %vm11512_vm2, %v3413_v40, %v3415_v52 }
 0x442   : > { %3432 = vst [vmem:[#allocation3 + $0x28] sm:$0xf] %v3423_v22 }
 0x443   : > { %v3463_v53 = vpop.permute.xlu1 %3462  ;;  %3570 = vrot.lane.b32.xlu1 %v9189_v14, %s11501_s25  ;;  %s11562_s25 = smov 73  }
 0x444   : > { %3687 = vrot.lane.b32.xlu0 %v9225_v60, %s7393_s23 }
 0x447   : > { %v3513_v59 = vpop.permute.xlu1 %3512  ;;  %3620 = vrot.lane.b32.xlu1 %v9189_v14, %s11502_s10  ;;  %s11566_s10 = smov 72  }
 0x448   : > { %3691 = vrot.lane.b32.xlu0 %v9158_v8, %s7393_s23 }
 0x44b   : > { %v3563_v4 = vpop.permute.xlu1 %3562  ;;  %3670 = vrot.lane.b32.xlu1 %v9189_v14, %s11503_s14  ;;  %s11515_s14 = smov 98  }
 0x44c   : > { %3394 = vrot.lane.b32.xlu0 %v9201_v2, %s11506_s19  ;;  %s11533_s19 = smov 79  }
 0x44f   : > { %v3613_v3 = vpop.permute.xlu1 %3612  ;;  %3711 = vrot.lane.b32.xlu1 %v9123_v51, %s11513_s11 }
 0x450   : > { %3445 = vrot.lane.b32.xlu0 %v9201_v2, %s11507_s9  ;;  %s11540_s9 = smov 77  }
 0x453   : > { %3715 = vrot.lane.b32.xlu1 %v9149_v27, %s11513_s11  ;;  %v9296_v11 = vpop.permute.xlu1 %3662 }
 0x454   : > { %3495 = vrot.lane.b32.xlu0 %v9201_v2, %s11508_s17  ;;  %s11525_s17 = smov 96  }
 0x457   : > { %3719 = vrot.lane.b32.xlu1 %v9189_v14, %s11513_s11 }
 0x458   : > { %3545 = vrot.lane.b32.xlu0 %v9201_v2, %s11509_s13  ;;  %s11519_s13 = smov 97  }
 0x459   : > { %v3417_v57 = vpop.permute.xlu1 %3416 }
 0x45a   : > { %v3424_v10 = vsel %vm11514_vm12, %v3415_v52, %v3417_v57  ;;  %v9303_v54 = vpop.permute.xlu0 %3418  ;;  %vm11518_vm12 = vmmov %vm11516_vm0 }
 0x45b   : > { %3433 = vst [vmem:[#allocation3 + $0x30] sm:$0xf] %v3424_v10  ;;  %v3425_v13 = vsel %vm11512_vm2, %v3417_v57, %v9303_v54  ;;  %3738 = vrot.lane.b32.xlu1 %v9135_v63, %s11515_s14 }
 0x45c   : > { %3434 = vst [vmem:[#allocation3 + $0x38] sm:$0xf] %v3425_v13  ;;  %3595 = vrot.lane.b32.xlu0 %v9201_v2, %s11510_s26 }
 0x45d   : > { %v3467_v48 = vpop.permute.xlu1 %3466 }
 0x45e   : > { %v3465_v7 = vpop.permute.xlu0 %3464 }
 0x45f   : > { %v3473_v62 = vsel %vm11516_vm0, %v3463_v53, %v3465_v7  ;;  %v3474_v45 = vsel %vm11517_vm14, %v3465_v7, %v3467_v48  ;;  %3742 = vrot.lane.b32.xlu1 %v9164_v43, %s11515_s14  ;;  %vm11520_vm14 = vcmask 998400  }
 0x460   : > { %3482 = vst [vmem:[#allocation3 + $0x50] sm:$0xf] %v3473_v62  ;;  %3483 = vst [vmem:[#allocation3 + $0x58] sm:$0xf] %v3474_v45  ;;  %3645 = vrot.lane.b32.xlu0 %v9201_v2, %s11511_s18  ;;  %s11544_s18 = smov 76  }
 0x461   : > { %v3517_v55 = vpop.permute.xlu1 %3516  ;;  %vm11521_vm0 = vmmov %vm11520_vm14 }
 0x462   : > { %v9317_v36 = vpop.permute.xlu0 %3468  ;;  %vm11522_vm2 = vmmov %vm11521_vm0 }
 0x463   : > { %v3475_v56 = vsel %vm11518_vm12, %v3467_v48, %v9317_v36  ;;  %3761 = vrot.lane.b32.xlu1 %v9123_v51, %s11519_s13  ;;  %vm11523_vm12 = vcmask 982016  }
 0x464   : > { %3484 = vst [vmem:[#allocation3 + $0x60] sm:$0xf] %v3475_v56  ;;  %3695 = vrot.lane.b32.xlu0 %v9201_v2, %s7393_s23  ;;  %s11536_s23 = smov 78  }
 0x465   : > { %v3567_v50 = vpop.permute.xlu1 %3566 }
 0x466   : > { %v3515_v46 = vpop.permute.xlu0 %3514 }
 0x467   : > { %v3523_v0 = vsel %vm11520_vm14, %v3513_v59, %v3515_v46  ;;  %v3524_v41 = vsel %vm11521_vm0, %v3515_v46, %v3517_v55  ;;  %3765 = vrot.lane.b32.xlu1 %v9149_v27, %s11519_s13  ;;  %vm11524_vm14 = vmmov %vm11523_vm12 }
 0x468   : > { %3532 = vst [vmem:[#allocation3 + $0x78] sm:$0xf] %v3523_v0  ;;  %3533 = vst [vmem:[#allocation3 + $0x80] sm:$0xf] %v3524_v41  ;;  %3713 = vrot.lane.b32.xlu0 %v9127_v31, %s11513_s11 }
 0x469   : > { %v3617_v42 = vpop.permute.xlu1 %3616  ;;  %vm11526_vm0 = vmmov %vm11523_vm12 }
 0x46a   : > { %v9331_v18 = vpop.permute.xlu0 %3518 }
 0x46b   : > { %v3525_v6 = vsel %vm11522_vm2, %v3517_v55, %v9331_v18  ;;  %3769 = vrot.lane.b32.xlu1 %v9189_v14, %s11519_s13  ;;  %vm11527_vm2 = vcmask 842752  }
 0x46c   : > { %3534 = vst [vmem:[#allocation3 + $0x88] sm:$0xf] %v3525_v6  ;;  %3717 = vrot.lane.b32.xlu0 %v9153_v20, %s11513_s11  ;;  %s11572_s11 = smov 55  }
 0x46d   : > { %v3667_v1 = vpop.permute.xlu1 %3666 }
 0x46e   : > { %v3565_v37 = vpop.permute.xlu0 %3564 }
 0x46f   : > { %v3573_v44 = vsel %vm11523_vm12, %v3563_v4, %v3565_v37  ;;  %v3574_v28 = vsel %vm11524_vm14, %v3565_v37, %v3567_v50  ;;  %3788 = vrot.lane.b32.xlu1 %v9135_v63, %s11525_s17  ;;  %vm11528_vm12 = vmmov %vm11527_vm2 }
 0x470   : > { %3582 = vst [vmem:[#allocation3 + $0xa0] sm:$0xf] %v3573_v44  ;;  %3583 = vst [vmem:[#allocation3 + $0xa8] sm:$0xf] %v3574_v28  ;;  %3736 = vrot.lane.b32.xlu0 %v9225_v60, %s11515_s14 }
 0x471   : > { %v9345_v12 = vpop.permute.xlu1 %3388  ;;  %vm11529_vm14 = vmmov %vm11527_vm2 }
 0x472   : > { %v9347_v39 = vpop.permute.xlu0 %3568 }
 0x473   : > { %v3575_v38 = vsel %vm11526_vm0, %v3567_v50, %v9347_v39  ;;  %3792 = vrot.lane.b32.xlu1 %v9164_v43, %s11525_s17  ;;  %vm11530_vm0 = vcmask 826368  }
 0x474   : > { %3584 = vst [vmem:[#allocation3 + $0xb0] sm:$0xf] %v3575_v38  ;;  %3740 = vrot.lane.b32.xlu0 %v9158_v8, %s11515_s14 }
 0x475   : > { %v9355_v19 = vpop.permute.xlu1 %3392 }
 0x476   : > { %v3615_v23 = vpop.permute.xlu0 %3614 }
 0x477   : > { %v3623_v16 = vsel %vm11527_vm2, %v3613_v3, %v3615_v23  ;;  %v3624_v49 = vsel %vm11528_vm12, %v3615_v23, %v3617_v42  ;;  %3811 = vrot.lane.b32.xlu1 %v9123_v51, %s11354_s30  ;;  %vm11531_vm2 = vmmov %vm11530_vm0 }
 0x478   : > { %3632 = vst [vmem:[#allocation3 + $0xc8] sm:$0xf] %v3623_v16  ;;  %3633 = vst [vmem:[#allocation3 + $0xd0] sm:$0xf] %v3624_v49  ;;  %3744 = vrot.lane.b32.xlu0 %v9201_v2, %s11515_s14  ;;  %s11574_s14 = smov 54  }
 0x479   : > { %v9363_v9 = vpop.permute.xlu1 %3439  ;;  %vm11532_vm12 = vmmov %vm11530_vm0 }
 0x47a   : > { %v9365_v40 = vpop.permute.xlu0 %3618 }
 0x47b   : > { %v3625_v52 = vsel %vm11529_vm14, %v3617_v42, %v9365_v40  ;;  %3815 = vrot.lane.b32.xlu1 %v9149_v27, %s11354_s30  ;;  %vm11534_vm14 = vcmask 1039360  }
 0x47c   : > { %3634 = vst [vmem:[#allocation3 + $0xd8] sm:$0xf] %v3625_v52  ;;  %3763 = vrot.lane.b32.xlu0 %v9127_v31, %s11519_s13 }
 0x47d   : > { %v9373_v22 = vpop.permute.xlu1 %3443 }
 0x47e   : > { %v3665_v53 = vpop.permute.xlu0 %3664 }
 0x47f   : > { %v3673_v59 = vsel %vm11530_vm0, %v9296_v11, %v3665_v53  ;;  %v3674_v4 = vsel %vm11531_vm2, %v3665_v53, %v3667_v1  ;;  %3819 = vrot.lane.b32.xlu1 %v9189_v14, %s11354_s30  ;;  %vm11535_vm0 = vcmask 1022976   ;;  %vm11537_vm2 = vcmask 1006592  }
 0x480   : > { %3682 = vst [vmem:[#allocation3 + $0xf0] sm:$0xf] %v3673_v59  ;;  %3683 = vst [vmem:[#allocation3 + $0xf8] sm:$0xf] %v3674_v4  ;;  %3767 = vrot.lane.b32.xlu0 %v9153_v20, %s11519_s13  ;;  %s11576_s13 = smov 53  }
 0x481   : > { %v3490_v3 = vpop.permute.xlu1 %3489 }
 0x482   : > { %v9382_v57 = vpop.permute.xlu0 %3668 }
 0x483   : > { %v3675_v10 = vsel %vm11532_vm12, %v3667_v1, %v9382_v57  ;;  %3838 = vrot.lane.b32.xlu1 %v9135_v63, %s11533_s19  ;;  %vm11538_vm12 = vcmask 990208  }
 0x484   : > { %3684 = vst [vmem:[#allocation3 + $0x100] sm:$0xf] %v3675_v10  ;;  %3786 = vrot.lane.b32.xlu0 %v9225_v60, %s11525_s17 }
 0x485   : > { %v9390_v11 = vpop.permute.xlu1 %3493 }
 0x486   : > { %v3387_v13 = vpop.permute.xlu0 %3386 }
 0x487   : > { %v3397_v48 = vsel %vm11534_vm14, %v3387_v13, %v9345_v12  ;;  %3842 = vrot.lane.b32.xlu1 %v9164_v43, %s11533_s19  ;;  %vm11539_vm14 = vcmask 850944  }
 0x488   : > { %3406 = vst [vmem:[#allocation3] sm:$0xf0] %v3397_v48  ;;  %3790 = vrot.lane.b32.xlu0 %v9158_v8, %s11525_s17 }
 0x489   : > { %v3540_v7 = vpop.permute.xlu1 %3539 }
 0x48a   : > { %v3438_v62 = vpop.permute.xlu0 %3437 }
 0x48b   : > { %v3448_v45 = vsel %vm11535_vm0, %v3438_v62, %v9363_v9  ;;  %3861 = vrot.lane.b32.xlu1 %v9123_v51, %s11536_s23  ;;  %vm11541_vm0 = vcmask 834560  }
 0x48c   : > { %3457 = vst [vmem:[#allocation3 + $0x28] sm:$0xf0] %v3448_v45  ;;  %3794 = vrot.lane.b32.xlu0 %v9201_v2, %s11525_s17  ;;  %s11578_s17 = smov 52  }
 0x48d   : > { %v9404_v55 = vpop.permute.xlu1 %3543 }
 0x48e   : > { %v3488_v56 = vpop.permute.xlu0 %3487 }
 0x48f   : > { %v3498_v50 = vsel %vm11537_vm2, %v3488_v56, %v3490_v3  ;;  %3865 = vrot.lane.b32.xlu1 %v9149_v27, %s11536_s23  ;;  %vm11542_vm2 = vcmask 1039360  }
 0x490   : > { %3507 = vst [vmem:[#allocation3 + $0x50] sm:$0xf0] %v3498_v50  ;;  %3813 = vrot.lane.b32.xlu0 %v9127_v31, %s11354_s30 }
 0x491   : > { %v9411_v46 = vpop.permute.xlu1 %3589 }
 0x492   : > { %v3538_v0 = vpop.permute.xlu0 %3537 }
 0x493   : > { %v3548_v41 = vsel %vm11538_vm12, %v3538_v0, %v3540_v7  ;;  %3869 = vrot.lane.b32.xlu1 %v9189_v14, %s11536_s23  ;;  %vm11543_vm12 = vmmov %vm11542_vm2  ;;  %v5479_v56 = vld [vmem:[#allocation3 + $0x28] sm:$0xff] }
 0x494   : > { %3557 = vst [vmem:[#allocation3 + $0x78] sm:$0xf0] %v3548_v41  ;;  %3817 = vrot.lane.b32.xlu0 %v9153_v20, %s11354_s30  ;;  %s11601_s30 = smov 30  }
 0x495   : > { %v9418_v42 = vpop.permute.xlu1 %3593 }
 0x496   : > { %v3588_v6 = vpop.permute.xlu0 %3587 }
 0x497   : > { %v3598_v1 = vsel %vm11539_vm14, %v3588_v6, %v9411_v46  ;;  %3888 = vrot.lane.b32.xlu1 %v9135_v63, %s11540_s9  ;;  %vm11545_vm14 = vcmask 1022976   ;;  %v5474_v6 = vld [vmem:[#allocation3] sm:$0xff] }
 0x498   : > { %3607 = vst [vmem:[#allocation3 + $0xa0] sm:$0xf0] %v3598_v1  ;;  %3836 = vrot.lane.b32.xlu0 %v9225_v60, %s11533_s19 }
 0x499   : > { %v9426_v37 = vpop.permute.xlu1 %3639 }
 0x49a   : > { %v3638_v44 = vpop.permute.xlu0 %3637 }
 0x49b   : > { %v3648_v28 = vsel %vm11541_vm0, %v3638_v44, %v9426_v37  ;;  %3892 = vrot.lane.b32.xlu1 %v9164_v43, %s11540_s9  ;;  %vm11546_vm0 = vmmov %vm11545_vm14  ;;  %v6846_v44 = vpack.c.bf16 %v5479_v56, %v5474_v6 }
 0x49c   : > { %3657 = vst [vmem:[#allocation3 + $0xc8] sm:$0xf0] %v3648_v28  ;;  %3840 = vrot.lane.b32.xlu0 %v9158_v8, %s11533_s19 }
 0x49d   : > { %v9434_v38 = vpop.permute.xlu1 %3643 }
 0x49e   : > { %v3391_v23 = vpop.permute.xlu0 %3390 }
 0x49f   : > { %v3398_v16 = vsel %vm11542_vm2, %v9345_v12, %v3391_v23  ;;  %v3399_v49 = vsel %vm11543_vm12, %v3391_v23, %v9355_v19  ;;  %3911 = vrot.lane.b32.xlu1 %v9123_v51, %s11544_s18  ;;  %vm11547_vm2 = vcmask 1006592  }
 0x4a0   : > { %3407 = vst [vmem:[#allocation3 + $0x8] sm:$0xf0] %v3398_v16  ;;  %3408 = vst [vmem:[#allocation3 + $0x10] sm:$0xf0] %v3399_v49  ;;  %3844 = vrot.lane.b32.xlu0 %v9201_v2, %s11533_s19  ;;  %s11584_s19 = smov 51  }
 0x4a1   : > { %v9444_v52 = vpop.permute.xlu1 %3689  ;;  %vm11548_vm12 = vmmov %vm11547_vm2 }
 0x4a2   : > { %v3442_v53 = vpop.permute.xlu0 %3441 }
 0x4a3   : > { %v3449_v59 = vsel %vm11545_vm14, %v9363_v9, %v3442_v53  ;;  %v3450_v12 = vsel %vm11546_vm0, %v3442_v53, %v9373_v22  ;;  %3915 = vrot.lane.b32.xlu1 %v9149_v27, %s11544_s18  ;;  %vm11549_vm14 = vcmask 1031168   ;;  %vm11550_vm0 = vcmask 990208  }
 0x4a4   : > { %3458 = vst [vmem:[#allocation3 + $0x30] sm:$0xf0] %v3449_v59  ;;  %3459 = vst [vmem:[#allocation3 + $0x38] sm:$0xf0] %v3450_v12  ;;  %3863 = vrot.lane.b32.xlu0 %v9127_v31, %s11536_s23 }
 0x4a5   : > { %v9454_v4 = vpop.permute.xlu1 %3693 }
 0x4a6   : > { %v3492_v10 = vpop.permute.xlu0 %3491 }
 0x4a7   : > { %v3499_v13 = vsel %vm11547_vm2, %v3490_v3, %v3492_v10  ;;  %v3500_v48 = vsel %vm11548_vm12, %v3492_v10, %v9390_v11  ;;  %3919 = vrot.lane.b32.xlu1 %v9189_v14, %s11544_s18  ;;  %vm11551_vm2 = vmmov %vm11550_vm0  ;;  %v5475_v0 = vld [vmem:[#allocation3 + $0x8] sm:$0xff]  ;;  %vm11553_vm12 = vcmask 1014784  }
 0x4a8   : > { %3508 = vst [vmem:[#allocation3 + $0x58] sm:$0xf0] %v3499_v13  ;;  %3509 = vst [vmem:[#allocation3 + $0x60] sm:$0xf0] %v3500_v48  ;;  %3867 = vrot.lane.b32.xlu0 %v9153_v20, %s11536_s23  ;;  %v5484_v48 = vld [vmem:[#allocation3 + $0x50] sm:$0xff]  ;;  %s11587_s23 = smov 50  }
 0x4a9   : > { %v3421_v9 = vpop.permute.xlu1 %3420 }
 0x4aa   : > { %v3426_v62 = vsel %vm11549_vm14, %v9303_v54, %v3421_v9  ;;  %3436 = vst.msk [vmem:[#allocation3 + $0x48] sm:$0xf] %vm3378_vm7, %v3421_v9  ;;  %v3542_v45 = vpop.permute.xlu0 %3541  ;;  %vm11554_vm14 = vcmask 850944  }
 0x4ab   : > { %3435 = vst [vmem:[#allocation3 + $0x40] sm:$0xf] %v3426_v62  ;;  %v3549_v3 = vsel %vm11550_vm0, %v3540_v7, %v3542_v45  ;;  %v3550_v50 = vsel %vm11551_vm2, %v3542_v45, %v9404_v55  ;;  %3938 = vrot.lane.b32.xlu1 %v9135_v63, %s11552_s15  ;;  %v5480_v41 = vld [vmem:[#allocation3 + $0x30] sm:$0xff]  ;;  %vm11555_vm0 = vmmov %vm11554_vm14  ;;  %vm11556_vm2 = vcmask 998400  }
 0x4ac   : > { %3558 = vst [vmem:[#allocation3 + $0x80] sm:$0xf0] %v3549_v3  ;;  %3559 = vst [vmem:[#allocation3 + $0x88] sm:$0xf0] %v3550_v50  ;;  %3886 = vrot.lane.b32.xlu0 %v9225_v60, %s11540_s9  ;;  %v6844_v54 = vpack.c.bf16 %v5480_v41, %v5475_v0  ;;  %v5499_v0 = vld [vmem:[#allocation3 + $0xc8] sm:$0xff] }
 0x4ad   : > { %v3471_v1 = vpop.permute.xlu1 %3470 }
 0x4ae   : > { %v3476_v7 = vsel %vm11553_vm12, %v9317_v36, %v3471_v1  ;;  %3486 = vst.msk [vmem:[#allocation3 + $0x70] sm:$0xf] %vm3378_vm7, %v3471_v1  ;;  %v3592_v28 = vpop.permute.xlu0 %3591  ;;  %6845 = vmatprep.subr.bf16.mxu1 %v6844_v54  ;;  %vm11557_vm12 = vcmask 834560  }
 0x4af   : > { %3485 = vst [vmem:[#allocation3 + $0x68] sm:$0xf] %v3476_v7  ;;  %v3599_v23 = vsel %vm11554_vm14, %v9411_v46, %v3592_v28  ;;  %v3600_v16 = vsel %vm11555_vm0, %v3592_v28, %v9418_v42  ;;  %3942 = vrot.lane.b32.xlu1 %v9164_v43, %s11552_s15  ;;  %6847 = vmatpush1.bf16.msra.mxu1 %v6846_v44  ;;  %v5489_v46 = vld [vmem:[#allocation3 + $0x78] sm:$0xff]  ;;  %vm11558_vm14 = vmmov %vm11557_vm12  ;;  %vm11560_vm0 = vcmask 982016   ;;  %v5494_v44 = vld [vmem:[#allocation3 + $0xa0] sm:$0xff] }
 0x4b0   : > { %3608 = vst [vmem:[#allocation3 + $0xa8] sm:$0xf0] %v3599_v23  ;;  %3609 = vst [vmem:[#allocation3 + $0xb0] sm:$0xf0] %v3600_v16  ;;  %3890 = vrot.lane.b32.xlu0 %v9158_v8, %s11540_s9  ;;  %v5485_v10 = vld [vmem:[#allocation3 + $0x58] sm:$0xff]  ;;  %v6850_v62 = vpack.c.bf16 %v5489_v46, %v5484_v48  ;;  %v6854_v28 = vpack.c.bf16 %v5499_v0, %v5494_v44  ;;  %v5476_v48 = vld [vmem:[#allocation3 + $0x10] sm:$0xff] }
 0x4b1   : > { %v3521_v36 = vpop.permute.xlu1 %3520 }
 0x4b2   : > { %v3526_v49 = vsel %vm11556_vm2, %v9331_v18, %v3521_v36  ;;  %3536 = vst.msk [vmem:[#allocation3 + $0x98] sm:$0xf] %vm3378_vm7, %v3521_v36  ;;  %v3642_v53 = vpop.permute.xlu0 %3641  ;;  %vm11561_vm2 = vcmask 818176  }
 0x4b3   : > { %3535 = vst [vmem:[#allocation3 + $0x90] sm:$0xf] %v3526_v49  ;;  %v3649_v59 = vsel %vm11557_vm12, %v9426_v37, %v3642_v53  ;;  %v3650_v12 = vsel %vm11558_vm14, %v3642_v53, %v9434_v38  ;;  %3967 = vrot.lane.b32.xlu1 %v9153_v20, %s11559_s24  ;;  %v5490_v13 = vld [vmem:[#allocation3 + $0x80] sm:$0xff]  ;;  %vm11563_vm12 = vcmask 842752   ;;  %vm11564_vm14 = vmmov %vm11561_vm2 }
 0x4b4   : > { %3658 = vst [vmem:[#allocation3 + $0xd0] sm:$0xf0] %v3649_v59  ;;  %3659 = vst [vmem:[#allocation3 + $0xd8] sm:$0xf0] %v3650_v12  ;;  %3894 = vrot.lane.b32.xlu0 %v9201_v2, %s11540_s9  ;;  %v6848_v18 = vpack.c.bf16 %v5490_v13, %v5485_v10  ;;  %v5481_v12 = vld [vmem:[#allocation3 + $0x38] sm:$0xff]  ;;  %s11589_s9 = smov 49  }
 0x4b5   : > { %v3571_v9 = vpop.permute.xlu1 %3570 }
 0x4b6   : > { %v3576_v37 = vsel %vm11560_vm0, %v9347_v39, %v3571_v9  ;;  %3586 = vst.msk [vmem:[#allocation3 + $0xc0] sm:$0xf] %vm3378_vm7, %v3571_v9  ;;  %v3688_v45 = vpop.permute.xlu0 %3687  ;;  %6849 = vmatprep.subr.bf16.mxu1 %v6848_v18  ;;  %vm11565_vm0 = vmmov %vm11561_vm2 }
 0x4b7   : > { %3585 = vst [vmem:[#allocation3 + $0xb8] sm:$0xf] %v3576_v37  ;;  %v3697_v56 = vsel %vm11561_vm2, %v3688_v45, %v9444_v52  ;;  %3992 = vrot.lane.b32.xlu1 %v9164_v43, %s11562_s25  ;;  %6851 = vmatpush1.bf16.msra.mxu1 %v6850_v62  ;;  %v5495_v6 = vld [vmem:[#allocation3 + $0xa8] sm:$0xff]  ;;  %vm11567_vm2 = vcmask 826368   ;;  %v6926_v62 = vpack.c.bf16 %v5481_v12, %v5476_v48 }
 0x4b8   : > { %3706 = vst [vmem:[#allocation3 + $0xf0] sm:$0xf0] %v3697_v56  ;;  %3913 = vrot.lane.b32.xlu0 %v9127_v31, %s11544_s18 }
 0x4b9   : > { %v3621_v3 = vpop.permute.xlu1 %3620 }
 0x4ba   : > { %v3626_v39 = vsel %vm11563_vm12, %v9365_v40, %v3621_v3  ;;  %3636 = vst.msk [vmem:[#allocation3 + $0xe8] sm:$0xf] %vm3378_vm7, %v3621_v3  ;;  %v3692_v50 = vpop.permute.xlu0 %3691  ;;  %vm11568_vm12 = vcmask 1039360   ;;  %v5491_v3 = vld [vmem:[#allocation3 + $0x88] sm:$0xff] }
 0x4bb   : > { %3635 = vst [vmem:[#allocation3 + $0xe0] sm:$0xf] %v3626_v39  ;;  %v3698_v41 = vsel %vm11564_vm14, %v9444_v52, %v3692_v50  ;;  %v3699_v54 = vsel %vm11565_vm0, %v3692_v50, %v9454_v4  ;;  %4017 = vrot.lane.b32.xlu1 %v9153_v20, %s11566_s10  ;;  %v5500_v1 = vld [vmem:[#allocation3 + $0xd0] sm:$0xff]  ;;  %vm11569_vm14 = vcmask 1022976   ;;  %vm11570_vm0 = vcmask 1006592  }
 0x4bc   : > { %3707 = vst [vmem:[#allocation3 + $0xf8] sm:$0xf0] %v3698_v41  ;;  %3708 = vst [vmem:[#allocation3 + $0x100] sm:$0xf0] %v3699_v54  ;;  %3917 = vrot.lane.b32.xlu0 %v9153_v20, %s11544_s18  ;;  %v6852_v40 = vpack.c.bf16 %v5500_v1, %v5495_v6  ;;  %v5486_v41 = vld [vmem:[#allocation3 + $0x60] sm:$0xff]  ;;  %s11592_s18 = smov 48  }
 0x4bd   : > { %v3671_v7 = vpop.permute.xlu1 %3670  ;;  %v6930_v6 = vpack.c.bf16 %v5491_v3, %v5486_v41 }
 0x4be   : > { %v3676_v52 = vsel %vm11567_vm2, %v9382_v57, %v3671_v7  ;;  %3686 = vst.msk [vmem:[#allocation3 + $0x110] sm:$0xf] %vm3378_vm7, %v3671_v7  ;;  %v3395_v23 = vpop.permute.xlu0 %3394  ;;  %6853 = vmatprep.subr.bf16.mxu1 %v6852_v40  ;;  %vm11571_vm2 = vcmask 990208   ;;  %v5501_v7 = vld [vmem:[#allocation3 + $0xd8] sm:$0xff] }
 0x4bf   : > { %3685 = vst [vmem:[#allocation3 + $0x108] sm:$0xf] %v3676_v52  ;;  %v3400_v16 = vsel %vm11568_vm12, %v9355_v19, %v3395_v23  ;;  %3411 = vst.msk [vmem:[#allocation3 + $0x20] sm:$0xf0] %vm11460_vm4, %v3395_v23  ;;  %4044 = vrot.lane.b32.xlu1 %v9164_v43, %s11352_s29  ;;  %6855 = vmatpush1.bf16.msra.mxu1 %v6854_v28  ;;  %vm11573_vm12 = vcmask 850944  }
 0x4c0   : > { %3409 = vst [vmem:[#allocation3 + $0x18] sm:$0xf0] %v3400_v16  ;;  %3936 = vrot.lane.b32.xlu0 %v9225_v60, %s11552_s15 }
 0x4c1   : > { %v9525_v36 = vpop.permute.xlu1 %3711 }
 0x4c2   : > { %v3446_v57 = vpop.permute.xlu0 %3445 }
 0x4c3   : > { %v3451_v49 = vsel %vm11569_vm14, %v9373_v22, %v3446_v57  ;;  %3461 = vst.msk [vmem:[#allocation3 + $0x48] sm:$0xf0] %vm11460_vm4, %v3446_v57  ;;  %3965 = vrot.lane.b32.xlu1 %v9149_v27, %s11559_s24  ;;  %vm11575_vm14 = vcmask 834560   ;;  %v5496_v57 = vld [vmem:[#allocation3 + $0xb0] sm:$0xff] }
 0x4c4   : > { %3460 = vst [vmem:[#allocation3 + $0x40] sm:$0xf0] %v3451_v49  ;;  %3940 = vrot.lane.b32.xlu0 %v9158_v8, %s11552_s15 }
 0x4c5   : > { %v9534_v19 = vpop.permute.xlu1 %3715 }
 0x4c6   : > { %v3496_v53 = vpop.permute.xlu0 %3495 }
 0x4c7   : > { %v3501_v46 = vsel %vm11570_vm0, %v9390_v11, %v3496_v53  ;;  %3511 = vst.msk [vmem:[#allocation3 + $0x70] sm:$0xf0] %vm11460_vm4, %v3496_v53  ;;  %4015 = vrot.lane.b32.xlu1 %v9149_v27, %s11566_s10  ;;  %v5477_v11 = vld [vmem:[#allocation3 + $0x18] sm:$0xff]  ;;  %vm11577_vm0 = vcmask 818176   ;;  %v6934_v53 = vpack.c.bf16 %v5501_v7, %v5496_v57 }
 0x4c8   : > { %3510 = vst [vmem:[#allocation3 + $0x68] sm:$0xf0] %v3501_v46  ;;  %3944 = vrot.lane.b32.xlu0 %v9201_v2, %s11552_s15  ;;  %s11598_s15 = smov 32  }
 0x4c9   : > { %v9543_v22 = vpop.permute.xlu1 %3719 }
 0x4ca   : > { %3735 = vst.msk [vmem:[#allocation3 + $0x138] sm:$0xf] %vm3378_vm7, %v9543_v22  ;;  %v3546_v59 = vpop.permute.xlu0 %3545 }
 0x4cb   : > { %v3551_v10 = vsel %vm11571_vm2, %v9404_v55, %v3546_v59  ;;  %3561 = vst.msk [vmem:[#allocation3 + $0x98] sm:$0xf0] %vm11460_vm4, %v3546_v59  ;;  %4072 = vrot.lane.b32.xlu1 %v9153_v20, %s11572_s11  ;;  %v5482_v13 = vld [vmem:[#allocation3 + $0x40] sm:$0xff]  ;;  %vm11579_vm2 = vcmask 809984  }
 0x4cc   : > { %3560 = vst [vmem:[#allocation3 + $0x90] sm:$0xf0] %v3551_v10  ;;  %3969 = vrot.lane.b32.xlu0 %v9189_v14, %s11559_s24  ;;  %v6924_v18 = vpack.c.bf16 %v5482_v13, %v5477_v11 }
 0x4cd   : > { %v9554_v9 = vpop.permute.xlu1 %3738 }
 0x4ce   : > { %v3596_v37 = vpop.permute.xlu0 %3595  ;;  %6925 = vmatprep.subr.bf16.mxu0 %v6924_v18 }
 0x4cf   : > { %v3601_v55 = vsel %vm11573_vm12, %v9418_v42, %v3596_v37  ;;  %3611 = vst.msk [vmem:[#allocation3 + $0xc0] sm:$0xf0] %vm11460_vm4, %v3596_v37  ;;  %4100 = vrot.lane.b32.xlu1 %v9164_v43, %s11574_s14  ;;  %6927 = vmatpush1.bf16.msra.mxu0 %v6926_v62  ;;  %v5487_v42 = vld [vmem:[#allocation3 + $0x68] sm:$0xff]  ;;  %vm11580_vm12 = vmmov %vm11579_vm2 }
 0x4d0   : > { %3610 = vst [vmem:[#allocation3 + $0xb8] sm:$0xf0] %v3601_v55  ;;  %3994 = vrot.lane.b32.xlu0 %v9201_v2, %s11562_s25 }
 0x4d1   : > { %v9563_v45 = vpop.permute.xlu1 %3742 }
 0x4d2   : > { %v3646_v56 = vpop.permute.xlu0 %3645 }
 0x4d3   : > { %v3651_v39 = vsel %vm11575_vm14, %v9434_v38, %v3646_v56  ;;  %3661 = vst.msk [vmem:[#allocation3 + $0xe8] sm:$0xf0] %vm11460_vm4, %v3646_v56  ;;  %4128 = vrot.lane.b32.xlu1 %v9153_v20, %s11576_s13  ;;  %v5492_v50 = vld [vmem:[#allocation3 + $0x90] sm:$0xff]  ;;  %vm11581_vm14 = vmmov %vm11579_vm2 }
 0x4d4   : > { %3660 = vst [vmem:[#allocation3 + $0xe0] sm:$0xf0] %v3651_v39  ;;  %4019 = vrot.lane.b32.xlu0 %v9189_v14, %s11566_s10  ;;  %v6928_v0 = vpack.c.bf16 %v5492_v50, %v5487_v42 }
 0x4d5   : > { %v3762_v54 = vpop.permute.xlu1 %3761 }
 0x4d6   : > { %v3696_v1 = vpop.permute.xlu0 %3695  ;;  %6929 = vmatprep.subr.bf16.mxu0 %v6928_v0  ;;  %v5504_v0 = vld [vmem:[#allocation3 + $0xf0] sm:$0xff] }
 0x4d7   : > { %v3700_v38 = vsel %vm11577_vm0, %v9454_v4, %v3696_v1  ;;  %3710 = vst.msk [vmem:[#allocation3 + $0x110] sm:$0xf0] %vm11460_vm4, %v3696_v1  ;;  %4156 = vrot.lane.b32.xlu1 %v9164_v43, %s11578_s17  ;;  %6931 = vmatpush1.bf16.msra.mxu0 %v6930_v6  ;;  %v5497_v52 = vld [vmem:[#allocation3 + $0xb8] sm:$0xff]  ;;  %vm11582_vm0 = vmmov %vm11579_vm2 }
 0x4d8   : > { %3709 = vst [vmem:[#allocation3 + $0x108] sm:$0xf0] %v3700_v38  ;;  %4046 = vrot.lane.b32.xlu0 %v9201_v2, %s11352_s29 }
 0x4d9   : > { %v9579_v40 = vpop.permute.xlu1 %3765 }
 0x4da   : > { %v3714_v44 = vpop.permute.xlu0 %3713 }
 0x4db   : > { %v3722_v28 = vsel %vm11579_vm2, %v9525_v36, %v3714_v44  ;;  %v3723_v4 = vsel %vm11580_vm12, %v3714_v44, %v9534_v19  ;;  %4070 = vrot.lane.b32.xlu1 %v9149_v27, %s11572_s11  ;;  %v5502_v23 = vld [vmem:[#allocation3 + $0xe0] sm:$0xff]  ;;  %vm11583_vm2 = vcmask 801792  }
 0x4dc   : > { %3731 = vst [vmem:[#allocation3 + $0x118] sm:$0xf] %v3722_v28  ;;  %3732 = vst [vmem:[#allocation3 + $0x120] sm:$0xf] %v3723_v4  ;;  %3990 = vrot.lane.b32.xlu0 %v9158_v8, %s11562_s25  ;;  %v6932_v16 = vpack.c.bf16 %v5502_v23, %v5497_v52  ;;  %v5506_v52 = vld [vmem:[#allocation3 + $0x100] sm:$0xff] }
 0x4dd   : > { %v3770_v49 = vpop.permute.xlu1 %3769  ;;  %vm11585_vm12 = vmmov %vm11583_vm2 }
 0x4de   : > { %3785 = vst.msk [vmem:[#allocation3 + $0x160] sm:$0xf] %vm3378_vm7, %v3770_v49  ;;  %v3718_v36 = vpop.permute.xlu0 %3717  ;;  %6933 = vmatprep.subr.bf16.mxu0 %v6932_v16 }
 0x4df   : > { %v3724_v46 = vsel %vm11581_vm14, %v9534_v19, %v3718_v36  ;;  %v3725_v59 = vsel %vm11582_vm0, %v3718_v36, %v9543_v22  ;;  %4126 = vrot.lane.b32.xlu1 %v9149_v27, %s11576_s13  ;;  %6935 = vmatpush1.bf16.msra.mxu0 %v6934_v53  ;;  %vm11586_vm14 = vmmov %vm11583_vm2  ;;  %v5507_v7 = vld [vmem:[#allocation3 + $0x108] sm:$0xff] }
 0x4e0   : > { %3733 = vst [vmem:[#allocation3 + $0x128] sm:$0xf] %v3724_v46  ;;  %3734 = vst [vmem:[#allocation3 + $0x130] sm:$0xf] %v3725_v59  ;;  %4042 = vrot.lane.b32.xlu0 %v9158_v8, %s11352_s29  ;;  %s11600_s29 = smov 31  }
 0x4e1   : > { %v9598_v12 = vpop.permute.xlu1 %3788  ;;  %vm11588_vm0 = vmmov %vm11583_vm2 }
 0x4e2   : > { %v3737_v10 = vpop.permute.xlu0 %3736 }
 0x4e3   : > { %v3747_v11 = vsel %vm11583_vm2, %v3737_v10, %v9554_v9  ;;  %4184 = vrot.lane.b32.xlu1 %v9153_v20, %s11584_s19  ;;  %vm11590_vm2 = vcmask 793600  }
 0x4e4   : > { %3756 = vst [vmem:[#allocation3 + $0x118] sm:$0xf0] %v3747_v11  ;;  %4074 = vrot.lane.b32.xlu0 %v9189_v14, %s11572_s11 }
 0x4e5   : > { %v9606_v19 = vpop.permute.xlu1 %3792 }
 0x4e6   : > { %v3741_v22 = vpop.permute.xlu0 %3740 }
 0x4e7   : > { %v3748_v13 = vsel %vm11585_vm12, %v9554_v9, %v3741_v22  ;;  %v3749_v18 = vsel %vm11586_vm14, %v3741_v22, %v9563_v45  ;;  %4212 = vrot.lane.b32.xlu1 %v9164_v43, %s11587_s23  ;;  %vm11591_vm12 = vmmov %vm11590_vm2 }
 0x4e8   : > { %3757 = vst [vmem:[#allocation3 + $0x120] sm:$0xf0] %v3748_v13  ;;  %3758 = vst [vmem:[#allocation3 + $0x128] sm:$0xf0] %v3749_v18  ;;  %4102 = vrot.lane.b32.xlu0 %v9201_v2, %s11574_s14 }
 0x4e9   : > { %v9616_v48 = vpop.permute.xlu1 %3811  ;;  %vm11593_vm14 = vmmov %vm11590_vm2 }
 0x4ea   : > { %v3745_v62 = vpop.permute.xlu0 %3744 }
 0x4eb   : > { %v3750_v37 = vsel %vm11588_vm0, %v9563_v45, %v3745_v62  ;;  %3760 = vst.msk [vmem:[#allocation3 + $0x138] sm:$0xf0] %vm11460_vm4, %v3745_v62  ;;  %4240 = vrot.lane.b32.xlu1 %v9153_v20, %s11589_s9  ;;  %v5509_v56 = vld [vmem:[#allocation3 + $0x118] sm:$0xff]  ;;  %vm11594_vm0 = vmmov %vm11590_vm2 }
 0x4ec   : > { %3759 = vst [vmem:[#allocation3 + $0x130] sm:$0xf0] %v3750_v37  ;;  %4130 = vrot.lane.b32.xlu0 %v9189_v14, %s11576_s13  ;;  %v5505_v45 = vld [vmem:[#allocation3 + $0xf8] sm:$0xff]  ;;  %v6858_v6 = vpack.c.bf16 %v5509_v56, %v5504_v0 }
 0x4ed   : > { %v9625_v9 = vpop.permute.xlu1 %3815 }
 0x4ee   : > { %v3764_v55 = vpop.permute.xlu0 %3763 }
 0x4ef   : > { %v3772_v3 = vsel %vm11590_vm2, %v3762_v54, %v3764_v55  ;;  %v3773_v39 = vsel %vm11591_vm12, %v3764_v55, %v9579_v40  ;;  %4268 = vrot.lane.b32.xlu1 %v9164_v43, %s11592_s18  ;;  %v5510_v42 = vld [vmem:[#allocation3 + $0x120] sm:$0xff]  ;;  %v5511_v1 = vld [vmem:[#allocation3 + $0x128] sm:$0xff]  ;;  %vm11595_vm2 = vcmask 785408  }
 0x4f0   : > { %3781 = vst [vmem:[#allocation3 + $0x140] sm:$0xf] %v3772_v3  ;;  %3782 = vst [vmem:[#allocation3 + $0x148] sm:$0xf] %v3773_v39  ;;  %4158 = vrot.lane.b32.xlu0 %v9201_v2, %s11578_s17  ;;  %v6856_v50 = vpack.c.bf16 %v5510_v42, %v5505_v45  ;;  %v6938_v16 = vpack.c.bf16 %v5511_v1, %v5506_v52 }
 0x4f1   : > { %v3820_v41 = vpop.permute.xlu1 %3819  ;;  %vm11596_vm12 = vmmov %vm11595_vm2 }
 0x4f2   : > { %3835 = vst.msk [vmem:[#allocation3 + $0x188] sm:$0xf] %vm3378_vm7, %v3820_v41  ;;  %v3768_v54 = vpop.permute.xlu0 %3767  ;;  %6857 = vmatprep.subr.bf16.mxu1 %v6856_v50 }
 0x4f3   : > { %v3774_v38 = vsel %vm11593_vm14, %v9579_v40, %v3768_v54  ;;  %v3775_v44 = vsel %vm11594_vm0, %v3768_v54, %v3770_v49  ;;  %4182 = vrot.lane.b32.xlu1 %v9149_v27, %s11584_s19  ;;  %6859 = vmatpush1.bf16.msra.mxu1 %v6858_v6  ;;  %v5512_v28 = vld [vmem:[#allocation3 + $0x130] sm:$0xff]  ;;  %vm11597_vm14 = vmmov %vm11595_vm2 }
 0x4f4   : > { %3783 = vst [vmem:[#allocation3 + $0x150] sm:$0xf] %v3774_v38  ;;  %3784 = vst [vmem:[#allocation3 + $0x158] sm:$0xf] %v3775_v44  ;;  %4098 = vrot.lane.b32.xlu0 %v9158_v8, %s11574_s14  ;;  %v6936_v4 = vpack.c.bf16 %v5512_v28, %v5507_v7 }
 0x4f5   : > { %v3839_v23 = vpop.permute.xlu1 %3838  ;;  %vm11599_vm0 = vmmov %vm11595_vm2 }
 0x4f6   : > { %v3787_v57 = vpop.permute.xlu0 %3786  ;;  %6937 = vmatprep.subr.bf16.mxu0 %v6936_v4 }
 0x4f7   : > { %v3797_v40 = vsel %vm11595_vm2, %v3787_v57, %v9598_v12  ;;  %4238 = vrot.lane.b32.xlu1 %v9149_v27, %s11589_s9  ;;  %6939 = vmatpush1.bf16.msra.mxu0 %v6938_v16  ;;  %vm11603_vm2 = vcmask 646144  }
 0x4f8   : > { %3806 = vst [vmem:[#allocation3 + $0x140] sm:$0xf0] %v3797_v40  ;;  %4154 = vrot.lane.b32.xlu0 %v9158_v8, %s11578_s17 }
 0x4f9   : > { %v3843_v49 = vpop.permute.xlu1 %3842 }
 0x4fa   : > { %v3791_v53 = vpop.permute.xlu0 %3790 }
 0x4fb   : > { %v3798_v36 = vsel %vm11596_vm12, %v9598_v12, %v3791_v53  ;;  %v3799_v46 = vsel %vm11597_vm14, %v3791_v53, %v9606_v19  ;;  %4296 = vrot.lane.b32.xlu1 %v9153_v20, %s11598_s15  ;;  %vm11604_vm12 = vmmov %vm11603_vm2 }
 0x4fc   : > { %3807 = vst [vmem:[#allocation3 + $0x148] sm:$0xf0] %v3798_v36  ;;  %3808 = vst [vmem:[#allocation3 + $0x150] sm:$0xf0] %v3799_v46  ;;  %4186 = vrot.lane.b32.xlu0 %v9189_v14, %s11584_s19 }
 0x4fd   : > { %v3862_v59 = vpop.permute.xlu1 %3861  ;;  %vm11605_vm14 = vmmov %vm11603_vm2 }
 0x4fe   : > { %v3795_v10 = vpop.permute.xlu0 %3794 }
 0x4ff   : > { %v3800_v11 = vsel %vm11599_vm0, %v9606_v19, %v3795_v10  ;;  %3810 = vst.msk [vmem:[#allocation3 + $0x160] sm:$0xf0] %vm11460_vm4, %v3795_v10  ;;  %4324 = vrot.lane.b32.xlu1 %v9164_v43, %s11600_s29  ;;  %vm11606_vm0 = vmmov %vm11603_vm2  ;;  %v5514_v52 = vld [vmem:[#allocation3 + $0x140] sm:$0xff] }
 0x500   : > { %3809 = vst [vmem:[#allocation3 + $0x158] sm:$0xf0] %v3800_v11  ;;  %4214 = vrot.lane.b32.xlu0 %v9201_v2, %s11587_s23 }
 0x501   : > { %v3866_v12 = vpop.permute.xlu1 %3865 }
 0x502   : > { %v3814_v22 = vpop.permute.xlu0 %3813 }
 0x503   : > { %v3822_v13 = vsel %vm709_vm13, %v9616_v48, %v3814_v22  ;;  %v3823_v18 = vsel %vm709_vm13, %v3814_v22, %v9625_v9  ;;  %4352 = vrot.lane.b32.xlu1 %v9153_v20, %s11601_s30  ;;  %v5515_v7 = vld [vmem:[#allocation3 + $0x148] sm:$0xff]  ;;  %v5516_v10 = vld [vmem:[#allocation3 + $0x150] sm:$0xff] }
 0x504   : > { %3831 = vst [vmem:[#allocation3 + $0x168] sm:$0xf] %v3822_v13  ;;  %3832 = vst [vmem:[#allocation3 + $0x170] sm:$0xf] %v3823_v18  ;;  %4242 = vrot.lane.b32.xlu0 %v9189_v14, %s11589_s9 }
 0x505   : > { %v3870_v19 = vpop.permute.xlu1 %3869 }
 0x506   : > { %3885 = vst.msk [vmem:[#allocation3 + $0x1b0] sm:$0xf] %vm3378_vm7, %v3870_v19  ;;  %v3818_v62 = vpop.permute.xlu0 %3817 }
 0x507   : > { %v3824_v37 = vsel %vm709_vm13, %v9625_v9, %v3818_v62  ;;  %v3825_v48 = vsel %vm709_vm13, %v3818_v62, %v3820_v41  ;;  %4380 = vrot.lane.b32.xlu1 %v9164_v43, %s11602_s16  ;;  %v5517_v36 = vld [vmem:[#allocation3 + $0x158] sm:$0xff] }
 0x508   : > { %3833 = vst [vmem:[#allocation3 + $0x178] sm:$0xf] %v3824_v37  ;;  %3834 = vst [vmem:[#allocation3 + $0x180] sm:$0xf] %v3825_v48  ;;  %4270 = vrot.lane.b32.xlu0 %v9201_v2, %s11592_s18 }
 0x509   : > { %v9679_v55 = vpop.permute.xlu1 %3888 }
 0x50a   : > { %v3837_v56 = vpop.permute.xlu0 %3836 }
 0x50b   : > { %v3847_v3 = vsel %vm11603_vm2, %v3837_v56, %v3839_v23  ;;  %4294 = vrot.lane.b32.xlu1 %v9149_v27, %s11598_s15  ;;  %vm11608_vm2 = vcmask 637952  }
 0x50c   : > { %3856 = vst [vmem:[#allocation3 + $0x168] sm:$0xf0] %v3847_v3  ;;  %4210 = vrot.lane.b32.xlu0 %v9158_v8, %s11587_s23 }
 0x50d   : > { %v9686_v9 = vpop.permute.xlu1 %3892 }
 0x50e   : > { %v3841_v39 = vpop.permute.xlu0 %3840 }
 0x50f   : > { %v3848_v45 = vsel %vm11604_vm12, %v3839_v23, %v3841_v39  ;;  %v3849_v42 = vsel %vm11605_vm14, %v3841_v39, %v3843_v49  ;;  %4350 = vrot.lane.b32.xlu1 %v9149_v27, %s11601_s30  ;;  %vm11609_vm12 = vmmov %vm11608_vm2 }
 0x510   : > { %3857 = vst [vmem:[#allocation3 + $0x170] sm:$0xf0] %v3848_v45  ;;  %3858 = vst [vmem:[#allocation3 + $0x178] sm:$0xf0] %v3849_v42  ;;  %4266 = vrot.lane.b32.xlu0 %v9158_v8, %s11592_s18 }
 0x511   : > { %v9694_v50 = vpop.permute.xlu1 %3911  ;;  %vm11611_vm14 = vmmov %vm11608_vm2 }
 0x512   : > { %v3845_v0 = vpop.permute.xlu0 %3844 }
 0x513   : > { %v3850_v41 = vsel %vm11606_vm0, %v3843_v49, %v3845_v0  ;;  %3860 = vst.msk [vmem:[#allocation3 + $0x188] sm:$0xf0] %vm11460_vm4, %v3845_v0  ;;  %4408 = vrot.lane.b32.xlu1 %v9153_v20, %s11607_s12  ;;  %v5519_v1 = vld [vmem:[#allocation3 + $0x168] sm:$0xff]  ;;  %vm11612_vm0 = vmmov %vm11608_vm2 }
 0x514   : > { %3859 = vst [vmem:[#allocation3 + $0x180] sm:$0xf0] %v3850_v41  ;;  %4298 = vrot.lane.b32.xlu0 %v9189_v14, %s11598_s15  ;;  %v6862_v16 = vpack.c.bf16 %v5519_v1, %v5514_v52 }
 0x515   : > { %v9702_v6 = vpop.permute.xlu1 %3915 }
 0x516   : > { %v3864_v54 = vpop.permute.xlu0 %3863 }
 0x517   : > { %v3872_v38 = vsel %vm11608_vm2, %v3862_v59, %v3864_v54  ;;  %v3873_v44 = vsel %vm11609_vm12, %v3864_v54, %v3866_v12  ;;  %4436 = vrot.lane.b32.xlu1 %v9164_v43, %s11610_s22  ;;  %v5520_v28 = vld [vmem:[#allocation3 + $0x170] sm:$0xff]  ;;  %v5521_v40 = vld [vmem:[#allocation3 + $0x178] sm:$0xff]  ;;  %vm11614_vm2 = vcmask 629760  }
 0x518   : > { %3881 = vst [vmem:[#allocation3 + $0x190] sm:$0xf] %v3872_v38  ;;  %3882 = vst [vmem:[#allocation3 + $0x198] sm:$0xf] %v3873_v44  ;;  %4326 = vrot.lane.b32.xlu0 %v9201_v2, %s11600_s29  ;;  %v6860_v4 = vpack.c.bf16 %v5520_v28, %v5515_v7  ;;  %v6942_v22 = vpack.c.bf16 %v5521_v40, %v5516_v10 }
 0x519   : > { %v3920_v23 = vpop.permute.xlu1 %3919  ;;  %vm11616_vm12 = vmmov %vm11614_vm2 }
 0x51a   : > { %3935 = vst.msk [vmem:[#allocation3 + $0x1d8] sm:$0xf] %vm3378_vm7, %v3920_v23  ;;  %v3868_v57 = vpop.permute.xlu0 %3867  ;;  %6861 = vmatprep.subr.bf16.mxu1 %v6860_v4 }
 0x51b   : > { %v3874_v49 = vsel %vm11611_vm14, %v3866_v12, %v3868_v57  ;;  %v3875_v53 = vsel %vm11612_vm0, %v3868_v57, %v3870_v19  ;;  %4464 = vrot.lane.b32.xlu1 %v9153_v20, %s11613_s20  ;;  %6863 = vmatpush1.bf16.msra.mxu1 %v6862_v16  ;;  %v5522_v46 = vld [vmem:[#allocation3 + $0x180] sm:$0xff]  ;;  %vm11617_vm14 = vmmov %vm11614_vm2 }
 0x51c   : > { %3883 = vst [vmem:[#allocation3 + $0x1a0] sm:$0xf] %v3874_v49  ;;  %3884 = vst [vmem:[#allocation3 + $0x1a8] sm:$0xf] %v3875_v53  ;;  %4354 = vrot.lane.b32.xlu0 %v9189_v14, %s11601_s30  ;;  %v6940_v59 = vpack.c.bf16 %v5522_v46, %v5517_v36 }
 0x51d   : > { %v3939_v11 = vpop.permute.xlu1 %3938  ;;  %vm11618_vm0 = vmmov %vm11614_vm2 }
 0x51e   : > { %v3887_v13 = vpop.permute.xlu0 %3886  ;;  %6941 = vmatprep.subr.bf16.mxu0 %v6940_v59 }
 0x51f   : > { %v3897_v12 = vsel %vm11614_vm2, %v3887_v13, %v9679_v55  ;;  %4492 = vrot.lane.b32.xlu1 %v9164_v43, %s11615_s21  ;;  %6943 = vmatpush1.bf16.msra.mxu0 %v6942_v22  ;;  %vm11619_vm2 = vcmask 621568  }
 0x520   : > { %3906 = vst [vmem:[#allocation3 + $0x190] sm:$0xf0] %v3897_v12  ;;  %4382 = vrot.lane.b32.xlu0 %v9201_v2, %s11602_s16 }
 0x521   : > { %v3943_v18 = vpop.permute.xlu1 %3942 }
 0x522   : > { %v3891_v19 = vpop.permute.xlu0 %3890 }
 0x523   : > { %v3898_v62 = vsel %vm11616_vm12, %v9679_v55, %v3891_v19  ;;  %v3899_v37 = vsel %vm11617_vm14, %v3891_v19, %v9686_v9  ;;  %4406 = vrot.lane.b32.xlu1 %v9149_v27, %s11607_s12  ;;  %vm11620_vm12 = vmmov %vm11619_vm2 }
 0x524   : > { %3907 = vst [vmem:[#allocation3 + $0x198] sm:$0xf0] %v3898_v62  ;;  %3908 = vst [vmem:[#allocation3 + $0x1a0] sm:$0xf0] %v3899_v37  ;;  %4322 = vrot.lane.b32.xlu0 %v9158_v8, %s11600_s29 }
 0x525   : > { %v3968_v48 = vpop.permute.xlu1 %3967  ;;  %vm11622_vm14 = vmmov %vm11619_vm2 }
 0x526   : > { %v3895_v56 = vpop.permute.xlu0 %3894 }
 0x527   : > { %v3900_v3 = vsel %vm11618_vm0, %v9686_v9, %v3895_v56  ;;  %3910 = vst.msk [vmem:[#allocation3 + $0x1b0] sm:$0xf0] %vm11460_vm4, %v3895_v56  ;;  %4462 = vrot.lane.b32.xlu1 %v9149_v27, %s11613_s20  ;;  %vm11623_vm0 = vmmov %vm11619_vm2 }
 0x528   : > { %3909 = vst [vmem:[#allocation3 + $0x1a8] sm:$0xf0] %v3900_v3  ;;  %4378 = vrot.lane.b32.xlu0 %v9158_v8, %s11602_s16 }
 0x529   : > { %v9738_v55 = vpop.permute.xlu1 %3992 }
 0x52a   : > { %v3914_v39 = vpop.permute.xlu0 %3913 }
 0x52b   : > { %v3922_v45 = vsel %vm11619_vm2, %v9694_v50, %v3914_v39  ;;  %v3923_v42 = vsel %vm11620_vm12, %v3914_v39, %v9702_v6  ;;  %4520 = vrot.lane.b32.xlu1 %v9153_v20, %s11621_s0  ;;  %vm11625_vm2 = vcmask 613376   ;;  %vm11627_vm12 = vcmask 605184   ;;  %v5525_v46 = vld [vmem:[#allocation3 + $0x198] sm:$0xff]  ;;  %v5526_v56 = vld [vmem:[#allocation3 + $0x1a0] sm:$0xff] }
 0x52c   : > { %3931 = vst [vmem:[#allocation3 + $0x1b8] sm:$0xf] %v3922_v45  ;;  %3932 = vst [vmem:[#allocation3 + $0x1c0] sm:$0xf] %v3923_v42  ;;  %4410 = vrot.lane.b32.xlu0 %v9189_v14, %s11607_s12 }
 0x52d   : > { %v9748_v9 = vpop.permute.xlu1 %4017 }
 0x52e   : > { %v3918_v0 = vpop.permute.xlu0 %3917 }
 0x52f   : > { %v3924_v41 = vsel %vm11622_vm14, %v9702_v6, %v3918_v0  ;;  %v3925_v54 = vsel %vm11623_vm0, %v3918_v0, %v3920_v23  ;;  %4548 = vrot.lane.b32.xlu1 %v9164_v43, %s11624_s1  ;;  %vm11628_vm14 = vmmov %vm11625_vm2  ;;  %v5527_v62 = vld [vmem:[#allocation3 + $0x1a8] sm:$0xff] }
 0x530   : > { %3933 = vst [vmem:[#allocation3 + $0x1c8] sm:$0xf] %v3924_v41  ;;  %3934 = vst [vmem:[#allocation3 + $0x1d0] sm:$0xf] %v3925_v54  ;;  %4438 = vrot.lane.b32.xlu0 %v9201_v2, %s11610_s22 }
 0x531   : > { %v9757_v50 = vpop.permute.xlu1 %4044  ;;  %vm11629_vm0 = vmmov %vm11625_vm2 }
 0x532   : > { %v3937_v1 = vpop.permute.xlu0 %3936 }
 0x533   : > { %v3947_v38 = vsel %vm11625_vm2, %v3937_v1, %v3939_v11  ;;  %4576 = vrot.lane.b32.xlu1 %v9153_v20, %s11626_s2  ;;  %vm11631_vm2 = vcmask 588800  }
 0x534   : > { %3956 = vst [vmem:[#allocation3 + $0x1b8] sm:$0xf0] %v3947_v38  ;;  %4466 = vrot.lane.b32.xlu0 %v9189_v14, %s11613_s20 }
 0x535   : > { %v9764_v6 = vpop.permute.xlu1 %3965 }
 0x536   : > { %v3974_v44 = vsel %vm11627_vm12, %v9764_v6, %v3968_v48  ;;  %v3941_v7 = vpop.permute.xlu0 %3940  ;;  %vm11632_vm12 = vmmov %vm11629_vm0 }
 0x537   : > { %3983 = vst [vmem:[#allocation3 + $0x1f0] sm:$0xf] %v3974_v44  ;;  %v3948_v28 = vsel %vm11628_vm14, %v3939_v11, %v3941_v7  ;;  %v3949_v4 = vsel %vm11629_vm0, %v3941_v7, %v3943_v18  ;;  %4604 = vrot.lane.b32.xlu1 %v9164_v43, %s11630_s7  ;;  %vm11633_vm14 = vcmask 605184   ;;  %v5524_v11 = vld [vmem:[#allocation3 + $0x190] sm:$0xff]  ;;  %vm11634_vm0 = vcmask 596992  }
 0x538   : > { %3957 = vst [vmem:[#allocation3 + $0x1c0] sm:$0xf0] %v3948_v28  ;;  %3958 = vst [vmem:[#allocation3 + $0x1c8] sm:$0xf0] %v3949_v4  ;;  %4494 = vrot.lane.b32.xlu0 %v9201_v2, %s11615_s21 }
 0x539   : > { %v9774_v52 = vpop.permute.xlu1 %4015 }
 0x53a   : > { %v4024_v23 = vsel %vm11631_vm2, %v9774_v52, %v9748_v9  ;;  %v3945_v16 = vpop.permute.xlu0 %3944 }
 0x53b   : > { %4033 = vst [vmem:[#allocation3 + $0x218] sm:$0xf] %v4024_v23  ;;  %v3950_v57 = vsel %vm11632_vm12, %v3943_v18, %v3945_v16  ;;  %3960 = vst.msk [vmem:[#allocation3 + $0x1d8] sm:$0xf0] %vm11460_vm4, %v3945_v16  ;;  %4518 = vrot.lane.b32.xlu1 %v9149_v27, %s11621_s0  ;;  %v5529_v53 = vld [vmem:[#allocation3 + $0x1b8] sm:$0xff]  ;;  %vm11638_vm12 = vcmask 457728  }
 0x53c   : > { %3959 = vst [vmem:[#allocation3 + $0x1d0] sm:$0xf0] %v3950_v57  ;;  %4434 = vrot.lane.b32.xlu0 %v9158_v8, %s11610_s22  ;;  %v6866_v13 = vpack.c.bf16 %v5529_v53, %v5524_v11 }
 0x53d   : > { %v9785_v40 = vpop.permute.xlu1 %4072 }
 0x53e   : > { %v3970_v49 = vpop.permute.xlu0 %3969 }
 0x53f   : > { %v3975_v36 = vsel %vm11633_vm14, %v3968_v48, %v3970_v49  ;;  %3985 = vst.msk [vmem:[#allocation3 + $0x200] sm:$0xf] %vm3378_vm7, %v3970_v49  ;;  %4574 = vrot.lane.b32.xlu1 %v9149_v27, %s11626_s2  ;;  %v5530_v59 = vld [vmem:[#allocation3 + $0x1c0] sm:$0xff]  ;;  %v5531_v18 = vld [vmem:[#allocation3 + $0x1c8] sm:$0xff]  ;;  %vm11640_vm14 = vcmask 449536  }
 0x540   : > { %3984 = vst [vmem:[#allocation3 + $0x1f8] sm:$0xf] %v3975_v36  ;;  %4490 = vrot.lane.b32.xlu0 %v9158_v8, %s11615_s21  ;;  %v6864_v10 = vpack.c.bf16 %v5530_v59, %v5525_v46  ;;  %v6946_v39 = vpack.c.bf16 %v5531_v18, %v5526_v56 }
 0x541   : > { %v9793_v22 = vpop.permute.xlu1 %4100 }
 0x542   : > { %v3995_v12 = vpop.permute.xlu0 %3994  ;;  %6865 = vmatprep.subr.bf16.mxu1 %v6864_v10 }
 0x543   : > { %v4000_v19 = vsel %vm11634_vm0, %v9738_v55, %v3995_v12  ;;  %4010 = vst.msk [vmem:[#allocation3 + $0x200] sm:$0xf0] %vm11460_vm4, %v3995_v12  ;;  %4632 = vrot.lane.b32.xlu1 %v9153_v20, %s11635_s27  ;;  %6867 = vmatpush1.bf16.msra.mxu1 %v6866_v13  ;;  %v5532_v37 = vld [vmem:[#allocation3 + $0x1d0] sm:$0xff] }
 0x544   : > { %4009 = vst [vmem:[#allocation3 + $0x1f8] sm:$0xf0] %v4000_v19  ;;  %4522 = vrot.lane.b32.xlu0 %v9189_v14, %s11621_s0  ;;  %v6944_v48 = vpack.c.bf16 %v5532_v37, %v5527_v62 }
 0x545   : > { %v4129_v3 = vpop.permute.xlu1 %4128 }
 0x546   : > { %v4020_v45 = vpop.permute.xlu0 %4019  ;;  %6945 = vmatprep.subr.bf16.mxu0 %v6944_v48 }
 0x547   : > { %v4025_v42 = vsel %vm11631_vm2, %v9748_v9, %v4020_v45  ;;  %4035 = vst.msk [vmem:[#allocation3 + $0x228] sm:$0xf] %vm3378_vm7, %v4020_v45  ;;  %4660 = vrot.lane.b32.xlu1 %v9164_v43, %s11636_s8  ;;  %6947 = vmatpush1.bf16.msra.mxu0 %v6946_v39  ;;  %vm11642_vm2 = vcmask 433152  }
 0x548   : > { %4034 = vst [vmem:[#allocation3 + $0x220] sm:$0xf] %v4025_v42  ;;  %4550 = vrot.lane.b32.xlu0 %v9201_v2, %s11624_s1 }
 0x549   : > { %v9809_v0 = vpop.permute.xlu1 %4156 }
 0x54a   : > { %v9811_v41 = vpop.permute.xlu0 %4046 }
 0x54b   : > { %11637 = vst [vmem:[#allocation17_spill] sm:$0xff] %v9811_v41  ;;  %v4054_v54 = vsel %vm11638_vm12, %v9757_v50, %v9811_v41  ;;  %4688 = vrot.lane.b32.xlu1 %v9153_v20, %s11639_s28 }
 0x54c   : > { %4064 = vst [vmem:[#allocation3 + $0x220] sm:$0xf0] %v4054_v54  ;;  %4578 = vrot.lane.b32.xlu0 %v9189_v14, %s11626_s2 }
 0x54d   : > { %v9820_v9 = vpop.permute.xlu1 %4070 }
 0x54e   : > { %v4081_v1 = vsel %vm11640_vm14, %v9820_v9, %v9785_v40  ;;  %v9825_v38 = vpop.permute.xlu0 %3990 }
 0x54f   : > { %4091 = vst [vmem:[#allocation3 + $0x240] sm:$0xf] %v4081_v1  ;;  %v3999_v44 = vsel %vm11634_vm0, %v9825_v38, %v9738_v55  ;;  %4716 = vrot.lane.b32.xlu1 %v9164_v43, %s11641_s4  ;;  %v5537_v55 = vld [vmem:[#allocation3 + $0x1f8] sm:$0xff]  ;;  %vm11645_vm0 = vcmask 441344  }
 0x550   : > { %4008 = vst [vmem:[#allocation3 + $0x1f0] sm:$0xf0] %v3999_v44  ;;  %4606 = vrot.lane.b32.xlu0 %v9201_v2, %s11630_s7 }
 0x551   : > { %v9834_v7 = vpop.permute.xlu1 %4126 }
 0x552   : > { %v4137_v28 = vsel %vm11642_vm2, %v9834_v7, %v4129_v3  ;;  %v9838_v4 = vpop.permute.xlu0 %4042 }
 0x553   : > { %4147 = vst [vmem:[#allocation3 + $0x268] sm:$0xf] %v4137_v28  ;;  %v4053_v23 = vsel %vm11638_vm12, %v9838_v4, %v9757_v50  ;;  %4630 = vrot.lane.b32.xlu1 %v9149_v27, %s11635_s27  ;;  %v5542_v16 = vld [vmem:[#allocation3 + $0x220] sm:$0xff]  ;;  %vm11650_vm12 = vcmask 424960  }
 0x554   : > { %4063 = vst [vmem:[#allocation3 + $0x218] sm:$0xf0] %v4053_v23  ;;  %4546 = vrot.lane.b32.xlu0 %v9158_v8, %s11624_s1  ;;  %v6948_v57 = vpack.c.bf16 %v5542_v16, %v5537_v55  ;;  %s11655_s1 = smov 110  }
 0x555   : > { %v4185_v49 = vpop.permute.xlu1 %4184 }
 0x556   : > { %v9847_v53 = vpop.permute.xlu0 %4074  ;;  %6949 = vmatprep.subr.bf16.mxu0 %v6948_v57 }
 0x557   : > { %11643 = vst [vmem:[#allocation18_spill] sm:$0xff] %v9847_v53  ;;  %v4082_v36 = vsel %vm11640_vm14, %v9785_v40, %v9847_v53  ;;  %4686 = vrot.lane.b32.xlu1 %v9149_v27, %s11639_s28  ;;  %v5536_v10 = vld [vmem:[#allocation3 + $0x1f0] sm:$0xff]  ;;  %vm11652_vm14 = vcmask 416768  }
 0x558   : > { %4092 = vst [vmem:[#allocation3 + $0x248] sm:$0xf] %v4082_v36  ;;  %4602 = vrot.lane.b32.xlu0 %v9158_v8, %s11630_s7  ;;  %s11651_s7 = smov 111  }
 0x559   : > { %v9856_v50 = vpop.permute.xlu1 %4212 }
 0x55a   : > { %v9858_v46 = vpop.permute.xlu0 %4102 }
 0x55b   : > { %11644 = vst [vmem:[#allocation19_spill] sm:$0xff] %v9858_v46  ;;  %v4110_v59 = vsel %vm11645_vm0, %v9793_v22, %v9858_v46  ;;  %4744 = vrot.lane.b32.xlu1 %v9153_v20, %s11646_s6  ;;  %v5541_v40 = vld [vmem:[#allocation3 + $0x218] sm:$0xff] }
 0x55c   : > { %4120 = vst [vmem:[#allocation3 + $0x248] sm:$0xf0] %v4110_v59  ;;  %4634 = vrot.lane.b32.xlu0 %v9189_v14, %s11635_s27  ;;  %v6950_v11 = vpack.c.bf16 %v5541_v40, %v5536_v10  ;;  %s11705_s27 = smov 64  }
 0x55d   : > { %v4241_v13 = vpop.permute.xlu1 %4240 }
 0x55e   : > { %v9867_v12 = vpop.permute.xlu0 %4130  ;;  %6951 = vmatpush1.bf16.msra.mxu0 %v6950_v11 }
 0x55f   : > { %11647 = vst [vmem:[#allocation20_spill] sm:$0xff] %v9867_v12  ;;  %v4138_v18 = vsel %vm11642_vm2, %v4129_v3, %v9867_v12  ;;  %4782 = vrot.lane.b32.xlu1 %v9189_v14, %s11648_s5  ;;  %vm11653_vm2 = vcmask 400384  }
 0x560   : > { %4148 = vst [vmem:[#allocation3 + $0x270] sm:$0xf] %v4138_v18  ;;  %4662 = vrot.lane.b32.xlu0 %v9201_v2, %s11636_s8 }
 0x561   : > { %v9875_v19 = vpop.permute.xlu1 %4268 }
 0x562   : > { %v9877_v62 = vpop.permute.xlu0 %4158 }
 0x563   : > { %11649 = vst [vmem:[#allocation21_spill] sm:$0xff] %v9877_v62  ;;  %v4166_v37 = vsel %vm11650_vm12, %v9809_v0, %v9877_v62  ;;  %4807 = vrot.lane.b32.xlu1 %v9201_v2, %s11651_s7 }
 0x564   : > { %4176 = vst [vmem:[#allocation3 + $0x270] sm:$0xf0] %v4166_v37  ;;  %4690 = vrot.lane.b32.xlu0 %v9189_v14, %s11639_s28  ;;  %s11708_s28 = smov 63  }
 0x565   : > { %v9886_v48 = vpop.permute.xlu1 %4182 }
 0x566   : > { %v4193_v56 = vsel %vm11652_vm14, %v9886_v48, %v4185_v49  ;;  %v9890_v3 = vpop.permute.xlu0 %4098 }
 0x567   : > { %4203 = vst [vmem:[#allocation3 + $0x290] sm:$0xf] %v4193_v56  ;;  %v4109_v39 = vsel %vm11645_vm0, %v9890_v3, %v9793_v22  ;;  %4742 = vrot.lane.b32.xlu1 %v9149_v27, %s11646_s6  ;;  %v5547_v22 = vld [vmem:[#allocation3 + $0x248] sm:$0xff]  ;;  %vm11657_vm0 = vcmask 408576  }
 0x568   : > { %4119 = vst [vmem:[#allocation3 + $0x240] sm:$0xf0] %v4109_v39  ;;  %4718 = vrot.lane.b32.xlu0 %v9201_v2, %s11641_s4 }
 0x569   : > { %v9899_v45 = vpop.permute.xlu1 %4238 }
 0x56a   : > { %v4249_v42 = vsel %vm11653_vm2, %v9899_v45, %v4241_v13  ;;  %v9903_v54 = vpop.permute.xlu0 %4154 }
 0x56b   : > { %4259 = vst [vmem:[#allocation3 + $0x2b8] sm:$0xf] %v4249_v42  ;;  %v4165_v1 = vsel %vm11650_vm12, %v9903_v54, %v9809_v0  ;;  %4805 = vrot.lane.b32.xlu1 %v9164_v43, %s11651_s7  ;;  %v5552_v44 = vld [vmem:[#allocation3 + $0x270] sm:$0xff]  ;;  %vm11662_vm12 = vcmask 392192  }
 0x56c   : > { %4175 = vst [vmem:[#allocation3 + $0x268] sm:$0xf0] %v4165_v1  ;;  %4658 = vrot.lane.b32.xlu0 %v9158_v8, %s11636_s8  ;;  %v6952_v28 = vpack.c.bf16 %v5552_v44, %v5547_v22  ;;  %s11658_s8 = smov 109  }
 0x56d   : > { %v4297_v23 = vpop.permute.xlu1 %4296 }
 0x56e   : > { %v9912_v55 = vpop.permute.xlu0 %4186  ;;  %6953 = vmatprep.subr.bf16.mxu0 %v6952_v28 }
 0x56f   : > { %11654 = vst [vmem:[#allocation22_spill] sm:$0xff] %v9912_v55  ;;  %v4194_v16 = vsel %vm11652_vm14, %v4185_v49, %v9912_v55  ;;  %4834 = vrot.lane.b32.xlu1 %v9191_v32, %s11655_s1  ;;  %v5546_v59 = vld [vmem:[#allocation3 + $0x240] sm:$0xff]  ;;  %vm11664_vm14 = vcmask 261120  }
 0x570   : > { %4204 = vst [vmem:[#allocation3 + $0x298] sm:$0xf] %v4194_v16  ;;  %4714 = vrot.lane.b32.xlu0 %v9158_v8, %s11641_s4  ;;  %s11660_s4 = smov 108  }
 0x571   : > { %v9920_v0 = vpop.permute.xlu1 %4324 }
 0x572   : > { %v9922_v57 = vpop.permute.xlu0 %4214 }
 0x573   : > { %11656 = vst [vmem:[#allocation23_spill] sm:$0xff] %v9922_v57  ;;  %v4222_v36 = vsel %vm11657_vm0, %v9856_v50, %v9922_v57  ;;  %4859 = vrot.lane.b32.xlu1 %v9196_v29, %s11658_s8  ;;  %v5551_v49 = vld [vmem:[#allocation3 + $0x268] sm:$0xff] }
 0x574   : > { %4232 = vst [vmem:[#allocation3 + $0x298] sm:$0xf0] %v4222_v36  ;;  %4746 = vrot.lane.b32.xlu0 %v9189_v14, %s11646_s6  ;;  %v6954_v10 = vpack.c.bf16 %v5551_v49, %v5546_v59  ;;  %s11663_s6 = smov 107  }
 0x575   : > { %v4353_v40 = vpop.permute.xlu1 %4352 }
 0x576   : > { %v9931_v11 = vpop.permute.xlu0 %4242  ;;  %6955 = vmatpush1.bf16.msra.mxu0 %v6954_v10 }
 0x577   : > { %11659 = vst [vmem:[#allocation24_spill] sm:$0xff] %v9931_v11  ;;  %v4250_v18 = vsel %vm11653_vm2, %v4241_v13, %v9931_v11  ;;  %4884 = vrot.lane.b32.xlu1 %v9191_v32, %s11660_s4  ;;  %vm11665_vm2 = vcmask 244736  }
 0x578   : > { %4260 = vst [vmem:[#allocation3 + $0x2c0] sm:$0xf] %v4250_v18  ;;  %4784 = vrot.lane.b32.xlu0 %v9191_v32, %s11648_s5 }
 0x579   : > { %v9939_v37 = vpop.permute.xlu1 %4380 }
 0x57a   : > { %v9941_v56 = vpop.permute.xlu0 %4270 }
 0x57b   : > { %11661 = vst [vmem:[#allocation25_spill] sm:$0xff] %v9941_v56  ;;  %v4278_v39 = vsel %vm11662_vm12, %v9875_v19, %v9941_v56  ;;  %4909 = vrot.lane.b32.xlu1 %v9196_v29, %s11663_s6 }
 0x57c   : > { %4288 = vst [vmem:[#allocation3 + $0x2c0] sm:$0xf0] %v4278_v39  ;;  %4809 = vrot.lane.b32.xlu0 %v9196_v29, %s11651_s7  ;;  %s11670_s7 = smov 105  }
 0x57d   : > { %v9950_v13 = vpop.permute.xlu1 %4294 }
 0x57e   : > { %v4305_v42 = vsel %vm11664_vm14, %v9950_v13, %v4297_v23  ;;  %v9954_v1 = vpop.permute.xlu0 %4210 }
 0x57f   : > { %4315 = vst [vmem:[#allocation3 + $0x2e0] sm:$0xf] %v4305_v42  ;;  %v4221_v22 = vsel %vm11657_vm0, %v9954_v1, %v9856_v50  ;;  %4855 = vrot.lane.b32.xlu1 %v9164_v43, %s11658_s8  ;;  %v5557_v50 = vld [vmem:[#allocation3 + $0x298] sm:$0xff]  ;;  %vm11669_vm0 = vcmask 252928  }
 0x580   : > { %4231 = vst [vmem:[#allocation3 + $0x290] sm:$0xf0] %v4221_v22  ;;  %4780 = vrot.lane.b32.xlu0 %v9153_v20, %s11648_s5  ;;  %s11667_s5 = smov 106  }
 0x581   : > { %v9963_v44 = vpop.permute.xlu1 %4350 }
 0x582   : > { %v4361_v28 = vsel %vm11665_vm2, %v9963_v44, %v4353_v40  ;;  %v9967_v16 = vpop.permute.xlu0 %4266 }
 0x583   : > { %4371 = vst [vmem:[#allocation3 + $0x308] sm:$0xf] %v4361_v28  ;;  %v4277_v36 = vsel %vm11662_vm12, %v9967_v16, %v9875_v19  ;;  %4905 = vrot.lane.b32.xlu1 %v9164_v43, %s11663_s6  ;;  %v5562_v59 = vld [vmem:[#allocation3 + $0x2c0] sm:$0xff]  ;;  %vm11673_vm12 = vcmask 236544  }
 0x584   : > { %4287 = vst [vmem:[#allocation3 + $0x2b8] sm:$0xf0] %v4277_v36  ;;  %4832 = vrot.lane.b32.xlu0 %v9189_v14, %s11655_s1  ;;  %v6956_v49 = vpack.c.bf16 %v5562_v59, %v5557_v50 }
 0x585   : > { %v4409_v10 = vpop.permute.xlu1 %4408 }
 0x586   : > { %v9976_v18 = vpop.permute.xlu0 %4298  ;;  %6957 = vmatprep.subr.bf16.mxu0 %v6956_v49 }
 0x587   : > { %11666 = vst [vmem:[#allocation26_spill] sm:$0xff] %v9976_v18  ;;  %v4306_v39 = vsel %vm11664_vm14, %v4297_v23, %v9976_v18  ;;  %4934 = vrot.lane.b32.xlu1 %v9191_v32, %s11667_s5  ;;  %v5556_v28 = vld [vmem:[#allocation3 + $0x290] sm:$0xff]  ;;  %vm11675_vm14 = vcmask 228352  }
 0x588   : > { %4316 = vst [vmem:[#allocation3 + $0x2e8] sm:$0xf] %v4306_v39  ;;  %4857 = vrot.lane.b32.xlu0 %v9201_v2, %s11658_s8  ;;  %s11674_s8 = smov 88  }
 0x589   : > { %v9984_v19 = vpop.permute.xlu1 %4436 }
 0x58a   : > { %v9986_v42 = vpop.permute.xlu0 %4326 }
 0x58b   : > { %11668 = vst [vmem:[#allocation27_spill] sm:$0xff] %v9986_v42  ;;  %v4334_v22 = vsel %vm11669_vm0, %v9920_v0, %v9986_v42  ;;  %4959 = vrot.lane.b32.xlu1 %v9196_v29, %s11670_s7  ;;  %v5561_v23 = vld [vmem:[#allocation3 + $0x2b8] sm:$0xff] }
 0x58c   : > { %4344 = vst [vmem:[#allocation3 + $0x2e8] sm:$0xf0] %v4334_v22  ;;  %4882 = vrot.lane.b32.xlu0 %v9189_v14, %s11660_s4  ;;  %v6958_v36 = vpack.c.bf16 %v5561_v23, %v5556_v28 }
 0x58d   : > { %v4465_v50 = vpop.permute.xlu1 %4464 }
 0x58e   : > { %v9995_v59 = vpop.permute.xlu0 %4354  ;;  %6959 = vmatpush1.bf16.msra.mxu0 %v6958_v36 }
 0x58f   : > { %11671 = vst [vmem:[#allocation28_spill] sm:$0xff] %v9995_v59  ;;  %v4362_v49 = vsel %vm11665_vm2, %v4353_v40, %v9995_v59  ;;  %4984 = vrot.lane.b32.xlu1 %v9191_v32, %s11510_s26  ;;  %vm11676_vm2 = vcmask 211968  }
 0x590   : > { %4372 = vst [vmem:[#allocation3 + $0x310] sm:$0xf] %v4362_v49  ;;  %4907 = vrot.lane.b32.xlu0 %v9201_v2, %s11663_s6  ;;  %s11678_s6 = smov 87  }
 0x591   : > { %v10003_v39 = vpop.permute.xlu1 %4492 }
 0x592   : > { %v10005_v22 = vpop.permute.xlu0 %4382 }
 0x593   : > { %11672 = vst [vmem:[#allocation29_spill] sm:$0xff] %v10005_v22  ;;  %v4390_v28 = vsel %vm11673_vm12, %v9939_v37, %v10005_v22  ;;  %5008 = vrot.lane.b32.xlu1 %v9196_v29, %s11674_s8 }
 0x594   : > { %4400 = vst [vmem:[#allocation3 + $0x310] sm:$0xf0] %v4390_v28  ;;  %4830 = vrot.lane.b32.xlu0 %v9153_v20, %s11655_s1  ;;  %s11686_s1 = smov 84  }
 0x595   : > { %v10014_v40 = vpop.permute.xlu1 %4406 }
 0x596   : > { %v4417_v23 = vsel %vm11675_vm14, %v10014_v40, %v4409_v10  ;;  %v10018_v36 = vpop.permute.xlu0 %4322 }
 0x597   : > { %4427 = vst [vmem:[#allocation3 + $0x330] sm:$0xf] %v4417_v23  ;;  %v4333_v49 = vsel %vm11669_vm0, %v10018_v36, %v9920_v0  ;;  %4955 = vrot.lane.b32.xlu1 %v9164_v43, %s11670_s7  ;;  %v5567_v0 = vld [vmem:[#allocation3 + $0x2e8] sm:$0xff]  ;;  %vm11680_vm0 = vcmask 220160  }
 0x598   : > { %4343 = vst [vmem:[#allocation3 + $0x2e0] sm:$0xf0] %v4333_v49  ;;  %4880 = vrot.lane.b32.xlu0 %v9153_v20, %s11660_s4  ;;  %s11681_s4 = smov 86  }
 0x599   : > { %v10027_v28 = vpop.permute.xlu1 %4462 }
 0x59a   : > { %v4473_v21 = vsel %vm11676_vm2, %v10027_v28, %v4465_v50  ;;  %v10031_v25 = vpop.permute.xlu0 %4378 }
 0x59b   : > { %4483 = vst [vmem:[#allocation3 + $0x358] sm:$0xf] %v4473_v21  ;;  %v4389_v23 = vsel %vm11673_vm12, %v10031_v25, %v9939_v37  ;;  %5004 = vrot.lane.b32.xlu1 %v9164_v43, %s11674_s8  ;;  %v5572_v49 = vld [vmem:[#allocation3 + $0x310] sm:$0xff]  ;;  %vm11685_vm12 = vcmask 203776  }
 0x59c   : > { %4399 = vst [vmem:[#allocation3 + $0x308] sm:$0xf0] %v4389_v23  ;;  %4932 = vrot.lane.b32.xlu0 %v9189_v14, %s11667_s5  ;;  %v6960_v26 = vpack.c.bf16 %v5572_v49, %v5567_v0 }
 0x59d   : > { %v4521_v34 = vpop.permute.xlu1 %4520 }
 0x59e   : > { %v10040_v35 = vpop.permute.xlu0 %4410  ;;  %6961 = vmatprep.subr.bf16.mxu0 %v6960_v26 }
 0x59f   : > { %11677 = vst [vmem:[#allocation30_spill] sm:$0xff] %v10040_v35  ;;  %v4418_v21 = vsel %vm11675_vm14, %v4409_v10, %v10040_v35  ;;  %5033 = vrot.lane.b32.xlu1 %v9191_v32, %s11678_s6  ;;  %v5566_v26 = vld [vmem:[#allocation3 + $0x2e0] sm:$0xff]  ;;  %vm11687_vm14 = vcmask 195584  }
 0x5a0   : > { %4428 = vst [vmem:[#allocation3 + $0x338] sm:$0xf] %v4418_v21  ;;  %4957 = vrot.lane.b32.xlu0 %v9201_v2, %s11670_s7  ;;  %s11683_s7 = smov 85  }
 0x5a1   : > { %v10048_v37 = vpop.permute.xlu1 %4548 }
 0x5a2   : > { %v10050_v23 = vpop.permute.xlu0 %4438 }
 0x5a3   : > { %11679 = vst [vmem:[#allocation31_spill] sm:$0xff] %v10050_v23  ;;  %v4446_v0 = vsel %vm11680_vm0, %v9984_v19, %v10050_v23  ;;  %5058 = vrot.lane.b32.xlu1 %v9196_v29, %s11681_s4  ;;  %v5571_v10 = vld [vmem:[#allocation3 + $0x308] sm:$0xff] }
 0x5a4   : > { %4456 = vst [vmem:[#allocation3 + $0x338] sm:$0xf0] %v4446_v0  ;;  %4982 = vrot.lane.b32.xlu0 %v9189_v14, %s11510_s26  ;;  %v6962_v49 = vpack.c.bf16 %v5571_v10, %v5566_v26 }
 0x5a5   : > { %v4577_v21 = vpop.permute.xlu1 %4576 }
 0x5a6   : > { %v10059_v33 = vpop.permute.xlu0 %4466  ;;  %6963 = vmatpush1.bf16.msra.mxu0 %v6962_v49 }
 0x5a7   : > { %11682 = vst [vmem:[#allocation32_spill] sm:$0xff] %v10059_v33  ;;  %v4474_v17 = vsel %vm11676_vm2, %v4465_v50, %v10059_v33  ;;  %5083 = vrot.lane.b32.xlu1 %v9191_v32, %s11683_s7  ;;  %vm11688_vm2 = vcmask 56320  }
 0x5a8   : > { %4484 = vst [vmem:[#allocation3 + $0x360] sm:$0xf] %v4474_v17  ;;  %5006 = vrot.lane.b32.xlu0 %v9201_v2, %s11674_s8  ;;  %s11690_s8 = smov 83  }
 0x5a9   : > { %v10067_v61 = vpop.permute.xlu1 %4604 }
 0x5aa   : > { %v10069_v0 = vpop.permute.xlu0 %4494 }
 0x5ab   : > { %11684 = vst [vmem:[#allocation33_spill] sm:$0xff] %v10069_v0  ;;  %v4502_v26 = vsel %vm11685_vm12, %v10003_v39, %v10069_v0  ;;  %5108 = vrot.lane.b32.xlu1 %v9196_v29, %s11686_s1 }
 0x5ac   : > { %4512 = vst [vmem:[#allocation3 + $0x360] sm:$0xf0] %v4502_v26  ;;  %4930 = vrot.lane.b32.xlu0 %v9153_v20, %s11667_s5  ;;  %s11698_s5 = smov 80  }
 0x5ad   : > { %v10078_v50 = vpop.permute.xlu1 %4518 }
 0x5ae   : > { %v4529_v17 = vsel %vm11687_vm14, %v10078_v50, %v4521_v34  ;;  %v10082_v10 = vpop.permute.xlu0 %4434 }
 0x5af   : > { %4539 = vst [vmem:[#allocation3 + $0x380] sm:$0xf] %v4529_v17  ;;  %v4445_v49 = vsel %vm11680_vm0, %v10082_v10, %v9984_v19  ;;  %5054 = vrot.lane.b32.xlu1 %v9164_v43, %s11681_s4  ;;  %v5577_v19 = vld [vmem:[#allocation3 + $0x338] sm:$0xff]  ;;  %vm11692_vm0 = vcmask 64512  }
 0x5b0   : > { %4455 = vst [vmem:[#allocation3 + $0x330] sm:$0xf0] %v4445_v49  ;;  %4980 = vrot.lane.b32.xlu0 %v9153_v20, %s11510_s26  ;;  %s11693_s26 = smov 82  }
 0x5b1   : > { %v10091_v26 = vpop.permute.xlu1 %4574 }
 0x5b2   : > { %v4585_v47 = vsel %vm11688_vm2, %v10091_v26, %v4577_v21  ;;  %v10095_v24 = vpop.permute.xlu0 %4490 }
 0x5b3   : > { %4595 = vst [vmem:[#allocation3 + $0x3a8] sm:$0xf] %v4585_v47  ;;  %v4501_v17 = vsel %vm11685_vm12, %v10095_v24, %v10003_v39  ;;  %5104 = vrot.lane.b32.xlu1 %v9164_v43, %s11686_s1  ;;  %v5582_v49 = vld [vmem:[#allocation3 + $0x360] sm:$0xff]  ;;  %vm11697_vm12 = vcmask 48128  }
 0x5b4   : > { %4511 = vst [vmem:[#allocation3 + $0x358] sm:$0xf0] %v4501_v17  ;;  %5031 = vrot.lane.b32.xlu0 %v9189_v14, %s11678_s6  ;;  %v6964_v58 = vpack.c.bf16 %v5582_v49, %v5577_v19 }
 0x5b5   : > { %v4633_v62 = vpop.permute.xlu1 %4632 }
 0x5b6   : > { %v10104_v46 = vpop.permute.xlu0 %4522  ;;  %6965 = vmatprep.subr.bf16.mxu0 %v6964_v58 }
 0x5b7   : > { %11689 = vst [vmem:[#allocation34_spill] sm:$0xff] %v10104_v46  ;;  %v4530_v47 = vsel %vm11687_vm14, %v4521_v34, %v10104_v46  ;;  %5133 = vrot.lane.b32.xlu1 %v9191_v32, %s11690_s8  ;;  %v5576_v58 = vld [vmem:[#allocation3 + $0x330] sm:$0xff]  ;;  %vm11701_vm14 = vcmask 39936  }
 0x5b8   : > { %4540 = vst [vmem:[#allocation3 + $0x388] sm:$0xf] %v4530_v47  ;;  %5056 = vrot.lane.b32.xlu0 %v9201_v2, %s11681_s4  ;;  %s11695_s4 = smov 81  }
 0x5b9   : > { %v10112_v39 = vpop.permute.xlu1 %4660 }
 0x5ba   : > { %v10114_v17 = vpop.permute.xlu0 %4550 }
 0x5bb   : > { %11691 = vst [vmem:[#allocation35_spill] sm:$0xff] %v10114_v17  ;;  %v4558_v19 = vsel %vm11692_vm0, %v10048_v37, %v10114_v17  ;;  %5158 = vrot.lane.b32.xlu1 %v9196_v29, %s11693_s26  ;;  %v5581_v34 = vld [vmem:[#allocation3 + $0x358] sm:$0xff] }
 0x5bc   : > { %4568 = vst [vmem:[#allocation3 + $0x388] sm:$0xf0] %v4558_v19  ;;  %5081 = vrot.lane.b32.xlu0 %v9189_v14, %s11683_s7  ;;  %v6966_v49 = vpack.c.bf16 %v5581_v34, %v5576_v58 }
 0x5bd   : > { %v4689_v47 = vpop.permute.xlu1 %4688 }
 0x5be   : > { %v10123_v41 = vpop.permute.xlu0 %4578  ;;  %6967 = vmatpush1.bf16.msra.mxu0 %v6966_v49 }
 0x5bf   : > { %11694 = vst [vmem:[#allocation36_spill] sm:$0xff] %v10123_v41  ;;  %v4586_v12 = vsel %vm11688_vm2, %v4577_v21, %v10123_v41  ;;  %5183 = vrot.lane.b32.xlu1 %v9191_v32, %s11695_s4  ;;  %vm11703_vm2 = vcmask 23552  }
 0x5c0   : > { %4596 = vst [vmem:[#allocation3 + $0x3b0] sm:$0xf] %v4586_v12  ;;  %5106 = vrot.lane.b32.xlu0 %v9201_v2, %s11686_s1  ;;  %v10145_v12 = vld [vmem:[%s11699_s3] sm:$0x3f]  ;;  %s11710_s3 = smov 62   ;;  %s11722_s1 = smov 59  }
 0x5c1   : > { %v10131_v53 = vpop.permute.xlu1 %4716  ;;  %v10151_v34 = vrot.slane %v10145_v12, %v7520_v5 }
 0x5c2   : > { %v10133_v19 = vpop.permute.xlu0 %4606 }
 0x5c3   : > { %11696 = vst [vmem:[#allocation37_spill] sm:$0xff] %v10133_v19  ;;  %v4614_v58 = vsel %vm11697_vm12, %v10067_v61, %v10133_v19  ;;  %5208 = vrot.lane.b32.xlu1 %v9196_v29, %s11698_s5  ;;  %11700 = vst [vmem:[#allocation38_spill] sm:$0xff] %v10151_v34  ;;  %v10164_v17 = vcombine.high %v10151_v34, %v10151_v34 }
 0x5c4   : > { %4624 = vst [vmem:[#allocation3 + $0x3b0] sm:$0xf0] %v4614_v58  ;;  %5029 = vrot.lane.b32.xlu0 %v9153_v20, %s11678_s6 }
 0x5c5   : > { %v10147_v21 = vpop.permute.xlu1 %4630  ;;  %11702 = vst [vmem:[#allocation39_spill] sm:$0xff] %v10164_v17  ;;  %5928 = vmatprep.mubr.f32.mxu0 %v10164_v17  ;;  %5786 = vmatprep.mubr.f32.mxu1 %v10164_v17 }
 0x5c6   : > { %v4641_v49 = vsel %vm11701_vm14, %v10147_v21, %v4633_v62  ;;  %v10155_v19 = vpop.permute.xlu0 %4546 }
 0x5c7   : > { %4651 = vst [vmem:[#allocation3 + $0x3d0] sm:$0xf] %v4641_v49  ;;  %v4557_v58 = vsel %vm11692_vm0, %v10155_v19, %v10048_v37  ;;  %5154 = vrot.lane.b32.xlu1 %v9164_v43, %s11693_s26  ;;  %vm11707_vm0 = vcmask 31744  }
 0x5c8   : > { %4567 = vst [vmem:[#allocation3 + $0x380] sm:$0xf0] %v4557_v58  ;;  %5079 = vrot.lane.b32.xlu0 %v9153_v20, %s11683_s7  ;;  %v5587_v58 = vld [vmem:[#allocation3 + $0x388] sm:$0xff] }
 0x5c9   : > { %v10168_v0 = vpop.permute.xlu1 %4686 }
 0x5ca   : > { %v4697_v37 = vsel %vm11703_vm2, %v10168_v0, %v4689_v47  ;;  %v10174_v49 = vpop.permute.xlu0 %4602 }
 0x5cb   : > { %4707 = vst [vmem:[#allocation3 + $0x3f8] sm:$0xf] %v4697_v37  ;;  %v4613_v23 = vsel %vm11697_vm12, %v10174_v49, %v10067_v61  ;;  %5204 = vrot.lane.b32.xlu1 %v9164_v43, %s11698_s5  ;;  %v5592_v22 = vld [vmem:[#allocation3 + $0x3b0] sm:$0xff]  ;;  %vm11711_vm12 = vcmask 7168  }
 0x5cc   : > { %4623 = vst [vmem:[#allocation3 + $0x3a8] sm:$0xf0] %v4613_v23  ;;  %5131 = vrot.lane.b32.xlu0 %v9189_v14, %s11690_s8  ;;  %v6968_v17 = vpack.c.bf16 %v5592_v22, %v5587_v58 }
 0x5cd   : > { %v4745_v41 = vpop.permute.xlu1 %4744 }
 0x5ce   : > { %v10183_v42 = vpop.permute.xlu0 %4634  ;;  %6969 = vmatprep.subr.bf16.mxu0 %v6968_v17 }
 0x5cf   : > { %11704 = vst [vmem:[#allocation40_spill] sm:$0xff] %v10183_v42  ;;  %v4642_v37 = vsel %vm11701_vm14, %v4633_v62, %v10183_v42  ;;  %5232 = vrot.lane.b32.xlu1 %v9191_v32, %s11705_s27  ;;  %v5586_v17 = vld [vmem:[#allocation3 + $0x380] sm:$0xff]  ;;  %vm11713_vm14 = vcmask 15360  }
 0x5d0   : > { %4652 = vst [vmem:[#allocation3 + $0x3d8] sm:$0xf] %v4642_v37  ;;  %5156 = vrot.lane.b32.xlu0 %v9201_v2, %s11693_s26  ;;  %s11714_s26 = smov 61  }
 0x5d1   : > { %v10191_v61 = vpop.permute.xlu1 %4782 }
 0x5d2   : > { %v10193_v23 = vpop.permute.xlu0 %4662 }
 0x5d3   : > { %11706 = vst [vmem:[#allocation41_spill] sm:$0xff] %v10193_v23  ;;  %v4670_v22 = vsel %vm11707_vm0, %v10112_v39, %v10193_v23  ;;  %5258 = vrot.lane.b32.xlu1 %v9196_v29, %s11708_s28  ;;  %v5591_v62 = vld [vmem:[#allocation3 + $0x3a8] sm:$0xff]  ;;  %vm11715_vm0 = vcmask 908288  }
 0x5d4   : > { %4680 = vst [vmem:[#allocation3 + $0x3d8] sm:$0xf0] %v4670_v22  ;;  %5181 = vrot.lane.b32.xlu0 %v9189_v14, %s11695_s4  ;;  %v6970_v58 = vpack.c.bf16 %v5591_v62, %v5586_v17 }
 0x5d5   : > { %v4808_v37 = vpop.permute.xlu1 %4807 }
 0x5d6   : > { %v10202_v42 = vpop.permute.xlu0 %4690  ;;  %6971 = vmatpush1.bf16.msra.mxu0 %v6970_v58 }
 0x5d7   : > { %11709 = vst [vmem:[#allocation42_spill] sm:$0xff] %v10202_v42  ;;  %v4698_v46 = vsel %vm11703_vm2, %v4689_v47, %v10202_v42  ;;  %5286 = vrot.lane.b32.xlu1 %v9191_v32, %s11710_s3  ;;  %vm11716_vm2 = vcmask 31744  }
 0x5d8   : > { %4708 = vst [vmem:[#allocation3 + $0x400] sm:$0xf] %v4698_v46  ;;  %5206 = vrot.lane.b32.xlu0 %v9201_v2, %s11698_s5  ;;  %s11720_s5 = smov 60  }
 0x5d9   : > { %v10210_v23 = vpop.permute.xlu1 %4742 }
 0x5da   : > { %v4753_v22 = vsel %vm11711_vm12, %v10210_v23, %v4745_v41  ;;  %v10214_v17 = vpop.permute.xlu0 %4718  ;;  %vm11717_vm12 = vmmov %vm11713_vm14 }
 0x5db   : > { %11712 = vst [vmem:[#allocation43_spill] sm:$0xff] %v10214_v17  ;;  %4763 = vst [vmem:[#allocation3 + $0x420] sm:$0xf] %v4753_v22  ;;  %v4726_v62 = vsel %vm11713_vm14, %v10131_v53, %v10214_v17  ;;  %5314 = vrot.lane.b32.xlu1 %v9196_v29, %s11714_s26  ;;  %vm11719_vm14 = vcmask 7168  }
 0x5dc   : > { %4736 = vst [vmem:[#allocation3 + $0x400] sm:$0xf0] %v4726_v62  ;;  %5129 = vrot.lane.b32.xlu0 %v9153_v20, %s11690_s8  ;;  %s11728_s8 = smov 57  }
 0x5dd   : > { %v10223_v46 = vpop.permute.xlu1 %4805 }
 0x5de   : > { %v4814_v47 = vsel %vm11715_vm0, %v10223_v46, %v4808_v37  ;;  %v10227_v58 = vpop.permute.xlu0 %4658  ;;  %vm11721_vm0 = vcmask 916480  }
 0x5df   : > { %4823 = vst [vmem:[#allocation3 + $0x448] sm:$0xf0] %v4814_v47  ;;  %v4669_v22 = vsel %vm11716_vm2, %v10227_v58, %v10112_v39  ;;  %5254 = vrot.lane.b32.xlu1 %v9164_v43, %s11708_s28  ;;  %v5597_v39 = vld [vmem:[#allocation3 + $0x3d8] sm:$0xff]  ;;  %vm11723_vm2 = vcmask 908288  }
 0x5e0   : > { %4679 = vst [vmem:[#allocation3 + $0x3d0] sm:$0xf0] %v4669_v22  ;;  %5179 = vrot.lane.b32.xlu0 %v9153_v20, %s11695_s4  ;;  %s11724_s4 = smov 58  }
 0x5e1   : > { %v4835_v62 = vpop.permute.xlu1 %4834 }
 0x5e2   : > { %4850 = vst.msk [vmem:[#allocation3 + $0x480] sm:$0xf] %vm3378_vm7, %v4835_v62  ;;  %v10237_v17 = vpop.permute.xlu0 %4714  ;;  %v5606_v11 = vld [vmem:[#allocation3 + $0x420] sm:$0xff] }
 0x5e3   : > { %v4725_v47 = vsel %vm11717_vm12, %v10237_v17, %v10131_v53  ;;  %5310 = vrot.lane.b32.xlu1 %v9164_v43, %s11714_s26  ;;  %v5602_v42 = vld [vmem:[#allocation3 + $0x400] sm:$0xff]  ;;  %vm11727_vm12 = vmmov %vm11721_vm0 }
 0x5e4   : > { %4735 = vst [vmem:[#allocation3 + $0x3f8] sm:$0xf0] %v4725_v47  ;;  %5230 = vrot.lane.b32.xlu0 %v9189_v14, %s11705_s27  ;;  %v6972_v22 = vpack.c.bf16 %v5602_v42, %v5597_v39 }
 0x5e5   : > { %v4860_v33 = vpop.permute.xlu1 %4859 }
 0x5e6   : > { %4875 = vst.msk [vmem:[#allocation3 + $0x480] sm:$0xf0] %vm11460_vm4, %v4860_v33  ;;  %v10247_v56 = vpop.permute.xlu0 %4746  ;;  %6973 = vmatprep.subr.bf16.mxu0 %v6972_v22 }
 0x5e7   : > { %11718 = vst [vmem:[#allocation44_spill] sm:$0xff] %v10247_v56  ;;  %v4754_v35 = vsel %vm11719_vm14, %v4745_v41, %v10247_v56  ;;  %5342 = vrot.lane.b32.xlu1 %v9191_v32, %s11720_s5  ;;  %v5596_v41 = vld [vmem:[#allocation3 + $0x3d0] sm:$0xff]  ;;  %vm11730_vm14 = vcmask 900096  }
 0x5e8   : > { %4764 = vst [vmem:[#allocation3 + $0x428] sm:$0xf] %v4754_v35  ;;  %5256 = vrot.lane.b32.xlu0 %v9201_v2, %s11708_s28 }
 0x5e9   : > { %v4885_v53 = vpop.permute.xlu1 %4884 }
 0x5ea   : > { %4900 = vst.msk [vmem:[#allocation3 + $0x4a8] sm:$0xf] %vm3378_vm7, %v4885_v53  ;;  %v4785_v42 = vpop.permute.xlu0 %4784 }
 0x5eb   : > { %v4790_v47 = vsel %vm11721_vm0, %v10191_v61, %v4785_v42  ;;  %4800 = vst.msk [vmem:[#allocation3 + $0x458] sm:$0xf] %vm3378_vm7, %v4785_v42  ;;  %5370 = vrot.lane.b32.xlu1 %v9196_v29, %s11722_s1  ;;  %v5601_v39 = vld [vmem:[#allocation3 + $0x3f8] sm:$0xff]  ;;  %vm11731_vm0 = vcmask 891904  }
 0x5ec   : > { %4799 = vst [vmem:[#allocation3 + $0x450] sm:$0xf] %v4790_v47  ;;  %5284 = vrot.lane.b32.xlu0 %v9189_v14, %s11710_s3  ;;  %v6974_v35 = vpack.c.bf16 %v5601_v39, %v5596_v41 }
 0x5ed   : > { %v4910_v22 = vpop.permute.xlu1 %4909 }
 0x5ee   : > { %4925 = vst.msk [vmem:[#allocation3 + $0x4a8] sm:$0xf0] %vm11460_vm4, %v4910_v22  ;;  %v4810_v56 = vpop.permute.xlu0 %4809  ;;  %6975 = vmatpush1.bf16.msra.mxu0 %v6974_v35 }
 0x5ef   : > { %v4815_v57 = vsel %vm11723_vm2, %v4808_v37, %v4810_v56  ;;  %4825 = vst.msk [vmem:[#allocation3 + $0x458] sm:$0xf0] %vm11460_vm4, %v4810_v56  ;;  %5398 = vrot.lane.b32.xlu1 %v9191_v32, %s11724_s4  ;;  %v5607_v39 = vld [vmem:[#allocation3 + $0x428] sm:$0xff]  ;;  %vm11732_vm2 = vmmov %vm11731_vm0 }
 0x5f0   : > { %4824 = vst [vmem:[#allocation3 + $0x450] sm:$0xf0] %v4815_v57  ;;  %5312 = vrot.lane.b32.xlu0 %v9201_v2, %s11714_s26 }
 0x5f1   : > { %v10270_v42 = vpop.permute.xlu1 %4855 }
 0x5f2   : > { %11725 = vst [vmem:[#allocation45_spill] sm:$0xff] %v10270_v42  ;;  %v10272_v47 = vpop.permute.xlu0 %4780 }
 0x5f3   : > { %11726 = vst [vmem:[#allocation46_spill] sm:$0xff] %v10272_v47  ;;  %v4789_v41 = vsel %vm11727_vm12, %v10272_v47, %v10191_v61  ;;  %5426 = vrot.lane.b32.xlu1 %v9196_v29, %s11728_s8  ;;  %vm11733_vm12 = vcmask 883712  }
 0x5f4   : > { %4798 = vst [vmem:[#allocation3 + $0x448] sm:$0xf] %v4789_v41  ;;  %5228 = vrot.lane.b32.xlu0 %v9153_v20, %s11705_s27  ;;  %s11734_s27 = smov 56  }
 0x5f5   : > { %v10281_v56 = vpop.permute.xlu1 %4905 }
 0x5f6   : > { %11729 = vst [vmem:[#allocation47_spill] sm:$0xff] %v10281_v56  ;;  %v4833_v57 = vpop.permute.xlu0 %4832 }
 0x5f7   : > { %v4840_v37 = vsel %vm11730_vm14, %v4833_v57, %v4835_v62  ;;  %5366 = vrot.lane.b32.xlu1 %v9164_v43, %s11722_s1  ;;  %v5612_v35 = vld [vmem:[#allocation3 + $0x450] sm:$0xff]  ;;  %vm11736_vm14 = vcmask 875520  }
 0x5f8   : > { %4849 = vst [vmem:[#allocation3 + $0x478] sm:$0xf] %v4840_v37  ;;  %5282 = vrot.lane.b32.xlu0 %v9153_v20, %s11710_s3  ;;  %v6976_v61 = vpack.c.bf16 %v5612_v35, %v5607_v39 }
 0x5f9   : > { %v4935_v59 = vpop.permute.xlu1 %4934 }
 0x5fa   : > { %4950 = vst.msk [vmem:[#allocation3 + $0x4d0] sm:$0xf] %vm3378_vm7, %v4935_v59  ;;  %v4858_v41 = vpop.permute.xlu0 %4857  ;;  %6977 = vmatprep.subr.bf16.mxu0 %v6976_v61 }
 0x5fb   : > { %v4864_v18 = vsel %vm11731_vm0, %v10270_v42, %v4858_v41  ;;  %v4865_v62 = vsel %vm11732_vm2, %v4858_v41, %v4860_v33  ;;  %5422 = vrot.lane.b32.xlu1 %v9164_v43, %s11728_s8  ;;  %v5611_v55 = vld [vmem:[#allocation3 + $0x448] sm:$0xff]  ;;  %v11735_v33 = vmov 0.0   ;;  %vm11737_vm0 = vmmov %vm11736_vm14  ;;  %vm11738_vm2 = vcmask 900096  }
 0x5fc   : > { %4873 = vst [vmem:[#allocation3 + $0x470] sm:$0xf0] %v4864_v18  ;;  %4874 = vst [vmem:[#allocation3 + $0x478] sm:$0xf0] %v4865_v62  ;;  %5340 = vrot.lane.b32.xlu0 %v9189_v14, %s11720_s5  ;;  %v6978_v37 = vpack.c.bf16 %v5611_v55, %v5606_v11  ;;  %v10301_v43 = vrot.slane %v11735_v33, 4 }
 0x5fd   : > { %v4960_v39 = vpop.permute.xlu1 %4959 }
 0x5fe   : > { %4975 = vst.msk [vmem:[#allocation3 + $0x4d0] sm:$0xf0] %vm11460_vm4, %v4960_v39  ;;  %v4883_v35 = vpop.permute.xlu0 %4882  ;;  %6979 = vmatpush1.bf16.msra.mxu0 %v6978_v37 }
 0x5ff   : > { %v4890_v61 = vsel %vm11733_vm12, %v4883_v35, %v4885_v53  ;;  %5454 = vrot.lane.b32.xlu1 %v9191_v32, %s11734_s27 }
 0x600   : > { %4899 = vst [vmem:[#allocation3 + $0x4a0] sm:$0xf] %v4890_v61  ;;  %5368 = vrot.lane.b32.xlu0 %v9201_v2, %s11722_s1 }
 0x601   : > { %v4985_v18 = vpop.permute.xlu1 %4984 }
 0x602   : > { %4999 = vst.msk [vmem:[#allocation3 + $0x4f8] sm:$0xf] %vm3378_vm7, %v4985_v18  ;;  %v4908_v55 = vpop.permute.xlu0 %4907 }
 0x603   : > { %v4914_v11 = vsel %vm11736_vm14, %v10281_v56, %v4908_v55  ;;  %v4915_v41 = vsel %vm11737_vm0, %v4908_v55, %v4910_v22  ;;  %5260 = vrot.lane.b32.xlu1 %v10301_v43, %s11708_s28  ;;  %vm11742_vm14 = vcmask 867328   ;;  %vm11743_vm0 = vcmask 859136  }
 0x604   : > { %4923 = vst [vmem:[#allocation3 + $0x498] sm:$0xf0] %v4914_v11  ;;  %4924 = vst [vmem:[#allocation3 + $0x4a0] sm:$0xf0] %v4915_v41  ;;  %5396 = vrot.lane.b32.xlu0 %v9189_v14, %s11724_s4  ;;  %v5617_v11 = vld [vmem:[#allocation3 + $0x478] sm:$0xff] }
 0x605   : > { %v5009_v53 = vpop.permute.xlu1 %5008 }
 0x606   : > { %5024 = vst.msk [vmem:[#allocation3 + $0x4f8] sm:$0xf0] %vm11460_vm4, %v5009_v53  ;;  %v10314_v62 = vpop.permute.xlu0 %4830 }
 0x607   : > { %v4839_v37 = vsel %vm11738_vm2, %v10314_v62, %v4833_v57  ;;  %5316 = vrot.lane.b32.xlu1 %v10301_v43, %s11714_s26  ;;  %vm11744_vm2 = vmmov %vm11743_vm0 }
 0x608   : > { %4848 = vst [vmem:[#allocation3 + $0x470] sm:$0xf] %v4839_v37  ;;  %5424 = vrot.lane.b32.xlu0 %v9201_v2, %s11728_s8 }
 0x609   : > { %v10322_v22 = vpop.permute.xlu1 %4955 }
 0x60a   : > { %11739 = vst [vmem:[#allocation48_spill] sm:$0xff] %v10322_v22  ;;  %v10324_v61 = vpop.permute.xlu0 %4880 }
 0x60b   : > { %11740 = vst [vmem:[#allocation49_spill] sm:$0xff] %v10324_v61  ;;  %v4889_v55 = vsel %vm11733_vm12, %v10324_v61, %v4883_v35  ;;  %v5622_v41 = vld [vmem:[#allocation3 + $0x4a0] sm:$0xff]  ;;  %vm11745_vm12 = vcmask 850944  }
 0x60c   : > { %4898 = vst [vmem:[#allocation3 + $0x498] sm:$0xf] %v4889_v55  ;;  %5338 = vrot.lane.b32.xlu0 %v9153_v20, %s11720_s5  ;;  %v6980_v57 = vpack.c.bf16 %v5622_v41, %v5617_v11 }
 0x60d   : > { %v10330_v56 = vpop.permute.xlu1 %5004 }
 0x60e   : > { %11741 = vst [vmem:[#allocation50_spill] sm:$0xff] %v10330_v56  ;;  %v4933_v37 = vpop.permute.xlu0 %4932  ;;  %6981 = vmatprep.subr.bf16.mxu0 %v6980_v57 }
 0x60f   : > { %v4940_v2 = vsel %vm11742_vm14, %v4933_v37, %v4935_v59  ;;  %v5616_v11 = vld [vmem:[#allocation3 + $0x470] sm:$0xff]  ;;  %vm11746_vm14 = vcmask 719872  }
 0x610   : > { %4949 = vst [vmem:[#allocation3 + $0x4c8] sm:$0xf] %v4940_v2  ;;  %5394 = vrot.lane.b32.xlu0 %v9153_v20, %s11724_s4 }
 0x611   : > { %v5034_v42 = vpop.permute.xlu1 %5033 }
 0x612   : > { %5049 = vst.msk [vmem:[#allocation3 + $0x520] sm:$0xf] %vm3378_vm7, %v5034_v42  ;;  %v4958_v35 = vpop.permute.xlu0 %4957 }
 0x613   : > { %v4964_v55 = vsel %vm11743_vm0, %v10322_v22, %v4958_v35  ;;  %v4965_v47 = vsel %vm11744_vm2, %v4958_v35, %v4960_v39  ;;  %v5621_v41 = vld [vmem:[#allocation3 + $0x498] sm:$0xff]  ;;  %vm11747_vm0 = vmmov %vm11746_vm14  ;;  %vm11748_vm2 = vcmask 867328  }
 0x614   : > { %4973 = vst [vmem:[#allocation3 + $0x4c0] sm:$0xf0] %v4964_v55  ;;  %4974 = vst [vmem:[#allocation3 + $0x4c8] sm:$0xf0] %v4965_v47  ;;  %5452 = vrot.lane.b32.xlu0 %v9189_v14, %s11734_s27  ;;  %v6982_v59 = vpack.c.bf16 %v5621_v41, %v5616_v11 }
 0x615   : > { %v5059_v57 = vpop.permute.xlu1 %5058 }
 0x616   : > { %5074 = vst.msk [vmem:[#allocation3 + $0x520] sm:$0xf0] %vm11460_vm4, %v5059_v57  ;;  %v4983_v2 = vpop.permute.xlu0 %4982  ;;  %6983 = vmatpush1.bf16.msra.mxu0 %v6982_v59 }
 0x617   : > { %v4989_v61 = vsel %vm11745_vm12, %v4983_v2, %v4985_v18 }
 0x618   : > { %4998 = vst [vmem:[#allocation3 + $0x4f0] sm:$0xf] %v4989_v61  ;;  %5450 = vrot.lane.b32.xlu0 %v9153_v20, %s11734_s27 }
 0x619   : > { %v5084_v39 = vpop.permute.xlu1 %5083 }
 0x61a   : > { %5099 = vst.msk [vmem:[#allocation3 + $0x548] sm:$0xf] %vm3378_vm7, %v5084_v39  ;;  %v5007_v35 = vpop.permute.xlu0 %5006 }
 0x61b   : > { %v5013_v47 = vsel %vm11746_vm14, %v10330_v56, %v5007_v35  ;;  %v5014_v14 = vsel %vm11747_vm0, %v5007_v35, %v5009_v53  ;;  %v5627_v41 = vld [vmem:[#allocation3 + $0x4c8] sm:$0xff]  ;;  %vm11752_vm14 = vcmask 687104  }
 0x61c   : > { %5022 = vst [vmem:[#allocation3 + $0x4e8] sm:$0xf0] %v5013_v47  ;;  %5023 = vst [vmem:[#allocation3 + $0x4f0] sm:$0xf0] %v5014_v14  ;;  %5288 = vrot.lane.b32.xlu0 %v11735_v33, %s11710_s3 }
 0x61d   : > { %v5109_v55 = vpop.permute.xlu1 %5108  ;;  %vm11753_vm0 = vmmov %vm11752_vm14 }
 0x61e   : > { %5124 = vst.msk [vmem:[#allocation3 + $0x548] sm:$0xf0] %vm11460_vm4, %v5109_v55  ;;  %v10352_v18 = vpop.permute.xlu0 %4930 }
 0x61f   : > { %v4939_v20 = vsel %vm11748_vm2, %v10352_v18, %v4933_v37  ;;  %vm11757_vm2 = vcmask 678912  }
 0x620   : > { %4948 = vst [vmem:[#allocation3 + $0x4c0] sm:$0xf] %v4939_v20 }
 0x621   : > { %v10356_v61 = vpop.permute.xlu1 %5054 }
 0x622   : > { %11749 = vst [vmem:[#allocation51_spill] sm:$0xff] %v10356_v61  ;;  %v10358_v11 = vpop.permute.xlu0 %4980 }
 0x623   : > { %11750 = vst [vmem:[#allocation52_spill] sm:$0xff] %v10358_v11  ;;  %v4988_v53 = vsel %vm11745_vm12, %v10358_v11, %v4983_v2  ;;  %v5632_v59 = vld [vmem:[#allocation3 + $0x4f0] sm:$0xff]  ;;  %vm11758_vm12 = vcmask 670720  }
 0x624   : > { %4997 = vst [vmem:[#allocation3 + $0x4e8] sm:$0xf] %v4988_v53  ;;  %v6984_v35 = vpack.c.bf16 %v5632_v59, %v5627_v41 }
 0x625   : > { %v10362_v47 = vpop.permute.xlu1 %5104 }
 0x626   : > { %11751 = vst [vmem:[#allocation53_spill] sm:$0xff] %v10362_v47  ;;  %v5032_v14 = vpop.permute.xlu0 %5031  ;;  %6985 = vmatprep.subr.bf16.mxu0 %v6984_v35 }
 0x627   : > { %v5039_v56 = vsel %vm1642_vm15, %v5032_v14, %v5034_v42  ;;  %v5626_v53 = vld [vmem:[#allocation3 + $0x4c0] sm:$0xff] }
 0x628   : > { %5048 = vst [vmem:[#allocation3 + $0x518] sm:$0xf] %v5039_v56 }
 0x629   : > { %v5134_v37 = vpop.permute.xlu1 %5133 }
 0x62a   : > { %5149 = vst.msk [vmem:[#allocation3 + $0x570] sm:$0xf] %vm3378_vm7, %v5134_v37  ;;  %v5057_v20 = vpop.permute.xlu0 %5056 }
 0x62b   : > { %v5063_v22 = vsel %vm1662_vm9, %v10356_v61, %v5057_v20  ;;  %v5064_v2 = vsel %vm1662_vm9, %v5057_v20, %v5059_v57  ;;  %6218 = vadd.xlane.f32.xlu1 %v9094_v30  ;;  %v5631_v41 = vld [vmem:[#allocation3 + $0x4e8] sm:$0xff] }
 0x62c   : > { %5072 = vst [vmem:[#allocation3 + $0x510] sm:$0xf0] %v5063_v22  ;;  %5073 = vst [vmem:[#allocation3 + $0x518] sm:$0xf0] %v5064_v2  ;;  %v6986_v59 = vpack.c.bf16 %v5631_v41, %v5626_v53 }
 0x62d   : > { %v5159_v35 = vpop.permute.xlu1 %5158 }
 0x62e   : > { %5174 = vst.msk [vmem:[#allocation3 + $0x570] sm:$0xf0] %vm11460_vm4, %v5159_v35  ;;  %v5082_v42 = vpop.permute.xlu0 %5081  ;;  %6987 = vmatpush1.bf16.msra.mxu0 %v6986_v59 }
 0x62f   : > { %v5089_v56 = vsel %vm1682_vm3, %v5082_v42, %v5084_v39 }
 0x630   : > { %5098 = vst [vmem:[#allocation3 + $0x540] sm:$0xf] %v5089_v56 }
 0x631   : > { %v5184_v11 = vpop.permute.xlu1 %5183  ;;  %5929 = vmatmul.mubr.f32.vlgmr.msra.gmra.mrb[24].mxu0 %v10151_v34 }
 0x632   : > { %5199 = vst.msk [vmem:[#allocation3 + $0x598] sm:$0xf] %vm3378_vm7, %v5184_v11  ;;  %v5107_v57 = vpop.permute.xlu0 %5106  ;;  %5999 = vmatprep.mubr.f32.mxu0 %v11735_v33 }
 0x633   : > { %v5113_v30 = vsel %vm11752_vm14, %v10362_v47, %v5107_v57  ;;  %v5114_v22 = vsel %vm11753_vm0, %v5107_v57, %v5109_v55  ;;  %v5637_v55 = vld [vmem:[#allocation3 + $0x518] sm:$0xff]  ;;  %vm11759_vm14 = vmmov %vm11758_vm12  ;;  %vm11760_vm0 = vcmask 662528  }
 0x634   : > { %5122 = vst [vmem:[#allocation3 + $0x538] sm:$0xf0] %v5113_v30  ;;  %5123 = vst [vmem:[#allocation3 + $0x540] sm:$0xf0] %v5114_v22 }
 0x635   : > { %v5209_v20 = vpop.permute.xlu1 %5208 }
 0x636   : > { %5223 = vst.msk [vmem:[#allocation3 + $0x598] sm:$0xf0] %vm11460_vm4, %v5209_v20  ;;  %v10379_v39 = vpop.permute.xlu0 %5029 }
 0x637   : > { %v5038_v2 = vsel %vm1642_vm15, %v10379_v39, %v5032_v14 }
 0x638   : > { %5047 = vst [vmem:[#allocation3 + $0x510] sm:$0xf] %v5038_v2 }
 0x639   : > { %v10383_v53 = vpop.permute.xlu1 %5154 }
 0x63a   : > { %11754 = vst [vmem:[#allocation54_spill] sm:$0xff] %v10383_v53  ;;  %v10385_v41 = vpop.permute.xlu0 %5079 }
 0x63b   : > { %11755 = vst [vmem:[#allocation55_spill] sm:$0xff] %v10385_v41  ;;  %v5088_v59 = vsel %vm1682_vm3, %v10385_v41, %v5082_v42  ;;  %6211 = vadd.xlane.f32.xlu0 %v9097_v15  ;;  %v5642_v56 = vld [vmem:[#allocation3 + $0x540] sm:$0xff] }
 0x63c   : > { %5097 = vst [vmem:[#allocation3 + $0x538] sm:$0xf] %v5088_v59  ;;  %5372 = vrot.lane.b32.xlu1 %v10301_v43, %s11722_s1  ;;  %v6988_v57 = vpack.c.bf16 %v5642_v56, %v5637_v55 }
 0x63d   : > { %v10392_v30 = vpop.permute.xlu1 %5204 }
 0x63e   : > { %11756 = vst [vmem:[#allocation56_spill] sm:$0xff] %v10392_v30  ;;  %v5132_v14 = vpop.permute.xlu0 %5131  ;;  %6989 = vmatprep.subr.bf16.mxu0 %v6988_v57 }
 0x63f   : > { %v5139_v22 = vsel %vm11757_vm2, %v5132_v14, %v5134_v37  ;;  %v5636_v55 = vld [vmem:[#allocation3 + $0x510] sm:$0xff] }
 0x640   : > { %5148 = vst [vmem:[#allocation3 + $0x568] sm:$0xf] %v5139_v22  ;;  %5428 = vrot.lane.b32.xlu1 %v10301_v43, %s11728_s8 }
 0x641   : > { %v5233_v42 = vpop.permute.xlu1 %5232 }
 0x642   : > { %5247 = vst.msk [vmem:[#allocation3 + $0x5c0] sm:$0xf] %vm3378_vm7, %v5233_v42  ;;  %v5157_v15 = vpop.permute.xlu0 %5156 }
 0x643   : > { %v5163_v2 = vsel %vm11758_vm12, %v10383_v53, %v5157_v15  ;;  %v5164_v59 = vsel %vm11759_vm14, %v5157_v15, %v5159_v35  ;;  %v5641_v56 = vld [vmem:[#allocation3 + $0x538] sm:$0xff]  ;;  %vm11764_vm12 = vmmov %vm11760_vm0  ;;  %vm11766_vm14 = vcmask 498688  }
 0x644   : > { %5172 = vst [vmem:[#allocation3 + $0x560] sm:$0xf0] %v5163_v2  ;;  %5173 = vst [vmem:[#allocation3 + $0x568] sm:$0xf0] %v5164_v59  ;;  %3963 = vrot.lane.b32.xlu1 %v9127_v31, %s11559_s24  ;;  %v6990_v37 = vpack.c.bf16 %v5641_v56, %v5636_v55 }
 0x645   : > { %v10403_v57 = vpop.permute.xlu1 %5258 }
 0x646   : > { %v5182_v43 = vpop.permute.xlu0 %5181  ;;  %6991 = vmatpush1.bf16.msra.mxu0 %v6990_v37 }
 0x647   : > { %v5189_v22 = vsel %vm11760_vm0, %v5182_v43, %v5184_v11  ;;  %vm11767_vm0 = vmmov %vm11766_vm14 }
 0x648   : > { %5198 = vst [vmem:[#allocation3 + $0x590] sm:$0xf] %v5189_v22  ;;  %4013 = vrot.lane.b32.xlu1 %v9127_v31, %s11566_s10 }
 0x649   : > { %v10408_v53 = vpop.permute.xlu1 %5286 }
 0x64a   : > { %v5207_v35 = vpop.permute.xlu0 %5206 }
 0x64b   : > { %v5212_v15 = vsel %vm709_vm13, %v10392_v30, %v5207_v35  ;;  %v5213_v2 = vsel %vm709_vm13, %v5207_v35, %v5209_v20  ;;  %v5647_v22 = vld [vmem:[#allocation3 + $0x568] sm:$0xff] }
 0x64c   : > { %5221 = vst [vmem:[#allocation3 + $0x588] sm:$0xf0] %v5212_v15  ;;  %5222 = vst [vmem:[#allocation3 + $0x590] sm:$0xf0] %v5213_v2  ;;  %3961 = vrot.lane.b32.xlu1 %v9123_v51, %s11559_s24  ;;  %s11777_s24 = smov 5  }
 0x64d   : > { %v10415_v59 = vpop.permute.xlu1 %5314 }
 0x64e   : > { %v10417_v11 = vpop.permute.xlu0 %5129 }
 0x64f   : > { %11761 = vst [vmem:[#allocation57_spill] sm:$0xff] %v10417_v11  ;;  %v5138_v55 = vsel %vm11757_vm2, %v10417_v11, %v5132_v14  ;;  %vm11770_vm2 = vcmask 490496  }
 0x650   : > { %5147 = vst [vmem:[#allocation3 + $0x560] sm:$0xf] %v5138_v55  ;;  %4011 = vrot.lane.b32.xlu1 %v9123_v51, %s11566_s10  ;;  %s11779_s10 = smov 8  }
 0x651   : > { %5344 = vrot.lane.b32.xlu0 %v11735_v33, %s11720_s5  ;;  %v10425_v20 = vpop.permute.xlu1 %5254 }
 0x652   : > { %11762 = vst [vmem:[#allocation58_spill] sm:$0xff] %v10425_v20  ;;  %v10427_v56 = vpop.permute.xlu0 %5179 }
 0x653   : > { %11763 = vst [vmem:[#allocation59_spill] sm:$0xff] %v10427_v56  ;;  %v5188_v37 = vsel %vm11764_vm12, %v10427_v56, %v5182_v43  ;;  %v5652_v35 = vld [vmem:[#allocation3 + $0x590] sm:$0xff]  ;;  %vm11771_vm12 = vcmask 482304  }
 0x654   : > { %5197 = vst [vmem:[#allocation3 + $0x588] sm:$0xf] %v5188_v37  ;;  %4068 = vrot.lane.b32.xlu1 %v9127_v31, %s11572_s11  ;;  %v6992_v14 = vpack.c.bf16 %v5652_v35, %v5647_v22 }
 0x655   : > { %5400 = vrot.lane.b32.xlu0 %v11735_v33, %s11724_s4  ;;  %v10435_v15 = vpop.permute.xlu1 %5310 }
 0x656   : > { %11765 = vst [vmem:[#allocation60_spill] sm:$0xff] %v10435_v15  ;;  %v5231_v2 = vpop.permute.xlu0 %5230  ;;  %6993 = vmatprep.subr.bf16.mxu0 %v6992_v14 }
 0x657   : > { %v5237_v55 = vsel %vm1798_vm6, %v5231_v2, %v5233_v42  ;;  %v5646_v30 = vld [vmem:[#allocation3 + $0x560] sm:$0xff] }
 0x658   : > { %5246 = vst [vmem:[#allocation3 + $0x5b8] sm:$0xf] %v5237_v55  ;;  %4124 = vrot.lane.b32.xlu1 %v9127_v31, %s11576_s13 }
 0x659   : > { %5456 = vrot.lane.b32.xlu0 %v11735_v33, %s11734_s27  ;;  %v10442_v43 = vpop.permute.xlu1 %5342 }
 0x65a   : > { %v5257_v37 = vpop.permute.xlu0 %5256 }
 0x65b   : > { %v5265_v22 = vsel %vm1820_vm8, %v10425_v20, %v5257_v37  ;;  %v5266_v35 = vsel %vm1820_vm8, %v5257_v37, %v10403_v57  ;;  %v5651_v14 = vld [vmem:[#allocation3 + $0x588] sm:$0xff] }
 0x65c   : > { %5275 = vst [vmem:[#allocation3 + $0x5b0] sm:$0xf0] %v5265_v22  ;;  %5276 = vst [vmem:[#allocation3 + $0x5b8] sm:$0xf0] %v5266_v35  ;;  %4066 = vrot.lane.b32.xlu1 %v9123_v51, %s11572_s11  ;;  %v6994_v42 = vpack.c.bf16 %v5651_v14, %v5646_v30  ;;  %s11785_s11 = smov 4  }
 0x65d   : > { %3988 = vrot.lane.b32.xlu0 %v9135_v63, %s11562_s25  ;;  %v10452_v55 = vpop.permute.xlu1 %5370 }
 0x65e   : > { %v5285_v34 = vpop.permute.xlu0 %5284  ;;  %6995 = vmatpush1.bf16.msra.mxu0 %v6994_v42 }
 0x65f   : > { %v5294_v20 = vsel %vm1851_vm10, %v5285_v34, %v10408_v53 }
 0x660   : > { %5304 = vst [vmem:[#allocation3 + $0x5e0] sm:$0xf] %v5294_v20  ;;  %4122 = vrot.lane.b32.xlu1 %v9123_v51, %s11576_s13  ;;  %s11782_s13 = smov 111  }
 0x661   : > { %4040 = vrot.lane.b32.xlu0 %v9135_v63, %s11734_s27  ;;  %v10460_v37 = vpop.permute.xlu1 %5398 }
 0x662   : > { %v5313_v30 = vpop.permute.xlu0 %5312 }
 0x663   : > { %v5321_v22 = vsel %vm11766_vm14, %v10435_v15, %v5313_v30  ;;  %v5322_v35 = vsel %vm11767_vm0, %v5313_v30, %v10415_v59  ;;  %v5657_v15 = vld [vmem:[#allocation3 + $0x5b8] sm:$0xff]  ;;  %vm11772_vm14 = vmmov %vm11771_vm12 }
 0x664   : > { %5331 = vst [vmem:[#allocation3 + $0x5d8] sm:$0xf0] %v5321_v22  ;;  %5332 = vst [vmem:[#allocation3 + $0x5e0] sm:$0xf0] %v5322_v35  ;;  %4180 = vrot.lane.b32.xlu1 %v9127_v31, %s11584_s19 }
 0x665   : > { %3986 = vrot.lane.b32.xlu0 %v9225_v60, %s11562_s25  ;;  %v10470_v20 = vpop.permute.xlu1 %5426  ;;  %s11778_s25 = smov 3  }
 0x666   : > { %v10472_v14 = vpop.permute.xlu0 %5228 }
 0x667   : > { %11768 = vst [vmem:[#allocation61_spill] sm:$0xff] %v10472_v14  ;;  %v5236_v42 = vsel %vm1798_vm6, %v10472_v14, %v5231_v2 }
 0x668   : > { %5245 = vst [vmem:[#allocation3 + $0x5b0] sm:$0xf] %v5236_v42  ;;  %4236 = vrot.lane.b32.xlu1 %v9127_v31, %s11589_s9 }
 0x669   : > { %4038 = vrot.lane.b32.xlu0 %v9225_v60, %s11734_s27  ;;  %v10480_v30 = vpop.permute.xlu1 %5366 }
 0x66a   : > { %v10482_v22 = vpop.permute.xlu0 %5282 }
 0x66b   : > { %11769 = vst [vmem:[#allocation62_spill] sm:$0xff] %v10482_v22  ;;  %v5293_v35 = vsel %vm1851_vm10, %v10482_v22, %v5285_v34  ;;  %v5662_v47 = vld [vmem:[#allocation3 + $0x5e0] sm:$0xff] }
 0x66c   : > { %5303 = vst [vmem:[#allocation3 + $0x5d8] sm:$0xf] %v5293_v35  ;;  %4178 = vrot.lane.b32.xlu1 %v9123_v51, %s11584_s19  ;;  %v6996_v2 = vpack.c.bf16 %v5662_v47, %v5657_v15 }
 0x66d   : > { %4096 = vrot.lane.b32.xlu0 %v9135_v63, %s11574_s14  ;;  %v10490_v42 = vpop.permute.xlu1 %5422 }
 0x66e   : > { %v5341_v14 = vpop.permute.xlu0 %5340  ;;  %6997 = vmatprep.subr.bf16.mxu0 %v6996_v2 }
 0x66f   : > { %v5350_v56 = vsel %vm11770_vm2, %v5341_v14, %v10442_v43  ;;  %v5656_v2 = vld [vmem:[#allocation3 + $0x5b0] sm:$0xff] }
 0x670   : > { %5360 = vst [vmem:[#allocation3 + $0x608] sm:$0xf] %v5350_v56  ;;  %4234 = vrot.lane.b32.xlu1 %v9123_v51, %s11589_s9 }
 0x671   : > { %4152 = vrot.lane.b32.xlu0 %v9135_v63, %s11578_s17  ;;  %v10498_v34 = vpop.permute.xlu1 %5454 }
 0x672   : > { %v5369_v47 = vpop.permute.xlu0 %5368 }
 0x673   : > { %v5377_v15 = vsel %vm11771_vm12, %v10480_v30, %v5369_v47  ;;  %v5378_v35 = vsel %vm11772_vm14, %v5369_v47, %v10452_v55  ;;  %v5661_v22 = vld [vmem:[#allocation3 + $0x5d8] sm:$0xff]  ;;  %vm11773_vm12 = vcmask 457728  }
 0x674   : > { %5387 = vst [vmem:[#allocation3 + $0x600] sm:$0xf0] %v5377_v15  ;;  %5388 = vst [vmem:[#allocation3 + $0x608] sm:$0xf0] %v5378_v35  ;;  %4292 = vrot.lane.b32.xlu1 %v9127_v31, %s11598_s15  ;;  %v6998_v56 = vpack.c.bf16 %v5661_v22, %v5656_v2 }
 0x675   : > { %4094 = vrot.lane.b32.xlu0 %v9225_v60, %s11574_s14  ;;  %v5261_v61 = vpop.permute.xlu1 %5260  ;;  %vm11774_vm14 = vmmov %vm11773_vm12  ;;  %s11781_s14 = smov 1  }
 0x676   : > { %v5267_v11 = vsel %vm1820_vm8, %v10403_v57, %v5261_v61  ;;  %v5397_v41 = vpop.permute.xlu0 %5396  ;;  %6999 = vmatpush1.bf16.msra.mxu0 %v6998_v56 }
 0x677   : > { %5277 = vst.msk [vmem:[#allocation3 + $0x5c0] sm:$0xf0] %vm11460_vm4, %v5267_v11  ;;  %v5406_v47 = vsel %vm1943_vm11, %v5397_v41, %v10460_v37 }
 0x678   : > { %5416 = vst [vmem:[#allocation3 + $0x630] sm:$0xf] %v5406_v47  ;;  %4348 = vrot.lane.b32.xlu1 %v9127_v31, %s11601_s30 }
 0x679   : > { %4150 = vrot.lane.b32.xlu0 %v9225_v60, %s11578_s17  ;;  %v5317_v22 = vpop.permute.xlu1 %5316  ;;  %s11780_s17 = smov 6  }
 0x67a   : > { %v5323_v15 = vsel %vm11767_vm0, %v10415_v59, %v5317_v22  ;;  %v5425_v35 = vpop.permute.xlu0 %5424  ;;  %vm11775_vm0 = vcmask 556032  }
 0x67b   : > { %5333 = vst.msk [vmem:[#allocation3 + $0x5e8] sm:$0xf0] %vm11460_vm4, %v5323_v15  ;;  %v5433_v61 = vsel %vm1966_vm5, %v10490_v42, %v5425_v35  ;;  %v5434_v57 = vsel %vm1966_vm5, %v5425_v35, %v10470_v20  ;;  %v5667_v47 = vld [vmem:[#allocation3 + $0x608] sm:$0xff] }
 0x67c   : > { %5443 = vst [vmem:[#allocation3 + $0x628] sm:$0xf0] %v5433_v61  ;;  %5444 = vst [vmem:[#allocation3 + $0x630] sm:$0xf0] %v5434_v57  ;;  %4290 = vrot.lane.b32.xlu1 %v9123_v51, %s11598_s15 }
 0x67d   : > { %4208 = vrot.lane.b32.xlu0 %v9135_v63, %s11587_s23 }
 0x67e   : > { %v10528_v11 = vpop.permute.xlu0 %5338 }
 0x67f   : > { %v5349_v59 = vsel %vm11770_vm2, %v10528_v11, %v5341_v14  ;;  %vm11776_vm2 = vmmov 0  }
 0x680   : > { %5359 = vst [vmem:[#allocation3 + $0x600] sm:$0xf] %v5349_v59  ;;  %4346 = vrot.lane.b32.xlu1 %v9123_v51, %s11601_s30 }
 0x681   : > { %4264 = vrot.lane.b32.xlu0 %v9135_v63, %s11592_s18 }
 0x682   : > { %v10536_v2 = vpop.permute.xlu0 %5394 }
 0x683   : > { %v5405_v56 = vsel %vm1943_vm11, %v10536_v2, %v5397_v41  ;;  %v5672_v22 = vld [vmem:[#allocation3 + $0x630] sm:$0xff] }
 0x684   : > { %5415 = vst [vmem:[#allocation3 + $0x628] sm:$0xf] %v5405_v56  ;;  %4404 = vrot.lane.b32.xlu1 %v9127_v31, %s11607_s12  ;;  %v7000_v15 = vpack.c.bf16 %v5672_v22, %v5667_v47  ;;  %v5686_v22 = vcombine.high %v10145_v12, %v10145_v12  ;;  %v5638_v12 = vld [vmem:[#allocation3 + $0x520] sm:$0xff] }
 0x685   : > { %4206 = vrot.lane.b32.xlu0 %v9225_v60, %s11587_s23 }
 0x686   : > { %v5453_v14 = vpop.permute.xlu0 %5452  ;;  %7001 = vmatprep.subr.bf16.mxu0 %v7000_v15 }
 0x687   : > { %v5461_v35 = vsel %vm11773_vm12, %v5453_v14, %v10498_v34  ;;  %v5666_v57 = vld [vmem:[#allocation3 + $0x600] sm:$0xff]  ;;  %vm11784_vm12 = vcmask 482304  }
 0x688   : > { %5471 = vst [vmem:[#allocation3 + $0x658] sm:$0xf] %v5461_v35  ;;  %4460 = vrot.lane.b32.xlu1 %v9127_v31, %s11613_s20 }
 0x689   : > { %4262 = vrot.lane.b32.xlu0 %v9225_v60, %s11592_s18 }
 0x68a   : > { %v10550_v41 = vpop.permute.xlu0 %5450 }
 0x68b   : > { %v5460_v61 = vsel %vm11774_vm14, %v10550_v41, %v5453_v14  ;;  %v5671_v59 = vld [vmem:[#allocation3 + $0x628] sm:$0xff]  ;;  %v10569_v14 = vrot.slane %v5686_v22, %v7520_v5  ;;  %v5653_v5 = vld [vmem:[#allocation3 + $0x598] sm:$0xff]  ;;  %vm11789_vm14 = vcmask 605184  }
 0x68c   : > { %5470 = vst [vmem:[#allocation3 + $0x650] sm:$0xf] %v5460_v61  ;;  %4402 = vrot.lane.b32.xlu1 %v9123_v51, %s11607_s12  ;;  %v7002_v56 = vpack.c.bf16 %v5671_v59, %v5666_v57  ;;  %v5643_v61 = vld [vmem:[#allocation3 + $0x548] sm:$0xff] }
 0x68d   : > { %4320 = vrot.lane.b32.xlu0 %v9135_v63, %s11600_s29  ;;  %v7037_v59 = vpack.c.bf16 %v5643_v61, %v5638_v12 }
 0x68e   : > { %v5289_v47 = vpop.permute.xlu0 %5288  ;;  %7003 = vmatpush1.bf16.msra.mxu0 %v7002_v56  ;;  %v5648_v56 = vld [vmem:[#allocation3 + $0x570] sm:$0xff] }
 0x68f   : > { %v5295_v15 = vsel %vm1851_vm10, %v10408_v53, %v5289_v47  ;;  %v5677_v35 = vld [vmem:[#allocation3 + $0x658] sm:$0xf]  ;;  %v7460_v53 = vmov 0.0|0.0   ;;  %v7040_v47 = vpack.c.bf16 %v5653_v5, %v5648_v56 }
 0x690   : > { %5305 = vst.msk [vmem:[#allocation3 + $0x5e8] sm:$0xf] %vm3378_vm7, %v5295_v15  ;;  %4458 = vrot.lane.b32.xlu1 %v9123_v51, %s11613_s20  ;;  %6678 = vmatprep.subr.msk.mxu0 %vm366_vm1, %v5677_v35  ;;  %v5658_v15 = vld [vmem:[#allocation3 + $0x5c0] sm:$0xff] }
 0x691   : > { %4376 = vrot.lane.b32.xlu0 %v9135_v63, %s11602_s16 }
 0x693   : > { %v5676_v57 = vld [vmem:[#allocation3 + $0x650] sm:$0xf] }
 0x694   : > { %4516 = vrot.lane.b32.xlu1 %v9127_v31, %s11621_s0  ;;  %6679 = vmatpush1.msk.msra.mxu0 %vm366_vm1, %v5676_v57 }
 0x695   : > { %4318 = vrot.lane.b32.xlu0 %v9225_v60, %s11600_s29  ;;  %7036 = vmatprep.subr.bf16.mxu0 %v7460_v53 }
 0x696   : > { %6680 = vmatmul.mubr.msk.f32.vlgmr.msra.gmra.mrb[24].mxu0 %vm11775_vm0, %v10569_v14  ;;  %vm11790_vm0 = vcmask 588800  }
 0x697   : > { %7038 = vmatpush3.bf16.msra.mxu0 %v7037_v59  ;;  %6829 = vmatprep.mubr.msk.f32.mxu0 %vm11776_vm2, %v11735_v33  ;;  %v5663_v22 = vld [vmem:[#allocation3 + $0x5e8] sm:$0xff] }
 0x698   : > { %4572 = vrot.lane.b32.xlu1 %v9127_v31, %s11626_s2  ;;  %7039 = vmatprep.subr.bf16.mxu0 %v7460_v53  ;;  %v7043_v35 = vpack.c.bf16 %v5663_v22, %v5658_v15 }
 0x699   : > { %4374 = vrot.lane.b32.xlu0 %v9225_v60, %s11602_s16 }
 0x69b   : > { %7041 = vmatpush3.bf16.msra.mxu0 %v7040_v47 }
 0x69c   : > { %4514 = vrot.lane.b32.xlu1 %v9123_v51, %s11621_s0  ;;  %7042 = vmatprep.subr.bf16.mxu0 %v7460_v53 }
 0x69d   : > { %4432 = vrot.lane.b32.xlu0 %v9135_v63, %s11610_s22 }
 0x69f   : > { %7044 = vmatpush3.bf16.msra.mxu0 %v7043_v35 }
 0x6a0   : > { %4570 = vrot.lane.b32.xlu1 %v9123_v51, %s11626_s2  ;;  %7045 = vmatprep.subr.bf16.mxu0 %v7460_v53 }
 0x6a1   : > { %4488 = vrot.lane.b32.xlu0 %v9135_v63, %s11615_s21 }
 0x6a4   : > { %4628 = vrot.lane.b32.xlu1 %v9127_v31, %s11777_s24 }
 0x6a5   : > { %4430 = vrot.lane.b32.xlu0 %v9225_v60, %s11610_s22  ;;  %s11788_s22 = smov 108  }
 0x6a8   : > { %4684 = vrot.lane.b32.xlu1 %v9127_v31, %s11778_s25 }
 0x6a9   : > { %4486 = vrot.lane.b32.xlu0 %v9225_v60, %s11615_s21  ;;  %s11783_s21 = smov 112  }
 0x6ac   : > { %4626 = vrot.lane.b32.xlu1 %v9123_v51, %s11777_s24 }
 0x6ad   : > { %4544 = vrot.lane.b32.xlu0 %v9135_v63, %s11779_s10 }
 0x6b0   : > { %4682 = vrot.lane.b32.xlu1 %v9123_v51, %s11778_s25 }
 0x6b1   : > { %4600 = vrot.lane.b32.xlu0 %v9135_v63, %s11780_s17 }
 0x6b4   : > { %4740 = vrot.lane.b32.xlu1 %v9127_v31, %s11781_s14 }
 0x6b5   : > { %4542 = vrot.lane.b32.xlu0 %v9225_v60, %s11779_s10  ;;  %s11786_s10 = smov 110  }
 0x6b8   : > { %4803 = vrot.lane.b32.xlu1 %v9158_v8, %s11782_s13  ;;  %v10618_v61 = vpop.xlane.xlu1 %6218 }
 0x6b9   : > { %4598 = vrot.lane.b32.xlu0 %v9225_v60, %s11780_s17  ;;  %s11787_s17 = smov 2  }
 0x6bc   : > { %4776 = vrot.lane.b32.xlu1 %v9127_v31, %s11783_s21  ;;  %v5373_v57 = vpop.permute.xlu1 %5372 }
 0x6bd   : > { %v5379_v12 = vsel %vm11784_vm12, %v10452_v55, %v5373_v57  ;;  %4656 = vrot.lane.b32.xlu0 %v9135_v63, %s11785_s11  ;;  %vm11791_vm12 = vcmask 490496  }
 0x6be   : > { %5389 = vst.msk [vmem:[#allocation3 + $0x610] sm:$0xf0] %vm11460_vm4, %v5379_v12 }
 0x6c0   : > { %4828 = vrot.lane.b32.xlu1 %v9149_v27, %s11786_s10  ;;  %v5429_v59 = vpop.permute.xlu1 %5428 }
 0x6c1   : > { %v5435_v5 = vsel %vm1966_vm5, %v10470_v20, %v5429_v59  ;;  %4712 = vrot.lane.b32.xlu0 %v9135_v63, %s11787_s17 }
 0x6c2   : > { %5445 = vst.msk [vmem:[#allocation3 + $0x638] sm:$0xf0] %vm11460_vm4, %v5435_v5  ;;  %vm11797_vm4 = vcmask 433152  }
 0x6c4   : > { %4878 = vrot.lane.b32.xlu1 %v9149_v27, %s11788_s22  ;;  %v3964_v55 = vpop.permute.xlu1 %3963 }
 0x6c5   : > { %v3973_v56 = vsel %vm11789_vm14, %v3964_v55, %v9764_v6  ;;  %4654 = vrot.lane.b32.xlu0 %v9225_v60, %s11785_s11 }
 0x6c6   : > { %3982 = vst [vmem:[#allocation3 + $0x1e8] sm:$0xf] %v3973_v56 }
 0x6c8   : > { %v6212_v47 = vpop.xlane.xlu0 %6211  ;;  %4826 = vrot.lane.b32.xlu1 %v9127_v31, %s11786_s10  ;;  %v4014_v20 = vpop.permute.xlu1 %4013  ;;  %s11792_s10 = smov 106  }
 0x6c9   : > { %v4023_v22 = vsel %vm11790_vm0, %v4014_v20, %v9774_v52  ;;  %4710 = vrot.lane.b32.xlu0 %v9225_v60, %s11787_s17  ;;  %s11803_s17 = sld [smem:[#allocation68_spill]] }
 0x6ca   : > { %4032 = vst [vmem:[#allocation3 + $0x210] sm:$0xf] %v4023_v22 }
 0x6cc   : > { %v5345_v15 = vpop.permute.xlu0 %5344  ;;  %4876 = vrot.lane.b32.xlu1 %v9127_v31, %s11788_s22  ;;  %v3962_v6 = vpop.permute.xlu1 %3961  ;;  %s11798_s22 = smov 109  }
 0x6cd   : > { %v5351_v35 = vsel %vm11791_vm12, %v10442_v43, %v5345_v15  ;;  %v3972_v57 = vsel %vm11789_vm14, %v3962_v6, %v3964_v55  ;;  %4778 = vrot.lane.b32.xlu0 %v9149_v27, %s11783_s21  ;;  %s11793_s21 = smov 104   ;;  %vm11794_vm12 = vcmask 457728   ;;  %vm11795_vm14 = vcmask 449536  }
 0x6ce   : > { %5361 = vst.msk [vmem:[#allocation3 + $0x610] sm:$0xf] %vm3378_vm7, %v5351_v35  ;;  %3981 = vst [vmem:[#allocation3 + $0x1e0] sm:$0xf] %v3972_v57  ;;  %v6220_v57 = vmul.f32 0.00390625, %v6212_v47 }
 0x6d0   : > { %v5401_v52 = vpop.permute.xlu0 %5400  ;;  %4928 = vrot.lane.b32.xlu1 %v9149_v27, %s11792_s10  ;;  %v4012_v60 = vpop.permute.xlu1 %4011 }
 0x6d1   : > { %v5407_v12 = vsel %vm1943_vm11, %v10460_v37, %v5401_v52  ;;  %v4022_v59 = vsel %vm11790_vm0, %v4012_v60, %v4014_v20  ;;  %4738 = vrot.lane.b32.xlu0 %v9123_v51, %s11781_s14  ;;  %vm11796_vm0 = vcmask 596992   ;;  %v6221_v52 = vmul.f32 0.00390625, %v10618_v61  ;;  %v6222_v61 = vld [vmem:[%s11803_s17] sm:$0x1]  ;;  %s11808_s17 = smov 105  }
 0x6d2   : > { %5417 = vst.msk [vmem:[#allocation3 + $0x638] sm:$0xf] %vm3378_vm7, %v5407_v12  ;;  %4031 = vst [vmem:[#allocation3 + $0x208] sm:$0xf] %v4022_v59 }
 0x6d4   : > { %v5457_v43 = vpop.permute.xlu0 %5456  ;;  %4978 = vrot.lane.b32.xlu1 %v9149_v27, %s11793_s21  ;;  %v4069_v5 = vpop.permute.xlu1 %4068 }
 0x6d5   : > { %v5462_v55 = vsel %vm11794_vm12, %v10498_v34, %v5457_v43  ;;  %v4080_v56 = vsel %vm11795_vm14, %v4069_v5, %v9820_v9  ;;  %4801 = vrot.lane.b32.xlu0 %v9135_v63, %s11782_s13  ;;  %v5668_v9 = vld [vmem:[#allocation3 + $0x610] sm:$0xff]  ;;  %s11799_s13 = smov 107  }
 0x6d6   : > { %5472 = vst.msk [vmem:[#allocation3 + $0x660] sm:$0xf] %vm3378_vm7, %v5462_v55  ;;  %4090 = vst [vmem:[#allocation3 + $0x238] sm:$0xf] %v4080_v56 }
 0x6d8   : > { %v3989_v51 = vpop.permute.xlu0 %3988  ;;  %4926 = vrot.lane.b32.xlu1 %v9127_v31, %s11792_s10  ;;  %v4125_v37 = vpop.permute.xlu1 %4124  ;;  %s11823_s10 = smov 84  }
 0x6d9   : > { %v3998_v20 = vsel %vm11796_vm0, %v3989_v51, %v9825_v38  ;;  %v4136_v34 = vsel %vm11797_vm4, %v4125_v37, %v9834_v7  ;;  %4853 = vrot.lane.b32.xlu0 %v9158_v8, %s11798_s22  ;;  %v5673_v22 = vld [vmem:[#allocation3 + $0x638] sm:$0xff]  ;;  %vm11800_vm4 = vmmov %vm11796_vm0  ;;  %vm11801_vm0 = vcmask 433152  }
 0x6da   : > { %4007 = vst [vmem:[#allocation3 + $0x1e8] sm:$0xf0] %v3998_v20  ;;  %4146 = vst [vmem:[#allocation3 + $0x260] sm:$0xf] %v4136_v34  ;;  %v7046_v15 = vpack.c.bf16 %v5673_v22, %v5668_v9 }
 0x6dc   : > { %v4041_v6 = vpop.permute.xlu0 %4040  ;;  %4976 = vrot.lane.b32.xlu1 %v9127_v31, %s11793_s21  ;;  %7047 = vmatpush3.bf16.msra.mxu0 %v7046_v15  ;;  %v4067_v35 = vpop.permute.xlu1 %4066  ;;  %s11824_s21 = smov 64  }
 0x6dd   : > { %v4052_v38 = vsel %vm11794_vm12, %v4041_v6, %v9838_v4  ;;  %v4079_v7 = vsel %vm11795_vm14, %v4067_v35, %v4069_v5  ;;  %4903 = vrot.lane.b32.xlu0 %v9158_v8, %s11799_s13  ;;  %6827 = vmatprep.subr.mxu0 %v11735_v33  ;;  %v5678_v60 = vld [vmem:[#allocation3 + $0x660] sm:$0xf]  ;;  %v7049_v4 = vpack.c.bf16 %v6221_v52, %v6220_v57  ;;  %vm11802_vm12 = vcmask 556032  }
 0x6de   : > { %4062 = vst [vmem:[#allocation3 + $0x210] sm:$0xf0] %v4052_v38  ;;  %4089 = vst [vmem:[#allocation3 + $0x230] sm:$0xf] %v4079_v7  ;;  %vm6223_vm14 = vcmask 130048  }
 0x6e0   : > { %v3987_v12 = vpop.permute.xlu0 %3986  ;;  %5027 = vrot.lane.b32.xlu1 %v9149_v27, %s11678_s6  ;;  %6828 = vmatpush3.msk.msra.mxu0 %vm366_vm1, %v5678_v60  ;;  %v4123_v47 = vpop.permute.xlu1 %4122 }
 0x6e1   : > { %v3997_v59 = vsel %vm11800_vm4, %v3987_v12, %v3989_v51  ;;  %v4135_v43 = vsel %vm11801_vm0, %v4123_v47, %v4125_v37  ;;  %4851 = vrot.lane.b32.xlu0 %v9135_v63, %s11798_s22  ;;  %6830 = vmatmul.mubr.msk.f32.vlgmr.msra.gmra.mrb[26].mxu0 %vm11802_vm12, %v10569_v14  ;;  %vm11804_vm4 = vcmask 457728   ;;  %vm11805_vm0 = vcmask 416768   ;;  %s11812_s22 = smov 83  }
 0x6e2   : > { %4006 = vst [vmem:[#allocation3 + $0x1e0] sm:$0xf0] %v3997_v59  ;;  %4145 = vst [vmem:[#allocation3 + $0x258] sm:$0xf] %v4135_v43  ;;  %7048 = vmatprep.subr.bf16.mxu0 %v7460_v53  ;;  %6836 = vmatprep.mubr.msk.f32.mxu0 %vm11776_vm2, %v11735_v33  ;;  %v5535_v53 = vld [vmem:[#allocation3 + $0x1e8] sm:$0xff]  ;;  %vm11806_vm2 = vcmask 441344  }
 0x6e3   : > { %7050 = vmatpush3.bf16.msra.mxu0 %v7049_v4  ;;  %vm11807_vm12 = vcmask 400384  }
 0x6e4   : > { %v4039_v5 = vpop.permute.xlu0 %4038  ;;  %5077 = vrot.lane.b32.xlu1 %v9149_v27, %s11683_s7  ;;  %v4181_v55 = vpop.permute.xlu1 %4180 }
 0x6e5   : > { %v4051_v56 = vsel %vm11804_vm4, %v4039_v5, %v4041_v6  ;;  %v4192_v51 = vsel %vm11805_vm0, %v4181_v55, %v9886_v48  ;;  %4901 = vrot.lane.b32.xlu0 %v9135_v63, %s11799_s13  ;;  %v5540_v37 = vld [vmem:[#allocation3 + $0x210] sm:$0xff]  ;;  %vm11810_vm4 = vmmov %vm11805_vm0  ;;  %s11820_s13 = smov 86  }
 0x6e6   : > { %4061 = vst [vmem:[#allocation3 + $0x208] sm:$0xf0] %v4051_v56  ;;  %4202 = vst [vmem:[#allocation3 + $0x288] sm:$0xf] %v4192_v51  ;;  %6837 = vmatmul.mubr.msk.f32.vlgmr.msra.gmra.mrb[28].mxu0 %vm6223_vm14, %v6222_v61  ;;  %v6868_v20 = vpack.c.bf16 %v5540_v37, %v5535_v53  ;;  %vm11809_vm14 = vcmask 424960  }
 0x6e7   : > { %vm11813_vm0 = vmmov %vm11806_vm2 }
 0x6e8   : > { %v4097_v34 = vpop.permute.xlu0 %4096  ;;  %5025 = vrot.lane.b32.xlu1 %v9127_v31, %s11678_s6  ;;  %6869 = vmatprep.subr.bf16.mxu1 %v6868_v20  ;;  %v4237_v9 = vpop.permute.xlu1 %4236  ;;  %s11811_s6 = smov 88  }
 0x6e9   : > { %v4108_v22 = vsel %vm11806_vm2, %v4097_v34, %v9890_v3  ;;  %v4248_v48 = vsel %vm11807_vm12, %v4237_v9, %v9899_v45  ;;  %4953 = vrot.lane.b32.xlu0 %v9158_v8, %s11808_s17  ;;  %v5534_v3 = vld [vmem:[#allocation3 + $0x1e0] sm:$0xff]  ;;  %vm11814_vm2 = vmmov %vm11807_vm12 }
 0x6ea   : > { %4118 = vst [vmem:[#allocation3 + $0x238] sm:$0xf0] %v4108_v22  ;;  %4258 = vst [vmem:[#allocation3 + $0x2b0] sm:$0xf] %v4248_v48 }
 0x6eb   : > { %vm11816_vm12 = vmmov %vm11809_vm14 }
 0x6ec   : > { %v4153_v15 = vpop.permute.xlu0 %4152  ;;  %5075 = vrot.lane.b32.xlu1 %v9127_v31, %s11683_s7  ;;  %v4179_v6 = vpop.permute.xlu1 %4178  ;;  %s11815_s7 = smov 81  }
 0x6ed   : > { %v4164_v35 = vsel %vm11809_vm14, %v4153_v15, %v9903_v54  ;;  %v4191_v57 = vsel %vm11810_vm4, %v4179_v6, %v4181_v55  ;;  %5002 = vrot.lane.b32.xlu0 %v9158_v8, %s11811_s6  ;;  %v5539_v45 = vld [vmem:[#allocation3 + $0x208] sm:$0xff]  ;;  %vm11817_vm14 = vcmask 261120   ;;  %vm11818_vm4 = vcmask 408576  }
 0x6ee   : > { %4174 = vst [vmem:[#allocation3 + $0x260] sm:$0xf0] %v4164_v35  ;;  %4201 = vst [vmem:[#allocation3 + $0x280] sm:$0xf] %v4191_v57  ;;  %v6870_v38 = vpack.c.bf16 %v5539_v45, %v5534_v3 }
 0x6f0   : > { %v4095_v7 = vpop.permute.xlu0 %4094  ;;  %5127 = vrot.lane.b32.xlu1 %v9149_v27, %s11812_s22  ;;  %6871 = vmatpush1.bf16.msra.mxu1 %v6870_v38  ;;  %v4235_v52 = vpop.permute.xlu1 %4234 }
 0x6f1   : > { %v4107_v60 = vsel %vm11813_vm0, %v4095_v7, %v4097_v34  ;;  %v4247_v54 = vsel %vm11814_vm2, %v4235_v52, %v4237_v9  ;;  %4951 = vrot.lane.b32.xlu0 %v9135_v63, %s11808_s17  ;;  %v5545_v43 = vld [vmem:[#allocation3 + $0x238] sm:$0xff]  ;;  %vm11819_vm0 = vcmask 244736   ;;  %vm11821_vm2 = vcmask 392192   ;;  %s11831_s17 = smov 82  }
 0x6f2   : > { %4117 = vst [vmem:[#allocation3 + $0x230] sm:$0xf0] %v4107_v60  ;;  %4257 = vst [vmem:[#allocation3 + $0x2a8] sm:$0xf] %v4247_v54 }
 0x6f4   : > { %v4151_v12 = vpop.permute.xlu0 %4150  ;;  %5177 = vrot.lane.b32.xlu1 %v9149_v27, %s11815_s7  ;;  %v4293_v47 = vpop.permute.xlu1 %4292 }
 0x6f5   : > { %v4163_v4 = vsel %vm11816_vm12, %v4151_v12, %v4153_v15  ;;  %v4304_v59 = vsel %vm11817_vm14, %v4293_v47, %v9950_v13  ;;  %5000 = vrot.lane.b32.xlu0 %v9135_v63, %s11811_s6  ;;  %v5550_v61 = vld [vmem:[#allocation3 + $0x260] sm:$0xff]  ;;  %vm11822_vm12 = vmmov %vm11817_vm14  ;;  %s11834_s6 = smov 80  }
 0x6f6   : > { %4173 = vst [vmem:[#allocation3 + $0x258] sm:$0xf0] %v4163_v4  ;;  %4314 = vst [vmem:[#allocation3 + $0x2d8] sm:$0xf] %v4304_v59  ;;  %v6872_v5 = vpack.c.bf16 %v5550_v61, %v5545_v43 }
 0x6f7   : > { %vm11825_vm14 = vmmov %vm11818_vm4 }
 0x6f8   : > { %v4209_v55 = vpop.permute.xlu0 %4208  ;;  %5125 = vrot.lane.b32.xlu1 %v9127_v31, %s11812_s22  ;;  %6873 = vmatprep.subr.bf16.mxu1 %v6872_v5  ;;  %v4349_v56 = vpop.permute.xlu1 %4348 }
 0x6f9   : > { %v4220_v51 = vsel %vm11818_vm4, %v4209_v55, %v9954_v1  ;;  %v4360_v13 = vsel %vm11819_vm0, %v4349_v56, %v9963_v44  ;;  %5052 = vrot.lane.b32.xlu0 %v9158_v8, %s11820_s13  ;;  %v5544_v1 = vld [vmem:[#allocation3 + $0x230] sm:$0xff]  ;;  %vm11826_vm4 = vmmov %vm11819_vm0 }
 0x6fa   : > { %4230 = vst [vmem:[#allocation3 + $0x288] sm:$0xf0] %v4220_v51  ;;  %4370 = vst [vmem:[#allocation3 + $0x300] sm:$0xf] %v4360_v13 }
 0x6fb   : > { %vm11827_vm0 = vmmov %vm11821_vm2 }
 0x6fc   : > { %v4265_v53 = vpop.permute.xlu0 %4264  ;;  %5175 = vrot.lane.b32.xlu1 %v9127_v31, %s11815_s7  ;;  %v4291_v37 = vpop.permute.xlu1 %4290 }
 0x6fd   : > { %v4276_v20 = vsel %vm11821_vm2, %v4265_v53, %v9967_v16  ;;  %v4303_v34 = vsel %vm11822_vm12, %v4291_v37, %v4293_v47  ;;  %5102 = vrot.lane.b32.xlu0 %v9158_v8, %s11823_s10  ;;  %v5549_v44 = vld [vmem:[#allocation3 + $0x258] sm:$0xff]  ;;  %vm11828_vm2 = vcmask 228352   ;;  %vm11829_vm12 = vcmask 252928  }
 0x6fe   : > { %4286 = vst [vmem:[#allocation3 + $0x2b0] sm:$0xf0] %v4276_v20  ;;  %4313 = vst [vmem:[#allocation3 + $0x2d0] sm:$0xf] %v4303_v34  ;;  %v6874_v9 = vpack.c.bf16 %v5549_v44, %v5544_v1 }
 0x700   : > { %v4207_v22 = vpop.permute.xlu0 %4206  ;;  %5226 = vrot.lane.b32.xlu1 %v9149_v27, %s11824_s21  ;;  %6875 = vmatpush1.bf16.msra.mxu1 %v6874_v9  ;;  %v4347_v48 = vpop.permute.xlu1 %4346 }
 0x701   : > { %v4219_v15 = vsel %vm11825_vm14, %v4207_v22, %v4209_v55  ;;  %v4359_v16 = vsel %vm11826_vm4, %v4347_v48, %v4349_v56  ;;  %5050 = vrot.lane.b32.xlu0 %v9135_v63, %s11820_s13  ;;  %v5555_v45 = vld [vmem:[#allocation3 + $0x288] sm:$0xff]  ;;  %vm11830_vm14 = vcmask 211968   ;;  %vm11832_vm4 = vcmask 236544  }
 0x702   : > { %4229 = vst [vmem:[#allocation3 + $0x280] sm:$0xf0] %v4219_v15  ;;  %4369 = vst [vmem:[#allocation3 + $0x2f8] sm:$0xf] %v4359_v16 }
 0x704   : > { %v4263_v6 = vpop.permute.xlu0 %4262  ;;  %5280 = vrot.lane.b32.xlu1 %v9149_v27, %s11710_s3  ;;  %v4405_v35 = vpop.permute.xlu1 %4404 }
 0x705   : > { %v4275_v57 = vsel %vm11827_vm0, %v4263_v6, %v4265_v53  ;;  %v4416_v3 = vsel %vm11828_vm2, %v4405_v35, %v10014_v40  ;;  %5100 = vrot.lane.b32.xlu0 %v9135_v63, %s11823_s10  ;;  %v5560_v38 = vld [vmem:[#allocation3 + $0x2b0] sm:$0xff]  ;;  %vm11833_vm0 = vmmov %vm11828_vm2 }
 0x706   : > { %4285 = vst [vmem:[#allocation3 + $0x2a8] sm:$0xf0] %v4275_v57  ;;  %4426 = vst [vmem:[#allocation3 + $0x328] sm:$0xf] %v4416_v3  ;;  %v6876_v7 = vpack.c.bf16 %v5560_v38, %v5555_v45 }
 0x707   : > { %vm11835_vm2 = vmmov %vm11829_vm12 }
 0x708   : > { %v4321_v52 = vpop.permute.xlu0 %4320  ;;  %5224 = vrot.lane.b32.xlu1 %v9127_v31, %s11824_s21  ;;  %6877 = vmatprep.subr.bf16.mxu1 %v6876_v7  ;;  %v4461_v60 = vpop.permute.xlu1 %4460 }
 0x709   : > { %v4332_v54 = vsel %vm11829_vm12, %v4321_v52, %v10018_v36  ;;  %v4472_v40 = vsel %vm11830_vm14, %v4461_v60, %v10027_v28  ;;  %5152 = vrot.lane.b32.xlu0 %v9158_v8, %s11831_s17  ;;  %v5554_v36 = vld [vmem:[#allocation3 + $0x280] sm:$0xff]  ;;  %vm11836_vm12 = vmmov %vm11830_vm14 }
 0x70a   : > { %4342 = vst [vmem:[#allocation3 + $0x2d8] sm:$0xf0] %v4332_v54  ;;  %4482 = vst [vmem:[#allocation3 + $0x350] sm:$0xf] %v4472_v40 }
 0x70b   : > { %vm11837_vm14 = vmmov %vm11832_vm4 }
 0x70c   : > { %v4377_v12 = vpop.permute.xlu0 %4376  ;;  %5278 = vrot.lane.b32.xlu1 %v9127_v31, %s11710_s3  ;;  %v4403_v47 = vpop.permute.xlu1 %4402 }
 0x70d   : > { %v4388_v4 = vsel %vm11832_vm4, %v4377_v12, %v10031_v25  ;;  %v4415_v59 = vsel %vm11833_vm0, %v4403_v47, %v4405_v35  ;;  %5202 = vrot.lane.b32.xlu0 %v9158_v8, %s11834_s6  ;;  %v5559_v28 = vld [vmem:[#allocation3 + $0x2a8] sm:$0xff]  ;;  %vm11838_vm4 = vcmask 195584   ;;  %vm11839_vm0 = vcmask 220160  }
 0x70e   : > { %4398 = vst [vmem:[#allocation3 + $0x300] sm:$0xf0] %v4388_v4  ;;  %4425 = vst [vmem:[#allocation3 + $0x320] sm:$0xf] %v4415_v59  ;;  %v6878_v43 = vpack.c.bf16 %v5559_v28, %v5554_v36 }
 0x710   : > { %v4319_v61 = vpop.permute.xlu0 %4318  ;;  %5336 = vrot.lane.b32.xlu1 %v9149_v27, %s11720_s5  ;;  %6879 = vmatpush1.bf16.msra.mxu1 %v6878_v43  ;;  %v4459_v5 = vpop.permute.xlu1 %4458 }
 0x711   : > { %v4331_v55 = vsel %vm11835_vm2, %v4319_v61, %v4321_v52  ;;  %v4471_v25 = vsel %vm11836_vm12, %v4459_v5, %v4461_v60  ;;  %5150 = vrot.lane.b32.xlu0 %v9135_v63, %s11831_s17  ;;  %v5565_v37 = vld [vmem:[#allocation3 + $0x2d8] sm:$0xff]  ;;  %vm11840_vm2 = vcmask 56320   ;;  %vm11841_vm12 = vcmask 203776  }
 0x712   : > { %4341 = vst [vmem:[#allocation3 + $0x2d0] sm:$0xf0] %v4331_v55  ;;  %4481 = vst [vmem:[#allocation3 + $0x348] sm:$0xf] %v4471_v25 }
 0x714   : > { %v4375_v56 = vpop.permute.xlu0 %4374  ;;  %5392 = vrot.lane.b32.xlu1 %v9149_v27, %s11724_s4  ;;  %v4517_v51 = vpop.permute.xlu1 %4516 }
 0x715   : > { %v4387_v13 = vsel %vm11837_vm14, %v4375_v56, %v4377_v12  ;;  %v4528_v53 = vsel %vm11838_vm4, %v4517_v51, %v10078_v50  ;;  %5200 = vrot.lane.b32.xlu0 %v9135_v63, %s11834_s6  ;;  %v5570_v20 = vld [vmem:[#allocation3 + $0x300] sm:$0xff]  ;;  %vm11842_vm14 = vmmov %vm11838_vm4 }
 0x716   : > { %4397 = vst [vmem:[#allocation3 + $0x2f8] sm:$0xf0] %v4387_v13  ;;  %4538 = vst [vmem:[#allocation3 + $0x378] sm:$0xf] %v4528_v53  ;;  %v6880_v34 = vpack.c.bf16 %v5570_v20, %v5565_v37 }
 0x717   : > { %vm11843_vm4 = vmmov %vm11839_vm0 }
 0x718   : > { %v4433_v1 = vpop.permute.xlu0 %4432  ;;  %5334 = vrot.lane.b32.xlu1 %v9127_v31, %s11720_s5  ;;  %6881 = vmatprep.subr.bf16.mxu1 %v6880_v34  ;;  %v4573_v44 = vpop.permute.xlu1 %4572  ;;  %s11873_s5 = smov 25  }
 0x719   : > { %v4444_v9 = vsel %vm11839_vm0, %v4433_v1, %v10082_v10  ;;  %v4584_v50 = vsel %vm11840_vm2, %v4573_v44, %v10091_v26  ;;  %5252 = vrot.lane.b32.xlu0 %v9158_v8, %s11708_s28  ;;  %v5564_v10 = vld [vmem:[#allocation3 + $0x2d0] sm:$0xff]  ;;  %vm11844_vm0 = vmmov %vm11840_vm2 }
 0x71a   : > { %4454 = vst [vmem:[#allocation3 + $0x328] sm:$0xf0] %v4444_v9  ;;  %4594 = vst [vmem:[#allocation3 + $0x3a0] sm:$0xf] %v4584_v50 }
 0x71b   : > { %vm11845_vm2 = vmmov %vm11841_vm12 }
 0x71c   : > { %v4489_v22 = vpop.permute.xlu0 %4488  ;;  %5390 = vrot.lane.b32.xlu1 %v9127_v31, %s11724_s4  ;;  %v4515_v48 = vpop.permute.xlu1 %4514  ;;  %s11858_s4 = sld [smem:[#allocation69_spill]] }
 0x71d   : > { %v4500_v15 = vsel %vm11841_vm12, %v4489_v22, %v10095_v24  ;;  %v4527_v16 = vsel %vm11842_vm14, %v4515_v48, %v4517_v51  ;;  %5308 = vrot.lane.b32.xlu0 %v9158_v8, %s11714_s26  ;;  %v5569_v26 = vld [vmem:[#allocation3 + $0x2f8] sm:$0xff]  ;;  %vm11846_vm12 = vcmask 39936   ;;  %vm11847_vm14 = vcmask 64512  }
 0x71e   : > { %4510 = vst [vmem:[#allocation3 + $0x350] sm:$0xf0] %v4500_v15  ;;  %4537 = vst [vmem:[#allocation3 + $0x370] sm:$0xf] %v4527_v16  ;;  %v6882_v6 = vpack.c.bf16 %v5569_v26, %v5564_v10 }
 0x720   : > { %v4431_v35 = vpop.permute.xlu0 %4430  ;;  %4188 = vrot.lane.b32.xlu1 %v9191_v32, %s11584_s19  ;;  %6883 = vmatpush1.bf16.msra.mxu1 %v6882_v6  ;;  %v4571_v57 = vpop.permute.xlu1 %4570 }
 0x721   : > { %v4443_v3 = vsel %vm11843_vm4, %v4431_v35, %v4433_v1  ;;  %v4583_v24 = vsel %vm11844_vm0, %v4571_v57, %v4573_v44  ;;  %5250 = vrot.lane.b32.xlu0 %v9135_v63, %s11708_s28  ;;  %v5575_v60 = vld [vmem:[#allocation3 + $0x328] sm:$0xff]  ;;  %vm11848_vm4 = vcmask 23552   ;;  %vm11849_vm0 = vcmask 48128   ;;  %v11863_v35 = vld [vmem:[#allocation49_spill] sm:$0xff]  ;;  %s12007_s28 = sld [smem:[#allocation71_spill]] }
 0x722   : > { %4453 = vst [vmem:[#allocation3 + $0x320] sm:$0xf0] %v4443_v3  ;;  %4593 = vst [vmem:[#allocation3 + $0x398] sm:$0xf] %v4583_v24 }
 0x724   : > { %v4487_v45 = vpop.permute.xlu0 %4486  ;;  %4244 = vrot.lane.b32.xlu1 %v9191_v32, %s11589_s9  ;;  %v4629_v38 = vpop.permute.xlu1 %4628  ;;  %s11995_s9 = sld [smem:[#allocation5_spill]] }
 0x725   : > { %v4499_v7 = vsel %vm11845_vm2, %v4487_v45, %v4489_v22  ;;  %v4640_v52 = vsel %vm11846_vm12, %v4629_v38, %v10147_v21  ;;  %5306 = vrot.lane.b32.xlu0 %v9135_v63, %s11714_s26  ;;  %v5580_v54 = vld [vmem:[#allocation3 + $0x350] sm:$0xff]  ;;  %vm11850_vm2 = vmmov %vm11846_vm12 }
 0x726   : > { %4509 = vst [vmem:[#allocation3 + $0x348] sm:$0xf0] %v4499_v7  ;;  %4650 = vst [vmem:[#allocation3 + $0x3c8] sm:$0xf] %v4640_v52  ;;  %v6884_v40 = vpack.c.bf16 %v5580_v54, %v5575_v60  ;;  %v6298_v22 = vld [vmem:[%s11858_s4] sm:$0xff] }
 0x727   : > { %vm11851_vm12 = vmmov %vm11847_vm14  ;;  %v11866_v7 = vld [vmem:[#allocation46_spill] sm:$0xff] }
 0x728   : > { %v4545_v12 = vpop.permute.xlu0 %4544  ;;  %5448 = vrot.lane.b32.xlu1 %v9149_v27, %s11734_s27  ;;  %6885 = vmatprep.subr.bf16.mxu1 %v6884_v40  ;;  %v4685_v47 = vpop.permute.xlu1 %4684 }
 0x729   : > { %v4556_v4 = vsel %vm11847_vm14, %v4545_v12, %v10155_v19  ;;  %v4696_v21 = vsel %vm11848_vm4, %v4685_v47, %v10168_v0  ;;  %5364 = vrot.lane.b32.xlu0 %v9158_v8, %s11722_s1  ;;  %v5574_v19 = vld [vmem:[#allocation3 + $0x320] sm:$0xff]  ;;  %vm11852_vm14 = vmmov %vm11848_vm4 }
 0x72a   : > { %4566 = vst [vmem:[#allocation3 + $0x378] sm:$0xf0] %v4556_v4  ;;  %4706 = vst [vmem:[#allocation3 + $0x3f0] sm:$0xf] %v4696_v21 }
 0x72b   : > { %vm11853_vm4 = vmmov %vm11849_vm0 }
 0x72c   : > { %v4601_v59 = vpop.permute.xlu0 %4600  ;;  %4300 = vrot.lane.b32.xlu1 %v9191_v32, %s11598_s15  ;;  %v4627_v36 = vpop.permute.xlu1 %4626 }
 0x72d   : > { %v4612_v27 = vsel %vm11849_vm0, %v4601_v59, %v10174_v49  ;;  %v4639_v28 = vsel %vm11850_vm2, %v4627_v36, %v4629_v38  ;;  %5420 = vrot.lane.b32.xlu0 %v9158_v8, %s11728_s8  ;;  %v5579_v0 = vld [vmem:[#allocation3 + $0x348] sm:$0xff]  ;;  %vm11854_vm0 = vcmask 7168   ;;  %vm11855_vm2 = vcmask 31744  }
 0x72e   : > { %4622 = vst [vmem:[#allocation3 + $0x3a0] sm:$0xf0] %v4612_v27  ;;  %4649 = vst [vmem:[#allocation3 + $0x3c0] sm:$0xf] %v4639_v28  ;;  %v6886_v43 = vpack.c.bf16 %v5579_v0, %v5574_v19 }
 0x730   : > { %v4543_v61 = vpop.permute.xlu0 %4542  ;;  %4356 = vrot.lane.b32.xlu1 %v9191_v32, %s11601_s30  ;;  %6887 = vmatpush1.bf16.msra.mxu1 %v6886_v43  ;;  %v4683_v5 = vpop.permute.xlu1 %4682  ;;  %s11884_s30 = smov 6  }
 0x731   : > { %v4555_v55 = vsel %vm11851_vm12, %v4543_v61, %v4545_v12  ;;  %v4695_v49 = vsel %vm11852_vm14, %v4683_v5, %v4685_v47  ;;  %5362 = vrot.lane.b32.xlu0 %v9135_v63, %s11722_s1  ;;  %v5585_v13 = vld [vmem:[#allocation3 + $0x378] sm:$0xff]  ;;  %vm11856_vm12 = vcmask 908288   ;;  %vm11857_vm14 = vcmask 15360  }
 0x732   : > { %4565 = vst [vmem:[#allocation3 + $0x370] sm:$0xf0] %v4555_v55  ;;  %4705 = vst [vmem:[#allocation3 + $0x3e8] sm:$0xf] %v4695_v49  ;;  %v11875_v49 = vld [vmem:[#allocation45_spill] sm:$0xff] }
 0x734   : > { %v4599_v8 = vpop.permute.xlu0 %4598  ;;  %4412 = vrot.lane.b32.xlu1 %v9191_v32, %s11607_s12  ;;  %v10847_v25 = vpop.permute.xlu1 %4740  ;;  %s11879_s12 = smov 8  }
 0x735   : > { %v4611_v56 = vsel %vm11853_vm4, %v4599_v8, %v4601_v59  ;;  %v4752_v51 = vsel %vm11854_vm0, %v10847_v25, %v10210_v23  ;;  %5418 = vrot.lane.b32.xlu0 %v9135_v63, %s11728_s8  ;;  %v5590_v53 = vld [vmem:[#allocation3 + $0x3a0] sm:$0xff]  ;;  %vm11859_vm4 = vmmov %vm11854_vm0  ;;  %s11874_s8 = smov 53  }
 0x736   : > { %4621 = vst [vmem:[#allocation3 + $0x398] sm:$0xf0] %v4611_v56  ;;  %4762 = vst [vmem:[#allocation3 + $0x418] sm:$0xf] %v4752_v51  ;;  %v6888_v37 = vpack.c.bf16 %v5590_v53, %v5585_v13  ;;  %6841 = vmatprep.mubr.msk.f32.mxu0 %vm11859_vm4, %v6298_v22  ;;  %vm11865_vm4 = vcmask 916480   ;;  %v11881_v13 = vld [vmem:[#allocation47_spill] sm:$0xff] }
 0x737   : > { %vm11860_vm0 = vmmov %vm11855_vm2 }
 0x738   : > { %v4657_v20 = vpop.permute.xlu0 %4656  ;;  %4468 = vrot.lane.b32.xlu1 %v9191_v32, %s11613_s20  ;;  %6889 = vmatprep.subr.bf16.mxu1 %v6888_v37  ;;  %v10857_v34 = vpop.permute.xlu1 %4803 }
 0x739   : > { %v4668_v1 = vsel %vm11855_vm2, %v4657_v20, %v10227_v58  ;;  %v4813_v23 = vsel %vm11856_vm12, %v10857_v34, %v10223_v46  ;;  %4216 = vrot.lane.b32.xlu0 %v9196_v29, %s11587_s23  ;;  %v5584_v58 = vld [vmem:[#allocation3 + $0x370] sm:$0xff]  ;;  %vm11861_vm2 = vcmask 900096   ;;  %vm11862_vm12 = vmmov %vm11857_vm14 }
 0x73a   : > { %4678 = vst [vmem:[#allocation3 + $0x3c8] sm:$0xf0] %v4668_v1  ;;  %4822 = vst [vmem:[#allocation3 + $0x440] sm:$0xf0] %v4813_v23 }
 0x73c   : > { %v4713_v63 = vpop.permute.xlu0 %4712  ;;  %4524 = vrot.lane.b32.xlu1 %v9191_v32, %s11621_s0  ;;  %v4777_v44 = vpop.permute.xlu1 %4776  ;;  %s11869_s0 = smov 27  }
 0x73d   : > { %v4724_v9 = vsel %vm11857_vm14, %v4713_v63, %v10237_v17  ;;  %4272 = vrot.lane.b32.xlu0 %v9196_v29, %s11592_s18  ;;  %v5589_v50 = vld [vmem:[#allocation3 + $0x398] sm:$0xff]  ;;  %vm11864_vm14 = vcmask 883712   ;;  %s7108_s18 = smul.u32 80, %s11995_s9 }
 0x73e   : > { %4734 = vst [vmem:[#allocation3 + $0x3f0] sm:$0xf0] %v4724_v9  ;;  %v6890_v46 = vpack.c.bf16 %v5589_v50, %v5584_v58  ;;  %v5605_v0 = vld [vmem:[#allocation3 + $0x418] sm:$0xff] }
 0x740   : > { %v4655_v48 = vpop.permute.xlu0 %4654  ;;  %4580 = vrot.lane.b32.xlu1 %v9191_v32, %s11626_s2  ;;  %6891 = vmatpush1.bf16.msra.mxu1 %v6890_v46  ;;  %v4829_v15 = vpop.permute.xlu1 %4828  ;;  %s11870_s2 = smov 55  }
 0x741   : > { %v4667_v17 = vsel %vm11860_vm0, %v4655_v48, %v4657_v20  ;;  %v4838_v16 = vsel %vm11861_vm2, %v4829_v15, %v10314_v62  ;;  %5446 = vrot.lane.b32.xlu0 %v9127_v31, %s11734_s27  ;;  %v5595_v3 = vld [vmem:[#allocation3 + $0x3c8] sm:$0xff]  ;;  %vm11867_vm0 = vmmov %vm11865_vm4 }
 0x742   : > { %4677 = vst [vmem:[#allocation3 + $0x3c0] sm:$0xf0] %v4667_v17  ;;  %4847 = vst [vmem:[#allocation3 + $0x468] sm:$0xf] %v4838_v16 }
 0x744   : > { %v4711_v10 = vpop.permute.xlu0 %4710  ;;  %4636 = vrot.lane.b32.xlu1 %v9191_v32, %s11777_s24  ;;  %v4879_v26 = vpop.permute.xlu1 %4878  ;;  %s11119_s24 = scalar_lea.vmem %s12007_s28, %s7108_s18 }
 0x745   : > { %v4723_v6 = vsel %vm11862_vm12, %v4711_v10, %v4713_v63  ;;  %v4888_v57 = vsel %vm11864_vm14, %v4879_v26, %v11863_v35  ;;  %4328 = vrot.lane.b32.xlu0 %v9196_v29, %s11600_s29  ;;  %v5600_v62 = vld [vmem:[#allocation3 + $0x3f0] sm:$0xff]  ;;  %vm11868_vm12 = vcmask 7168   ;;  %s11880_s29 = sld [smem:[#allocation67_spill]] }
 0x746   : > { %4733 = vst [vmem:[#allocation3 + $0x3e8] sm:$0xf0] %v4723_v6  ;;  %4897 = vst [vmem:[#allocation3 + $0x490] sm:$0xf] %v4888_v57  ;;  %v6892_v31 = vpack.c.bf16 %v5600_v62, %v5595_v3  ;;  %v11891_v35 = vld [vmem:[#allocation55_spill] sm:$0xff]  ;;  %v11892_v62 = vld [vmem:[#allocation50_spill] sm:$0xff] }
 0x748   : > { %v4779_v24 = vpop.permute.xlu0 %4778  ;;  %4692 = vrot.lane.b32.xlu1 %v9191_v32, %s11778_s25  ;;  %6893 = vmatprep.subr.bf16.mxu1 %v6892_v31  ;;  %v4827_v45 = vpop.permute.xlu1 %4826 }
 0x749   : > { %v4787_v38 = vsel %vm11865_vm4, %v4777_v44, %v4779_v24  ;;  %v4788_v52 = vsel %vm11867_vm0, %v4779_v24, %v11866_v7  ;;  %v4837_v60 = vsel %vm11861_vm2, %v4827_v45, %v4829_v15  ;;  %4384 = vrot.lane.b32.xlu0 %v9196_v29, %s11602_s16  ;;  %v5594_v4 = vld [vmem:[#allocation3 + $0x3c0] sm:$0xff]  ;;  %vm11871_vm4 = vcmask 908288   ;;  %s11888_s16 = smov 2  }
 0x74a   : > { %4796 = vst [vmem:[#allocation3 + $0x438] sm:$0xf] %v4787_v38  ;;  %4797 = vst [vmem:[#allocation3 + $0x440] sm:$0xf] %v4788_v52  ;;  %vm11872_vm0 = vcmask 867328   ;;  %vm11876_vm2 = vcmask 891904  }
 0x74b   : > { %4846 = vst [vmem:[#allocation3 + $0x460] sm:$0xf] %v4837_v60  ;;  %v5679_v56 = vld [vmem:[%s11880_s29] sm:$0x3] }
 0x74c   : > { %v4739_v54 = vpop.permute.xlu0 %4738  ;;  %4748 = vrot.lane.b32.xlu1 %v9191_v32, %s11781_s14  ;;  %v4877_v40 = vpop.permute.xlu1 %4876  ;;  %s11896_s14 = smov 52  }
 0x74d   : > { %v4751_v12 = vsel %vm11868_vm12, %v4739_v54, %v10847_v25  ;;  %v4887_v47 = vsel %vm11864_vm14, %v4877_v40, %v4879_v26  ;;  %4440 = vrot.lane.b32.xlu0 %v9196_v29, %s11869_s0  ;;  %v5599_v21 = vld [vmem:[#allocation3 + $0x3e8] sm:$0xff]  ;;  %v11877_v25 = vld [vmem:[#allocation52_spill] sm:$0xff]  ;;  %vm11878_vm12 = vcmask 850944   ;;  %vm11882_vm14 = vcmask 875520  }
 0x74e   : > { %4761 = vst [vmem:[#allocation3 + $0x410] sm:$0xf] %v4751_v12  ;;  %4896 = vst [vmem:[#allocation3 + $0x488] sm:$0xf] %v4887_v47  ;;  %v6894_v59 = vpack.c.bf16 %v5599_v21, %v5594_v4  ;;  %v11889_v26 = vld [vmem:[#allocation48_spill] sm:$0xff] }
 0x750   : > { %v4802_v36 = vpop.permute.xlu0 %4801  ;;  %4076 = vrot.lane.b32.xlu1 %v9191_v32, %s11870_s2  ;;  %6895 = vmatpush1.bf16.msra.mxu1 %v6894_v59  ;;  %v4929_v27 = vpop.permute.xlu1 %4928 }
 0x751   : > { %v4812_v28 = vsel %vm11871_vm4, %v4802_v36, %v10857_v34  ;;  %v4938_v19 = vsel %vm11872_vm0, %v4929_v27, %v10352_v18  ;;  %4496 = vrot.lane.b32.xlu0 %v9196_v29, %s11873_s5  ;;  %v5610_v43 = vld [vmem:[#allocation3 + $0x440] sm:$0xff]  ;;  %vm11883_vm4 = vmmov %vm11872_vm0 }
 0x752   : > { %4821 = vst [vmem:[#allocation3 + $0x438] sm:$0xf0] %v4812_v28  ;;  %4947 = vst [vmem:[#allocation3 + $0x4b8] sm:$0xf] %v4938_v19  ;;  %v6896_v61 = vpack.c.bf16 %v5610_v43, %v5605_v0  ;;  %v11898_v36 = vld [vmem:[#allocation57_spill] sm:$0xff] }
 0x753   : > { %vm11885_vm0 = vmmov %vm11876_vm2 }
 0x754   : > { %v4854_v5 = vpop.permute.xlu0 %4853  ;;  %4132 = vrot.lane.b32.xlu1 %v9191_v32, %s11874_s8  ;;  %6897 = vmatprep.subr.bf16.mxu1 %v6896_v61  ;;  %v4979_v55 = vpop.permute.xlu1 %4978 }
 0x755   : > { %v4863_v8 = vsel %vm11876_vm2, %v4854_v5, %v11875_v49  ;;  %v4987_v18 = vsel %vm11878_vm12, %v4979_v55, %v11877_v25  ;;  %4552 = vrot.lane.b32.xlu0 %v9196_v29, %s11879_s12  ;;  %v5604_v20 = vld [vmem:[#allocation3 + $0x410] sm:$0xff]  ;;  %vm11886_vm2 = vmmov %vm11878_vm12 }
 0x756   : > { %4872 = vst [vmem:[#allocation3 + $0x468] sm:$0xf0] %v4863_v8  ;;  %4996 = vst [vmem:[#allocation3 + $0x4e0] sm:$0xf] %v4987_v18  ;;  %v11903_v18 = vld [vmem:[#allocation53_spill] sm:$0xff] }
 0x757   : > { %vm11887_vm12 = vmmov %vm11882_vm14 }
 0x758   : > { %v4904_v51 = vpop.permute.xlu0 %4903  ;;  %5682 = vperm.xlu1 %7199, %v5679_v56   ;;  %v4927_v32 = vpop.permute.xlu1 %4926 }
 0x759   : > { %v4913_v53 = vsel %vm11882_vm14, %v4904_v51, %v11881_v13  ;;  %v4937_v37 = vsel %vm11883_vm4, %v4927_v32, %v4929_v27  ;;  %4608 = vrot.lane.b32.xlu0 %v9196_v29, %s11884_s30  ;;  %v5609_v34 = vld [vmem:[#allocation3 + $0x438] sm:$0xff]  ;;  %vm11890_vm14 = vcmask 859136   ;;  %vm11893_vm4 = vcmask 719872  }
 0x75a   : > { %4922 = vst [vmem:[#allocation3 + $0x490] sm:$0xf0] %v4913_v53  ;;  %4946 = vst [vmem:[#allocation3 + $0x4b0] sm:$0xf] %v4937_v37  ;;  %v6898_v1 = vpack.c.bf16 %v5609_v34, %v5604_v20 }
 0x75c   : > { %v4852_v23 = vpop.permute.xlu0 %4851  ;;  %6899 = vmatpush1.bf16.msra.mxu1 %v6898_v1  ;;  %v4977_v63 = vpop.permute.xlu1 %4976 }
 0x75d   : > { %v4862_v44 = vsel %vm11885_vm0, %v4852_v23, %v4854_v5  ;;  %v4986_v9 = vsel %vm11886_vm2, %v4977_v63, %v4979_v55  ;;  %4664 = vrot.lane.b32.xlu0 %v9196_v29, %s11785_s11  ;;  %v5615_v48 = vld [vmem:[#allocation3 + $0x468] sm:$0xff]  ;;  %s11894_s11 = smov 54   ;;  %vm11895_vm0 = vmmov %vm11890_vm14  ;;  %vm11899_vm2 = vcmask 678912   ;;  %v11900_v5 = vld [vmem:[#allocation51_spill] sm:$0xff] }
 0x75e   : > { %4871 = vst [vmem:[#allocation3 + $0x460] sm:$0xf0] %v4862_v44  ;;  %4995 = vst [vmem:[#allocation3 + $0x4d8] sm:$0xf] %v4986_v9  ;;  %v11901_v55 = vld [vmem:[#allocation59_spill] sm:$0xff]  ;;  %v11907_v23 = vld [vmem:[#allocation38_spill] sm:$0xff] }
 0x760   : > { %v4902_v58 = vpop.permute.xlu0 %4901  ;;  %v5028_v50 = vpop.permute.xlu1 %5027 }
 0x761   : > { %v4912_v46 = vsel %vm11887_vm12, %v4902_v58, %v4904_v51  ;;  %v5037_v22 = vsel %vm1642_vm15, %v5028_v50, %v10379_v39  ;;  %4720 = vrot.lane.b32.xlu0 %v9196_v29, %s11888_s16  ;;  %v5620_v15 = vld [vmem:[#allocation3 + $0x490] sm:$0xff]  ;;  %vm11904_vm12 = vcmask 687104   ;;  %v11909_v58 = vld [vmem:[#allocation61_spill] sm:$0xff] }
 0x762   : > { %4921 = vst [vmem:[#allocation3 + $0x488] sm:$0xf0] %v4912_v46  ;;  %5046 = vst [vmem:[#allocation3 + $0x508] sm:$0xf] %v5037_v22  ;;  %v6900_v17 = vpack.c.bf16 %v5620_v15, %v5615_v48 }
 0x764   : > { %v4954_v16 = vpop.permute.xlu0 %4953  ;;  %6901 = vmatprep.subr.bf16.mxu1 %v6900_v17  ;;  %v5078_v10 = vpop.permute.xlu1 %5077 }
 0x765   : > { %v4963_v6 = vsel %vm11890_vm14, %v4954_v16, %v11889_v26  ;;  %v5087_v57 = vsel %vm1682_vm3, %v5078_v10, %v11891_v35  ;;  %4048 = vrot.lane.b32.xlu0 %v9196_v29, %s11734_s27  ;;  %v5614_v45 = vld [vmem:[#allocation3 + $0x460] sm:$0xff]  ;;  %vm11905_vm14 = vmmov %vm11899_vm2  ;;  %v11912_v26 = vld [vmem:[#allocation62_spill] sm:$0xff] }
 0x766   : > { %4972 = vst [vmem:[#allocation3 + $0x4b8] sm:$0xf0] %v4963_v6  ;;  %5096 = vst [vmem:[#allocation3 + $0x530] sm:$0xf] %v5087_v57  ;;  %v11913_v57 = vld [vmem:[#allocation56_spill] sm:$0xff] }
 0x768   : > { %v5003_v39 = vpop.permute.xlu0 %5002  ;;  %v5026_v3 = vpop.permute.xlu1 %5025 }
 0x769   : > { %v5012_v31 = vsel %vm11893_vm4, %v5003_v39, %v11892_v62  ;;  %v5036_v24 = vsel %vm1642_vm15, %v5026_v3, %v5028_v50  ;;  %4104 = vrot.lane.b32.xlu0 %v9196_v29, %s11894_s11  ;;  %v5619_v38 = vld [vmem:[#allocation3 + $0x488] sm:$0xff]  ;;  %v10949_v7 = vpop.f32.mrb[24].mxu0  ;;  %vm11897_vm15 = vmmov %vm11893_vm4 }
 0x76a   : > { %5021 = vst [vmem:[#allocation3 + $0x4e0] sm:$0xf0] %v5012_v31  ;;  %5045 = vst [vmem:[#allocation3 + $0x500] sm:$0xf] %v5036_v24  ;;  %v6902_v52 = vpack.c.bf16 %v5619_v38, %v5614_v45  ;;  %v10951_v60 = vpop.f32.mrb[25].mxu0 }
 0x76c   : > { %v4952_v54 = vpop.permute.xlu0 %4951  ;;  %6903 = vmatpush1.bf16.msra.mxu1 %v6902_v52  ;;  %v5076_v40 = vpop.permute.xlu1 %5075 }
 0x76d   : > { %v4962_v12 = vsel %vm11895_vm0, %v4952_v54, %v4954_v16  ;;  %v5086_v47 = vsel %vm1682_vm3, %v5076_v40, %v5078_v10  ;;  %4160 = vrot.lane.b32.xlu0 %v9196_v29, %s11896_s14  ;;  %v5625_v28 = vld [vmem:[#allocation3 + $0x4b8] sm:$0xff]  ;;  %vm11902_vm3 = vcmask 662528   ;;  %vm11908_vm0 = vmmov %vm11904_vm12  ;;  %v11910_v16 = vld [vmem:[#allocation54_spill] sm:$0xff] }
 0x76e   : > { %4971 = vst [vmem:[#allocation3 + $0x4b0] sm:$0xf0] %v4962_v12  ;;  %5095 = vst [vmem:[#allocation3 + $0x528] sm:$0xf] %v5086_v47 }
 0x76f   : > { %vm11906_vm4 = vmmov %vm11902_vm3 }
 0x770   : > { %v5001_v4 = vpop.permute.xlu0 %5000  ;;  %v5128_v21 = vpop.permute.xlu1 %5127 }
 0x771   : > { %v5011_v59 = vsel %vm11897_vm15, %v5001_v4, %v5003_v39  ;;  %v5137_v27 = vsel %vm11899_vm2, %v5128_v21, %v11898_v36  ;;  %v5630_v19 = vld [vmem:[#allocation3 + $0x4e0] sm:$0xff]  ;;  %vm11915_vm2 = vcmask 490496  }
 0x772   : > { %5020 = vst [vmem:[#allocation3 + $0x4d8] sm:$0xf0] %v5011_v59  ;;  %5146 = vst [vmem:[#allocation3 + $0x558] sm:$0xf] %v5137_v27  ;;  %v6904_v0 = vpack.c.bf16 %v5630_v19, %v5625_v28  ;;  %v11916_v19 = vld [vmem:[#allocation58_spill] sm:$0xff] }
 0x774   : > { %v5053_v43 = vpop.permute.xlu0 %5052  ;;  %6905 = vmatprep.subr.bf16.mxu1 %v6904_v0  ;;  %v5178_v61 = vpop.permute.xlu1 %5177 }
 0x775   : > { %v5062_v29 = vsel %vm1662_vm9, %v5053_v43, %v11900_v5  ;;  %v5187_v49 = vsel %vm11902_vm3, %v5178_v61, %v11901_v55  ;;  %v5624_v32 = vld [vmem:[#allocation3 + $0x4b0] sm:$0xff] }
 0x776   : > { %5071 = vst [vmem:[#allocation3 + $0x508] sm:$0xf0] %v5062_v29  ;;  %5196 = vst [vmem:[#allocation3 + $0x580] sm:$0xf] %v5187_v49  ;;  %v11917_v29 = vld [vmem:[#allocation60_spill] sm:$0xff] }
 0x778   : > { %v5103_v8 = vpop.permute.xlu0 %5102  ;;  %v5126_v25 = vpop.permute.xlu1 %5125 }
 0x779   : > { %v5112_v56 = vsel %vm11904_vm12, %v5103_v8, %v11903_v18  ;;  %v5136_v51 = vsel %vm11905_vm14, %v5126_v25, %v5128_v21  ;;  %v5629_v13 = vld [vmem:[#allocation3 + $0x4d8] sm:$0xff]  ;;  %vm11922_vm12 = vcmask 416768   ;;  %vm11926_vm14 = vcmask 457728  }
 0x77a   : > { %5121 = vst [vmem:[#allocation3 + $0x530] sm:$0xf0] %v5112_v56  ;;  %5145 = vst [vmem:[#allocation3 + $0x550] sm:$0xf] %v5136_v51  ;;  %v6906_v53 = vpack.c.bf16 %v5629_v13, %v5624_v32 }
 0x77c   : > { %v5051_v37 = vpop.permute.xlu0 %5050  ;;  %6907 = vmatpush1.bf16.msra.mxu1 %v6906_v53  ;;  %v5176_v20 = vpop.permute.xlu1 %5175 }
 0x77d   : > { %v5061_v34 = vsel %vm1662_vm9, %v5051_v37, %v5053_v43  ;;  %v5186_v1 = vsel %vm11906_vm4, %v5176_v20, %v5178_v61  ;;  %v5635_v46 = vld [vmem:[#allocation3 + $0x508] sm:$0xff]  ;;  %vm11911_vm9 = vcmask 670720  }
 0x77e   : > { %5070 = vst [vmem:[#allocation3 + $0x500] sm:$0xf0] %v5061_v34  ;;  %5195 = vst [vmem:[#allocation3 + $0x578] sm:$0xf] %v5186_v1  ;;  %v11921_v37 = vld [vmem:[#allocation22_spill] sm:$0xff] }
 0x77f   : > { %5787 = vmatmul.mubr.f32.vlgmr.msra.gmra.mrb[24].mxu1 %v11907_v23  ;;  %vm11914_vm15 = vmmov %vm11911_vm9 }
 0x780   : > { %v5101_v63 = vpop.permute.xlu0 %5100  ;;  %v5227_v44 = vpop.permute.xlu1 %5226  ;;  %5857 = vmatprep.mubr.f32.mxu1 %v11735_v33 }
 0x781   : > { %v5111_v9 = vsel %vm11908_vm0, %v5101_v63, %v5103_v8  ;;  %v5235_v50 = vsel %vm1798_vm6, %v5227_v44, %v11909_v58  ;;  %v5640_v22 = vld [vmem:[#allocation3 + $0x530] sm:$0xff]  ;;  %vm11929_vm0 = vcmask 261120  }
 0x782   : > { %5120 = vst [vmem:[#allocation3 + $0x528] sm:$0xf0] %v5111_v9  ;;  %5244 = vst [vmem:[#allocation3 + $0x5a8] sm:$0xf] %v5235_v50  ;;  %v6908_v48 = vpack.c.bf16 %v5640_v22, %v5635_v46  ;;  %v11924_v50 = vld [vmem:[#allocation24_spill] sm:$0xff] }
 0x784   : > { %v5153_v15 = vpop.permute.xlu0 %5152  ;;  %6909 = vmatprep.subr.bf16.mxu1 %v6908_v48  ;;  %v5281_v17 = vpop.permute.xlu1 %5280 }
 0x785   : > { %v5162_v10 = vsel %vm11911_vm9, %v5153_v15, %v11910_v16  ;;  %v5292_v6 = vsel %vm1851_vm10, %v5281_v17, %v11912_v26  ;;  %v5634_v62 = vld [vmem:[#allocation3 + $0x500] sm:$0xff]  ;;  %vm11931_vm9 = vcmask 244736  }
 0x786   : > { %5171 = vst [vmem:[#allocation3 + $0x558] sm:$0xf0] %v5162_v10  ;;  %5302 = vst [vmem:[#allocation3 + $0x5d0] sm:$0xf] %v5292_v6 }
 0x788   : > { %v5203_v33 = vpop.permute.xlu0 %5202  ;;  %v5225_v35 = vpop.permute.xlu1 %5224 }
 0x789   : > { %v5211_v39 = vsel %vm709_vm13, %v5203_v33, %v11913_v57  ;;  %v5234_v3 = vsel %vm1798_vm6, %v5225_v35, %v5227_v44  ;;  %v5639_v31 = vld [vmem:[#allocation3 + $0x528] sm:$0xff] }
 0x78a   : > { %5220 = vst [vmem:[#allocation3 + $0x580] sm:$0xf0] %v5211_v39  ;;  %5243 = vst [vmem:[#allocation3 + $0x5a0] sm:$0xf] %v5234_v3  ;;  %v6910_v24 = vpack.c.bf16 %v5639_v31, %v5634_v62  ;;  %v11928_v35 = vld [vmem:[#allocation26_spill] sm:$0xff]  ;;  %v11930_v3 = vld [vmem:[#allocation28_spill] sm:$0xff] }
 0x78c   : > { %v5151_v45 = vpop.permute.xlu0 %5150  ;;  %6911 = vmatpush1.bf16.msra.mxu1 %v6910_v24  ;;  %v5279_v38 = vpop.permute.xlu1 %5278 }
 0x78d   : > { %v5161_v52 = vsel %vm11914_vm15, %v5151_v45, %v5153_v15  ;;  %v5291_v54 = vsel %vm1851_vm10, %v5279_v38, %v5281_v17  ;;  %v5645_v21 = vld [vmem:[#allocation3 + $0x558] sm:$0xff]  ;;  %vm11918_vm10 = vcmask 498688   ;;  %vm11933_vm15 = vcmask 408576  }
 0x78e   : > { %5170 = vst [vmem:[#allocation3 + $0x550] sm:$0xf0] %v5161_v52  ;;  %5301 = vst [vmem:[#allocation3 + $0x5c8] sm:$0xf] %v5291_v54  ;;  %v11932_v54 = vld [vmem:[#allocation23_spill] sm:$0xff] }
 0x78f   : > { %vm11920_vm3 = vmmov %vm11918_vm10 }
 0x790   : > { %v5201_v40 = vpop.permute.xlu0 %5200  ;;  %v5337_v12 = vpop.permute.xlu1 %5336 }
 0x791   : > { %v5210_v47 = vsel %vm709_vm13, %v5201_v40, %v5203_v33  ;;  %v5348_v4 = vsel %vm11915_vm2, %v5337_v12, %v10528_v11  ;;  %v5650_v59 = vld [vmem:[#allocation3 + $0x580] sm:$0xff]  ;;  %vm11919_vm13 = vmmov %vm11915_vm2  ;;  %vm11934_vm2 = vcmask 523268  }
 0x792   : > { %5219 = vst [vmem:[#allocation3 + $0x578] sm:$0xf0] %v5210_v47  ;;  %5358 = vst [vmem:[#allocation3 + $0x5f8] sm:$0xf] %v5348_v4  ;;  %v6912_v36 = vpack.c.bf16 %v5650_v59, %v5645_v21  ;;  %v11935_v4 = vld [vmem:[#allocation30_spill] sm:$0xff] }
 0x794   : > { %v5253_v27 = vpop.permute.xlu0 %5252  ;;  %6913 = vmatprep.subr.bf16.mxu1 %v6912_v36  ;;  %v5393_v28 = vpop.permute.xlu1 %5392  ;;  %v11937_v36 = vld [vmem:[#allocation25_spill] sm:$0xff] }
 0x795   : > { %v5264_v0 = vsel %vm1820_vm8, %v5253_v27, %v11916_v19  ;;  %v5404_v43 = vsel %vm1943_vm11, %v5393_v28, %v10536_v2  ;;  %v5644_v49 = vld [vmem:[#allocation3 + $0x550] sm:$0xff] }
 0x796   : > { %5274 = vst [vmem:[#allocation3 + $0x5a8] sm:$0xf0] %v5264_v0  ;;  %5414 = vst [vmem:[#allocation3 + $0x620] sm:$0xf] %v5404_v43 }
 0x798   : > { %v5309_v61 = vpop.permute.xlu0 %5308  ;;  %v5335_v5 = vpop.permute.xlu1 %5334 }
 0x799   : > { %v5320_v11 = vsel %vm11918_vm10, %v5309_v61, %v11917_v29  ;;  %v5347_v55 = vsel %vm11919_vm13, %v5335_v5, %v5337_v12  ;;  %v5649_v8 = vld [vmem:[#allocation3 + $0x578] sm:$0xff]  ;;  %vm11938_vm10 = vcmask 392192   ;;  %vm11939_vm13 = vmmov %vm11934_vm2 }
 0x79a   : > { %5330 = vst [vmem:[#allocation3 + $0x5d0] sm:$0xf0] %v5320_v11  ;;  %5357 = vst [vmem:[#allocation3 + $0x5f0] sm:$0xf] %v5347_v55  ;;  %v6914_v25 = vpack.c.bf16 %v5649_v8, %v5644_v49  ;;  %v11940_v5 = vld [vmem:[#allocation32_spill] sm:$0xff] }
 0x79b   : > { %v6299_v49 = vld [vmem:[%s11858_s4 + $0x8] sm:$0xff] }
 0x79c   : > { %v5251_v18 = vpop.permute.xlu0 %5250  ;;  %6915 = vmatpush1.bf16.msra.mxu1 %v6914_v25  ;;  %v5391_v56 = vpop.permute.xlu1 %5390 }
 0x79d   : > { %v5263_v51 = vsel %vm1820_vm8, %v5251_v18, %v5253_v27  ;;  %v5403_v2 = vsel %vm1943_vm11, %v5391_v56, %v5393_v28  ;;  %v5655_v34 = vld [vmem:[#allocation3 + $0x5a8] sm:$0xff]  ;;  %vm11923_vm8 = vcmask 482304   ;;  %vm11925_vm11 = vcmask 400384  }
 0x79e   : > { %5273 = vst [vmem:[#allocation3 + $0x5a0] sm:$0xf0] %v5263_v51  ;;  %5413 = vst [vmem:[#allocation3 + $0x618] sm:$0xf] %v5403_v2  ;;  %v11945_v51 = vld [vmem:[#allocation34_spill] sm:$0xff] }
 0x79f   : > { %vm11927_vm4 = vmmov %vm11923_vm8 }
 0x7a0   : > { %v5307_v32 = vpop.permute.xlu0 %5306  ;;  %v4189_v13 = vpop.permute.xlu1 %4188 }
 0x7a1   : > { %v5319_v53 = vsel %vm11920_vm3, %v5307_v32, %v5309_v61  ;;  %v4195_v20 = vsel %vm11922_vm12, %v11921_v37, %v4189_v13  ;;  %v5660_v1 = vld [vmem:[#allocation3 + $0x5d0] sm:$0xff]  ;;  %vm11941_vm3 = vcmask 211968   ;;  %vm11942_vm12 = vcmask 1040384  }
 0x7a2   : > { %5329 = vst [vmem:[#allocation3 + $0x5c8] sm:$0xf0] %v5319_v53  ;;  %4205 = vst.msk [vmem:[#allocation3 + $0x2a0] sm:$0xf] %vm3378_vm7, %v4195_v20  ;;  %v6916_v63 = vpack.c.bf16 %v5660_v1, %v5655_v34  ;;  %v11948_v13 = vld [vmem:[#allocation27_spill] sm:$0xff]  ;;  %v11951_v20 = vld [vmem:[#allocation36_spill] sm:$0xff] }
 0x7a4   : > { %v5365_v44 = vpop.permute.xlu0 %5364  ;;  %6917 = vmatprep.subr.bf16.mxu1 %v6916_v63  ;;  %v4245_v9 = vpop.permute.xlu1 %4244  ;;  %v5483_v63 = vld [vmem:[#allocation3 + $0x48] sm:$0xff] }
 0x7a5   : > { %v5376_v58 = vsel %vm11923_vm8, %v5365_v44, %v10480_v30  ;;  %v4251_v46 = vsel %vm11925_vm11, %v11924_v50, %v4245_v9  ;;  %v5654_v16 = vld [vmem:[#allocation3 + $0x5a0] sm:$0xff]  ;;  %vm11943_vm8 = vmmov %vm11926_vm14 }
 0x7a6   : > { %5386 = vst [vmem:[#allocation3 + $0x5f8] sm:$0xf0] %v5376_v58  ;;  %4261 = vst.msk [vmem:[#allocation3 + $0x2c8] sm:$0xf] %vm3378_vm7, %v4251_v46  ;;  %v11953_v58 = vld [vmem:[#allocation29_spill] sm:$0xff] }
 0x7a7   : > { %vm11944_vm11 = vmmov %vm11942_vm12 }
 0x7a8   : > { %v5421_v22 = vpop.permute.xlu0 %5420  ;;  %v5449_v48 = vpop.permute.xlu1 %5448 }
 0x7a9   : > { %v5432_v15 = vsel %vm1966_vm5, %v5421_v22, %v10490_v42  ;;  %v5459_v17 = vsel %vm11926_vm14, %v5449_v48, %v10550_v41  ;;  %v5659_v10 = vld [vmem:[#allocation3 + $0x5c8] sm:$0xff]  ;;  %vm11946_vm14 = vcmask 195584  }
 0x7aa   : > { %5442 = vst [vmem:[#allocation3 + $0x620] sm:$0xf0] %v5432_v15  ;;  %5469 = vst [vmem:[#allocation3 + $0x648] sm:$0xf] %v5459_v17  ;;  %v6918_v26 = vpack.c.bf16 %v5659_v10, %v5654_v16  ;;  %v5478_v15 = vld [vmem:[#allocation3 + $0x20] sm:$0xff]  ;;  %v11956_v17 = vld [vmem:[#allocation40_spill] sm:$0xff] }
 0x7ab   : > { %v7006_v10 = vpack.c.bf16 %v5483_v63, %v5478_v15 }
 0x7ac   : > { %v5363_v30 = vpop.permute.xlu0 %5362  ;;  %6919 = vmatpush1.bf16.msra.mxu1 %v6918_v26  ;;  %v4301_v6 = vpop.permute.xlu1 %4300 }
 0x7ad   : > { %v5375_v33 = vsel %vm11927_vm4, %v5363_v30, %v5365_v44  ;;  %v4307_v57 = vsel %vm11929_vm0, %v11928_v35, %v4301_v6  ;;  %v5665_v31 = vld [vmem:[#allocation3 + $0x5f8] sm:$0xff]  ;;  %vm11947_vm4 = vcmask 7168   ;;  %vm11949_vm0 = vcmask 252928   ;;  %v11959_v30 = vld [vmem:[#allocation39_spill] sm:$0xff] }
 0x7ae   : > { %5385 = vst [vmem:[#allocation3 + $0x5f0] sm:$0xf0] %v5375_v33  ;;  %4317 = vst.msk [vmem:[#allocation3 + $0x2f0] sm:$0xf] %vm3378_vm7, %v4307_v57  ;;  %v11960_v6 = vld [vmem:[#allocation31_spill] sm:$0xff]  ;;  %v11963_v57 = vld [vmem:[#allocation42_spill] sm:$0xff] }
 0x7b0   : > { %v5419_v42 = vpop.permute.xlu0 %5418  ;;  %v4357_v39 = vpop.permute.xlu1 %4356 }
 0x7b1   : > { %v5431_v41 = vsel %vm1966_vm5, %v5419_v42, %v5421_v22  ;;  %v4363_v62 = vsel %vm11931_vm9, %v11930_v3, %v4357_v39  ;;  %v5670_v24 = vld [vmem:[#allocation3 + $0x620] sm:$0xff]  ;;  %vm11936_vm5 = vcmask 228352   ;;  %v5675_v25 = vld [vmem:[#allocation3 + $0x648] sm:$0xf]  ;;  %vm11950_vm9 = vmmov %vm11934_vm2 }
 0x7b2   : > { %5441 = vst [vmem:[#allocation3 + $0x618] sm:$0xf0] %v5431_v41  ;;  %4373 = vst.msk [vmem:[#allocation3 + $0x318] sm:$0xf] %vm3378_vm7, %v4363_v62  ;;  %v6920_v45 = vpack.c.bf16 %v5670_v24, %v5665_v31  ;;  %v5493_v41 = vld [vmem:[#allocation3 + $0x98] sm:$0xff]  ;;  %v11965_v3 = vld [vmem:[#allocation33_spill] sm:$0xff] }
 0x7b4   : > { %v4217_v38 = vpop.permute.xlu0 %4216  ;;  %6921 = vmatprep.subr.bf16.mxu1 %v6920_v45  ;;  %v11016_v52 = vpop.f32.mrb[26].mxu0  ;;  %v11968_v45 = vld [vmem:[#allocation44_spill] sm:$0xff] }
 0x7b5   : > { %v4223_v40 = vsel %vm11933_vm15, %v11932_v54, %v4217_v38  ;;  %v4413_v12 = vpop.permute.xlu1 %4412  ;;  %v6831_v47 = vpop.f32.mrb[27].mxu0  ;;  %v5664_v0 = vld [vmem:[#allocation3 + $0x5f0] sm:$0xff]  ;;  %vm11952_vm15 = vcmask 56320  }
 0x7b6   : > { %4233 = vst.msk [vmem:[#allocation3 + $0x2a0] sm:$0xf0] %vm11934_vm2, %v4223_v40  ;;  %v4419_v21 = vsel %vm11936_vm5, %v11935_v4, %v4413_v12  ;;  %vm11954_vm2 = vcmask 236544   ;;  %vm11955_vm5 = vmmov %vm11950_vm9  ;;  %v5488_v40 = vld [vmem:[#allocation3 + $0x70] sm:$0xff] }
 0x7b7   : > { %4429 = vst.msk [vmem:[#allocation3 + $0x340] sm:$0xf] %vm3378_vm7, %v4419_v21  ;;  %v7010_v12 = vpack.c.bf16 %v5493_v41, %v5488_v40  ;;  %v11970_v4 = vld [vmem:[#allocation35_spill] sm:$0xff]  ;;  %v5623_v41 = vld [vmem:[#allocation3 + $0x4a8] sm:$0xff] }
 0x7b8   : > { %v4273_v59 = vpop.permute.xlu0 %4272  ;;  %v5628_v40 = vld [vmem:[#allocation3 + $0x4d0] sm:$0xff] }
 0x7b9   : > { %v4279_v27 = vsel %vm11938_vm10, %v11937_v36, %v4273_v59  ;;  %v6293_v28 = vpop.f32.mrb[28].mxu0  ;;  %v4469_v19 = vpop.permute.xlu1 %4468  ;;  %v5669_v43 = vld [vmem:[#allocation3 + $0x618] sm:$0xff]  ;;  %vm11957_vm10 = vcmask 39936   ;;  %v11973_v36 = vld [vmem:[#allocation18_spill] sm:$0xff] }
 0x7ba   : > { %4289 = vst.msk [vmem:[#allocation3 + $0x2c8] sm:$0xf0] %vm11939_vm13, %v4279_v27  ;;  %v6297_v61 = vmax.f32 %v6293_v28, 0.0  ;;  %v4475_v29 = vsel %vm11941_vm3, %v11940_v5, %v4469_v19  ;;  %v6838_v11 = vpop.f32.mrb[29].mxu0  ;;  %v6922_v55 = vpack.c.bf16 %v5669_v43, %v5664_v0  ;;  %vm11958_vm13 = vcmask 556032   ;;  %v5503_v19 = vld [vmem:[#allocation3 + $0xe8] sm:$0xff] }
 0x7bb   : > { %4485 = vst.msk [vmem:[#allocation3 + $0x368] sm:$0xf] %vm3378_vm7, %v4475_v29  ;;  %vm11961_vm3 = vcmask 220160   ;;  %v11975_v0 = vld [vmem:[#allocation37_spill] sm:$0xff]  ;;  %v11978_v11 = vld [vmem:[#allocation20_spill] sm:$0xff] }
 0x7bc   : > { %6839 = vmatprep.subr.msk.mxu0 %vm11942_vm12, %v6297_v61  ;;  %v5447_v8 = vpop.permute.xlu0 %5446  ;;  %6923 = vmatpush1.bf16.msra.mxu1 %v6922_v55  ;;  %vm11962_vm12 = vmmov %vm11955_vm5 }
 0x7bd   : > { %v5458_v18 = vsel %vm11943_vm8, %v5447_v8, %v5449_v48  ;;  %6840 = vmatpush3.msk.msra.mxu0 %vm11944_vm11, %v6297_v61  ;;  %v4525_v56 = vpop.permute.xlu1 %4524  ;;  %6675 = vmatprep.subr.msk.mxu1 %vm366_vm1, %v5675_v25  ;;  %v5558_v9 = vld [vmem:[#allocation3 + $0x2a0] sm:$0xff]  ;;  %vm11964_vm8 = vcmask 23552   ;;  %vm11967_vm11 = vmmov %vm11955_vm5 }
 0x7be   : > { %5468 = vst [vmem:[#allocation3 + $0x640] sm:$0xf] %v5458_v18  ;;  %v4531_v2 = vsel %vm11946_vm14, %v11945_v51, %v4525_v56  ;;  %6842 = vmatmul.mubr.msk.f32.vlgmr.msra.gmra.mrb[30].mxu0 %vm11947_vm4, %v6299_v49  ;;  %vm11969_vm14 = vmmov %vm11947_vm4  ;;  %vm11971_vm4 = vcmask 64512   ;;  %v5498_v8 = vld [vmem:[#allocation3 + $0xc0] sm:$0xff] }
 0x7bf   : > { %4541 = vst.msk [vmem:[#allocation3 + $0x390] sm:$0xf] %vm3378_vm7, %v4531_v2  ;;  %v7014_v25 = vpack.c.bf16 %v5503_v19, %v5498_v8  ;;  %v11980_v56 = vld [vmem:[#allocation41_spill] sm:$0xff] }
 0x7c0   : > { %v4329_v32 = vpop.permute.xlu0 %4328 }
 0x7c1   : > { %v4335_v53 = vsel %vm11949_vm0, %v11948_v13, %v4329_v32  ;;  %v4581_v37 = vpop.permute.xlu1 %4580  ;;  %v5563_v1 = vld [vmem:[#allocation3 + $0x2c8] sm:$0xff]  ;;  %vm11972_vm0 = vmmov %vm11955_vm5  ;;  %v5513_v32 = vld [vmem:[#allocation3 + $0x138] sm:$0xff] }
 0x7c2   : > { %4345 = vst.msk [vmem:[#allocation3 + $0x2f0] sm:$0xf0] %vm11950_vm9, %v4335_v53  ;;  %v4587_v34 = vsel %vm11952_vm15, %v11951_v20, %v4581_v37  ;;  %v7004_v48 = vpack.c.bf16 %v5563_v1, %v5558_v9  ;;  %vm11974_vm9 = vcmask 449536   ;;  %vm11976_vm15 = vcmask 48128   ;;  %v11983_v13 = vld [vmem:[#allocation43_spill] sm:$0xff]  ;;  %v11986_v9 = vld [vmem:[#allocation17_spill] sm:$0xff] }
 0x7c3   : > { %4597 = vst.msk [vmem:[#allocation3 + $0x3b8] sm:$0xf] %vm3378_vm7, %v4587_v34  ;;  %v5508_v1 = vld [vmem:[#allocation3 + $0x110] sm:$0xff] }
 0x7c4   : > { %v4385_v44 = vpop.permute.xlu0 %4384  ;;  %v7018_v63 = vpack.c.bf16 %v5513_v32, %v5508_v1 }
 0x7c5   : > { %v4391_v50 = vsel %vm11954_vm2, %v11953_v58, %v4385_v44  ;;  %v4637_v46 = vpop.permute.xlu1 %4636  ;;  %v5674_v22 = vld [vmem:[#allocation3 + $0x640] sm:$0xf]  ;;  %vm11977_vm2 = vmmov %vm11972_vm0 }
 0x7c6   : > { %4401 = vst.msk [vmem:[#allocation3 + $0x318] sm:$0xf0] %vm11955_vm5, %v4391_v50  ;;  %v4643_v16 = vsel %vm11957_vm10, %v11956_v17, %v4637_v46  ;;  %6676 = vmatpush1.msk.msra.mxu1 %vm366_vm1, %v5674_v22  ;;  %vm11966_vm1 = vcmask 203776   ;;  %vm11979_vm5 = vcmask 433152   ;;  %vm11981_vm10 = vcmask 31744   ;;  %v5523_v46 = vld [vmem:[#allocation3 + $0x188] sm:$0xff] }
 0x7c7   : > { %4653 = vst.msk [vmem:[#allocation3 + $0x3e0] sm:$0xf] %vm3378_vm7, %v4643_v16  ;;  %6677 = vmatmul.mubr.msk.f32.vlgmr.msra.gmra.mrb[24].mxu1 %vm11958_vm13, %v10569_v14  ;;  %7005 = vmatprep.subr.bf16.mxu1 %v7004_v48  ;;  %vm11982_vm13 = vmmov %vm11972_vm0  ;;  %v11989_v22 = vld [vmem:[#allocation19_spill] sm:$0xff] }
 0x7c8   : > { %v4441_v26 = vpop.permute.xlu0 %4440  ;;  %7007 = vmatpush3.bf16.msra.mxu1 %v7006_v10  ;;  %6070 = vmatprep.mubr.f32.mxu1 %v11959_v30 }
 0x7c9   : > { %v4447_v33 = vsel %vm11961_vm3, %v11960_v6, %v4441_v26  ;;  %v4693_v35 = vpop.permute.xlu1 %4692  ;;  %v5568_v31 = vld [vmem:[#allocation3 + $0x2f0] sm:$0xff]  ;;  %vm11984_vm3 = vcmask 15360   ;;  %v5518_v26 = vld [vmem:[#allocation3 + $0x160] sm:$0xff]  ;;  %v5613_v6 = vld [vmem:[#allocation3 + $0x458] sm:$0xff] }
 0x7ca   : > { %4457 = vst.msk [vmem:[#allocation3 + $0x340] sm:$0xf0] %vm11962_vm12, %v4447_v33  ;;  %v4699_v42 = vsel %vm11964_vm8, %v11963_v57, %v4693_v35  ;;  %vm11985_vm12 = vmmov %vm11972_vm0  ;;  %v7022_v30 = vpack.c.bf16 %v5523_v46, %v5518_v26  ;;  %v5533_v57 = vld [vmem:[#allocation3 + $0x1d8] sm:$0xff] }
 0x7cb   : > { %4709 = vst.msk [vmem:[#allocation3 + $0x408] sm:$0xf] %vm3378_vm7, %v4699_v42  ;;  %vm11988_vm8 = vmmov %vm11972_vm0  ;;  %v11992_v42 = vld [vmem:[#allocation21_spill] sm:$0xff] }
 0x7cc   : > { %v4497_v39 = vpop.permute.xlu0 %4496 }
 0x7cd   : > { %v4503_v14 = vsel %vm11966_vm1, %v11965_v3, %v4497_v39  ;;  %v4749_v62 = vpop.permute.xlu1 %4748  ;;  %v5573_v24 = vld [vmem:[#allocation3 + $0x318] sm:$0xff]  ;;  %vm11990_vm1 = vcmask 441344   ;;  %v5528_v3 = vld [vmem:[#allocation3 + $0x1b0] sm:$0xff] }
 0x7ce   : > { %4513 = vst.msk [vmem:[#allocation3 + $0x368] sm:$0xf0] %vm11967_vm11, %v4503_v14  ;;  %v4755_v38 = vsel %vm11969_vm14, %v11968_v45, %v4749_v62  ;;  %v7008_v54 = vpack.c.bf16 %v5573_v24, %v5568_v31  ;;  %vm11991_vm11 = vmmov %vm11972_vm0  ;;  %vm11993_vm14 = vcmask 424960   ;;  %v7026_v14 = vpack.c.bf16 %v5533_v57, %v5528_v3  ;;  %v5618_v62 = vld [vmem:[#allocation3 + $0x480] sm:$0xff]  ;;  %v5633_v45 = vld [vmem:[#allocation3 + $0x4f8] sm:$0xff] }
 0x7cf   : > { %4765 = vst.msk [vmem:[#allocation3 + $0x430] sm:$0xf] %vm3378_vm7, %v4755_v38  ;;  %v7028_v31 = vpack.c.bf16 %v5623_v41, %v5618_v62  ;;  %v5538_v38 = vld [vmem:[#allocation3 + $0x200] sm:$0xff] }
 0x7d0   : > { %v4553_v47 = vpop.permute.xlu0 %4552  ;;  %7009 = vmatprep.subr.bf16.mxu1 %v7008_v54 }
 0x7d1   : > { %v4559_v21 = vsel %vm11971_vm4, %v11970_v4, %v4553_v47  ;;  %v4077_v59 = vpop.permute.xlu1 %4076  ;;  %7011 = vmatpush3.bf16.msra.mxu1 %v7010_v12  ;;  %v5578_v5 = vld [vmem:[#allocation3 + $0x340] sm:$0xff]  ;;  %vm11994_vm4 = vmmov %vm11972_vm0  ;;  %v7032_v12 = vpack.c.bf16 %v5633_v45, %v5628_v40 }
 0x7d2   : > { %4569 = vst.msk [vmem:[#allocation3 + $0x390] sm:$0xf0] %vm11972_vm0, %v4559_v21  ;;  %v4083_v27 = vsel %vm11974_vm9, %v11973_v36, %v4077_v59  ;;  %v11997_v40 = vld [vmem:[#allocation9_spill] sm:$0xff] }
 0x7d3   : > { %4093 = vst.msk [vmem:[#allocation3 + $0x250] sm:$0xf] %vm3378_vm7, %v4083_v27 }
 0x7d4   : > { %v4609_v28 = vpop.permute.xlu0 %4608 }
 0x7d5   : > { %v4615_v43 = vsel %vm11976_vm15, %v11975_v0, %v4609_v28  ;;  %v4133_v61 = vpop.permute.xlu1 %4132  ;;  %v5583_v29 = vld [vmem:[#allocation3 + $0x368] sm:$0xff] }
 0x7d6   : > { %4625 = vst.msk [vmem:[#allocation3 + $0x3b8] sm:$0xf0] %vm11977_vm2, %v4615_v43  ;;  %v4139_v55 = vsel %vm11979_vm5, %v11978_v11, %v4133_v61  ;;  %v7012_v49 = vpack.c.bf16 %v5583_v29, %v5578_v5  ;;  %v5608_v16 = vld [vmem:[#allocation3 + $0x430] sm:$0xff] }
 0x7d7   : > { %4149 = vst.msk [vmem:[#allocation3 + $0x278] sm:$0xf] %vm3378_vm7, %v4139_v55  ;;  %vm11987_vm7 = vcmask 457728   ;;  %v7024_v35 = vpack.c.bf16 %v5613_v6, %v5608_v16 }
 0x7d8   : > { %v4665_v18 = vpop.permute.xlu0 %4664  ;;  %7013 = vmatprep.subr.bf16.mxu1 %v7012_v49 }
 0x7d9   : > { %v4671_v51 = vsel %vm11981_vm10, %v11980_v56, %v4665_v18  ;;  %7015 = vmatpush3.bf16.msra.mxu1 %v7014_v25  ;;  %v5588_v37 = vld [vmem:[#allocation3 + $0x390] sm:$0xff]  ;;  %v5683_v25 = vpop.permute.xlu1 %5682 }
 0x7da   : > { %4681 = vst.msk [vmem:[#allocation3 + $0x3e0] sm:$0xf0] %vm11982_vm13, %v4671_v51  ;;  %v7077_v51 = vadd.f32 %v10949_v7, %v5683_v25 }
 0x7dc   : > { %v4721_v2 = vpop.permute.xlu0 %4720 }
 0x7dd   : > { %v4727_v53 = vsel %vm11984_vm3, %v11983_v13, %v4721_v2  ;;  %v5593_v20 = vld [vmem:[#allocation3 + $0x3b8] sm:$0xff]  ;;  %v7078_v2 = vadd.f32 %v10951_v60, %v5683_v25 }
 0x7de   : > { %4737 = vst.msk [vmem:[#allocation3 + $0x408] sm:$0xf0] %vm11985_vm12, %v4727_v53  ;;  %v7016_v34 = vpack.c.bf16 %v5593_v20, %v5588_v37  ;;  %v6685_v53 = vmul.f32 -1.442695, %v7077_v51 }
 0x7df   : > { %v6686_v37 = vmul.f32 -1.442695, %v7078_v2  ;;  %v12006_v2 = vld [vmem:[#allocation15_spill] sm:$0xff] }
 0x7e0   : > { %v4049_v44 = vpop.permute.xlu0 %4048  ;;  %7017 = vmatprep.subr.bf16.mxu1 %v7016_v34 }
 0x7e1   : > { %v4055_v58 = vsel %vm11987_vm7, %v11986_v9, %v4049_v44  ;;  %7019 = vmatpush3.bf16.msra.mxu1 %v7018_v63  ;;  %v5598_v15 = vld [vmem:[#allocation3 + $0x3e0] sm:$0xff] }
 0x7e2   : > { %4065 = vst.msk [vmem:[#allocation3 + $0x228] sm:$0xf0] %vm11988_vm8, %v4055_v58 }
 0x7e4   : > { %v4105_v50 = vpop.permute.xlu0 %4104 }
 0x7e5   : > { %v4111_v48 = vsel %vm11990_vm1, %v11989_v22, %v4105_v50  ;;  %v5603_v17 = vld [vmem:[#allocation3 + $0x408] sm:$0xff] }
 0x7e6   : > { %4121 = vst.msk [vmem:[#allocation3 + $0x250] sm:$0xf0] %vm11991_vm11, %v4111_v48  ;;  %v7020_v10 = vpack.c.bf16 %v5603_v17, %v5598_v15 }
 0x7e8   : > { %v4161_v33 = vpop.permute.xlu0 %4160  ;;  %7021 = vmatprep.subr.bf16.mxu1 %v7020_v10 }
 0x7e9   : > { %v4167_v39 = vsel %vm11993_vm14, %v11992_v42, %v4161_v33  ;;  %7023 = vmatpush3.bf16.msra.mxu1 %v7022_v30  ;;  %v5543_v24 = vld [vmem:[#allocation3 + $0x228] sm:$0xff] }
 0x7ea   : > { %4177 = vst.msk [vmem:[#allocation3 + $0x278] sm:$0xf0] %vm11994_vm4, %v4167_v39  ;;  %7025 = vmatprep.subr.bf16.mxu1 %v7024_v35  ;;  %v7030_v54 = vpack.c.bf16 %v5543_v24, %v5538_v38 }
 0x7ed   : > { %7027 = vmatpush3.bf16.msra.mxu1 %v7026_v14  ;;  %v5548_v47 = vld [vmem:[#allocation3 + $0x250] sm:$0xff]  ;;  %v11996_v14 = vld [vmem:[#allocation6_spill] sm:$0xff] }
 0x7ee   : > { %7029 = vmatprep.subr.bf16.mxu1 %v7028_v31 }
 0x7f1   : > { %7031 = vmatpush3.bf16.msra.mxu1 %v7030_v54  ;;  %v5553_v4 = vld [vmem:[#allocation3 + $0x278] sm:$0xff] }
 0x7f2   : > { %7033 = vmatprep.subr.bf16.mxu1 %v7032_v12  ;;  %v7034_v21 = vpack.c.bf16 %v5553_v4, %v5548_v47  ;;  %v11998_v47 = vld [vmem:[#allocation10_spill] sm:$0xff] }
 0x7f5   : > { %7035 = vmatpush3.bf16.msra.mxu1 %v7034_v21  ;;  %v11999_v21 = vld [vmem:[#allocation13_spill] sm:$0xff] }
 0x7f8   : > { %6071 = vmatmul.mubr.f32.vlgmr.msra.gmra.mrb[26].mxu1 %v11907_v23 }
 0x891   : > { %v6843_v59 = vpop.f32.mrb[30].mxu0 }
 0x892   : > { %v6693_v36 = vmul.f32 -1.442695, %v6843_v59  ;;  %v6375_v27 = vpop.f32.mrb[31].mxu0 }
 0x893   : > { %v6692_v28 = vmul.f32 -1.442695, %v6375_v27 }
 0x894   : > { %7342 = vpow2.f32 %v6693_v36  ;;  %v12000_v36 = vld [vmem:[#allocation14_spill] sm:$0xff] }
 0x895   : > { %7344 = vpow2.f32 %v6692_v28 }
 0x89a   : > { %v5859_v19 = vpop.f32.mrb[24].mxu1 }
 0x89b   : > { %v5861_v0 = vpop.f32.mrb[25].mxu1  ;;  %v7075_v32 = vadd.f32 %v5859_v19, %v5683_v25  ;;  %v12001_v19 = vld [vmem:[#allocation16_spill] sm:$0xff] }
 0x89c   : > { %v7076_v13 = vadd.f32 %v5861_v0, %v5683_v25 }
 0x89d   : > { %v6683_v20 = vmul.f32 -1.442695, %v7075_v32 }
 0x89e   : > { %v7343_v43 = vpop.eup %7342  ;;  %v6684_v34 = vmul.f32 -1.442695, %v7076_v13 }
 0x89f   : > { %v7345_v61 = vpop.eup %7344  ;;  %v6391_v5 = vadd.f32 1.0, %v7343_v43  ;;  %v12002_v43 = vld [vmem:[#allocation7_spill] sm:$0xff] }
 0x8a0   : > { %v6390_v29 = vadd.f32 1.0, %v7345_v61 }
 0x8a1   : > { %7346 = vrcp.f32 %v6391_v5  ;;  %v12003_v5 = vld [vmem:[#allocation8_spill] sm:$0xff] }
 0x8a2   : > { %7348 = vrcp.f32 %v6390_v29 }
 0x8a3   : > { %7350 = vpow2.f32 %v6685_v53 }
 0x8a4   : > { %7352 = vpow2.f32 %v6686_v37 }
 0x8a5   : > { %7354 = vpow2.f32 %v6683_v20 }
 0x8a6   : > { %7356 = vpow2.f32 %v6684_v34 }
 0x8ab   : > { %v7347_v11 = vpop.eup %7346 }
 0x8ac   : > { %v7349_v55 = vpop.eup %7348  ;;  %6403 = vperm.xlu1 %7199, %v7347_v11   ;;  %v12004_v11 = vld [vmem:[#allocation11_spill] sm:$0xff] }
 0x8ad   : > { %6398 = vperm.xlu0 %7198, %v7349_v55   ;;  %v7351_v63 = vpop.eup %7350 }
 0x8ae   : > { %v7353_v44 = vpop.eup %7352  ;;  %v6163_v58 = vadd.f32 1.0, %v7351_v63 }
 0x8af   : > { %v7355_v9 = vpop.eup %7354  ;;  %v6164_v50 = vadd.f32 1.0, %v7353_v44 }
 0x8b0   : > { %v6161_v60 = vadd.f32 1.0, %v7355_v9 }
 0x8cb   : > { %v6770_v49 = vpop.f32.mrb[26].mxu1 }
 0x8cc   : > { %v6771_v23 = vpop.f32.mrb[27].mxu1 }
 0x8cd   : > { %v6772_v8 = vadd.f32 %v6771_v23, %v6770_v49 }
 0x8cf   : > { %v6073_v18 = vadd.f32 %v6772_v8, %v5683_v25 }
 0x8d1   : > { %v6143_v56 = vadd.f32 %v11016_v52, %v6073_v18  ;;  %v7357_v52 = vpop.eup %7356 }
 0x8d2   : > { %v6162_v46 = vadd.f32 1.0, %v7357_v52 }
 0x8d3   : > { %v6687_v1 = vmul.f32 -1.442695, %v6143_v56  ;;  %v12005_v56 = vld [vmem:[#allocation12_spill] sm:$0xff] }
 0x8d5   : > { %7358 = vpow2.f32 %v6687_v1 }
 0x8d6   : > { %7360 = vrcp.f32 %v6163_v58 }
 0x8d7   : > { %7362 = vrcp.f32 %v6164_v50 }
 0x8d8   : > { %7364 = vrcp.f32 %v6161_v60 }
 0x8d9   : > { %7366 = vrcp.f32 %v6162_v46 }
 0x8df   : > { %v7359_v7 = vpop.eup %7358 }
 0x8e0   : > { %v6165_v22 = vadd.f32 1.0, %v7359_v7  ;;  %v7361_v48 = vpop.eup %7360 }
 0x8e1   : > { %v7363_v15 = vpop.eup %7362  ;;  %v6183_v26 = vrot.slane %v7361_v48, 1 }
 0x8e2   : > { %7368 = vrcp.f32 %v6165_v22  ;;  %v7365_v17 = vpop.eup %7364  ;;  %v6184_v33 = vrot.slane %v7363_v15, 1 }
 0x8e3   : > { %v7367_v16 = vpop.eup %7366  ;;  %v6181_v30 = vrot.slane %v7365_v17, 1  ;;  %v6193_v57 = vadd.f32 %v7361_v48, %v6183_v26 }
 0x8e4   : > { %v6182_v6 = vrot.slane %v7367_v16, 1  ;;  %v6194_v41 = vadd.f32 %v7363_v15, %v6184_v33 }
 0x8e5   : > { %v6191_v42 = vadd.f32 %v7365_v17, %v6181_v30  ;;  %v6427_v62 = vrot.slane %v6193_v57, %v11996_v14 }
 0x8e6   : > { %v6192_v39 = vadd.f32 %v7367_v16, %v6182_v6  ;;  %v6431_v45 = vrot.slane %v6194_v41, %v11996_v14 }
 0x8e7   : > { %v6419_v31 = vrot.slane %v6191_v42, %v11996_v14 }
 0x8e8   : > { %v6423_v24 = vrot.slane %v6192_v39, %v11996_v14 }
 0x8ec   : > { %v7369_v10 = vpop.eup %7368 }
 0x8ed   : > { %v6185_v35 = vrot.slane %v7369_v10, 1 }
 0x8ef   : > { %v6195_v3 = vadd.f32 %v7369_v10, %v6185_v35 }
 0x8f1   : > { %v6435_v38 = vrot.slane %v6195_v3, %v11996_v14 }
 0x92b   : > { %v6404_v54 = vpop.permute.xlu1 %6403 }
 0x92c   : > { %v6411_v12 = vmul.f32 %v11997_v40, %v6404_v54  ;;  %v6412_v4 = vmul.f32 %v11998_v47, %v6404_v54  ;;  %v6413_v59 = vmul.f32 %v11999_v21, %v6404_v54  ;;  %v6414_v27 = vmul.f32 %v12000_v36, %v6404_v54  ;;  %v6399_v28 = vpop.permute.xlu0 %6398 }
 0x92d   : > { %v6415_v0 = vmul.f32 %v6404_v54, %v12001_v19  ;;  %v6406_v61 = vmul.f32 %v12002_v43, %v6399_v28  ;;  %v6407_v29 = vmul.f32 %v12003_v5, %v6399_v28  ;;  %v6408_v55 = vmul.f32 %v12004_v11, %v6399_v28 }
 0x92e   : > { %v6441_v49 = vmul.f32 %v6419_v31, %v6411_v12  ;;  %v6442_v23 = vmul.f32 %v6423_v24, %v6412_v4  ;;  %v6443_v8 = vmul.f32 %v6427_v62, %v6413_v59  ;;  %v6444_v25 = vmul.f32 %v6431_v45, %v6414_v27 }
 0x92f   : > { %v6445_v18 = vmul.f32 %v6435_v38, %v6415_v0  ;;  %v6409_v51 = vmul.f32 %v12005_v56, %v6399_v28  ;;  %v6410_v32 = vmul.f32 %v6399_v28, %v12006_v2  ;;  %v6436_v13 = vmul.f32 %v6419_v31, %v6406_v61 }
 0x930   : > { %vm6451_vm0 = vcmp.gt.f32.partialorder %v6441_v49, 0.0  ;;  %vm6452_vm9 = vcmp.gt.f32.partialorder %v6442_v23, 0.0  ;;  %vm6453_vm15 = vcmp.gt.f32.partialorder %v6443_v8, 0.0  ;;  %vm6454_vm2 = vcmp.gt.f32.partialorder %v6444_v25, 0.0 }
 0x931   : > { %vm6455_vm5 = vcmp.gt.f32.partialorder %v6445_v18, 0.0  ;;  %v6461_v53 = vmul.f32 0.2, %v6441_v49  ;;  %v6462_v37 = vmul.f32 0.2, %v6442_v23  ;;  %v6437_v20 = vmul.f32 %v6423_v24, %v6407_v29 }
 0x932   : > { %v6463_v34 = vmul.f32 0.2, %v6443_v8  ;;  %v6464_v1 = vmul.f32 0.2, %v6444_v25  ;;  %v6465_v63 = vmul.f32 0.2, %v6445_v18  ;;  %v6438_v44 = vmul.f32 %v6427_v62, %v6408_v55 }
 0x933   : > { %v6471_v9 = vsel %vm6451_vm0, %v6441_v49, %v6461_v53  ;;  %v6472_v52 = vsel %vm6452_vm9, %v6442_v23, %v6462_v37  ;;  %v6439_v58 = vmul.f32 %v6431_v45, %v6409_v51  ;;  %v6440_v7 = vmul.f32 %v6435_v38, %v6410_v32 }
 0x934   : > { %v6473_v50 = vsel %vm6453_vm15, %v6443_v8, %v6463_v34  ;;  %v6474_v60 = vsel %vm6454_vm2, %v6444_v25, %v6464_v1  ;;  %v6475_v46 = vsel %vm6455_vm5, %v6445_v18, %v6465_v63  ;;  %6481 = vst [vmem:[%s11119_s24 + $0x28] sm:$0xff] %v6471_v9  ;;  %6482 = vst [vmem:[%s11119_s24 + $0x30] sm:$0xff] %v6472_v52  ;;  %vm6446_vm10 = vcmp.gt.f32.partialorder %v6436_v13, 0.0 }
 0x935   : > { %6483 = vst [vmem:[%s11119_s24 + $0x38] sm:$0xff] %v6473_v50  ;;  %6484 = vst [vmem:[%s11119_s24 + $0x40] sm:$0xff] %v6474_v60  ;;  %vm6447_vm13 = vcmp.gt.f32.partialorder %v6437_v20, 0.0  ;;  %vm6448_vm3 = vcmp.gt.f32.partialorder %v6438_v44, 0.0  ;;  %vm6449_vm12 = vcmp.gt.f32.partialorder %v6439_v58, 0.0  ;;  %vm6450_vm7 = vcmp.gt.f32.partialorder %v6440_v7, 0.0 }
 0x936   : > { %6485 = vst.msk [vmem:[%s11119_s24 + $0x48] sm:$0xff] %vm1798_vm6, %v6475_v46  ;;  %v6456_v22 = vmul.f32 0.2, %v6436_v13  ;;  %v6457_v48 = vmul.f32 0.2, %v6437_v20 }
 0x937   : > { %v6458_v15 = vmul.f32 0.2, %v6438_v44  ;;  %v6459_v17 = vmul.f32 0.2, %v6439_v58  ;;  %v6460_v16 = vmul.f32 0.2, %v6440_v7 }
 0x938   : > { %v6466_v10 = vsel %vm6446_vm10, %v6436_v13, %v6456_v22  ;;  %v6467_v26 = vsel %vm6447_vm13, %v6437_v20, %v6457_v48 }
 0x939   : > { %v6468_v30 = vsel %vm6448_vm3, %v6438_v44, %v6458_v15  ;;  %v6469_v6 = vsel %vm6449_vm12, %v6439_v58, %v6459_v17  ;;  %v6470_v33 = vsel %vm6450_vm7, %v6440_v7, %v6460_v16  ;;  %6476 = vst [vmem:[%s11119_s24] sm:$0xff] %v6466_v10  ;;  %6477 = vst [vmem:[%s11119_s24 + $0x8] sm:$0xff] %v6467_v26 }
 0x93a   : > { %6478 = vst [vmem:[%s11119_s24 + $0x10] sm:$0xff] %v6468_v30  ;;  %6479 = vst [vmem:[%s11119_s24 + $0x18] sm:$0xff] %v6469_v6 }
 0x93b   : > { %6480 = vst.msk [vmem:[%s11119_s24 + $0x20] sm:$0xff] %vm1798_vm6, %v6470_v33 }
 0x93c PF: > { %s12008_s25 = sld [smem:[#allocation4_spill]] }
 0x942   : > { %s18_s27 = sadd.s32 1, %s12008_s25  }
 0x943   : > { %p15_p4 = scmp.ge.s32.totalorder %s18_s27, 4  }
 0x945   :  { %17 = sbr.rel (!%p15_p4) target bundleno = 10 (0xa), region = 82 }

</bundles_post_ra>
